<compile_context>
chip_gen: v6e
topology: v6e:2x2x1
jax: 0.10.0
libtpu: 0.0.40
codegen_flags: <defaults>
</compile_context>

<pallas_src>
import functools

import jax
import jax.numpy as jnp
from jax import lax
from jax.experimental import pallas as pl
from jax.experimental.pallas import tpu as pltpu

# ---------------------------------------------------------------------------
# Static geometry (28x28 input is forced by fc1's 490 = 10*7*7)
# ---------------------------------------------------------------------------
H1 = W1 = 28
NPIX1 = H1 * W1           # 784 pixels / image (conv1 output grid)
H2 = W2 = 14              # after pool1
WP2 = 16                  # conv2 zero-padded grid width
P2 = WP2 * WP2            # 256 padded pixels / image
H3 = W3 = 7               # after pool2
CP = 128                  # channel lanes (10 real channels zero-padded to 128)
KC1 = 16                  # padded contraction width of the conv1 im2col
FCK = H3 * W3 * CP        # 6272 = fc1 LHS lane width (49 spatial x 128 lanes)
A2OFF = 32                # prefix/suffix guard rows of the conv2-input scratch
TB_MAX = 12               # max images per grid step (VMEM-safe on v7x)

_TAPS2 = [(kh - 1) * WP2 + (kw - 1) for kh in range(3) for kw in range(3)]


# ---------------------------------------------------------------------------
# Fused forward kernel (one batch tile of `tb` images per grid step)
# ---------------------------------------------------------------------------
def _xnet_kernel(x_ref, w1_ref, b1_ref, w2_ref, b2_ref, wf1_ref, bf1_ref,
                 wf2_ref, bf2_ref, o_ref, a1, vm1, a2, a3, vm3, a4, *, tb):
    n2 = tb * P2

    # -- conv1 (1->10 ch, 3x3, pad 1): one im2col MXU matmul per image,
    #    bias + ReLU fused into the store.  Channels live in lanes 0..9.
    for b in range(tb):
        r0 = b * NPIX1
        y = jnp.dot(x_ref[pl.ds(r0, NPIX1), :], w1_ref[...],
                    preferred_element_type=jnp.float32)
        a1[pl.ds(r0, NPIX1), :] = jnp.maximum(y + b1_ref[...], 0.0)       # (784,128)

    # -- pool1 (2x2 / stride 2): hoist the full 2x2 window max as contiguous
    #    shifted reads (VPU), so each output row below is one strided gather.
    #    Only window origins with even (h,w) are consumed; 755 rows cover them
    #    without reading past the image.
    nv1 = NPIX1 - W1 - 1
    for b in range(tb):
        r0 = b * NPIX1
        vm1[pl.ds(r0, nv1), :] = jnp.maximum(
            jnp.maximum(a1[pl.ds(r0, nv1), :], a1[pl.ds(r0 + 1, nv1), :]),
            jnp.maximum(a1[pl.ds(r0 + W1, nv1), :],
                        a1[pl.ds(r0 + W1 + 1, nv1), :]))

    # a2 is the zero-padded 16x16 conv2 input grid.  The halo rows/cols ARE the
    # conv2 'SAME' padding, so they must be zero; interior rows are fully
    # rewritten each step.  Re-zeroed every step (not pl.when(step==0)) so the
    # kernel stays correct when the parallel grid axis is split across cores.
    a2[...] = jnp.zeros((n2 + 2 * A2OFF, CP), jnp.float32)
    for b in range(tb):
        for h2 in range(H2):
            src = b * NPIX1 + (2 * h2) * W1
            dst = A2OFF + b * P2 + (h2 + 1) * WP2 + 1
            a2[pl.ds(dst, W2), :] = vm1[pl.ds(src, W2, 2), :]             # (14,128)

    # -- conv2 (10->10 ch, 3x3, pad 1): per image, 9 accumulated MXU matmuls
    #    (256,128)@(128,128) against the tap matrices; bias + ReLU fused.
    #    Interior outputs only ever read their own image's 16x16 block, whose
    #    halo is zero; cross-image tap bleed only touches discarded halo rows.
    for b in range(tb):
        base = A2OFF + b * P2
        acc = None
        for t, d in enumerate(_TAPS2):
            prod = jnp.dot(a2[pl.ds(base + d, P2), :], w2_ref[t],
                           preferred_element_type=jnp.float32)
            acc = prod if acc is None else acc + prod
        a3[pl.ds(b * P2, P2), :] = jnp.maximum(acc + b2_ref[...], 0.0)    # (256,128)

    # -- pool2 (2x2 / stride 2) fused with fc1: hoist the full 2x2 window max,
    #    then for each of the 49 spatial positions gather the batch tile with
    #    a single stride-P2 read and store it as a full 128-lane-aligned block
    #    of the (tb, 6272) fc1 LHS.  All lanes/rows of a4 are overwritten each
    #    step (channel lanes 10..127 are exactly zero), so no zero-init needed.
    nv3 = P2 - WP2 - 1
    for b in range(tb):
        r0 = b * P2
        vm3[pl.ds(r0, nv3), :] = jnp.maximum(
            jnp.maximum(a3[pl.ds(r0, nv3), :], a3[pl.ds(r0 + 1, nv3), :]),
            jnp.maximum(a3[pl.ds(r0 + WP2, nv3), :],
                        a3[pl.ds(r0 + WP2 + 1, nv3), :]))

    for h3 in range(H3):
        for w3 in range(W3):
            s = h3 * W3 + w3
            p = (1 + 2 * h3) * WP2 + (1 + 2 * w3)
            a4[:, pl.ds(s * CP, CP)] = vm3[pl.ds(p, tb, P2), :]           # (tb,128)

    # -- fc1 (ONE matmul) + ReLU, then fc2 (output lanes 10..127 stay zero).
    hidden = jnp.maximum(
        jnp.dot(a4[...], wf1_ref[...], preferred_element_type=jnp.float32)
        + bf1_ref[...], 0.0)                                              # (tb,128)
    o_ref[...] = jnp.dot(hidden, wf2_ref[...],
                         preferred_element_type=jnp.float32) + bf2_ref[...]


# ---------------------------------------------------------------------------
# One-time parameter packing: lane-pad channels to 128, reorder conv2 weights
# per tap, and re-permute fc1 from PyTorch's CHW flatten to the kernel's
# (spatial, lane-block) pooled layout (zero runtime cost, numerically exact).
# ---------------------------------------------------------------------------
def pack_params(params):
    w1, b1, w2, b2, wf1, bf1, wf2, bf2 = [p.astype(jnp.float32) for p in params]
    w1p = jnp.zeros((KC1, CP), jnp.float32).at[:9, :10].set(w1.reshape(10, 9).T)
    b1p = jnp.zeros((1, CP), jnp.float32).at[0, :10].set(b1)
    w2p = jnp.zeros((9, CP, CP), jnp.float32).at[:, :10, :10].set(
        jnp.transpose(w2.reshape(10, 10, 9), (2, 1, 0)))      # [tap, cin, cout]
    b2p = jnp.zeros((1, CP), jnp.float32).at[0, :10].set(b2)
    # wf1p[s*128 + c, out] = wf1[out, c*49 + s]   (s = h3*7 + w3)
    wf1r = jnp.transpose(wf1.reshape(CP, 10, 49), (2, 1, 0))  # [s, c, out]
    wf1p = jnp.zeros((49, CP, CP), jnp.float32).at[:, :10, :].set(wf1r)
    wf1p = wf1p.reshape(FCK, CP)
    bf1p = bf1.reshape(1, CP)
    wf2p = jnp.zeros((CP, CP), jnp.float32).at[:, :10].set(wf2.T)
    bf2p = jnp.zeros((1, CP), jnp.float32).at[0, :10].set(bf2)
    return (w1p, b1p, w2p, b2p, wf1p, bf1p, wf2p, bf2p)


def _batch_tiles(batch):
    # tb up to 12 keeps per-step VMEM ~<35 MiB (v7x-safe) while amortizing the
    # per-step overhead and giving the fc matmuls a decent M.  Small batches
    # are split into g == 2 steps so v7x's two TensorCores both get work.
    if batch <= 1:
        return 1, 1
    if batch < 2 * TB_MAX:
        tb = -(-batch // 2)
    else:
        tb = TB_MAX
    return tb, -(-batch // tb)


def xnet_forward(x, packed):
    assert x.shape[1:] == (1, H1, W1), x.shape
    batch = x.shape[0]
    tb, g = _batch_tiles(batch)
    bpad = tb * g
    n1 = tb * NPIX1

    # Host/XLA-side im2col for conv1 (negligible for 28x28x1 images): 9 shifted
    # taps per pixel, zero-padded to K=16 contraction columns.
    x = x.astype(jnp.float32)
    xp = jnp.pad(x[:, 0], ((0, bpad - batch), (1, 1), (1, 1)))   # (bpad, 30, 30)
    cols = [xp[:, kh:kh + H1, kw:kw + W1] for kh in range(3) for kw in range(3)]
    col = jnp.stack(cols, axis=-1).reshape(bpad, NPIX1, 9)
    col = jnp.pad(col, ((0, 0), (0, 0), (0, KC1 - 9)))           # (bpad, 784, 16)
    xcol = col.reshape(g, n1, KC1)

    out = pl.pallas_call(
        functools.partial(_xnet_kernel, tb=tb),
        out_shape=jax.ShapeDtypeStruct((g, tb, CP), jnp.float32),
        grid=(g,),
        in_specs=[
            pl.BlockSpec((None, n1, KC1), lambda i: (i, 0, 0)),   # im2col tile
            pl.BlockSpec((KC1, CP), lambda i: (0, 0)),            # w1 (resident)
            pl.BlockSpec((1, CP), lambda i: (0, 0)),              # b1
            pl.BlockSpec((9, CP, CP), lambda i: (0, 0, 0)),       # w2 tap mats
            pl.BlockSpec((1, CP), lambda i: (0, 0)),              # b2
            pl.BlockSpec((FCK, CP), lambda i: (0, 0)),            # wf1 (pooled layout)
            pl.BlockSpec((1, CP), lambda i: (0, 0)),              # bf1
            pl.BlockSpec((CP, CP), lambda i: (0, 0)),             # wf2
            pl.BlockSpec((1, CP), lambda i: (0, 0)),              # bf2
        ],
        out_specs=pl.BlockSpec((None, tb, CP), lambda i: (i, 0, 0)),
        scratch_shapes=[
            pltpu.VMEM((n1, CP), jnp.float32),                 # a1: conv1 out
            pltpu.VMEM((n1, CP), jnp.float32),                 # vm1: pool1 window max
            pltpu.VMEM((tb * P2 + 2 * A2OFF, CP), jnp.float32),  # a2: padded conv2 in
            pltpu.VMEM((tb * P2, CP), jnp.float32),            # a3: conv2 out
            pltpu.VMEM((tb * P2, CP), jnp.float32),            # vm3: pool2 window max
            pltpu.VMEM((tb, FCK), jnp.float32),                # a4: fc1 LHS
        ],
        compiler_params=pltpu.CompilerParams(
            dimension_semantics=("parallel",),
            vmem_limit_bytes=64 * 1024 * 1024,
        ),
    )(xcol, *packed)

    return out.reshape(bpad, CP)[:batch, :10]


# ---------------------------------------------------------------------------
# Pure-JAX (lax) reference for correctness checking
# ---------------------------------------------------------------------------
def xnet_reference(x, params):
    w1, b1, w2, b2, wf1, bf1, wf2, bf2 = params
    dn = ('NCHW', 'OIHW', 'NCHW')
    y = lax.conv_general_dilated(x, w1, (1, 1), 'SAME', dimension_numbers=dn)
    y = jnp.maximum(y + b1[None, :, None, None], 0.0)
    y = lax.reduce_window(y, -jnp.inf, lax.max, (1, 1, 2, 2), (1, 1, 2, 2), 'VALID')
    y = lax.conv_general_dilated(y, w2, (1, 1), 'SAME', dimension_numbers=dn)
    y = jnp.maximum(y + b2[None, :, None, None], 0.0)
    y = lax.reduce_window(y, -jnp.inf, lax.max, (1, 1, 2, 2), (1, 1, 2, 2), 'VALID')
    flat = y.reshape(y.shape[0], -1)
    h = jnp.maximum(flat @ wf1.T + bf1, 0.0)
    return h @ wf2.T + bf2


# ---------------------------------------------------------------------------
# Deterministic parameter init (PyTorch Conv2d / Linear shapes)
# ---------------------------------------------------------------------------
def init_params(key):
    ks = jax.random.split(key, 8)

    def u(k, shape, fan_in):
        bound = 1.0 / jnp.sqrt(jnp.float32(fan_in))
        return jax.random.uniform(k, shape, jnp.float32, -bound, bound)

    w1 = u(ks[0], (10, 1, 3, 3), 9)
    b1 = u(ks[1], (10,), 9)
    w2 = u(ks[2], (10, 10, 3, 3), 90)
    b2 = u(ks[3], (10,), 90)
    wf1 = u(ks[4], (128, 490), 490)
    bf1 = u(ks[5], (128,), 490)
    wf2 = u(ks[6], (10, 128), 128)
    bf2 = u(ks[7], (10,), 128)
    return (w1, b1, w2, b2, wf1, bf1, wf2, bf2)


if __name__ == "__main__":
    key = jax.random.PRNGKey(0)
    kx, kp = jax.random.split(key)
    # Input must be (B, 1, 28, 28): fc1's 490 = 10 * 7 * 7 forces 28x28 spatial.
    x = jax.random.normal(kx, (2, 1, 28, 28), jnp.float32)
    params = init_params(kp)
    packed = pack_params(params)

    fwd = jax.jit(xnet_forward)
    out = jax.block_until_ready(fwd(x, packed))
    ref = jax.block_until_ready(xnet_reference(x, params))

    assert out.shape == (2, 10), out.shape
    assert jnp.allclose(out, ref, atol=1e-4, rtol=1e-4), \
        float(jnp.max(jnp.abs(out - ref)))
    print("KERNEL_OK")
</pallas_src>

<mosaic_0001>
module attributes {stable_mosaic.version = 11 : i64} {
  func.func @_xnet_kernel(%arg0: i32, %arg1: memref<1x784x16xf32, #tpu.memory_space<vmem>>, %arg2: memref<16x128xf32, #tpu.memory_space<vmem>>, %arg3: memref<1x128xf32, #tpu.memory_space<vmem>>, %arg4: memref<9x128x128xf32, #tpu.memory_space<vmem>>, %arg5: memref<1x128xf32, #tpu.memory_space<vmem>>, %arg6: memref<6272x128xf32, #tpu.memory_space<vmem>>, %arg7: memref<1x128xf32, #tpu.memory_space<vmem>>, %arg8: memref<128x128xf32, #tpu.memory_space<vmem>>, %arg9: memref<1x128xf32, #tpu.memory_space<vmem>>, %arg10: memref<1x1x128xf32, #tpu.memory_space<vmem>>, %arg11: memref<784x128xf32, #tpu.memory_space<vmem>>, %arg12: memref<784x128xf32, #tpu.memory_space<vmem>>, %arg13: memref<320x128xf32, #tpu.memory_space<vmem>>, %arg14: memref<256x128xf32, #tpu.memory_space<vmem>>, %arg15: memref<256x128xf32, #tpu.memory_space<vmem>>, %arg16: memref<1x6272xf32, #tpu.memory_space<vmem>>) attributes {dimension_semantics = [#tpu.dimension_semantics<parallel>], iteration_bounds = array<i64: 2>, scalar_prefetch = 0 : i64, scratch_operands = 6 : i64, tpu.core_type = #tpu.core_type<tc>, window_params = [{transform_indices = @transform_0, window_bounds = array<i64: 1, 784, 16>}, {pipeline_mode = #tpu.pipeline_mode<synchronous>, transform_indices = @transform_1, window_bounds = array<i64: 16, 128>}, {pipeline_mode = #tpu.pipeline_mode<synchronous>, transform_indices = @transform_2, window_bounds = array<i64: 1, 128>}, {pipeline_mode = #tpu.pipeline_mode<synchronous>, transform_indices = @transform_3, window_bounds = array<i64: 9, 128, 128>}, {pipeline_mode = #tpu.pipeline_mode<synchronous>, transform_indices = @transform_4, window_bounds = array<i64: 1, 128>}, {pipeline_mode = #tpu.pipeline_mode<synchronous>, transform_indices = @transform_5, window_bounds = array<i64: 6272, 128>}, {pipeline_mode = #tpu.pipeline_mode<synchronous>, transform_indices = @transform_6, window_bounds = array<i64: 1, 128>}, {pipeline_mode = #tpu.pipeline_mode<synchronous>, transform_indices = @transform_7, window_bounds = array<i64: 128, 128>}, {pipeline_mode = #tpu.pipeline_mode<synchronous>, transform_indices = @transform_8, window_bounds = array<i64: 1, 128>}, {transform_indices = @transform_9, window_bounds = array<i64: 1, 1, 128>}]} {
    %c0 = arith.constant 0 : index
    %c0_0 = arith.constant 0 : index
    %c0_1 = arith.constant 0 : index
    %0 = vector.load %arg1[%c0, %c0_0, %c0_1] : memref<1x784x16xf32, #tpu.memory_space<vmem>>, vector<1x784x16xf32>
    %1 = vector.shape_cast %0 : vector<1x784x16xf32> to vector<784x16xf32>
    %c0_2 = arith.constant 0 : index
    %c0_3 = arith.constant 0 : index
    %2 = vector.load %arg2[%c0_2, %c0_3] : memref<16x128xf32, #tpu.memory_space<vmem>>, vector<16x128xf32>
    %cst = arith.constant dense<0.000000e+00> : vector<784x128xf32>
    %3 = tpu.matmul %1, %2, %cst {dimension_numbers = #tpu.dot_dimension_numbers<[1], [0], [0], [1], [0, 0, 1, 1], [], []>} : vector<784x16xf32>, vector<16x128xf32>, vector<784x128xf32> -> vector<784x128xf32>
    %c0_4 = arith.constant 0 : index
    %c0_5 = arith.constant 0 : index
    %4 = vector.load %arg3[%c0_4, %c0_5] : memref<1x128xf32, #tpu.memory_space<vmem>>, vector<1x128xf32>
    %5 = vector.broadcast %4 : vector<1x128xf32> to vector<784x128xf32>
    %6 = arith.addf %3, %5 : vector<784x128xf32>
    %cst_6 = arith.constant 0.000000e+00 : f32
    %7 = vector.broadcast %cst_6 : f32 to vector<784x128xf32>
    %8 = arith.maximumf %6, %7 : vector<784x128xf32>
    %c0_7 = arith.constant 0 : index
    %c0_8 = arith.constant 0 : index
    %9 = vector.load %arg11[%c0_7, %c0_8] : memref<784x128xf32, #tpu.memory_space<vmem>>, vector<784x128xf32>
    tpu.vector_store %arg11[%c0_7, %c0_8], %8 {strides = array<i32>} : memref<784x128xf32, #tpu.memory_space<vmem>>, vector<784x128xf32>,
    %c0_9 = arith.constant 0 : index
    %c0_10 = arith.constant 0 : index
    %10 = vector.load %arg11[%c0_9, %c0_10] : memref<784x128xf32, #tpu.memory_space<vmem>>, vector<755x128xf32>
    %c1 = arith.constant 1 : index
    %c0_11 = arith.constant 0 : index
    %11 = vector.load %arg11[%c1, %c0_11] : memref<784x128xf32, #tpu.memory_space<vmem>>, vector<755x128xf32>
    %12 = arith.maximumf %10, %11 : vector<755x128xf32>
    %c28 = arith.constant 28 : index
    %c0_12 = arith.constant 0 : index
    %13 = vector.load %arg11[%c28, %c0_12] : memref<784x128xf32, #tpu.memory_space<vmem>>, vector<755x128xf32>
    %c29 = arith.constant 29 : index
    %c0_13 = arith.constant 0 : index
    %14 = vector.load %arg11[%c29, %c0_13] : memref<784x128xf32, #tpu.memory_space<vmem>>, vector<755x128xf32>
    %15 = arith.maximumf %13, %14 : vector<755x128xf32>
    %16 = arith.maximumf %12, %15 : vector<755x128xf32>
    %c0_14 = arith.constant 0 : index
    %c0_15 = arith.constant 0 : index
    %17 = vector.load %arg12[%c0_14, %c0_15] : memref<784x128xf32, #tpu.memory_space<vmem>>, vector<755x128xf32>
    tpu.vector_store %arg12[%c0_14, %c0_15], %16 {strides = array<i32>} : memref<784x128xf32, #tpu.memory_space<vmem>>, vector<755x128xf32>,
    %cst_16 = arith.constant 0.000000e+00 : f32
    %18 = vector.broadcast %cst_16 : f32 to vector<320x128xf32>
    %c0_17 = arith.constant 0 : index
    %c0_18 = arith.constant 0 : index
    %19 = vector.load %arg13[%c0_17, %c0_18] : memref<320x128xf32, #tpu.memory_space<vmem>>, vector<320x128xf32>
    tpu.vector_store %arg13[%c0_17, %c0_18], %18 {strides = array<i32>} : memref<320x128xf32, #tpu.memory_space<vmem>>, vector<320x128xf32>,
    %c0_19 = arith.constant 0 : index
    %c0_20 = arith.constant 0 : index
    %20 = tpu.strided_load %arg12[%c0_19, %c0_20] {strides = array<i32: 2, 1>} : memref<784x128xf32, #tpu.memory_space<vmem>>, vector<14x128xf32>
    %c49 = arith.constant 49 : index
    %c0_21 = arith.constant 0 : index
    %21 = vector.load %arg13[%c49, %c0_21] : memref<320x128xf32, #tpu.memory_space<vmem>>, vector<14x128xf32>
    tpu.vector_store %arg13[%c49, %c0_21], %20 {strides = array<i32>} : memref<320x128xf32, #tpu.memory_space<vmem>>, vector<14x128xf32>,
    %c56 = arith.constant 56 : index
    %c0_22 = arith.constant 0 : index
    %22 = tpu.strided_load %arg12[%c56, %c0_22] {strides = array<i32: 2, 1>} : memref<784x128xf32, #tpu.memory_space<vmem>>, vector<14x128xf32>
    %c65 = arith.constant 65 : index
    %c0_23 = arith.constant 0 : index
    %23 = vector.load %arg13[%c65, %c0_23] : memref<320x128xf32, #tpu.memory_space<vmem>>, vector<14x128xf32>
    tpu.vector_store %arg13[%c65, %c0_23], %22 {strides = array<i32>} : memref<320x128xf32, #tpu.memory_space<vmem>>, vector<14x128xf32>,
    %c112 = arith.constant 112 : index
    %c0_24 = arith.constant 0 : index
    %24 = tpu.strided_load %arg12[%c112, %c0_24] {strides = array<i32: 2, 1>} : memref<784x128xf32, #tpu.memory_space<vmem>>, vector<14x128xf32>
    %c81 = arith.constant 81 : index
    %c0_25 = arith.constant 0 : index
    %25 = vector.load %arg13[%c81, %c0_25] : memref<320x128xf32, #tpu.memory_space<vmem>>, vector<14x128xf32>
    tpu.vector_store %arg13[%c81, %c0_25], %24 {strides = array<i32>} : memref<320x128xf32, #tpu.memory_space<vmem>>, vector<14x128xf32>,
    %c168 = arith.constant 168 : index
    %c0_26 = arith.constant 0 : index
    %26 = tpu.strided_load %arg12[%c168, %c0_26] {strides = array<i32: 2, 1>} : memref<784x128xf32, #tpu.memory_space<vmem>>, vector<14x128xf32>
    %c97 = arith.constant 97 : index
    %c0_27 = arith.constant 0 : index
    %27 = vector.load %arg13[%c97, %c0_27] : memref<320x128xf32, #tpu.memory_space<vmem>>, vector<14x128xf32>
    tpu.vector_store %arg13[%c97, %c0_27], %26 {strides = array<i32>} : memref<320x128xf32, #tpu.memory_space<vmem>>, vector<14x128xf32>,
    %c224 = arith.constant 224 : index
    %c0_28 = arith.constant 0 : index
    %28 = tpu.strided_load %arg12[%c224, %c0_28] {strides = array<i32: 2, 1>} : memref<784x128xf32, #tpu.memory_space<vmem>>, vector<14x128xf32>
    %c113 = arith.constant 113 : index
    %c0_29 = arith.constant 0 : index
    %29 = vector.load %arg13[%c113, %c0_29] : memref<320x128xf32, #tpu.memory_space<vmem>>, vector<14x128xf32>
    tpu.vector_store %arg13[%c113, %c0_29], %28 {strides = array<i32>} : memref<320x128xf32, #tpu.memory_space<vmem>>, vector<14x128xf32>,
    %c280 = arith.constant 280 : index
    %c0_30 = arith.constant 0 : index
    %30 = tpu.strided_load %arg12[%c280, %c0_30] {strides = array<i32: 2, 1>} : memref<784x128xf32, #tpu.memory_space<vmem>>, vector<14x128xf32>
    %c129 = arith.constant 129 : index
    %c0_31 = arith.constant 0 : index
    %31 = vector.load %arg13[%c129, %c0_31] : memref<320x128xf32, #tpu.memory_space<vmem>>, vector<14x128xf32>
    tpu.vector_store %arg13[%c129, %c0_31], %30 {strides = array<i32>} : memref<320x128xf32, #tpu.memory_space<vmem>>, vector<14x128xf32>,
    %c336 = arith.constant 336 : index
    %c0_32 = arith.constant 0 : index
    %32 = tpu.strided_load %arg12[%c336, %c0_32] {strides = array<i32: 2, 1>} : memref<784x128xf32, #tpu.memory_space<vmem>>, vector<14x128xf32>
    %c145 = arith.constant 145 : index
    %c0_33 = arith.constant 0 : index
    %33 = vector.load %arg13[%c145, %c0_33] : memref<320x128xf32, #tpu.memory_space<vmem>>, vector<14x128xf32>
    tpu.vector_store %arg13[%c145, %c0_33], %32 {strides = array<i32>} : memref<320x128xf32, #tpu.memory_space<vmem>>, vector<14x128xf32>,
    %c392 = arith.constant 392 : index
    %c0_34 = arith.constant 0 : index
    %34 = tpu.strided_load %arg12[%c392, %c0_34] {strides = array<i32: 2, 1>} : memref<784x128xf32, #tpu.memory_space<vmem>>, vector<14x128xf32>
    %c161 = arith.constant 161 : index
    %c0_35 = arith.constant 0 : index
    %35 = vector.load %arg13[%c161, %c0_35] : memref<320x128xf32, #tpu.memory_space<vmem>>, vector<14x128xf32>
    tpu.vector_store %arg13[%c161, %c0_35], %34 {strides = array<i32>} : memref<320x128xf32, #tpu.memory_space<vmem>>, vector<14x128xf32>,
    %c448 = arith.constant 448 : index
    %c0_36 = arith.constant 0 : index
    %36 = tpu.strided_load %arg12[%c448, %c0_36] {strides = array<i32: 2, 1>} : memref<784x128xf32, #tpu.memory_space<vmem>>, vector<14x128xf32>
    %c177 = arith.constant 177 : index
    %c0_37 = arith.constant 0 : index
    %37 = vector.load %arg13[%c177, %c0_37] : memref<320x128xf32, #tpu.memory_space<vmem>>, vector<14x128xf32>
    tpu.vector_store %arg13[%c177, %c0_37], %36 {strides = array<i32>} : memref<320x128xf32, #tpu.memory_space<vmem>>, vector<14x128xf32>,
    %c504 = arith.constant 504 : index
    %c0_38 = arith.constant 0 : index
    %38 = tpu.strided_load %arg12[%c504, %c0_38] {strides = array<i32: 2, 1>} : memref<784x128xf32, #tpu.memory_space<vmem>>, vector<14x128xf32>
    %c193 = arith.constant 193 : index
    %c0_39 = arith.constant 0 : index
    %39 = vector.load %arg13[%c193, %c0_39] : memref<320x128xf32, #tpu.memory_space<vmem>>, vector<14x128xf32>
    tpu.vector_store %arg13[%c193, %c0_39], %38 {strides = array<i32>} : memref<320x128xf32, #tpu.memory_space<vmem>>, vector<14x128xf32>,
    %c560 = arith.constant 560 : index
    %c0_40 = arith.constant 0 : index
    %40 = tpu.strided_load %arg12[%c560, %c0_40] {strides = array<i32: 2, 1>} : memref<784x128xf32, #tpu.memory_space<vmem>>, vector<14x128xf32>
    %c209 = arith.constant 209 : index
    %c0_41 = arith.constant 0 : index
    %41 = vector.load %arg13[%c209, %c0_41] : memref<320x128xf32, #tpu.memory_space<vmem>>, vector<14x128xf32>
    tpu.vector_store %arg13[%c209, %c0_41], %40 {strides = array<i32>} : memref<320x128xf32, #tpu.memory_space<vmem>>, vector<14x128xf32>,
    %c616 = arith.constant 616 : index
    %c0_42 = arith.constant 0 : index
    %42 = tpu.strided_load %arg12[%c616, %c0_42] {strides = array<i32: 2, 1>} : memref<784x128xf32, #tpu.memory_space<vmem>>, vector<14x128xf32>
    %c225 = arith.constant 225 : index
    %c0_43 = arith.constant 0 : index
    %43 = vector.load %arg13[%c225, %c0_43] : memref<320x128xf32, #tpu.memory_space<vmem>>, vector<14x128xf32>
    tpu.vector_store %arg13[%c225, %c0_43], %42 {strides = array<i32>} : memref<320x128xf32, #tpu.memory_space<vmem>>, vector<14x128xf32>,
    %c672 = arith.constant 672 : index
    %c0_44 = arith.constant 0 : index
    %44 = tpu.strided_load %arg12[%c672, %c0_44] {strides = array<i32: 2, 1>} : memref<784x128xf32, #tpu.memory_space<vmem>>, vector<14x128xf32>
    %c241 = arith.constant 241 : index
    %c0_45 = arith.constant 0 : index
    %45 = vector.load %arg13[%c241, %c0_45] : memref<320x128xf32, #tpu.memory_space<vmem>>, vector<14x128xf32>
    tpu.vector_store %arg13[%c241, %c0_45], %44 {strides = array<i32>} : memref<320x128xf32, #tpu.memory_space<vmem>>, vector<14x128xf32>,
    %c728 = arith.constant 728 : index
    %c0_46 = arith.constant 0 : index
    %46 = tpu.strided_load %arg12[%c728, %c0_46] {strides = array<i32: 2, 1>} : memref<784x128xf32, #tpu.memory_space<vmem>>, vector<14x128xf32>
    %c257 = arith.constant 257 : index
    %c0_47 = arith.constant 0 : index
    %47 = vector.load %arg13[%c257, %c0_47] : memref<320x128xf32, #tpu.memory_space<vmem>>, vector<14x128xf32>
    tpu.vector_store %arg13[%c257, %c0_47], %46 {strides = array<i32>} : memref<320x128xf32, #tpu.memory_space<vmem>>, vector<14x128xf32>,
    %c15 = arith.constant 15 : index
    %c0_48 = arith.constant 0 : index
    %48 = vector.load %arg13[%c15, %c0_48] : memref<320x128xf32, #tpu.memory_space<vmem>>, vector<256x128xf32>
    %c0_49 = arith.constant 0 : index
    %c0_50 = arith.constant 0 : index
    %c0_51 = arith.constant 0 : index
    %49 = vector.load %arg4[%c0_49, %c0_50, %c0_51] : memref<9x128x128xf32, #tpu.memory_space<vmem>>, vector<1x128x128xf32>
    %50 = vector.shape_cast %49 : vector<1x128x128xf32> to vector<128x128xf32>
    %cst_52 = arith.constant dense<0.000000e+00> : vector<256x128xf32>
    %51 = tpu.matmul %48, %50, %cst_52 {dimension_numbers = #tpu.dot_dimension_numbers<[1], [0], [0], [1], [0, 0, 1, 1], [], []>} : vector<256x128xf32>, vector<128x128xf32>, vector<256x128xf32> -> vector<256x128xf32>
    %c16 = arith.constant 16 : index
    %c0_53 = arith.constant 0 : index
    %52 = vector.load %arg13[%c16, %c0_53] : memref<320x128xf32, #tpu.memory_space<vmem>>, vector<256x128xf32>
    %c1_54 = arith.constant 1 : index
    %c0_55 = arith.constant 0 : index
    %c0_56 = arith.constant 0 : index
    %53 = vector.load %arg4[%c1_54, %c0_55, %c0_56] : memref<9x128x128xf32, #tpu.memory_space<vmem>>, vector<1x128x128xf32>
    %54 = vector.shape_cast %53 : vector<1x128x128xf32> to vector<128x128xf32>
    %cst_57 = arith.constant dense<0.000000e+00> : vector<256x128xf32>
    %55 = tpu.matmul %52, %54, %cst_57 {dimension_numbers = #tpu.dot_dimension_numbers<[1], [0], [0], [1], [0, 0, 1, 1], [], []>} : vector<256x128xf32>, vector<128x128xf32>, vector<256x128xf32> -> vector<256x128xf32>
    %56 = arith.addf %51, %55 : vector<256x128xf32>
    %c17 = arith.constant 17 : index
    %c0_58 = arith.constant 0 : index
    %57 = vector.load %arg13[%c17, %c0_58] : memref<320x128xf32, #tpu.memory_space<vmem>>, vector<256x128xf32>
    %c2 = arith.constant 2 : index
    %c0_59 = arith.constant 0 : index
    %c0_60 = arith.constant 0 : index
    %58 = vector.load %arg4[%c2, %c0_59, %c0_60] : memref<9x128x128xf32, #tpu.memory_space<vmem>>, vector<1x128x128xf32>
    %59 = vector.shape_cast %58 : vector<1x128x128xf32> to vector<128x128xf32>
    %cst_61 = arith.constant dense<0.000000e+00> : vector<256x128xf32>
    %60 = tpu.matmul %57, %59, %cst_61 {dimension_numbers = #tpu.dot_dimension_numbers<[1], [0], [0], [1], [0, 0, 1, 1], [], []>} : vector<256x128xf32>, vector<128x128xf32>, vector<256x128xf32> -> vector<256x128xf32>
    %61 = arith.addf %56, %60 : vector<256x128xf32>
    %c31 = arith.constant 31 : index
    %c0_62 = arith.constant 0 : index
    %62 = vector.load %arg13[%c31, %c0_62] : memref<320x128xf32, #tpu.memory_space<vmem>>, vector<256x128xf32>
    %c3 = arith.constant 3 : index
    %c0_63 = arith.constant 0 : index
    %c0_64 = arith.constant 0 : index
    %63 = vector.load %arg4[%c3, %c0_63, %c0_64] : memref<9x128x128xf32, #tpu.memory_space<vmem>>, vector<1x128x128xf32>
    %64 = vector.shape_cast %63 : vector<1x128x128xf32> to vector<128x128xf32>
    %cst_65 = arith.constant dense<0.000000e+00> : vector<256x128xf32>
    %65 = tpu.matmul %62, %64, %cst_65 {dimension_numbers = #tpu.dot_dimension_numbers<[1], [0], [0], [1], [0, 0, 1, 1], [], []>} : vector<256x128xf32>, vector<128x128xf32>, vector<256x128xf32> -> vector<256x128xf32>
    %66 = arith.addf %61, %65 : vector<256x128xf32>
    %c32 = arith.constant 32 : index
    %c0_66 = arith.constant 0 : index
    %67 = vector.load %arg13[%c32, %c0_66] : memref<320x128xf32, #tpu.memory_space<vmem>>, vector<256x128xf32>
    %c4 = arith.constant 4 : index
    %c0_67 = arith.constant 0 : index
    %c0_68 = arith.constant 0 : index
    %68 = vector.load %arg4[%c4, %c0_67, %c0_68] : memref<9x128x128xf32, #tpu.memory_space<vmem>>, vector<1x128x128xf32>
    %69 = vector.shape_cast %68 : vector<1x128x128xf32> to vector<128x128xf32>
    %cst_69 = arith.constant dense<0.000000e+00> : vector<256x128xf32>
    %70 = tpu.matmul %67, %69, %cst_69 {dimension_numbers = #tpu.dot_dimension_numbers<[1], [0], [0], [1], [0, 0, 1, 1], [], []>} : vector<256x128xf32>, vector<128x128xf32>, vector<256x128xf32> -> vector<256x128xf32>
    %71 = arith.addf %66, %70 : vector<256x128xf32>
    %c33 = arith.constant 33 : index
    %c0_70 = arith.constant 0 : index
    %72 = vector.load %arg13[%c33, %c0_70] : memref<320x128xf32, #tpu.memory_space<vmem>>, vector<256x128xf32>
    %c5 = arith.constant 5 : index
    %c0_71 = arith.constant 0 : index
    %c0_72 = arith.constant 0 : index
    %73 = vector.load %arg4[%c5, %c0_71, %c0_72] : memref<9x128x128xf32, #tpu.memory_space<vmem>>, vector<1x128x128xf32>
    %74 = vector.shape_cast %73 : vector<1x128x128xf32> to vector<128x128xf32>
    %cst_73 = arith.constant dense<0.000000e+00> : vector<256x128xf32>
    %75 = tpu.matmul %72, %74, %cst_73 {dimension_numbers = #tpu.dot_dimension_numbers<[1], [0], [0], [1], [0, 0, 1, 1], [], []>} : vector<256x128xf32>, vector<128x128xf32>, vector<256x128xf32> -> vector<256x128xf32>
    %76 = arith.addf %71, %75 : vector<256x128xf32>
    %c47 = arith.constant 47 : index
    %c0_74 = arith.constant 0 : index
    %77 = vector.load %arg13[%c47, %c0_74] : memref<320x128xf32, #tpu.memory_space<vmem>>, vector<256x128xf32>
    %c6 = arith.constant 6 : index
    %c0_75 = arith.constant 0 : index
    %c0_76 = arith.constant 0 : index
    %78 = vector.load %arg4[%c6, %c0_75, %c0_76] : memref<9x128x128xf32, #tpu.memory_space<vmem>>, vector<1x128x128xf32>
    %79 = vector.shape_cast %78 : vector<1x128x128xf32> to vector<128x128xf32>
    %cst_77 = arith.constant dense<0.000000e+00> : vector<256x128xf32>
    %80 = tpu.matmul %77, %79, %cst_77 {dimension_numbers = #tpu.dot_dimension_numbers<[1], [0], [0], [1], [0, 0, 1, 1], [], []>} : vector<256x128xf32>, vector<128x128xf32>, vector<256x128xf32> -> vector<256x128xf32>
    %81 = arith.addf %76, %80 : vector<256x128xf32>
    %c48 = arith.constant 48 : index
    %c0_78 = arith.constant 0 : index
    %82 = vector.load %arg13[%c48, %c0_78] : memref<320x128xf32, #tpu.memory_space<vmem>>, vector<256x128xf32>
    %c7 = arith.constant 7 : index
    %c0_79 = arith.constant 0 : index
    %c0_80 = arith.constant 0 : index
    %83 = vector.load %arg4[%c7, %c0_79, %c0_80] : memref<9x128x128xf32, #tpu.memory_space<vmem>>, vector<1x128x128xf32>
    %84 = vector.shape_cast %83 : vector<1x128x128xf32> to vector<128x128xf32>
    %cst_81 = arith.constant dense<0.000000e+00> : vector<256x128xf32>
    %85 = tpu.matmul %82, %84, %cst_81 {dimension_numbers = #tpu.dot_dimension_numbers<[1], [0], [0], [1], [0, 0, 1, 1], [], []>} : vector<256x128xf32>, vector<128x128xf32>, vector<256x128xf32> -> vector<256x128xf32>
    %86 = arith.addf %81, %85 : vector<256x128xf32>
    %c49_82 = arith.constant 49 : index
    %c0_83 = arith.constant 0 : index
    %87 = vector.load %arg13[%c49_82, %c0_83] : memref<320x128xf32, #tpu.memory_space<vmem>>, vector<256x128xf32>
    %c8 = arith.constant 8 : index
    %c0_84 = arith.constant 0 : index
    %c0_85 = arith.constant 0 : index
    %88 = vector.load %arg4[%c8, %c0_84, %c0_85] : memref<9x128x128xf32, #tpu.memory_space<vmem>>, vector<1x128x128xf32>
    %89 = vector.shape_cast %88 : vector<1x128x128xf32> to vector<128x128xf32>
    %cst_86 = arith.constant dense<0.000000e+00> : vector<256x128xf32>
    %90 = tpu.matmul %87, %89, %cst_86 {dimension_numbers = #tpu.dot_dimension_numbers<[1], [0], [0], [1], [0, 0, 1, 1], [], []>} : vector<256x128xf32>, vector<128x128xf32>, vector<256x128xf32> -> vector<256x128xf32>
    %91 = arith.addf %86, %90 : vector<256x128xf32>
    %c0_87 = arith.constant 0 : index
    %c0_88 = arith.constant 0 : index
    %92 = vector.load %arg5[%c0_87, %c0_88] : memref<1x128xf32, #tpu.memory_space<vmem>>, vector<1x128xf32>
    %93 = vector.broadcast %92 : vector<1x128xf32> to vector<256x128xf32>
    %94 = arith.addf %91, %93 : vector<256x128xf32>
    %cst_89 = arith.constant 0.000000e+00 : f32
    %95 = vector.broadcast %cst_89 : f32 to vector<256x128xf32>
    %96 = arith.maximumf %94, %95 : vector<256x128xf32>
    %c0_90 = arith.constant 0 : index
    %c0_91 = arith.constant 0 : index
    %97 = vector.load %arg14[%c0_90, %c0_91] : memref<256x128xf32, #tpu.memory_space<vmem>>, vector<256x128xf32>
    tpu.vector_store %arg14[%c0_90, %c0_91], %96 {strides = array<i32>} : memref<256x128xf32, #tpu.memory_space<vmem>>, vector<256x128xf32>,
    %c0_92 = arith.constant 0 : index
    %c0_93 = arith.constant 0 : index
    %98 = vector.load %arg14[%c0_92, %c0_93] : memref<256x128xf32, #tpu.memory_space<vmem>>, vector<239x128xf32>
    %c1_94 = arith.constant 1 : index
    %c0_95 = arith.constant 0 : index
    %99 = vector.load %arg14[%c1_94, %c0_95] : memref<256x128xf32, #tpu.memory_space<vmem>>, vector<239x128xf32>
    %100 = arith.maximumf %98, %99 : vector<239x128xf32>
    %c16_96 = arith.constant 16 : index
    %c0_97 = arith.constant 0 : index
    %101 = vector.load %arg14[%c16_96, %c0_97] : memref<256x128xf32, #tpu.memory_space<vmem>>, vector<239x128xf32>
    %c17_98 = arith.constant 17 : index
    %c0_99 = arith.constant 0 : index
    %102 = vector.load %arg14[%c17_98, %c0_99] : memref<256x128xf32, #tpu.memory_space<vmem>>, vector<239x128xf32>
    %103 = arith.maximumf %101, %102 : vector<239x128xf32>
    %104 = arith.maximumf %100, %103 : vector<239x128xf32>
    %c0_100 = arith.constant 0 : index
    %c0_101 = arith.constant 0 : index
    %105 = vector.load %arg15[%c0_100, %c0_101] : memref<256x128xf32, #tpu.memory_space<vmem>>, vector<239x128xf32>
    tpu.vector_store %arg15[%c0_100, %c0_101], %104 {strides = array<i32>} : memref<256x128xf32, #tpu.memory_space<vmem>>, vector<239x128xf32>,
    %c17_102 = arith.constant 17 : index
    %c0_103 = arith.constant 0 : index
    %106 = tpu.strided_load %arg15[%c17_102, %c0_103] {strides = array<i32: 256, 1>} : memref<256x128xf32, #tpu.memory_space<vmem>>, vector<1x128xf32>
    %c0_104 = arith.constant 0 : index
    %c0_105 = arith.constant 0 : index
    %107 = vector.load %arg16[%c0_104, %c0_105] : memref<1x6272xf32, #tpu.memory_space<vmem>>, vector<1x128xf32>
    tpu.vector_store %arg16[%c0_104, %c0_105], %106 {strides = array<i32>} : memref<1x6272xf32, #tpu.memory_space<vmem>>, vector<1x128xf32>,
    %c19 = arith.constant 19 : index
    %c0_106 = arith.constant 0 : index
    %108 = tpu.strided_load %arg15[%c19, %c0_106] {strides = array<i32: 256, 1>} : memref<256x128xf32, #tpu.memory_space<vmem>>, vector<1x128xf32>
    %c0_107 = arith.constant 0 : index
    %c128 = arith.constant 128 : index
    %109 = vector.load %arg16[%c0_107, %c128] : memref<1x6272xf32, #tpu.memory_space<vmem>>, vector<1x128xf32>
    tpu.vector_store %arg16[%c0_107, %c128], %108 {strides = array<i32>} : memref<1x6272xf32, #tpu.memory_space<vmem>>, vector<1x128xf32>,
    %c21 = arith.constant 21 : index
    %c0_108 = arith.constant 0 : index
    %110 = tpu.strided_load %arg15[%c21, %c0_108] {strides = array<i32: 256, 1>} : memref<256x128xf32, #tpu.memory_space<vmem>>, vector<1x128xf32>
    %c0_109 = arith.constant 0 : index
    %c256 = arith.constant 256 : index
    %111 = vector.load %arg16[%c0_109, %c256] : memref<1x6272xf32, #tpu.memory_space<vmem>>, vector<1x128xf32>
    tpu.vector_store %arg16[%c0_109, %c256], %110 {strides = array<i32>} : memref<1x6272xf32, #tpu.memory_space<vmem>>, vector<1x128xf32>,
    %c23 = arith.constant 23 : index
    %c0_110 = arith.constant 0 : index
    %112 = tpu.strided_load %arg15[%c23, %c0_110] {strides = array<i32: 256, 1>} : memref<256x128xf32, #tpu.memory_space<vmem>>, vector<1x128xf32>
    %c0_111 = arith.constant 0 : index
    %c384 = arith.constant 384 : index
    %113 = vector.load %arg16[%c0_111, %c384] : memref<1x6272xf32, #tpu.memory_space<vmem>>, vector<1x128xf32>
    tpu.vector_store %arg16[%c0_111, %c384], %112 {strides = array<i32>} : memref<1x6272xf32, #tpu.memory_space<vmem>>, vector<1x128xf32>,
    %c25 = arith.constant 25 : index
    %c0_112 = arith.constant 0 : index
    %114 = tpu.strided_load %arg15[%c25, %c0_112] {strides = array<i32: 256, 1>} : memref<256x128xf32, #tpu.memory_space<vmem>>, vector<1x128xf32>
    %c0_113 = arith.constant 0 : index
    %c512 = arith.constant 512 : index
    %115 = vector.load %arg16[%c0_113, %c512] : memref<1x6272xf32, #tpu.memory_space<vmem>>, vector<1x128xf32>
    tpu.vector_store %arg16[%c0_113, %c512], %114 {strides = array<i32>} : memref<1x6272xf32, #tpu.memory_space<vmem>>, vector<1x128xf32>,
    %c27 = arith.constant 27 : index
    %c0_114 = arith.constant 0 : index
    %116 = tpu.strided_load %arg15[%c27, %c0_114] {strides = array<i32: 256, 1>} : memref<256x128xf32, #tpu.memory_space<vmem>>, vector<1x128xf32>
    %c0_115 = arith.constant 0 : index
    %c640 = arith.constant 640 : index
    %117 = vector.load %arg16[%c0_115, %c640] : memref<1x6272xf32, #tpu.memory_space<vmem>>, vector<1x128xf32>
    tpu.vector_store %arg16[%c0_115, %c640], %116 {strides = array<i32>} : memref<1x6272xf32, #tpu.memory_space<vmem>>, vector<1x128xf32>,
    %c29_116 = arith.constant 29 : index
    %c0_117 = arith.constant 0 : index
    %118 = tpu.strided_load %arg15[%c29_116, %c0_117] {strides = array<i32: 256, 1>} : memref<256x128xf32, #tpu.memory_space<vmem>>, vector<1x128xf32>
    %c0_118 = arith.constant 0 : index
    %c768 = arith.constant 768 : index
    %119 = vector.load %arg16[%c0_118, %c768] : memref<1x6272xf32, #tpu.memory_space<vmem>>, vector<1x128xf32>
    tpu.vector_store %arg16[%c0_118, %c768], %118 {strides = array<i32>} : memref<1x6272xf32, #tpu.memory_space<vmem>>, vector<1x128xf32>,
    %c49_119 = arith.constant 49 : index
    %c0_120 = arith.constant 0 : index
    %120 = tpu.strided_load %arg15[%c49_119, %c0_120] {strides = array<i32: 256, 1>} : memref<256x128xf32, #tpu.memory_space<vmem>>, vector<1x128xf32>
    %c0_121 = arith.constant 0 : index
    %c896 = arith.constant 896 : index
    %121 = vector.load %arg16[%c0_121, %c896] : memref<1x6272xf32, #tpu.memory_space<vmem>>, vector<1x128xf32>
    tpu.vector_store %arg16[%c0_121, %c896], %120 {strides = array<i32>} : memref<1x6272xf32, #tpu.memory_space<vmem>>, vector<1x128xf32>,
    %c51 = arith.constant 51 : index
    %c0_122 = arith.constant 0 : index
    %122 = tpu.strided_load %arg15[%c51, %c0_122] {strides = array<i32: 256, 1>} : memref<256x128xf32, #tpu.memory_space<vmem>>, vector<1x128xf32>
    %c0_123 = arith.constant 0 : index
    %c1024 = arith.constant 1024 : index
    %123 = vector.load %arg16[%c0_123, %c1024] : memref<1x6272xf32, #tpu.memory_space<vmem>>, vector<1x128xf32>
    tpu.vector_store %arg16[%c0_123, %c1024], %122 {strides = array<i32>} : memref<1x6272xf32, #tpu.memory_space<vmem>>, vector<1x128xf32>,
    %c53 = arith.constant 53 : index
    %c0_124 = arith.constant 0 : index
    %124 = tpu.strided_load %arg15[%c53, %c0_124] {strides = array<i32: 256, 1>} : memref<256x128xf32, #tpu.memory_space<vmem>>, vector<1x128xf32>
    %c0_125 = arith.constant 0 : index
    %c1152 = arith.constant 1152 : index
    %125 = vector.load %arg16[%c0_125, %c1152] : memref<1x6272xf32, #tpu.memory_space<vmem>>, vector<1x128xf32>
    tpu.vector_store %arg16[%c0_125, %c1152], %124 {strides = array<i32>} : memref<1x6272xf32, #tpu.memory_space<vmem>>, vector<1x128xf32>,
    %c55 = arith.constant 55 : index
    %c0_126 = arith.constant 0 : index
    %126 = tpu.strided_load %arg15[%c55, %c0_126] {strides = array<i32: 256, 1>} : memref<256x128xf32, #tpu.memory_space<vmem>>, vector<1x128xf32>
    %c0_127 = arith.constant 0 : index
    %c1280 = arith.constant 1280 : index
    %127 = vector.load %arg16[%c0_127, %c1280] : memref<1x6272xf32, #tpu.memory_space<vmem>>, vector<1x128xf32>
    tpu.vector_store %arg16[%c0_127, %c1280], %126 {strides = array<i32>} : memref<1x6272xf32, #tpu.memory_space<vmem>>, vector<1x128xf32>,
    %c57 = arith.constant 57 : index
    %c0_128 = arith.constant 0 : index
    %128 = tpu.strided_load %arg15[%c57, %c0_128] {strides = array<i32: 256, 1>} : memref<256x128xf32, #tpu.memory_space<vmem>>, vector<1x128xf32>
    %c0_129 = arith.constant 0 : index
    %c1408 = arith.constant 1408 : index
    %129 = vector.load %arg16[%c0_129, %c1408] : memref<1x6272xf32, #tpu.memory_space<vmem>>, vector<1x128xf32>
    tpu.vector_store %arg16[%c0_129, %c1408], %128 {strides = array<i32>} : memref<1x6272xf32, #tpu.memory_space<vmem>>, vector<1x128xf32>,
    %c59 = arith.constant 59 : index
    %c0_130 = arith.constant 0 : index
    %130 = tpu.strided_load %arg15[%c59, %c0_130] {strides = array<i32: 256, 1>} : memref<256x128xf32, #tpu.memory_space<vmem>>, vector<1x128xf32>
    %c0_131 = arith.constant 0 : index
    %c1536 = arith.constant 1536 : index
    %131 = vector.load %arg16[%c0_131, %c1536] : memref<1x6272xf32, #tpu.memory_space<vmem>>, vector<1x128xf32>
    tpu.vector_store %arg16[%c0_131, %c1536], %130 {strides = array<i32>} : memref<1x6272xf32, #tpu.memory_space<vmem>>, vector<1x128xf32>,
    %c61 = arith.constant 61 : index
    %c0_132 = arith.constant 0 : index
    %132 = tpu.strided_load %arg15[%c61, %c0_132] {strides = array<i32: 256, 1>} : memref<256x128xf32, #tpu.memory_space<vmem>>, vector<1x128xf32>
    %c0_133 = arith.constant 0 : index
    %c1664 = arith.constant 1664 : index
    %133 = vector.load %arg16[%c0_133, %c1664] : memref<1x6272xf32, #tpu.memory_space<vmem>>, vector<1x128xf32>
    tpu.vector_store %arg16[%c0_133, %c1664], %132 {strides = array<i32>} : memref<1x6272xf32, #tpu.memory_space<vmem>>, vector<1x128xf32>,
    %c81_134 = arith.constant 81 : index
    %c0_135 = arith.constant 0 : index
    %134 = tpu.strided_load %arg15[%c81_134, %c0_135] {strides = array<i32: 256, 1>} : memref<256x128xf32, #tpu.memory_space<vmem>>, vector<1x128xf32>
    %c0_136 = arith.constant 0 : index
    %c1792 = arith.constant 1792 : index
    %135 = vector.load %arg16[%c0_136, %c1792] : memref<1x6272xf32, #tpu.memory_space<vmem>>, vector<1x128xf32>
    tpu.vector_store %arg16[%c0_136, %c1792], %134 {strides = array<i32>} : memref<1x6272xf32, #tpu.memory_space<vmem>>, vector<1x128xf32>,
    %c83 = arith.constant 83 : index
    %c0_137 = arith.constant 0 : index
    %136 = tpu.strided_load %arg15[%c83, %c0_137] {strides = array<i32: 256, 1>} : memref<256x128xf32, #tpu.memory_space<vmem>>, vector<1x128xf32>
    %c0_138 = arith.constant 0 : index
    %c1920 = arith.constant 1920 : index
    %137 = vector.load %arg16[%c0_138, %c1920] : memref<1x6272xf32, #tpu.memory_space<vmem>>, vector<1x128xf32>
    tpu.vector_store %arg16[%c0_138, %c1920], %136 {strides = array<i32>} : memref<1x6272xf32, #tpu.memory_space<vmem>>, vector<1x128xf32>,
    %c85 = arith.constant 85 : index
    %c0_139 = arith.constant 0 : index
    %138 = tpu.strided_load %arg15[%c85, %c0_139] {strides = array<i32: 256, 1>} : memref<256x128xf32, #tpu.memory_space<vmem>>, vector<1x128xf32>
    %c0_140 = arith.constant 0 : index
    %c2048 = arith.constant 2048 : index
    %139 = vector.load %arg16[%c0_140, %c2048] : memref<1x6272xf32, #tpu.memory_space<vmem>>, vector<1x128xf32>
    tpu.vector_store %arg16[%c0_140, %c2048], %138 {strides = array<i32>} : memref<1x6272xf32, #tpu.memory_space<vmem>>, vector<1x128xf32>,
    %c87 = arith.constant 87 : index
    %c0_141 = arith.constant 0 : index
    %140 = tpu.strided_load %arg15[%c87, %c0_141] {strides = array<i32: 256, 1>} : memref<256x128xf32, #tpu.memory_space<vmem>>, vector<1x128xf32>
    %c0_142 = arith.constant 0 : index
    %c2176 = arith.constant 2176 : index
    %141 = vector.load %arg16[%c0_142, %c2176] : memref<1x6272xf32, #tpu.memory_space<vmem>>, vector<1x128xf32>
    tpu.vector_store %arg16[%c0_142, %c2176], %140 {strides = array<i32>} : memref<1x6272xf32, #tpu.memory_space<vmem>>, vector<1x128xf32>,
    %c89 = arith.constant 89 : index
    %c0_143 = arith.constant 0 : index
    %142 = tpu.strided_load %arg15[%c89, %c0_143] {strides = array<i32: 256, 1>} : memref<256x128xf32, #tpu.memory_space<vmem>>, vector<1x128xf32>
    %c0_144 = arith.constant 0 : index
    %c2304 = arith.constant 2304 : index
    %143 = vector.load %arg16[%c0_144, %c2304] : memref<1x6272xf32, #tpu.memory_space<vmem>>, vector<1x128xf32>
    tpu.vector_store %arg16[%c0_144, %c2304], %142 {strides = array<i32>} : memref<1x6272xf32, #tpu.memory_space<vmem>>, vector<1x128xf32>,
    %c91 = arith.constant 91 : index
    %c0_145 = arith.constant 0 : index
    %144 = tpu.strided_load %arg15[%c91, %c0_145] {strides = array<i32: 256, 1>} : memref<256x128xf32, #tpu.memory_space<vmem>>, vector<1x128xf32>
    %c0_146 = arith.constant 0 : index
    %c2432 = arith.constant 2432 : index
    %145 = vector.load %arg16[%c0_146, %c2432] : memref<1x6272xf32, #tpu.memory_space<vmem>>, vector<1x128xf32>
    tpu.vector_store %arg16[%c0_146, %c2432], %144 {strides = array<i32>} : memref<1x6272xf32, #tpu.memory_space<vmem>>, vector<1x128xf32>,
    %c93 = arith.constant 93 : index
    %c0_147 = arith.constant 0 : index
    %146 = tpu.strided_load %arg15[%c93, %c0_147] {strides = array<i32: 256, 1>} : memref<256x128xf32, #tpu.memory_space<vmem>>, vector<1x128xf32>
    %c0_148 = arith.constant 0 : index
    %c2560 = arith.constant 2560 : index
    %147 = vector.load %arg16[%c0_148, %c2560] : memref<1x6272xf32, #tpu.memory_space<vmem>>, vector<1x128xf32>
    tpu.vector_store %arg16[%c0_148, %c2560], %146 {strides = array<i32>} : memref<1x6272xf32, #tpu.memory_space<vmem>>, vector<1x128xf32>,
    %c113_149 = arith.constant 113 : index
    %c0_150 = arith.constant 0 : index
    %148 = tpu.strided_load %arg15[%c113_149, %c0_150] {strides = array<i32: 256, 1>} : memref<256x128xf32, #tpu.memory_space<vmem>>, vector<1x128xf32>
    %c0_151 = arith.constant 0 : index
    %c2688 = arith.constant 2688 : index
    %149 = vector.load %arg16[%c0_151, %c2688] : memref<1x6272xf32, #tpu.memory_space<vmem>>, vector<1x128xf32>
    tpu.vector_store %arg16[%c0_151, %c2688], %148 {strides = array<i32>} : memref<1x6272xf32, #tpu.memory_space<vmem>>, vector<1x128xf32>,
    %c115 = arith.constant 115 : index
    %c0_152 = arith.constant 0 : index
    %150 = tpu.strided_load %arg15[%c115, %c0_152] {strides = array<i32: 256, 1>} : memref<256x128xf32, #tpu.memory_space<vmem>>, vector<1x128xf32>
    %c0_153 = arith.constant 0 : index
    %c2816 = arith.constant 2816 : index
    %151 = vector.load %arg16[%c0_153, %c2816] : memref<1x6272xf32, #tpu.memory_space<vmem>>, vector<1x128xf32>
    tpu.vector_store %arg16[%c0_153, %c2816], %150 {strides = array<i32>} : memref<1x6272xf32, #tpu.memory_space<vmem>>, vector<1x128xf32>,
    %c117 = arith.constant 117 : index
    %c0_154 = arith.constant 0 : index
    %152 = tpu.strided_load %arg15[%c117, %c0_154] {strides = array<i32: 256, 1>} : memref<256x128xf32, #tpu.memory_space<vmem>>, vector<1x128xf32>
    %c0_155 = arith.constant 0 : index
    %c2944 = arith.constant 2944 : index
    %153 = vector.load %arg16[%c0_155, %c2944] : memref<1x6272xf32, #tpu.memory_space<vmem>>, vector<1x128xf32>
    tpu.vector_store %arg16[%c0_155, %c2944], %152 {strides = array<i32>} : memref<1x6272xf32, #tpu.memory_space<vmem>>, vector<1x128xf32>,
    %c119 = arith.constant 119 : index
    %c0_156 = arith.constant 0 : index
    %154 = tpu.strided_load %arg15[%c119, %c0_156] {strides = array<i32: 256, 1>} : memref<256x128xf32, #tpu.memory_space<vmem>>, vector<1x128xf32>
    %c0_157 = arith.constant 0 : index
    %c3072 = arith.constant 3072 : index
    %155 = vector.load %arg16[%c0_157, %c3072] : memref<1x6272xf32, #tpu.memory_space<vmem>>, vector<1x128xf32>
    tpu.vector_store %arg16[%c0_157, %c3072], %154 {strides = array<i32>} : memref<1x6272xf32, #tpu.memory_space<vmem>>, vector<1x128xf32>,
    %c121 = arith.constant 121 : index
    %c0_158 = arith.constant 0 : index
    %156 = tpu.strided_load %arg15[%c121, %c0_158] {strides = array<i32: 256, 1>} : memref<256x128xf32, #tpu.memory_space<vmem>>, vector<1x128xf32>
    %c0_159 = arith.constant 0 : index
    %c3200 = arith.constant 3200 : index
    %157 = vector.load %arg16[%c0_159, %c3200] : memref<1x6272xf32, #tpu.memory_space<vmem>>, vector<1x128xf32>
    tpu.vector_store %arg16[%c0_159, %c3200], %156 {strides = array<i32>} : memref<1x6272xf32, #tpu.memory_space<vmem>>, vector<1x128xf32>,
    %c123 = arith.constant 123 : index
    %c0_160 = arith.constant 0 : index
    %158 = tpu.strided_load %arg15[%c123, %c0_160] {strides = array<i32: 256, 1>} : memref<256x128xf32, #tpu.memory_space<vmem>>, vector<1x128xf32>
    %c0_161 = arith.constant 0 : index
    %c3328 = arith.constant 3328 : index
    %159 = vector.load %arg16[%c0_161, %c3328] : memref<1x6272xf32, #tpu.memory_space<vmem>>, vector<1x128xf32>
    tpu.vector_store %arg16[%c0_161, %c3328], %158 {strides = array<i32>} : memref<1x6272xf32, #tpu.memory_space<vmem>>, vector<1x128xf32>,
    %c125 = arith.constant 125 : index
    %c0_162 = arith.constant 0 : index
    %160 = tpu.strided_load %arg15[%c125, %c0_162] {strides = array<i32: 256, 1>} : memref<256x128xf32, #tpu.memory_space<vmem>>, vector<1x128xf32>
    %c0_163 = arith.constant 0 : index
    %c3456 = arith.constant 3456 : index
    %161 = vector.load %arg16[%c0_163, %c3456] : memref<1x6272xf32, #tpu.memory_space<vmem>>, vector<1x128xf32>
    tpu.vector_store %arg16[%c0_163, %c3456], %160 {strides = array<i32>} : memref<1x6272xf32, #tpu.memory_space<vmem>>, vector<1x128xf32>,
    %c145_164 = arith.constant 145 : index
    %c0_165 = arith.constant 0 : index
    %162 = tpu.strided_load %arg15[%c145_164, %c0_165] {strides = array<i32: 256, 1>} : memref<256x128xf32, #tpu.memory_space<vmem>>, vector<1x128xf32>
    %c0_166 = arith.constant 0 : index
    %c3584 = arith.constant 3584 : index
    %163 = vector.load %arg16[%c0_166, %c3584] : memref<1x6272xf32, #tpu.memory_space<vmem>>, vector<1x128xf32>
    tpu.vector_store %arg16[%c0_166, %c3584], %162 {strides = array<i32>} : memref<1x6272xf32, #tpu.memory_space<vmem>>, vector<1x128xf32>,
    %c147 = arith.constant 147 : index
    %c0_167 = arith.constant 0 : index
    %164 = tpu.strided_load %arg15[%c147, %c0_167] {strides = array<i32: 256, 1>} : memref<256x128xf32, #tpu.memory_space<vmem>>, vector<1x128xf32>
    %c0_168 = arith.constant 0 : index
    %c3712 = arith.constant 3712 : index
    %165 = vector.load %arg16[%c0_168, %c3712] : memref<1x6272xf32, #tpu.memory_space<vmem>>, vector<1x128xf32>
    tpu.vector_store %arg16[%c0_168, %c3712], %164 {strides = array<i32>} : memref<1x6272xf32, #tpu.memory_space<vmem>>, vector<1x128xf32>,
    %c149 = arith.constant 149 : index
    %c0_169 = arith.constant 0 : index
    %166 = tpu.strided_load %arg15[%c149, %c0_169] {strides = array<i32: 256, 1>} : memref<256x128xf32, #tpu.memory_space<vmem>>, vector<1x128xf32>
    %c0_170 = arith.constant 0 : index
    %c3840 = arith.constant 3840 : index
    %167 = vector.load %arg16[%c0_170, %c3840] : memref<1x6272xf32, #tpu.memory_space<vmem>>, vector<1x128xf32>
    tpu.vector_store %arg16[%c0_170, %c3840], %166 {strides = array<i32>} : memref<1x6272xf32, #tpu.memory_space<vmem>>, vector<1x128xf32>,
    %c151 = arith.constant 151 : index
    %c0_171 = arith.constant 0 : index
    %168 = tpu.strided_load %arg15[%c151, %c0_171] {strides = array<i32: 256, 1>} : memref<256x128xf32, #tpu.memory_space<vmem>>, vector<1x128xf32>
    %c0_172 = arith.constant 0 : index
    %c3968 = arith.constant 3968 : index
    %169 = vector.load %arg16[%c0_172, %c3968] : memref<1x6272xf32, #tpu.memory_space<vmem>>, vector<1x128xf32>
    tpu.vector_store %arg16[%c0_172, %c3968], %168 {strides = array<i32>} : memref<1x6272xf32, #tpu.memory_space<vmem>>, vector<1x128xf32>,
    %c153 = arith.constant 153 : index
    %c0_173 = arith.constant 0 : index
    %170 = tpu.strided_load %arg15[%c153, %c0_173] {strides = array<i32: 256, 1>} : memref<256x128xf32, #tpu.memory_space<vmem>>, vector<1x128xf32>
    %c0_174 = arith.constant 0 : index
    %c4096 = arith.constant 4096 : index
    %171 = vector.load %arg16[%c0_174, %c4096] : memref<1x6272xf32, #tpu.memory_space<vmem>>, vector<1x128xf32>
    tpu.vector_store %arg16[%c0_174, %c4096], %170 {strides = array<i32>} : memref<1x6272xf32, #tpu.memory_space<vmem>>, vector<1x128xf32>,
    %c155 = arith.constant 155 : index
    %c0_175 = arith.constant 0 : index
    %172 = tpu.strided_load %arg15[%c155, %c0_175] {strides = array<i32: 256, 1>} : memref<256x128xf32, #tpu.memory_space<vmem>>, vector<1x128xf32>
    %c0_176 = arith.constant 0 : index
    %c4224 = arith.constant 4224 : index
    %173 = vector.load %arg16[%c0_176, %c4224] : memref<1x6272xf32, #tpu.memory_space<vmem>>, vector<1x128xf32>
    tpu.vector_store %arg16[%c0_176, %c4224], %172 {strides = array<i32>} : memref<1x6272xf32, #tpu.memory_space<vmem>>, vector<1x128xf32>,
    %c157 = arith.constant 157 : index
    %c0_177 = arith.constant 0 : index
    %174 = tpu.strided_load %arg15[%c157, %c0_177] {strides = array<i32: 256, 1>} : memref<256x128xf32, #tpu.memory_space<vmem>>, vector<1x128xf32>
    %c0_178 = arith.constant 0 : index
    %c4352 = arith.constant 4352 : index
    %175 = vector.load %arg16[%c0_178, %c4352] : memref<1x6272xf32, #tpu.memory_space<vmem>>, vector<1x128xf32>
    tpu.vector_store %arg16[%c0_178, %c4352], %174 {strides = array<i32>} : memref<1x6272xf32, #tpu.memory_space<vmem>>, vector<1x128xf32>,
    %c177_179 = arith.constant 177 : index
    %c0_180 = arith.constant 0 : index
    %176 = tpu.strided_load %arg15[%c177_179, %c0_180] {strides = array<i32: 256, 1>} : memref<256x128xf32, #tpu.memory_space<vmem>>, vector<1x128xf32>
    %c0_181 = arith.constant 0 : index
    %c4480 = arith.constant 4480 : index
    %177 = vector.load %arg16[%c0_181, %c4480] : memref<1x6272xf32, #tpu.memory_space<vmem>>, vector<1x128xf32>
    tpu.vector_store %arg16[%c0_181, %c4480], %176 {strides = array<i32>} : memref<1x6272xf32, #tpu.memory_space<vmem>>, vector<1x128xf32>,
    %c179 = arith.constant 179 : index
    %c0_182 = arith.constant 0 : index
    %178 = tpu.strided_load %arg15[%c179, %c0_182] {strides = array<i32: 256, 1>} : memref<256x128xf32, #tpu.memory_space<vmem>>, vector<1x128xf32>
    %c0_183 = arith.constant 0 : index
    %c4608 = arith.constant 4608 : index
    %179 = vector.load %arg16[%c0_183, %c4608] : memref<1x6272xf32, #tpu.memory_space<vmem>>, vector<1x128xf32>
    tpu.vector_store %arg16[%c0_183, %c4608], %178 {strides = array<i32>} : memref<1x6272xf32, #tpu.memory_space<vmem>>, vector<1x128xf32>,
    %c181 = arith.constant 181 : index
    %c0_184 = arith.constant 0 : index
    %180 = tpu.strided_load %arg15[%c181, %c0_184] {strides = array<i32: 256, 1>} : memref<256x128xf32, #tpu.memory_space<vmem>>, vector<1x128xf32>
    %c0_185 = arith.constant 0 : index
    %c4736 = arith.constant 4736 : index
    %181 = vector.load %arg16[%c0_185, %c4736] : memref<1x6272xf32, #tpu.memory_space<vmem>>, vector<1x128xf32>
    tpu.vector_store %arg16[%c0_185, %c4736], %180 {strides = array<i32>} : memref<1x6272xf32, #tpu.memory_space<vmem>>, vector<1x128xf32>,
    %c183 = arith.constant 183 : index
    %c0_186 = arith.constant 0 : index
    %182 = tpu.strided_load %arg15[%c183, %c0_186] {strides = array<i32: 256, 1>} : memref<256x128xf32, #tpu.memory_space<vmem>>, vector<1x128xf32>
    %c0_187 = arith.constant 0 : index
    %c4864 = arith.constant 4864 : index
    %183 = vector.load %arg16[%c0_187, %c4864] : memref<1x6272xf32, #tpu.memory_space<vmem>>, vector<1x128xf32>
    tpu.vector_store %arg16[%c0_187, %c4864], %182 {strides = array<i32>} : memref<1x6272xf32, #tpu.memory_space<vmem>>, vector<1x128xf32>,
    %c185 = arith.constant 185 : index
    %c0_188 = arith.constant 0 : index
    %184 = tpu.strided_load %arg15[%c185, %c0_188] {strides = array<i32: 256, 1>} : memref<256x128xf32, #tpu.memory_space<vmem>>, vector<1x128xf32>
    %c0_189 = arith.constant 0 : index
    %c4992 = arith.constant 4992 : index
    %185 = vector.load %arg16[%c0_189, %c4992] : memref<1x6272xf32, #tpu.memory_space<vmem>>, vector<1x128xf32>
    tpu.vector_store %arg16[%c0_189, %c4992], %184 {strides = array<i32>} : memref<1x6272xf32, #tpu.memory_space<vmem>>, vector<1x128xf32>,
    %c187 = arith.constant 187 : index
    %c0_190 = arith.constant 0 : index
    %186 = tpu.strided_load %arg15[%c187, %c0_190] {strides = array<i32: 256, 1>} : memref<256x128xf32, #tpu.memory_space<vmem>>, vector<1x128xf32>
    %c0_191 = arith.constant 0 : index
    %c5120 = arith.constant 5120 : index
    %187 = vector.load %arg16[%c0_191, %c5120] : memref<1x6272xf32, #tpu.memory_space<vmem>>, vector<1x128xf32>
    tpu.vector_store %arg16[%c0_191, %c5120], %186 {strides = array<i32>} : memref<1x6272xf32, #tpu.memory_space<vmem>>, vector<1x128xf32>,
    %c189 = arith.constant 189 : index
    %c0_192 = arith.constant 0 : index
    %188 = tpu.strided_load %arg15[%c189, %c0_192] {strides = array<i32: 256, 1>} : memref<256x128xf32, #tpu.memory_space<vmem>>, vector<1x128xf32>
    %c0_193 = arith.constant 0 : index
    %c5248 = arith.constant 5248 : index
    %189 = vector.load %arg16[%c0_193, %c5248] : memref<1x6272xf32, #tpu.memory_space<vmem>>, vector<1x128xf32>
    tpu.vector_store %arg16[%c0_193, %c5248], %188 {strides = array<i32>} : memref<1x6272xf32, #tpu.memory_space<vmem>>, vector<1x128xf32>,
    %c209_194 = arith.constant 209 : index
    %c0_195 = arith.constant 0 : index
    %190 = tpu.strided_load %arg15[%c209_194, %c0_195] {strides = array<i32: 256, 1>} : memref<256x128xf32, #tpu.memory_space<vmem>>, vector<1x128xf32>
    %c0_196 = arith.constant 0 : index
    %c5376 = arith.constant 5376 : index
    %191 = vector.load %arg16[%c0_196, %c5376] : memref<1x6272xf32, #tpu.memory_space<vmem>>, vector<1x128xf32>
    tpu.vector_store %arg16[%c0_196, %c5376], %190 {strides = array<i32>} : memref<1x6272xf32, #tpu.memory_space<vmem>>, vector<1x128xf32>,
    %c211 = arith.constant 211 : index
    %c0_197 = arith.constant 0 : index
    %192 = tpu.strided_load %arg15[%c211, %c0_197] {strides = array<i32: 256, 1>} : memref<256x128xf32, #tpu.memory_space<vmem>>, vector<1x128xf32>
    %c0_198 = arith.constant 0 : index
    %c5504 = arith.constant 5504 : index
    %193 = vector.load %arg16[%c0_198, %c5504] : memref<1x6272xf32, #tpu.memory_space<vmem>>, vector<1x128xf32>
    tpu.vector_store %arg16[%c0_198, %c5504], %192 {strides = array<i32>} : memref<1x6272xf32, #tpu.memory_space<vmem>>, vector<1x128xf32>,
    %c213 = arith.constant 213 : index
    %c0_199 = arith.constant 0 : index
    %194 = tpu.strided_load %arg15[%c213, %c0_199] {strides = array<i32: 256, 1>} : memref<256x128xf32, #tpu.memory_space<vmem>>, vector<1x128xf32>
    %c0_200 = arith.constant 0 : index
    %c5632 = arith.constant 5632 : index
    %195 = vector.load %arg16[%c0_200, %c5632] : memref<1x6272xf32, #tpu.memory_space<vmem>>, vector<1x128xf32>
    tpu.vector_store %arg16[%c0_200, %c5632], %194 {strides = array<i32>} : memref<1x6272xf32, #tpu.memory_space<vmem>>, vector<1x128xf32>,
    %c215 = arith.constant 215 : index
    %c0_201 = arith.constant 0 : index
    %196 = tpu.strided_load %arg15[%c215, %c0_201] {strides = array<i32: 256, 1>} : memref<256x128xf32, #tpu.memory_space<vmem>>, vector<1x128xf32>
    %c0_202 = arith.constant 0 : index
    %c5760 = arith.constant 5760 : index
    %197 = vector.load %arg16[%c0_202, %c5760] : memref<1x6272xf32, #tpu.memory_space<vmem>>, vector<1x128xf32>
    tpu.vector_store %arg16[%c0_202, %c5760], %196 {strides = array<i32>} : memref<1x6272xf32, #tpu.memory_space<vmem>>, vector<1x128xf32>,
    %c217 = arith.constant 217 : index
    %c0_203 = arith.constant 0 : index
    %198 = tpu.strided_load %arg15[%c217, %c0_203] {strides = array<i32: 256, 1>} : memref<256x128xf32, #tpu.memory_space<vmem>>, vector<1x128xf32>
    %c0_204 = arith.constant 0 : index
    %c5888 = arith.constant 5888 : index
    %199 = vector.load %arg16[%c0_204, %c5888] : memref<1x6272xf32, #tpu.memory_space<vmem>>, vector<1x128xf32>
    tpu.vector_store %arg16[%c0_204, %c5888], %198 {strides = array<i32>} : memref<1x6272xf32, #tpu.memory_space<vmem>>, vector<1x128xf32>,
    %c219 = arith.constant 219 : index
    %c0_205 = arith.constant 0 : index
    %200 = tpu.strided_load %arg15[%c219, %c0_205] {strides = array<i32: 256, 1>} : memref<256x128xf32, #tpu.memory_space<vmem>>, vector<1x128xf32>
    %c0_206 = arith.constant 0 : index
    %c6016 = arith.constant 6016 : index
    %201 = vector.load %arg16[%c0_206, %c6016] : memref<1x6272xf32, #tpu.memory_space<vmem>>, vector<1x128xf32>
    tpu.vector_store %arg16[%c0_206, %c6016], %200 {strides = array<i32>} : memref<1x6272xf32, #tpu.memory_space<vmem>>, vector<1x128xf32>,
    %c221 = arith.constant 221 : index
    %c0_207 = arith.constant 0 : index
    %202 = tpu.strided_load %arg15[%c221, %c0_207] {strides = array<i32: 256, 1>} : memref<256x128xf32, #tpu.memory_space<vmem>>, vector<1x128xf32>
    %c0_208 = arith.constant 0 : index
    %c6144 = arith.constant 6144 : index
    %203 = vector.load %arg16[%c0_208, %c6144] : memref<1x6272xf32, #tpu.memory_space<vmem>>, vector<1x128xf32>
    tpu.vector_store %arg16[%c0_208, %c6144], %202 {strides = array<i32>} : memref<1x6272xf32, #tpu.memory_space<vmem>>, vector<1x128xf32>,
    %c0_209 = arith.constant 0 : index
    %c0_210 = arith.constant 0 : index
    %204 = vector.load %arg16[%c0_209, %c0_210] : memref<1x6272xf32, #tpu.memory_space<vmem>>, vector<1x6272xf32>
    %c0_211 = arith.constant 0 : index
    %c0_212 = arith.constant 0 : index
    %205 = vector.load %arg6[%c0_211, %c0_212] : memref<6272x128xf32, #tpu.memory_space<vmem>>, vector<6272x128xf32>
    %cst_213 = arith.constant dense<0.000000e+00> : vector<1x128xf32>
    %206 = tpu.matmul %204, %205, %cst_213 {dimension_numbers = #tpu.dot_dimension_numbers<[1], [0], [0], [1], [0, 0, 1, 1], [], []>} : vector<1x6272xf32>, vector<6272x128xf32>, vector<1x128xf32> -> vector<1x128xf32>
    %c0_214 = arith.constant 0 : index
    %c0_215 = arith.constant 0 : index
    %207 = vector.load %arg7[%c0_214, %c0_215] : memref<1x128xf32, #tpu.memory_space<vmem>>, vector<1x128xf32>
    %208 = arith.addf %206, %207 : vector<1x128xf32>
    %cst_216 = arith.constant 0.000000e+00 : f32
    %209 = vector.broadcast %cst_216 : f32 to vector<1x128xf32>
    %210 = arith.maximumf %208, %209 : vector<1x128xf32>
    %c0_217 = arith.constant 0 : index
    %c0_218 = arith.constant 0 : index
    %211 = vector.load %arg8[%c0_217, %c0_218] : memref<128x128xf32, #tpu.memory_space<vmem>>, vector<128x128xf32>
    %cst_219 = arith.constant dense<0.000000e+00> : vector<1x128xf32>
    %212 = tpu.matmul %210, %211, %cst_219 {dimension_numbers = #tpu.dot_dimension_numbers<[1], [0], [0], [1], [0, 0, 1, 1], [], []>} : vector<1x128xf32>, vector<128x128xf32>, vector<1x128xf32> -> vector<1x128xf32>
    %c0_220 = arith.constant 0 : index
    %c0_221 = arith.constant 0 : index
    %213 = vector.load %arg9[%c0_220, %c0_221] : memref<1x128xf32, #tpu.memory_space<vmem>>, vector<1x128xf32>
    %214 = arith.addf %212, %213 : vector<1x128xf32>
    %c0_222 = arith.constant 0 : index
    %c0_223 = arith.constant 0 : index
    %c0_224 = arith.constant 0 : index
    %215 = vector.load %arg10[%c0_222, %c0_223, %c0_224] : memref<1x1x128xf32, #tpu.memory_space<vmem>>, vector<1x1x128xf32>
    %216 = vector.shape_cast %215 : vector<1x1x128xf32> to vector<1x128xf32>
    %217 = vector.shape_cast %214 : vector<1x128xf32> to vector<1x1x128xf32>
    tpu.vector_store %arg10[%c0_222, %c0_223, %c0_224], %217 {strides = array<i32>} : memref<1x1x128xf32, #tpu.memory_space<vmem>>, vector<1x1x128xf32>,
    return
  }
  func.func @transform_0(%arg0: i32) -> (i32, i32, i32) {
    %c0_i32 = arith.constant 0 : i32
    %c0_i32_0 = arith.constant 0 : i32
    %c0_i32_1 = arith.constant 0 : i32
    return %arg0, %c0_i32, %c0_i32_0 : i32, i32, i32
  }
  func.func @transform_1(%arg0: i32) -> (i32, i32) {
    %c0_i32 = arith.constant 0 : i32
    %c0_i32_0 = arith.constant 0 : i32
    %c0_i32_1 = arith.constant 0 : i32
    return %c0_i32, %c0_i32_0 : i32, i32
  }
  func.func @transform_2(%arg0: i32) -> (i32, i32) {
    %c0_i32 = arith.constant 0 : i32
    %c0_i32_0 = arith.constant 0 : i32
    %c0_i32_1 = arith.constant 0 : i32
    return %c0_i32, %c0_i32_0 : i32, i32
  }
  func.func @transform_3(%arg0: i32) -> (i32, i32, i32) {
    %c0_i32 = arith.constant 0 : i32
    %c0_i32_0 = arith.constant 0 : i32
    %c0_i32_1 = arith.constant 0 : i32
    %c0_i32_2 = arith.constant 0 : i32
    return %c0_i32, %c0_i32_0, %c0_i32_1 : i32, i32, i32
  }
  func.func @transform_4(%arg0: i32) -> (i32, i32) {
    %c0_i32 = arith.constant 0 : i32
    %c0_i32_0 = arith.constant 0 : i32
    %c0_i32_1 = arith.constant 0 : i32
    return %c0_i32, %c0_i32_0 : i32, i32
  }
  func.func @transform_5(%arg0: i32) -> (i32, i32) {
    %c0_i32 = arith.constant 0 : i32
    %c0_i32_0 = arith.constant 0 : i32
    %c0_i32_1 = arith.constant 0 : i32
    return %c0_i32, %c0_i32_0 : i32, i32
  }
  func.func @transform_6(%arg0: i32) -> (i32, i32) {
    %c0_i32 = arith.constant 0 : i32
    %c0_i32_0 = arith.constant 0 : i32
    %c0_i32_1 = arith.constant 0 : i32
    return %c0_i32, %c0_i32_0 : i32, i32
  }
  func.func @transform_7(%arg0: i32) -> (i32, i32) {
    %c0_i32 = arith.constant 0 : i32
    %c0_i32_0 = arith.constant 0 : i32
    %c0_i32_1 = arith.constant 0 : i32
    return %c0_i32, %c0_i32_0 : i32, i32
  }
  func.func @transform_8(%arg0: i32) -> (i32, i32) {
    %c0_i32 = arith.constant 0 : i32
    %c0_i32_0 = arith.constant 0 : i32
    %c0_i32_1 = arith.constant 0 : i32
    return %c0_i32, %c0_i32_0 : i32, i32
  }
  func.func @transform_9(%arg0: i32) -> (i32, i32, i32) {
    %c0_i32 = arith.constant 0 : i32
    %c0_i32_0 = arith.constant 0 : i32
    %c0_i32_1 = arith.constant 0 : i32
    return %arg0, %c0_i32, %c0_i32_0 : i32, i32, i32
  }
}

</mosaic_0001>

<bundles_post_ra>
// kernel: xnet_forward.1
= control target key start
LH: loop header
LB: loop body
LE: loop exit
PB: predicated region body
PF: predicated region fallthrough
CT: control target
= control target key end

     0   :  { %14 = vsyncpa [#allocation9], 0  ;;  %s16531_s0 = inlined_call_operand.vmem [shape: f32[2,784,16], index: 0, kind: input, shape index: {}]   ;;  %s16532_s1 = inlined_call_operand.vmem [shape: f32[16,128], index: 1, kind: input, shape index: {}]   ;;  %s16533_s2 = inlined_call_operand.vmem [shape: f32[1,128], index: 2, kind: input, shape index: {}]   ;;  %s16534_s3 = inlined_call_operand.vmem [shape: f32[9,128,128], index: 3, kind: input, shape index: {}]   ;;  %s16535_s4 = inlined_call_operand.vmem [shape: f32[1,128], index: 4, kind: input, shape index: {}]   ;;  %s16536_s5 = inlined_call_operand.vmem [shape: f32[6272,128], index: 5, kind: input, shape index: {}]   ;;  %s16537_s6 = inlined_call_operand.vmem [shape: f32[1,128], index: 6, kind: input, shape index: {}]   ;;  %s16538_s7 = inlined_call_operand.hbm [shape: f32[128,128], index: 7, kind: input, shape index: {}]   ;;  %s16539_s8 = inlined_call_operand.vmem [shape: f32[1,128], index: 8, kind: input, shape index: {}]   ;;  %s16540_s9 = inlined_call_operand.hbm [shape: f32[2,1,128], index: 9, kind: output, shape index: {}]  }
   0x1   :  { %15 = vsyncpa [#allocation10], 0 }
   0x2   :  { %17 = vsyncpa [#allocation10 + $0x1], 0  ;;  %s11294_s30 = smov 0   ;;  %s11296_s10 = smov 0  }
   0x3   :  { %s11298_s11 = smov 0   ;;  %s11300_s12 = smov 0  }
   0x4 LB: > { %s11315_s13 = sadd.s32 4294967295, %s11236_s12   ;;  %s8500_s14 = sadd.s32 4294967294, %s11236_s12   ;;  %s11236_s12 = sphi %s11300_s12, %s16756_s12   ;;  %s11232_s11 = sphi %s11298_s11, %s16755_s11   ;;  %s11228_s10 = sphi %s11296_s10, %s16754_s10   ;;  %s11224_s30 = sphi %s11294_s30, %s16753_s30  }
   0x5   : > { %s11319_s15 = sadd.s32 1, %s11236_s12   ;;  %s224_s16 = sadd.s32 1, %s11232_s11 }
   0x6   : > { %s221_s17 = ssub.s32 %s11236_s12, %s11319_s15  ;;  %p234_p0 = scmp.ne.s32.totalorder %s11232_s11, %s11228_s10 }
   0x7   : > { %p222_p1 = scmp.eq.s32.totalorder %s221_s17, 0  ;;  %p235_p2 = scmp.eq.s32.totalorder %s11315_s13, 1 }
   0x8   : > { %p240_p3 = scmp.ne.s32.totalorder %s11228_s10, %s11224_s30  ;;  %p241_p4 = scmp.eq.s32.totalorder %s8500_s14, 1 }
   0x9   : > { %s11330_s18 = scalar_select %p222_p1, %s11232_s11, %s224_s16  }
   0xa   : > { %p11332_p5 = por %p235_p2, %p234_p0  ;;  %p11336_p6 = por %p241_p4, %p240_p3 }
   0xb   : > { %p8501_p7 = scmp.ge.s32.totalorder %s11236_s12, 1  ;;  %p248_p8 = scmp.lt.s32.totalorder %s11236_s12, 3 }
   0xc   : > { %s16542_s20 = scalar_select %p11336_p6, 1, 0 }
   0xd   : > { %p11101_p9 = scmp.eq.s32.totalorder %s11315_s13, 0  ;;  %p11343_p10 = pnand %p8501_p7, %p248_p8 }
   0xe   : > { %s11238_s22 = smov [#allocation8]  }
   0xf   : > { %s278_s23 = sshll.u32 %s11238_s22, 4  ;;  %p11093_p11 = pneg %p11343_p10  ;;  %s279_s23 = int_to_ptr.vmem [resolvable:$true] %s278_s23 }
  0x10   : > { %s11157_s24 = scalar_lea.vmem %s279_s23, 2048  ;;  %p11165_p3 = scmp.lt.s32.totalorder %s279_s23, %s279_s23 }
  0x11   : > { %p11094_p12 = pnand %p11101_p9, %p11093_p11  ;;  %p11158_p0 = scmp.ne.s32.totalorder %s279_s23, %s11157_s24 }
  0x12   : > { %p11166_p4 = scmp.lt.s32.totalorder %s11157_s24, %s11157_s24 }
  0x13   : > { %p11148_p13 = pneg %p11094_p12 }
  0x14   : > { %p11167_p6 = por %p11166_p4, %p11165_p3 }
  0x15   : > { %p11160_p1 = pnand %p11158_p0, %p11148_p13 }
  0x17   : > { %p11161_p2 = pneg %p11160_p1 }
  0x19   : > { %p11168_p7 = pnand %p11167_p6, %p11161_p2 }
  0x1b   : > { %11171 = shalt.err (!%p11168_p7)
}
  0x1c   : > { %s11239_s25 = smov 128   ;;  %s11240_s26 = smov 8  }
  0x1d   : > { %11096 = dma.hbm_to_vmem [thread:$0]  (!%p11094_p12), %s16538_s7, 2048, %s279_s23, [#allocation9], %s11239_s25, %s11239_s25, %s11240_s26  }
  0x1e   : > { %305 = sbr.rel (%p11343_p10) target bundleno = 1793 (0x701), region = 56 }
  0x23   : > { %11215 = dma.done.wait (%p11101_p9), [#allocation9], 2048  }
  0x24   : > { %11217 = vsyncadd (%p11101_p9), [#allocation9], 4294965248  ;;  %p340_p8 = scmp.lt.s32.totalorder %s11315_s13, 1  ;;  %v11241_v0 = vmov 0.0   ;;  %vm452_vm0 = vcmask 130048   ;;  %v444_v1 = vld [vmem:[%s16532_s1 + $0x8] sm:$0xff] }
  0x25   : > { %2258 = vst [vmem:[#allocation4] sm:$0xff] %v11241_v0  ;;  %2259 = vst [vmem:[#allocation4 + $0x8] sm:$0xff] %v11241_v0  ;;  %10328 = vmatprep.mubr.f32.mxu1 %v11241_v0  ;;  %v443_v2 = vld [vmem:[%s16532_s1] sm:$0xff]  ;;  %10145 = vmatprep.subr.mxu0 %v444_v1  ;;  %v8621_v41 = vld [vmem:[%s16534_s3 + $0xf8] sm:$0xff]  ;;  %vm11242_vm2 = vmmov 0   ;;  %s338_s27 = sand.u32 1, %s11228_s10  }
  0x26   : > { %2260 = vst [vmem:[#allocation4 + $0x10] sm:$0xff] %v11241_v0  ;;  %2261 = vst [vmem:[#allocation4 + $0x18] sm:$0xff] %v11241_v0  ;;  %s341_s29 = scalar_select %p340_p8, %s11315_s13, 1  ;;  %10146 = vmatpush3.msra.mxu0 %v444_v1  ;;  %10296 = vmatprep.subr.mxu1 %v8621_v41  ;;  %v8620_v43 = vld [vmem:[%s16534_s3 + $0xf0] sm:$0xff]  ;;  %v8619_v46 = vld [vmem:[%s16534_s3 + $0xe8] sm:$0xff] }
  0x27   : > { %2262 = vst [vmem:[#allocation4 + $0x20] sm:$0xff] %v11241_v0  ;;  %2263 = vst [vmem:[#allocation4 + $0x28] sm:$0xff] %v11241_v0  ;;  %10147 = vmatprep.subr.mxu0 %v443_v2  ;;  %10297 = vmatpush3.msra.mxu1 %v8621_v41  ;;  %v8653_v47 = vld [vmem:[%s16534_s3 + $0x1f8] sm:$0xff]  ;;  %v8618_v48 = vld [vmem:[%s16534_s3 + $0xe0] sm:$0xff]  ;;  %s339_s16 = scalar_lea.vmem [#allocation11], %s338_s27  ;;  %s8421_s25 = scalar_lea.sflag [#allocation10], %s338_s27 }
  0x28   : > { %2264 = vst [vmem:[#allocation4 + $0x30] sm:$0xff] %v11241_v0  ;;  %2265 = vst [vmem:[#allocation4 + $0x38] sm:$0xff] %v11241_v0  ;;  %s11086_s14 = smul.u32 784, %s341_s29  ;;  %10148 = vmatpush3.msra.mxu0 %v443_v2  ;;  %10298 = vmatprep.subr.mxu1 %v8620_v43  ;;  %v8652_v49 = vld [vmem:[%s16534_s3 + $0x1f0] sm:$0xff]  ;;  %v8617_v52 = vld [vmem:[%s16534_s3 + $0xd8] sm:$0xff]  ;;  %s8433_s17 = sshll.u32 %s339_s16, 4  ;;  %s8434_s17 = int_to_ptr.vmem [resolvable:$true] %s8433_s17 }
  0x29   : > { %2266 = vst [vmem:[#allocation4 + $0x40] sm:$0xff] %v11241_v0  ;;  %2267 = vst [vmem:[#allocation4 + $0x48] sm:$0xff] %v11241_v0  ;;  %10299 = vmatpush3.msra.mxu1 %v8620_v43  ;;  %10536 = vmatprep.subr.mxu0 %v8653_v47  ;;  %v8651_v53 = vld [vmem:[%s16534_s3 + $0x1e8] sm:$0xff]  ;;  %v8616_v54 = vld [vmem:[%s16534_s3 + $0xd0] sm:$0xff]  ;;  %s11243_s26 = smov [#allocation11]  }
  0x2a   : > { %2268 = vst [vmem:[#allocation4 + $0x50] sm:$0xff] %v11241_v0  ;;  %2269 = vst [vmem:[#allocation4 + $0x58] sm:$0xff] %v11241_v0  ;;  %s11407_s21 = scalar_lea.vmem %s16531_s0, %s11086_s14  ;;  %10300 = vmatprep.subr.mxu1 %v8619_v46  ;;  %v8650_v55 = vld [vmem:[%s16534_s3 + $0x1e0] sm:$0xff]  ;;  %v8615_v58 = vld [vmem:[%s16534_s3 + $0xc8] sm:$0xff]  ;;  %s8736_s14 = sshll.u32 %s11315_s13, 4 }
  0x2b   : > { %2270 = vst [vmem:[#allocation4 + $0x60] sm:$0xff] %v11241_v0  ;;  %2271 = vst [vmem:[#allocation4 + $0x68] sm:$0xff] %v11241_v0  ;;  %v345_v3 = vld [vmem:[%s11407_s21] sm:$0xff]  ;;  %v346_v4 = vld [vmem:[%s11407_s21 + $0x8] sm:$0xff]  ;;  %10301 = vmatpush3.msra.mxu1 %v8619_v46  ;;  %s16496_s24 = scalar_lea.hbm %s16540_s9, %s8736_s14  ;;  %s11176_s13 = sshll.u32 %s11243_s26, 4  ;;  %s11177_s13 = int_to_ptr.vmem [resolvable:$false] %s11176_s13 }
  0x2c   : > { %2272 = vst [vmem:[#allocation4 + $0x70] sm:$0xff] %v11241_v0  ;;  %2273 = vst [vmem:[#allocation4 + $0x78] sm:$0xff] %v11241_v0  ;;  %10149 = vmatprep.mubr.msk.f32.mxu0 %vm452_vm0, %v345_v3  ;;  %v347_v5 = vld [vmem:[%s11407_s21 + $0x10] sm:$0xff]  ;;  %v348_v6 = vld [vmem:[%s11407_s21 + $0x18] sm:$0xff]  ;;  %10302 = vmatprep.subr.mxu1 %v8618_v48  ;;  %s11178_s28 = scalar_lea.vmem %s11177_s13, 32  ;;  %p11179_p11 = scmp.lt.s32.totalorder %s8434_s17, %s11177_s13 }
  0x2d   : > { %2274 = vst [vmem:[#allocation4 + $0x80] sm:$0xff] %v11241_v0  ;;  %2275 = vst [vmem:[#allocation4 + $0x88] sm:$0xff] %v11241_v0  ;;  %10150 = vmatmul.mubr.msk.f32.vlgmr.msra.gmra.mxu0 %vm452_vm0, %v346_v4  ;;  %v349_v7 = vld [vmem:[%s11407_s21 + $0x20] sm:$0xff]  ;;  %v350_v8 = vld [vmem:[%s11407_s21 + $0x28] sm:$0xff]  ;;  %10303 = vmatpush3.msra.mxu1 %v8618_v48 }
  0x2e   : > { %2276 = vst [vmem:[#allocation4 + $0x90] sm:$0xff] %v11241_v0  ;;  %2277 = vst [vmem:[#allocation4 + $0x98] sm:$0xff] %v11241_v0  ;;  %10152 = vmatprep.mubr.msk.f32.mxu0 %vm452_vm0, %v347_v5  ;;  %v351_v9 = vld [vmem:[%s11407_s21 + $0x30] sm:$0xff]  ;;  %v352_v10 = vld [vmem:[%s11407_s21 + $0x38] sm:$0xff]  ;;  %10537 = vmatpush3.msra.mxu0 %v8653_v47 }
  0x2f   : > { %2278 = vst [vmem:[#allocation4 + $0xa0] sm:$0xff] %v11241_v0  ;;  %2279 = vst [vmem:[#allocation4 + $0xa8] sm:$0xff] %v11241_v0  ;;  %v353_v11 = vld [vmem:[%s11407_s21 + $0x40] sm:$0xff]  ;;  %v354_v12 = vld [vmem:[%s11407_s21 + $0x48] sm:$0xff]  ;;  %10538 = vmatprep.subr.mxu0 %v8652_v49  ;;  %10304 = vmatprep.subr.mxu1 %v8617_v52 }
  0x30   : > { %2280 = vst [vmem:[#allocation4 + $0xb0] sm:$0xff] %v11241_v0  ;;  %2281 = vst [vmem:[#allocation4 + $0xb8] sm:$0xff] %v11241_v0  ;;  %v355_v13 = vld [vmem:[%s11407_s21 + $0x50] sm:$0xff]  ;;  %v356_v14 = vld [vmem:[%s11407_s21 + $0x58] sm:$0xff]  ;;  %10539 = vmatpush3.msra.mxu0 %v8652_v49  ;;  %10305 = vmatpush3.msra.mxu1 %v8617_v52 }
  0x31   : > { %2282 = vst [vmem:[#allocation4 + $0xc0] sm:$0xff] %v11241_v0  ;;  %2283 = vst [vmem:[#allocation4 + $0xc8] sm:$0xff] %v11241_v0  ;;  %10153 = vmatmul.mubr.msk.f32.gmra.mxu0 %vm452_vm0, %v348_v6  ;;  %v357_v15 = vld [vmem:[%s11407_s21 + $0x60] sm:$0xff]  ;;  %v358_v16 = vld [vmem:[%s11407_s21 + $0x68] sm:$0xff]  ;;  %10540 = vmatprep.subr.mxu0 %v8651_v53 }
  0x32   : > { %2284 = vst [vmem:[#allocation4 + $0xd0] sm:$0xff] %v11241_v0  ;;  %2285 = vst [vmem:[#allocation4 + $0xd8] sm:$0xff] %v11241_v0  ;;  %10155 = vmatprep.mubr.msk.f32.mxu0 %vm452_vm0, %v349_v7  ;;  %v359_v17 = vld [vmem:[%s11407_s21 + $0x70] sm:$0xff]  ;;  %v360_v18 = vld [vmem:[%s11407_s21 + $0x78] sm:$0xff]  ;;  %10541 = vmatpush3.msra.mxu0 %v8651_v53 }
  0x33   : > { %2286 = vst [vmem:[#allocation4 + $0xe0] sm:$0xff] %v11241_v0  ;;  %2287 = vst [vmem:[#allocation4 + $0xe8] sm:$0xff] %v11241_v0  ;;  %v361_v19 = vld [vmem:[%s11407_s21 + $0x80] sm:$0xff]  ;;  %v362_v20 = vld [vmem:[%s11407_s21 + $0x88] sm:$0xff]  ;;  %10306 = vmatprep.subr.mxu1 %v8616_v54  ;;  %10542 = vmatprep.subr.mxu0 %v8650_v55 }
  0x34   : > { %2288 = vst [vmem:[#allocation4 + $0xf0] sm:$0xff] %v11241_v0  ;;  %2289 = vst [vmem:[#allocation4 + $0xf8] sm:$0xff] %v11241_v0  ;;  %v363_v21 = vld [vmem:[%s11407_s21 + $0x90] sm:$0xff]  ;;  %v364_v22 = vld [vmem:[%s11407_s21 + $0x98] sm:$0xff]  ;;  %10307 = vmatpush3.msra.mxu1 %v8616_v54  ;;  %10543 = vmatpush3.msra.mxu0 %v8650_v55 }
  0x35   : > { %2290 = vst [vmem:[#allocation4 + $0x100] sm:$0xff] %v11241_v0  ;;  %2291 = vst [vmem:[#allocation4 + $0x108] sm:$0xff] %v11241_v0  ;;  %10156 = vmatmul.mubr.msk.f32.gmra.mxu0 %vm452_vm0, %v350_v8  ;;  %v365_v23 = vld [vmem:[%s11407_s21 + $0xa0] sm:$0xff]  ;;  %v366_v24 = vld [vmem:[%s11407_s21 + $0xa8] sm:$0xff]  ;;  %10308 = vmatprep.subr.mxu1 %v8615_v58 }
  0x36   : > { %2292 = vst [vmem:[#allocation4 + $0x110] sm:$0xff] %v11241_v0  ;;  %2293 = vst [vmem:[#allocation4 + $0x118] sm:$0xff] %v11241_v0  ;;  %10158 = vmatprep.mubr.msk.f32.mxu0 %vm452_vm0, %v351_v9  ;;  %v367_v25 = vld [vmem:[%s11407_s21 + $0xb0] sm:$0xff]  ;;  %v368_v26 = vld [vmem:[%s11407_s21 + $0xb8] sm:$0xff]  ;;  %10309 = vmatpush3.msra.mxu1 %v8615_v58 }
  0x37   : > { %2294 = vst [vmem:[#allocation4 + $0x120] sm:$0xff] %v11241_v0  ;;  %2295 = vst [vmem:[#allocation4 + $0x128] sm:$0xff] %v11241_v0  ;;  %v369_v27 = vld [vmem:[%s11407_s21 + $0xc0] sm:$0xff]  ;;  %v370_v28 = vld [vmem:[%s11407_s21 + $0xc8] sm:$0xff] }
  0x38   : > { %2296 = vst [vmem:[#allocation4 + $0x130] sm:$0xff] %v11241_v0  ;;  %v371_v29 = vld [vmem:[%s11407_s21 + $0xd0] sm:$0xff]  ;;  %v372_v30 = vld [vmem:[%s11407_s21 + $0xd8] sm:$0xff]  ;;  %v373_v31 = vld [vmem:[%s11407_s21 + $0xe0] sm:$0xff] }
  0x39   : > { %10159 = vmatmul.mubr.msk.f32.gmra.mxu0 %vm452_vm0, %v352_v10  ;;  %v374_v32 = vld [vmem:[%s11407_s21 + $0xe8] sm:$0xff]  ;;  %v375_v33 = vld [vmem:[%s11407_s21 + $0xf0] sm:$0xff]  ;;  %v376_v34 = vld [vmem:[%s11407_s21 + $0xf8] sm:$0xff] }
  0x3a   : > { %10161 = vmatprep.mubr.msk.f32.mxu0 %vm452_vm0, %v353_v11  ;;  %v377_v35 = vld [vmem:[%s11407_s21 + $0x100] sm:$0xff]  ;;  %v378_v36 = vld [vmem:[%s11407_s21 + $0x108] sm:$0xff]  ;;  %v379_v37 = vld [vmem:[%s11407_s21 + $0x110] sm:$0xff] }
  0x3b   : > { %v380_v38 = vld [vmem:[%s11407_s21 + $0x118] sm:$0xff]  ;;  %v381_v39 = vld [vmem:[%s11407_s21 + $0x120] sm:$0xff]  ;;  %v382_v40 = vld [vmem:[%s11407_s21 + $0x128] sm:$0xff] }
  0x3c   : > { %v383_v42 = vld [vmem:[%s11407_s21 + $0x130] sm:$0xff]  ;;  %v384_v44 = vld [vmem:[%s11407_s21 + $0x138] sm:$0xff]  ;;  %v385_v45 = vld [vmem:[%s11407_s21 + $0x140] sm:$0xff] }
  0x3d   : > { %10162 = vmatmul.mubr.msk.f32.gmra.mxu0 %vm452_vm0, %v354_v12  ;;  %v386_v50 = vld [vmem:[%s11407_s21 + $0x148] sm:$0xff]  ;;  %v387_v51 = vld [vmem:[%s11407_s21 + $0x150] sm:$0xff]  ;;  %v388_v56 = vld [vmem:[%s11407_s21 + $0x158] sm:$0xff] }
  0x3e   : > { %10164 = vmatprep.mubr.msk.f32.mxu0 %vm452_vm0, %v355_v13  ;;  %v389_v57 = vld [vmem:[%s11407_s21 + $0x160] sm:$0xff]  ;;  %v8649_v59 = vld [vmem:[%s16534_s3 + $0x1d8] sm:$0xff]  ;;  %v390_v60 = vld [vmem:[%s11407_s21 + $0x168] sm:$0xff] }
  0x3f   : > { %v8614_v61 = vld [vmem:[%s16534_s3 + $0xc0] sm:$0xff]  ;;  %v391_v62 = vld [vmem:[%s11407_s21 + $0x170] sm:$0xff]  ;;  %10544 = vmatprep.subr.mxu0 %v8649_v59  ;;  %v8613_v1 = vld [vmem:[%s16534_s3 + $0xb8] sm:$0xff] }
  0x40   : > { %v8648_v63 = vld [vmem:[%s16534_s3 + $0x1d0] sm:$0xff]  ;;  %10545 = vmatpush3.msra.mxu0 %v8649_v59  ;;  %10310 = vmatprep.subr.mxu1 %v8614_v61  ;;  %v8647_v2 = vld [vmem:[%s16534_s3 + $0x1c8] sm:$0xff]  ;;  %v392_v3 = vld [vmem:[%s11407_s21 + $0x178] sm:$0xff] }
  0x41   : > { %10165 = vmatmul.mubr.msk.f32.gmra.mxu0 %vm452_vm0, %v356_v14  ;;  %10546 = vmatprep.subr.mxu0 %v8648_v63  ;;  %v393_v4 = vld [vmem:[%s11407_s21 + $0x180] sm:$0xff]  ;;  %v8612_v5 = vld [vmem:[%s16534_s3 + $0xb0] sm:$0xff]  ;;  %v394_v7 = vld [vmem:[%s11407_s21 + $0x188] sm:$0xff] }
  0x42   : > { %10167 = vmatprep.mubr.msk.f32.mxu0 %vm452_vm0, %v357_v15  ;;  %10311 = vmatpush3.msra.mxu1 %v8614_v61  ;;  %v8646_v6 = vld [vmem:[%s16534_s3 + $0x1c0] sm:$0xff]  ;;  %v8611_v8 = vld [vmem:[%s16534_s3 + $0xa8] sm:$0xff]  ;;  %v395_v9 = vld [vmem:[%s11407_s21 + $0x190] sm:$0xff] }
  0x43   : > { %10547 = vmatpush3.msra.mxu0 %v8648_v63  ;;  %10312 = vmatprep.subr.mxu1 %v8613_v1  ;;  %v8645_v10 = vld [vmem:[%s16534_s3 + $0x1b8] sm:$0xff]  ;;  %v8610_v11 = vld [vmem:[%s16534_s3 + $0xa0] sm:$0xff]  ;;  %v8644_v12 = vld [vmem:[%s16534_s3 + $0x1b0] sm:$0xff] }
  0x44   : > { %10548 = vmatprep.subr.mxu0 %v8647_v2  ;;  %10313 = vmatpush3.msra.mxu1 %v8613_v1  ;;  %v396_v13 = vld [vmem:[%s11407_s21 + $0x198] sm:$0xff]  ;;  %v397_v14 = vld [vmem:[%s11407_s21 + $0x1a0] sm:$0xff]  ;;  %v415_v41 = vld [vmem:[%s11407_s21 + $0x230] sm:$0xff] }
  0x45   : > { %10168 = vmatmul.mubr.msk.f32.gmra.mxu0 %vm452_vm0, %v358_v16  ;;  %10314 = vmatprep.subr.mxu1 %v8612_v5  ;;  %v8609_v15 = vld [vmem:[%s16534_s3 + $0x98] sm:$0xff]  ;;  %v8643_v16 = vld [vmem:[%s16534_s3 + $0x1a8] sm:$0xff]  ;;  %v417_v43 = vld [vmem:[%s11407_s21 + $0x240] sm:$0xff] }
  0x46   : > { %10170 = vmatprep.mubr.msk.f32.mxu0 %vm452_vm0, %v359_v17  ;;  %10549 = vmatpush3.msra.mxu0 %v8647_v2  ;;  %v398_v17 = vld [vmem:[%s11407_s21 + $0x1a8] sm:$0xff]  ;;  %v420_v46 = vld [vmem:[%s11407_s21 + $0x258] sm:$0xff]  ;;  %v421_v47 = vld [vmem:[%s11407_s21 + $0x260] sm:$0xff] }
  0x47   : > { %10550 = vmatprep.subr.mxu0 %v8646_v6  ;;  %10315 = vmatpush3.msra.mxu1 %v8612_v5  ;;  %v422_v48 = vld [vmem:[%s11407_s21 + $0x268] sm:$0xff]  ;;  %v423_v49 = vld [vmem:[%s11407_s21 + $0x270] sm:$0xff]  ;;  %v428_v54 = vld [vmem:[%s11407_s21 + $0x298] sm:$0xff] }
  0x48   : > { %10551 = vmatpush3.msra.mxu0 %v8646_v6  ;;  %10316 = vmatprep.subr.mxu1 %v8611_v8  ;;  %v426_v52 = vld [vmem:[%s11407_s21 + $0x288] sm:$0xff]  ;;  %v427_v53 = vld [vmem:[%s11407_s21 + $0x290] sm:$0xff]  ;;  %v429_v55 = vld [vmem:[%s11407_s21 + $0x2a0] sm:$0xff] }
  0x49   : > { %10171 = vmatmul.mubr.msk.f32.gmra.mxu0 %vm452_vm0, %v360_v18  ;;  %10552 = vmatprep.subr.mxu0 %v8645_v10  ;;  %v8608_v18 = vld [vmem:[%s16534_s3 + $0x90] sm:$0xff]  ;;  %v432_v58 = vld [vmem:[%s11407_s21 + $0x2b8] sm:$0xff]  ;;  %v433_v59 = vld [vmem:[%s11407_s21 + $0x2c0] sm:$0xff] }
  0x4a   : > { %10173 = vmatprep.mubr.msk.f32.mxu0 %vm452_vm0, %v361_v19  ;;  %10317 = vmatpush3.msra.mxu1 %v8611_v8  ;;  %v399_v19 = vld [vmem:[%s11407_s21 + $0x1b0] sm:$0xff]  ;;  %v437_v63 = vld [vmem:[%s11407_s21 + $0x2e0] sm:$0xff]  ;;  %v438_v1 = vld [vmem:[%s11407_s21 + $0x2e8] sm:$0xff] }
  0x4b   : > { %10553 = vmatpush3.msra.mxu0 %v8645_v10  ;;  %10318 = vmatprep.subr.mxu1 %v8610_v11  ;;  %v435_v61 = vld [vmem:[%s11407_s21 + $0x2d0] sm:$0xff]  ;;  %v442_v5 = vld [vmem:[%s11407_s21 + $0x308] sm:$0xff]  ;;  %v11712_v6 = vld [vmem:[%s16533_s2] ss:$0 sm:$0xff] }
  0x4c   : > { %10554 = vmatprep.subr.mxu0 %v8644_v12  ;;  %10319 = vmatpush3.msra.mxu1 %v8610_v11  ;;  %v439_v2 = vld [vmem:[%s11407_s21 + $0x2f0] sm:$0xff]  ;;  %v3235_v10 = vld [vmem:[#allocation4 + $0x27] sm:$0xff] }
  0x4d   : > { %10174 = vmatmul.mubr.msk.f32.gmra.mxu0 %vm452_vm0, %v362_v20  ;;  %10320 = vmatprep.subr.mxu1 %v8609_v15  ;;  %v8642_v20 = vld [vmem:[%s16534_s3 + $0x1a0] sm:$0xff] }
  0x4e   : > { %10176 = vmatprep.mubr.msk.f32.mxu0 %vm452_vm0, %v363_v21  ;;  %10555 = vmatpush3.msra.mxu0 %v8644_v12  ;;  %v8607_v21 = vld [vmem:[%s16534_s3 + $0x88] sm:$0xff] }
  0x4f   : > { %10556 = vmatprep.subr.mxu0 %v8643_v16  ;;  %10321 = vmatpush3.msra.mxu1 %v8609_v15 }
  0x50   : > { %10557 = vmatpush3.msra.mxu0 %v8643_v16  ;;  %10322 = vmatprep.subr.mxu1 %v8608_v18 }
  0x51   : > { %10177 = vmatmul.mubr.msk.f32.gmra.mxu0 %vm452_vm0, %v364_v22  ;;  %v8641_v22 = vld [vmem:[%s16534_s3 + $0x198] sm:$0xff]  ;;  %10558 = vmatprep.subr.mxu0 %v8642_v20 }
  0x52   : > { %10179 = vmatprep.mubr.msk.f32.mxu0 %vm452_vm0, %v365_v23  ;;  %v400_v23 = vld [vmem:[%s11407_s21 + $0x1b8] sm:$0xff]  ;;  %10323 = vmatpush3.msra.mxu1 %v8608_v18 }
  0x53   : > { %10559 = vmatpush3.msra.mxu0 %v8642_v20  ;;  %10324 = vmatprep.subr.mxu1 %v8607_v21 }
  0x54   : > { %10560 = vmatprep.subr.mxu0 %v8641_v22  ;;  %10325 = vmatpush3.msra.mxu1 %v8607_v21 }
  0x55   : > { %10180 = vmatmul.mubr.msk.f32.gmra.mxu0 %vm452_vm0, %v366_v24  ;;  %v401_v24 = vld [vmem:[%s11407_s21 + $0x1c0] sm:$0xff] }
  0x56   : > { %10182 = vmatprep.mubr.msk.f32.mxu0 %vm452_vm0, %v367_v25  ;;  %v8606_v25 = vld [vmem:[%s16534_s3 + $0x80] sm:$0xff]  ;;  %10561 = vmatpush3.msra.mxu0 %v8641_v22 }
  0x57   : > { %10326 = vmatprep.subr.mxu1 %v8606_v25 }
  0x58   : > { %10327 = vmatpush3.msra.mxu1 %v8606_v25 }
  0x59   : > { %10183 = vmatmul.mubr.msk.f32.gmra.mxu0 %vm452_vm0, %v368_v26  ;;  %v8640_v26 = vld [vmem:[%s16534_s3 + $0x190] sm:$0xff]  ;;  %10329 = vmatmul.mubr.f32.vlgmr.msra.gmra.mxu1 %v11241_v0 }
  0x5a   : > { %10185 = vmatprep.mubr.msk.f32.mxu0 %vm452_vm0, %v369_v27  ;;  %v402_v27 = vld [vmem:[%s11407_s21 + $0x1c8] sm:$0xff]  ;;  %10562 = vmatprep.subr.mxu0 %v8640_v26 }
  0x5b   : > { %10563 = vmatpush3.msra.mxu0 %v8640_v26  ;;  %10331 = vmatprep.mubr.f32.mxu1 %v11241_v0 }
  0x5d   : > { %10186 = vmatmul.mubr.msk.f32.gmra.mxu0 %vm452_vm0, %v370_v28  ;;  %v403_v28 = vld [vmem:[%s11407_s21 + $0x1d0] sm:$0xff]  ;;  %10332 = vmatmul.mubr.f32.gmra.mxu1 %v11241_v0  ;;  %v410_v0 = vld [vmem:[%s11407_s21 + $0x208] sm:$0xff] }
  0x5e   : > { %10188 = vmatprep.mubr.msk.f32.mxu0 %vm452_vm0, %v371_v29  ;;  %v8639_v29 = vld [vmem:[%s16534_s3 + $0x188] sm:$0xff] }
  0x5f   : > { %10564 = vmatprep.subr.mxu0 %v8639_v29 }
  0x60   : > { %10565 = vmatpush3.msra.mxu0 %v8639_v29 }
  0x61   : > { %10189 = vmatmul.mubr.msk.f32.gmra.mxu0 %vm452_vm0, %v372_v30  ;;  %v8638_v30 = vld [vmem:[%s16534_s3 + $0x180] sm:$0xff] }
  0x62   : > { %10191 = vmatprep.mubr.msk.f32.mxu0 %vm452_vm0, %v373_v31  ;;  %v404_v31 = vld [vmem:[%s11407_s21 + $0x1d8] sm:$0xff]  ;;  %10566 = vmatprep.subr.mxu0 %v8638_v30 }
  0x63   : > { %10567 = vmatpush3.msra.mxu0 %v8638_v30 }
  0x65   : > { %10192 = vmatmul.mubr.msk.f32.gmra.mxu0 %vm452_vm0, %v374_v32  ;;  %v405_v32 = vld [vmem:[%s11407_s21 + $0x1e0] sm:$0xff] }
  0x66   : > { %10194 = vmatprep.mubr.msk.f32.mxu0 %vm452_vm0, %v375_v33  ;;  %v406_v33 = vld [vmem:[%s11407_s21 + $0x1e8] sm:$0xff] }
  0x69   : > { %10195 = vmatmul.mubr.msk.f32.gmra.mxu0 %vm452_vm0, %v376_v34  ;;  %v407_v34 = vld [vmem:[%s11407_s21 + $0x1f0] sm:$0xff] }
  0x6a   : > { %10197 = vmatprep.mubr.msk.f32.mxu0 %vm452_vm0, %v377_v35  ;;  %v408_v35 = vld [vmem:[%s11407_s21 + $0x1f8] sm:$0xff] }
  0x6d   : > { %10198 = vmatmul.mubr.msk.f32.gmra.mxu0 %vm452_vm0, %v378_v36  ;;  %v409_v36 = vld [vmem:[%s11407_s21 + $0x200] sm:$0xff] }
  0x6e   : > { %10200 = vmatprep.mubr.msk.f32.mxu0 %vm452_vm0, %v379_v37  ;;  %v411_v37 = vld [vmem:[%s11407_s21 + $0x210] sm:$0xff] }
  0x71   : > { %10201 = vmatmul.mubr.msk.f32.gmra.mxu0 %vm452_vm0, %v380_v38  ;;  %v412_v38 = vld [vmem:[%s11407_s21 + $0x218] sm:$0xff] }
  0x72   : > { %10203 = vmatprep.mubr.msk.f32.mxu0 %vm452_vm0, %v381_v39  ;;  %v413_v39 = vld [vmem:[%s11407_s21 + $0x220] sm:$0xff] }
  0x75   : > { %10204 = vmatmul.mubr.msk.f32.gmra.mxu0 %vm452_vm0, %v382_v40  ;;  %v414_v40 = vld [vmem:[%s11407_s21 + $0x228] sm:$0xff] }
  0x76   : > { %10206 = vmatprep.mubr.msk.f32.mxu0 %vm452_vm0, %v383_v42  ;;  %v416_v42 = vld [vmem:[%s11407_s21 + $0x238] sm:$0xff] }
  0x79   : > { %10207 = vmatmul.mubr.msk.f32.gmra.mxu0 %vm452_vm0, %v384_v44  ;;  %v418_v44 = vld [vmem:[%s11407_s21 + $0x248] sm:$0xff] }
  0x7a   : > { %10209 = vmatprep.mubr.msk.f32.mxu0 %vm452_vm0, %v385_v45  ;;  %v419_v45 = vld [vmem:[%s11407_s21 + $0x250] sm:$0xff] }
  0x7d   : > { %10210 = vmatmul.mubr.msk.f32.gmra.mxu0 %vm452_vm0, %v386_v50  ;;  %v424_v50 = vld [vmem:[%s11407_s21 + $0x278] sm:$0xff] }
  0x7e   : > { %10212 = vmatprep.mubr.msk.f32.mxu0 %vm452_vm0, %v387_v51  ;;  %v425_v51 = vld [vmem:[%s11407_s21 + $0x280] sm:$0xff] }
  0x81   : > { %10213 = vmatmul.mubr.msk.f32.gmra.mxu0 %vm452_vm0, %v388_v56  ;;  %v430_v56 = vld [vmem:[%s11407_s21 + $0x2a8] sm:$0xff] }
  0x82   : > { %10215 = vmatprep.mubr.msk.f32.mxu0 %vm452_vm0, %v389_v57  ;;  %v431_v57 = vld [vmem:[%s11407_s21 + $0x2b0] sm:$0xff] }
  0x85   : > { %10216 = vmatmul.mubr.msk.f32.gmra.mxu0 %vm452_vm0, %v390_v60  ;;  %v434_v60 = vld [vmem:[%s11407_s21 + $0x2c8] sm:$0xff] }
  0x86   : > { %10218 = vmatprep.mubr.msk.f32.mxu0 %vm452_vm0, %v391_v62  ;;  %v436_v62 = vld [vmem:[%s11407_s21 + $0x2d8] sm:$0xff] }
  0x89   : > { %10219 = vmatmul.mubr.msk.f32.gmra.mxu0 %vm452_vm0, %v392_v3  ;;  %v440_v3 = vld [vmem:[%s11407_s21 + $0x2f8] sm:$0xff] }
  0x8a   : > { %10221 = vmatprep.mubr.msk.f32.mxu0 %vm452_vm0, %v393_v4  ;;  %v441_v4 = vld [vmem:[%s11407_s21 + $0x300] sm:$0xff]  ;;  %s11172_s21 = scalar_lea.vmem %s8434_s17, 16 }
  0x8b   : > { %p11173_p6 = scmp.ne.s32.totalorder %s8434_s17, %s11172_s21  ;;  %p11180_p12 = scmp.lt.s32.totalorder %s11178_s28, %s11172_s21 }
  0x8d   : > { %10222 = vmatmul.mubr.msk.f32.gmra.mxu0 %vm452_vm0, %v394_v7  ;;  %v3234_v7 = vld [vmem:[#allocation4 + $0x1f] sm:$0xff]  ;;  %p11174_p9 = pnand %p11173_p6, %p11332_p5  ;;  %p11181_p13 = por %p11180_p12, %p11179_p11 }
  0x8e   : > { %10224 = vmatprep.mubr.msk.f32.mxu0 %vm452_vm0, %v395_v9 }
  0x8f   : > { %p11175_p10 = pneg %p11174_p9 }
  0x91   : > { %10225 = vmatmul.mubr.msk.f32.gmra.mxu0 %vm452_vm0, %v396_v13  ;;  %p11182_p0 = pnand %p11181_p13, %p11175_p10 }
  0x92   : > { %10227 = vmatprep.mubr.msk.f32.mxu0 %vm452_vm0, %v397_v14 }
  0x95   : > { %10228 = vmatmul.mubr.msk.f32.gmra.mxu0 %vm452_vm0, %v398_v17 }
  0x96   : > { %10230 = vmatprep.mubr.msk.f32.mxu0 %vm452_vm0, %v399_v19 }
  0x99   : > { %10231 = vmatmul.mubr.msk.f32.gmra.mxu0 %vm452_vm0, %v400_v23 }
  0x9a   : > { %10233 = vmatprep.mubr.msk.f32.mxu0 %vm452_vm0, %v401_v24 }
  0x9d   : > { %10234 = vmatmul.mubr.msk.f32.gmra.mxu0 %vm452_vm0, %v402_v27 }
  0x9e   : > { %10236 = vmatprep.mubr.msk.f32.mxu0 %vm452_vm0, %v403_v28 }
  0xa1   : > { %10237 = vmatmul.mubr.msk.f32.gmra.mxu0 %vm452_vm0, %v404_v31 }
  0xa2   : > { %10239 = vmatprep.mubr.msk.f32.mxu0 %vm452_vm0, %v405_v32 }
  0xa5   : > { %10240 = vmatmul.mubr.msk.f32.gmra.mxu0 %vm452_vm0, %v406_v33 }
  0xa6   : > { %10242 = vmatprep.mubr.msk.f32.mxu0 %vm452_vm0, %v407_v34 }
  0xa9   : > { %10243 = vmatmul.mubr.msk.f32.gmra.mxu0 %vm452_vm0, %v408_v35 }
  0xaa   : > { %10245 = vmatprep.mubr.msk.f32.mxu0 %vm452_vm0, %v409_v36 }
  0xad   : > { %10246 = vmatmul.mubr.msk.f32.gmra.mxu0 %vm452_vm0, %v410_v0 }
  0xae   : > { %10248 = vmatprep.mubr.msk.f32.mxu0 %vm452_vm0, %v411_v37 }
  0xb1   : > { %10249 = vmatmul.mubr.msk.f32.gmra.mxu0 %vm452_vm0, %v412_v38 }
  0xb2   : > { %10251 = vmatprep.mubr.msk.f32.mxu0 %vm452_vm0, %v413_v39 }
  0xb5   : > { %10252 = vmatmul.mubr.msk.f32.gmra.mxu0 %vm452_vm0, %v414_v40 }
  0xb6   : > { %10254 = vmatprep.mubr.msk.f32.mxu0 %vm452_vm0, %v415_v41 }
  0xb9   : > { %10255 = vmatmul.mubr.msk.f32.gmra.mxu0 %vm452_vm0, %v416_v42 }
  0xba   : > { %10257 = vmatprep.mubr.msk.f32.mxu0 %vm452_vm0, %v417_v43 }
  0xbd   : > { %10258 = vmatmul.mubr.msk.f32.gmra.mxu0 %vm452_vm0, %v418_v44 }
  0xbe   : > { %10260 = vmatprep.mubr.msk.f32.mxu0 %vm452_vm0, %v419_v45 }
  0xc1   : > { %10261 = vmatmul.mubr.msk.f32.gmra.mxu0 %vm452_vm0, %v420_v46 }
  0xc2   : > { %10263 = vmatprep.mubr.msk.f32.mxu0 %vm452_vm0, %v421_v47 }
  0xc5   : > { %10264 = vmatmul.mubr.msk.f32.gmra.mxu0 %vm452_vm0, %v422_v48 }
  0xc6   : > { %10266 = vmatprep.mubr.msk.f32.mxu0 %vm452_vm0, %v423_v49 }
  0xc9   : > { %10267 = vmatmul.mubr.msk.f32.gmra.mxu0 %vm452_vm0, %v424_v50 }
  0xca   : > { %10269 = vmatprep.mubr.msk.f32.mxu0 %vm452_vm0, %v425_v51 }
  0xcd   : > { %10270 = vmatmul.mubr.msk.f32.gmra.mxu0 %vm452_vm0, %v426_v52 }
  0xce   : > { %10272 = vmatprep.mubr.msk.f32.mxu0 %vm452_vm0, %v427_v53 }
  0xd1   : > { %10273 = vmatmul.mubr.msk.f32.gmra.mxu0 %vm452_vm0, %v428_v54 }
  0xd2   : > { %10275 = vmatprep.mubr.msk.f32.mxu0 %vm452_vm0, %v429_v55 }
  0xd5   : > { %10276 = vmatmul.mubr.msk.f32.gmra.mxu0 %vm452_vm0, %v430_v56 }
  0xd6   : > { %10278 = vmatprep.mubr.msk.f32.mxu0 %vm452_vm0, %v431_v57 }
  0xd9   : > { %10279 = vmatmul.mubr.msk.f32.gmra.mxu0 %vm452_vm0, %v432_v58 }
  0xda   : > { %10281 = vmatprep.mubr.msk.f32.mxu0 %vm452_vm0, %v433_v59 }
  0xdd   : > { %10282 = vmatmul.mubr.msk.f32.gmra.mxu0 %vm452_vm0, %v434_v60 }
  0xde   : > { %10284 = vmatprep.mubr.msk.f32.mxu0 %vm452_vm0, %v435_v61 }
  0xe1   : > { %10285 = vmatmul.mubr.msk.f32.gmra.mxu0 %vm452_vm0, %v436_v62 }
  0xe2   : > { %10287 = vmatprep.mubr.msk.f32.mxu0 %vm452_vm0, %v437_v63 }
  0xe5   : > { %10288 = vmatmul.mubr.msk.f32.gmra.mxu0 %vm452_vm0, %v438_v1 }
  0xe6   : > { %10290 = vmatprep.mubr.msk.f32.mxu0 %vm452_vm0, %v439_v2 }
  0xe9   : > { %10291 = vmatmul.mubr.msk.f32.gmra.mxu0 %vm452_vm0, %v440_v3 }
  0xea   : > { %10293 = vmatprep.mubr.msk.f32.mxu0 %vm452_vm0, %v441_v4 }
  0xed   : > { %v10151_v8 = vpop.f32.mrf.mxu0  ;;  %10294 = vmatmul.mubr.msk.f32.gmra.mxu0 %vm452_vm0, %v442_v5 }
  0xee   : > { %v819_v9 = vadd.f32 %v10151_v8, %v11712_v6  ;;  %10568 = vmatprep.mubr.f32.mxu0 %v3234_v7 }
  0xef   : > { %v813_v11 = vpop.f32.mrf.mxu0 }
  0xf0   : > { %v1303_v12 = vmax.f32 %v819_v9, 0.0  ;;  %v814_v13 = vadd.f32 %v11712_v6, %v813_v11 }
  0xf1   : > { %v10154_v14 = vpop.f32.mrf.mxu0  ;;  %10569 = vmatmul.mubr.f32.vlgmr.msra.gmra.mxu0 %v3235_v10 }
  0xf2   : > { %1401 = vst [vmem:[#allocation2 + $0x8] sm:$0xff] %v1303_v12  ;;  %v1302_v15 = vmax.f32 %v814_v13, 0.0  ;;  %v11718_v16 = vadd.f32 %v10154_v14, %v11712_v6 }
  0xf3   : > { %v823_v17 = vpop.f32.mrf.mxu0 }
  0xf4   : > { %1400 = vst [vmem:[#allocation2] sm:$0xff] %v1302_v15  ;;  %v1305_v18 = vmax.f32 %v11718_v16, 0.0  ;;  %v824_v19 = vadd.f32 %v11712_v6, %v823_v17 }
  0xf5   : > { %v10157_v20 = vpop.f32.mrf.mxu0 }
  0xf6   : > { %1403 = vst [vmem:[#allocation2 + $0x18] sm:$0xff] %v1305_v18  ;;  %v1304_v21 = vmax.f32 %v824_v19, 0.0  ;;  %v839_v22 = vadd.f32 %v10157_v20, %v11712_v6 }
  0xf7   : > { %v833_v23 = vpop.f32.mrf.mxu0 }
  0xf8   : > { %1402 = vst [vmem:[#allocation2 + $0x10] sm:$0xff] %v1304_v21  ;;  %v1307_v24 = vmax.f32 %v839_v22, 0.0  ;;  %v834_v25 = vadd.f32 %v11712_v6, %v833_v23 }
  0xf9   : > { %v10160_v26 = vpop.f32.mrf.mxu0 }
  0xfa   : > { %1405 = vst [vmem:[#allocation2 + $0x28] sm:$0xff] %v1307_v24  ;;  %v1306_v27 = vmax.f32 %v834_v25, 0.0  ;;  %v11725_v28 = vadd.f32 %v10160_v26, %v11712_v6 }
  0xfb   : > { %v843_v29 = vpop.f32.mrf.mxu0  ;;  %v1593_v38 = vld [vmem:[#allocation2 + $0x1] sm:$0xff] }
  0xfc   : > { %1404 = vst [vmem:[#allocation2 + $0x20] sm:$0xff] %v1306_v27  ;;  %v1309_v30 = vmax.f32 %v11725_v28, 0.0  ;;  %v844_v31 = vadd.f32 %v11712_v6, %v843_v29  ;;  %v1688_v49 = vmax.f32 %v1302_v15, %v1593_v38 }
  0xfd   : > { %v10163_v32 = vpop.f32.mrf.mxu0 }
  0xfe   : > { %1407 = vst [vmem:[#allocation2 + $0x38] sm:$0xff] %v1309_v30  ;;  %v1308_v33 = vmax.f32 %v844_v31, 0.0  ;;  %v11732_v34 = vadd.f32 %v10163_v32, %v11712_v6 }
  0xff   : > { %v853_v35 = vpop.f32.mrf.mxu0  ;;  %v1594_v39 = vld [vmem:[#allocation2 + $0x9] sm:$0xff]  ;;  %v1595_v54 = vld [vmem:[#allocation2 + $0x11] sm:$0xff] }
 0x100   : > { %1406 = vst [vmem:[#allocation2 + $0x30] sm:$0xff] %v1308_v33  ;;  %v1311_v36 = vmax.f32 %v11732_v34, 0.0  ;;  %v11736_v0 = vadd.f32 %v11712_v6, %v853_v35  ;;  %v1689_v50 = vmax.f32 %v1303_v12, %v1594_v39  ;;  %v1690_v4 = vmax.f32 %v1304_v21, %v1595_v54 }
 0x101   : > { %v10166_v37 = vpop.f32.mrf.mxu0 }
 0x102   : > { %1409 = vst [vmem:[#allocation2 + $0x48] sm:$0xff] %v1311_v36  ;;  %v1310_v40 = vmax.f32 %v11736_v0, 0.0  ;;  %v869_v41 = vadd.f32 %v10166_v37, %v11712_v6 }
 0x103   : > { %v1783_v42 = vld [vmem:[#allocation2 + $0x1c] sm:$0xff]  ;;  %v863_v43 = vpop.f32.mrf.mxu0  ;;  %v1784_v44 = vld [vmem:[#allocation2 + $0x24] sm:$0xff] }
 0x104   : > { %v1878_v45 = vld [vmem:[#allocation2 + $0x1d] sm:$0xff]  ;;  %v1879_v46 = vld [vmem:[#allocation2 + $0x25] sm:$0xff]  ;;  %1408 = vst [vmem:[#allocation2 + $0x40] sm:$0xff] %v1310_v40  ;;  %v1313_v47 = vmax.f32 %v869_v41, 0.0  ;;  %v11745_v48 = vadd.f32 %v11712_v6, %v863_v43 }
 0x105   : > { %v1973_v51 = vmax.f32 %v1783_v42, %v1878_v45  ;;  %v1974_v52 = vmax.f32 %v1784_v44, %v1879_v46  ;;  %v10169_v53 = vpop.f32.mrf.mxu0  ;;  %v1596_v55 = vld [vmem:[#allocation2 + $0x19] sm:$0xff] }
 0x106   : > { %1411 = vst [vmem:[#allocation2 + $0x58] sm:$0xff] %v1313_v47  ;;  %v1312_v56 = vmax.f32 %v11745_v48, 0.0  ;;  %v879_v57 = vadd.f32 %v10169_v53, %v11712_v6  ;;  %v1691_v5 = vmax.f32 %v1305_v18, %v1596_v55 }
 0x107   : > { %v2068_v58 = vmax.f32 %v1688_v49, %v1973_v51  ;;  %v2069_v59 = vmax.f32 %v1689_v50, %v1974_v52  ;;  %v1785_v60 = vld [vmem:[#allocation2 + $0x2c] sm:$0xff]  ;;  %v873_v61 = vpop.f32.mrf.mxu0  ;;  %v1786_v62 = vld [vmem:[#allocation2 + $0x34] sm:$0xff] }
 0x108   : > { %v1880_v63 = vld [vmem:[#allocation2 + $0x2d] sm:$0xff]  ;;  %v1881_v1 = vld [vmem:[#allocation2 + $0x35] sm:$0xff]  ;;  %1410 = vst [vmem:[#allocation2 + $0x50] sm:$0xff] %v1312_v56  ;;  %v1315_v2 = vmax.f32 %v879_v57, 0.0  ;;  %v874_v3 = vadd.f32 %v11712_v6, %v873_v61 }
 0x109   : > { %2163 = vst [vmem:[#allocation3] sm:$0xff] %v2068_v58  ;;  %2164 = vst [vmem:[#allocation3 + $0x8] sm:$0xff] %v2069_v59  ;;  %v1975_v7 = vmax.f32 %v1785_v60, %v1880_v63  ;;  %v1976_v8 = vmax.f32 %v1786_v62, %v1881_v1  ;;  %v10172_v9 = vpop.f32.mrf.mxu0 }
 0x10a   : > { %1413 = vst [vmem:[#allocation2 + $0x68] sm:$0xff] %v1315_v2  ;;  %v1314_v10 = vmax.f32 %v874_v3, 0.0  ;;  %v11753_v11 = vadd.f32 %v10172_v9, %v11712_v6 }
 0x10b   : > { %v2070_v12 = vmax.f32 %v1690_v4, %v1975_v7  ;;  %v2071_v13 = vmax.f32 %v1691_v5, %v1976_v8  ;;  %v883_v14 = vpop.f32.mrf.mxu0  ;;  %v1600_v18 = vld [vmem:[#allocation2 + $0x39] sm:$0xff]  ;;  %v1601_v32 = vld [vmem:[#allocation2 + $0x41] sm:$0xff] }
 0x10c   : > { %1412 = vst [vmem:[#allocation2 + $0x60] sm:$0xff] %v1314_v10  ;;  %v1317_v15 = vmax.f32 %v11753_v11, 0.0  ;;  %v11757_v16 = vadd.f32 %v11712_v6, %v883_v14  ;;  %v1695_v26 = vmax.f32 %v1309_v30, %v1600_v18  ;;  %v1696_v45 = vmax.f32 %v1310_v40, %v1601_v32 }
 0x10d   : > { %2165 = vst [vmem:[#allocation3 + $0x10] sm:$0xff] %v2070_v12  ;;  %2166 = vst [vmem:[#allocation3 + $0x18] sm:$0xff] %v2071_v13  ;;  %v10175_v17 = vpop.f32.mrf.mxu0 }
 0x10e   : > { %1415 = vst [vmem:[#allocation2 + $0x78] sm:$0xff] %v1317_v15  ;;  %v1316_v19 = vmax.f32 %v11757_v16, 0.0  ;;  %v11763_v20 = vadd.f32 %v10175_v17, %v11712_v6 }
 0x10f   : > { %v893_v21 = vpop.f32.mrf.mxu0  ;;  %v1790_v22 = vld [vmem:[#allocation2 + $0x54] sm:$0xff]  ;;  %v1602_v33 = vld [vmem:[#allocation2 + $0x49] sm:$0xff] }
 0x110   : > { %v1885_v23 = vld [vmem:[#allocation2 + $0x55] sm:$0xff]  ;;  %1414 = vst [vmem:[#allocation2 + $0x70] sm:$0xff] %v1316_v19  ;;  %v1319_v24 = vmax.f32 %v11763_v20, 0.0  ;;  %v11769_v25 = vadd.f32 %v11712_v6, %v893_v21  ;;  %v1697_v46 = vmax.f32 %v1311_v36, %v1602_v33 }
 0x111   : > { %v1980_v27 = vmax.f32 %v1790_v22, %v1885_v23  ;;  %v10178_v29 = vpop.f32.mrf.mxu0  ;;  %v2298_v31 = vld [vmem:[#allocation3] ss:$2 sm:$0xff] }
 0x112   : > { %1417 = vst [vmem:[#allocation2 + $0x88] sm:$0xff] %v1319_v24  ;;  %v1318_v35 = vmax.f32 %v11769_v25, 0.0  ;;  %v909_v37 = vadd.f32 %v10178_v29, %v11712_v6  ;;  %2301 = vst [vmem:[#allocation4 + $0x31] sm:$0xff] %v2298_v31  ;;  %v1603_v52 = vld [vmem:[#allocation2 + $0x51] sm:$0xff] }
 0x113   : > { %v2075_v38 = vmax.f32 %v1695_v26, %v1980_v27  ;;  %v1791_v39 = vld [vmem:[#allocation2 + $0x5c] sm:$0xff]  ;;  %v903_v41 = vpop.f32.mrf.mxu0  ;;  %v1792_v42 = vld [vmem:[#allocation2 + $0x64] sm:$0xff]  ;;  %v1698_v59 = vmax.f32 %v1312_v56, %v1603_v52 }
 0x114   : > { %v1886_v43 = vld [vmem:[#allocation2 + $0x5d] sm:$0xff]  ;;  %v1887_v28 = vld [vmem:[#allocation2 + $0x65] sm:$0xff]  ;;  %1416 = vst [vmem:[#allocation2 + $0x80] sm:$0xff] %v1318_v35  ;;  %v1321_v30 = vmax.f32 %v909_v37, 0.0  ;;  %v904_v44 = vadd.f32 %v11712_v6, %v903_v41 }
 0x115   : > { %2170 = vst [vmem:[#allocation3 + $0x38] sm:$0xff] %v2075_v38  ;;  %v1981_v47 = vmax.f32 %v1791_v39, %v1886_v43  ;;  %v1982_v49 = vmax.f32 %v1792_v42, %v1887_v28  ;;  %v10181_v50 = vpop.f32.mrf.mxu0  ;;  %v2300_v51 = vld [vmem:[#allocation3 + $0x10] ss:$2 sm:$0x3f] }
 0x116   : > { %1419 = vst [vmem:[#allocation2 + $0x98] sm:$0xff] %v1321_v30  ;;  %v1320_v53 = vmax.f32 %v904_v44, 0.0  ;;  %v11785_v54 = vadd.f32 %v10181_v50, %v11712_v6  ;;  %2302 = vst [vmem:[#allocation4 + $0x39] sm:$0x3f] %v2300_v51 }
 0x117   : > { %v2076_v55 = vmax.f32 %v1696_v45, %v1981_v47  ;;  %v2077_v57 = vmax.f32 %v1697_v46, %v1982_v49  ;;  %v1793_v58 = vld [vmem:[#allocation2 + $0x6c] sm:$0xff]  ;;  %v913_v0 = vpop.f32.mrf.mxu0 }
 0x118   : > { %v1888_v40 = vld [vmem:[#allocation2 + $0x6d] sm:$0xff]  ;;  %1418 = vst [vmem:[#allocation2 + $0x90] sm:$0xff] %v1320_v53  ;;  %v1323_v34 = vmax.f32 %v11785_v54, 0.0  ;;  %v914_v36 = vadd.f32 %v11712_v6, %v913_v0  ;;  %v2428_v53 = vld [vmem:[%s16534_s3 + $0x78] sm:$0xff] }
 0x119   : > { %2171 = vst [vmem:[#allocation3 + $0x40] sm:$0xff] %v2076_v55  ;;  %2172 = vst [vmem:[#allocation3 + $0x48] sm:$0xff] %v2077_v57  ;;  %v1983_v60 = vmax.f32 %v1793_v58, %v1888_v40  ;;  %v2433_v61 = vld [vmem:[#allocation4 + $0x30] sm:$0xff]  ;;  %v10184_v63 = vpop.f32.mrf.mxu0  ;;  %10376 = vmatprep.subr.mxu1 %v2428_v53  ;;  %v2426_v54 = vld [vmem:[%s16534_s3 + $0x68] sm:$0xff] }
 0x11a   : > { %v3236_v62 = vld [vmem:[#allocation4 + $0x2f] sm:$0xff]  ;;  %1421 = vst [vmem:[#allocation2 + $0xa8] sm:$0xff] %v1323_v34  ;;  %v1322_v1 = vmax.f32 %v914_v36, 0.0  ;;  %10334 = vmatprep.mubr.f32.mxu1 %v2433_v61  ;;  %v11794_v2 = vadd.f32 %v10184_v63, %v11712_v6  ;;  %10377 = vmatpush3.msra.mxu1 %v2428_v53  ;;  %v2424_v53 = vld [vmem:[%s16534_s3 + $0x58] sm:$0xff] }
 0x11b   : > { %10571 = vmatprep.mubr.f32.mxu0 %v3236_v62  ;;  %v2078_v3 = vmax.f32 %v1698_v59, %v1983_v60  ;;  %v923_v4 = vpop.f32.mrf.mxu0  ;;  %v1607_v9 = vld [vmem:[#allocation2 + $0x71] sm:$0xff]  ;;  %v1608_v10 = vld [vmem:[#allocation2 + $0x79] sm:$0xff]  ;;  %v1609_v38 = vld [vmem:[#allocation2 + $0x81] sm:$0xff] }
 0x11c   : > { %1420 = vst [vmem:[#allocation2 + $0xa0] sm:$0xff] %v1322_v1  ;;  %v1325_v48 = vmax.f32 %v11794_v2, 0.0  ;;  %v11798_v56 = vadd.f32 %v11712_v6, %v923_v4  ;;  %v1702_v27 = vmax.f32 %v1316_v19, %v1607_v9  ;;  %v1703_v29 = vmax.f32 %v1317_v15, %v1608_v10  ;;  %v2427_v59 = vld [vmem:[%s16534_s3 + $0x70] sm:$0xff] }
 0x11d   : > { %2173 = vst [vmem:[#allocation3 + $0x50] sm:$0xff] %v2078_v3  ;;  %v2434_v5 = vld [vmem:[#allocation4 + $0x38] sm:$0xff]  ;;  %v10187_v8 = vpop.f32.mrf.mxu0  ;;  %v1704_v46 = vmax.f32 %v1318_v35, %v1609_v38  ;;  %10378 = vmatprep.subr.mxu1 %v2427_v59 }
 0x11e   : > { %v3237_v7 = vld [vmem:[#allocation4 + $0x37] sm:$0xff]  ;;  %1423 = vst [vmem:[#allocation2 + $0xb8] sm:$0xff] %v1325_v48  ;;  %v1324_v12 = vmax.f32 %v11798_v56, 0.0  ;;  %10335 = vmatmul.mubr.f32.gmra.mxu1 %v2434_v5  ;;  %v939_v13 = vadd.f32 %v10187_v8, %v11712_v6 }
 0x11f   : > { %10572 = vmatmul.mubr.f32.gmra.mxu0 %v3237_v7  ;;  %v1797_v14 = vld [vmem:[#allocation2 + $0x8c] sm:$0xff]  ;;  %v933_v17 = vpop.f32.mrf.mxu0  ;;  %v1798_v18 = vld [vmem:[#allocation2 + $0x94] sm:$0xff]  ;;  %10379 = vmatpush3.msra.mxu1 %v2427_v59 }
 0x120   : > { %v1892_v21 = vld [vmem:[#allocation2 + $0x8d] sm:$0xff]  ;;  %v1893_v22 = vld [vmem:[#allocation2 + $0x95] sm:$0xff]  ;;  %1422 = vst [vmem:[#allocation2 + $0xb0] sm:$0xff] %v1324_v12  ;;  %v1327_v23 = vmax.f32 %v939_v13, 0.0  ;;  %v11807_v26 = vadd.f32 %v11712_v6, %v933_v17  ;;  %10380 = vmatprep.subr.mxu1 %v2426_v54 }
 0x121   : > { %v1987_v31 = vmax.f32 %v1797_v14, %v1892_v21  ;;  %v1988_v32 = vmax.f32 %v1798_v18, %v1893_v22  ;;  %v10190_v33 = vpop.f32.mrf.mxu0  ;;  %v2304_v37 = vld [vmem:[#allocation3 + $0x38] ss:$2 sm:$0xff]  ;;  %10381 = vmatpush3.msra.mxu1 %v2426_v54 }
 0x122   : > { %v1610_v39 = vld [vmem:[#allocation2 + $0x89] sm:$0xff]  ;;  %1425 = vst [vmem:[#allocation2 + $0xc8] sm:$0xff] %v1327_v23  ;;  %v1326_v41 = vmax.f32 %v11807_v26, 0.0  ;;  %v949_v42 = vadd.f32 %v10190_v33, %v11712_v6  ;;  %2307 = vst [vmem:[#allocation4 + $0x41] sm:$0xff] %v2304_v37 }
 0x123   : > { %v2082_v43 = vmax.f32 %v1702_v27, %v1987_v31  ;;  %v2083_v28 = vmax.f32 %v1703_v29, %v1988_v32  ;;  %v1799_v30 = vld [vmem:[#allocation2 + $0x9c] sm:$0xff]  ;;  %v943_v16 = vpop.f32.mrf.mxu0  ;;  %v1800_v19 = vld [vmem:[#allocation2 + $0xa4] sm:$0xff]  ;;  %v1705_v47 = vmax.f32 %v1319_v24, %v1610_v39  ;;  %v2423_v59 = vld [vmem:[%s16534_s3 + $0x50] sm:$0xff] }
 0x124   : > { %v1894_v44 = vld [vmem:[#allocation2 + $0x9d] sm:$0xff]  ;;  %v1895_v11 = vld [vmem:[#allocation2 + $0xa5] sm:$0xff]  ;;  %1424 = vst [vmem:[#allocation2 + $0xc0] sm:$0xff] %v1326_v41  ;;  %v1329_v15 = vmax.f32 %v949_v42, 0.0  ;;  %v944_v45 = vadd.f32 %v11712_v6, %v943_v16 }
 0x125   : > { %2177 = vst [vmem:[#allocation3 + $0x70] sm:$0xff] %v2082_v43  ;;  %2178 = vst [vmem:[#allocation3 + $0x78] sm:$0xff] %v2083_v28  ;;  %v1989_v49 = vmax.f32 %v1799_v30, %v1894_v44  ;;  %v1990_v50 = vmax.f32 %v1800_v19, %v1895_v11  ;;  %v10193_v51 = vpop.f32.mrf.mxu0  ;;  %v2306_v52 = vld [vmem:[#allocation3 + $0x48] ss:$2 sm:$0x3f] }
 0x126   : > { %1427 = vst [vmem:[#allocation2 + $0xd8] sm:$0xff] %v1329_v15  ;;  %v1328_v55 = vmax.f32 %v944_v45, 0.0  ;;  %v11826_v57 = vadd.f32 %v10193_v51, %v11712_v6  ;;  %2308 = vst [vmem:[#allocation4 + $0x49] sm:$0x3f] %v2306_v52  ;;  %v2425_v16 = vld [vmem:[%s16534_s3 + $0x60] sm:$0xff] }
 0x127   : > { %v2084_v25 = vmax.f32 %v1704_v46, %v1989_v49  ;;  %v2085_v20 = vmax.f32 %v1705_v47, %v1990_v50  ;;  %v953_v24 = vpop.f32.mrf.mxu0  ;;  %v1614_v60 = vld [vmem:[#allocation2 + $0xa9] sm:$0xff]  ;;  %v1615_v17 = vld [vmem:[#allocation2 + $0xb1] sm:$0xff]  ;;  %10382 = vmatprep.subr.mxu1 %v2425_v16 }
 0x128   : > { %1426 = vst [vmem:[#allocation2 + $0xd0] sm:$0xff] %v1328_v55  ;;  %v1331_v35 = vmax.f32 %v11826_v57, 0.0  ;;  %v11830_v58 = vadd.f32 %v11712_v6, %v953_v24  ;;  %v1709_v7 = vmax.f32 %v1323_v34, %v1614_v60  ;;  %v1710_v38 = vmax.f32 %v1324_v12, %v1615_v17  ;;  %10383 = vmatpush3.msra.mxu1 %v2425_v16 }
 0x129   : > { %2179 = vst [vmem:[#allocation3 + $0x80] sm:$0xff] %v2084_v25  ;;  %2180 = vst [vmem:[#allocation3 + $0x88] sm:$0xff] %v2085_v20  ;;  %v2435_v0 = vld [vmem:[#allocation4 + $0x40] sm:$0xff]  ;;  %v10196_v36 = vpop.f32.mrf.mxu0  ;;  %10384 = vmatprep.subr.mxu1 %v2424_v53 }
 0x12a   : > { %v3238_v40 = vld [vmem:[#allocation4 + $0x3f] sm:$0xff]  ;;  %1429 = vst [vmem:[#allocation2 + $0xe8] sm:$0xff] %v1331_v35  ;;  %v1330_v61 = vmax.f32 %v11830_v58, 0.0  ;;  %10337 = vmatprep.mubr.f32.mxu1 %v2435_v0  ;;  %v11839_v62 = vadd.f32 %v10196_v36, %v11712_v6  ;;  %10385 = vmatpush3.msra.mxu1 %v2424_v53 }
 0x12b   : > { %10574 = vmatprep.mubr.f32.mxu0 %v3238_v40  ;;  %v963_v63 = vpop.f32.mrf.mxu0  ;;  %v1804_v1 = vld [vmem:[#allocation2 + $0xc4] sm:$0xff]  ;;  %v1616_v18 = vld [vmem:[#allocation2 + $0xb9] sm:$0xff]  ;;  %10386 = vmatprep.subr.mxu1 %v2423_v59 }
 0x12c   : > { %v1899_v3 = vld [vmem:[#allocation2 + $0xc5] sm:$0xff]  ;;  %1428 = vst [vmem:[#allocation2 + $0xe0] sm:$0xff] %v1330_v61  ;;  %v1333_v4 = vmax.f32 %v11839_v62, 0.0  ;;  %v11845_v5 = vadd.f32 %v11712_v6, %v963_v63  ;;  %v1711_v39 = vmax.f32 %v1325_v48, %v1616_v18  ;;  %10387 = vmatpush3.msra.mxu1 %v2423_v59 }
 0x12d   : > { %v1994_v8 = vmax.f32 %v1804_v1, %v1899_v3  ;;  %v2436_v9 = vld [vmem:[#allocation4 + $0x48] sm:$0xff]  ;;  %v10199_v13 = vpop.f32.mrf.mxu0 }
 0x12e   : > { %v3239_v10 = vld [vmem:[#allocation4 + $0x47] sm:$0xff]  ;;  %1431 = vst [vmem:[#allocation2 + $0xf8] sm:$0xff] %v1333_v4  ;;  %v1332_v21 = vmax.f32 %v11845_v5, 0.0  ;;  %10338 = vmatmul.mubr.f32.gmra.mxu1 %v2436_v9  ;;  %v979_v22 = vadd.f32 %v10199_v13, %v11712_v6 }
 0x12f   : > { %v2310_v14 = vld [vmem:[#allocation3 + $0x70] ss:$2 sm:$0xff]  ;;  %10575 = vmatmul.mubr.f32.gmra.mxu0 %v3239_v10  ;;  %v2089_v34 = vmax.f32 %v1709_v7, %v1994_v8  ;;  %v973_v27 = vpop.f32.mrf.mxu0  ;;  %v1806_v29 = vld [vmem:[#allocation2 + $0xd4] sm:$0xff] }
 0x130   : > { %2313 = vst [vmem:[#allocation4 + $0x51] sm:$0xff] %v2310_v14  ;;  %v1805_v23 = vld [vmem:[#allocation2 + $0xcc] sm:$0xff]  ;;  %v1901_v32 = vld [vmem:[#allocation2 + $0xd5] sm:$0xff]  ;;  %1430 = vst [vmem:[#allocation2 + $0xf0] sm:$0xff] %v1332_v21  ;;  %v1335_v33 = vmax.f32 %v979_v22, 0.0  ;;  %v974_v37 = vadd.f32 %v11712_v6, %v973_v27 }
 0x131   : > { %v1900_v31 = vld [vmem:[#allocation2 + $0xcd] sm:$0xff]  ;;  %2184 = vst [vmem:[#allocation3 + $0xa8] sm:$0xff] %v2089_v34  ;;  %v1996_v43 = vmax.f32 %v1806_v29, %v1901_v32  ;;  %v10202_v28 = vpop.f32.mrf.mxu0  ;;  %v1617_v19 = vld [vmem:[#allocation2 + $0xc1] sm:$0xff]  ;;  %v8685_v29 = vld [vmem:[%s16534_s3 + $0x2f8] sm:$0xff] }
 0x132   : > { %v1995_v42 = vmax.f32 %v1805_v23, %v1900_v31  ;;  %v2312_v30 = vld [vmem:[#allocation3 + $0x80] ss:$2 sm:$0x3f]  ;;  %1433 = vst [vmem:[#allocation2 + $0x108] sm:$0xff] %v1335_v33  ;;  %v1334_v44 = vmax.f32 %v974_v37, 0.0  ;;  %v11867_v11 = vadd.f32 %v10202_v28, %v11712_v6  ;;  %v1712_v47 = vmax.f32 %v1326_v41, %v1617_v19  ;;  %10696 = vmatprep.subr.mxu0 %v8685_v29  ;;  %v2418_v59 = vld [vmem:[%s16534_s3 + $0x28] sm:$0xff] }
 0x133   : > { %2314 = vst [vmem:[#allocation4 + $0x59] sm:$0x3f] %v2312_v30  ;;  %v2091_v2 = vmax.f32 %v1711_v39, %v1996_v43  ;;  %v1807_v48 = vld [vmem:[#allocation2 + $0xdc] sm:$0xff]  ;;  %v983_v12 = vpop.f32.mrf.mxu0  ;;  %v8684_v31 = vld [vmem:[%s16534_s3 + $0x2f0] sm:$0xff]  ;;  %10697 = vmatpush3.msra.mxu0 %v8685_v29 }
 0x134   : > { %v2090_v56 = vmax.f32 %v1710_v38, %v1995_v42  ;;  %v1902_v15 = vld [vmem:[#allocation2 + $0xdd] sm:$0xff]  ;;  %1432 = vst [vmem:[#allocation2 + $0x100] sm:$0xff] %v1334_v44  ;;  %v1337_v45 = vmax.f32 %v11867_v11, 0.0  ;;  %v984_v46 = vadd.f32 %v11712_v6, %v983_v12  ;;  %10698 = vmatprep.subr.mxu0 %v8684_v31 }
 0x135   : > { %2186 = vst [vmem:[#allocation3 + $0xb8] sm:$0xff] %v2091_v2  ;;  %v1997_v49 = vmax.f32 %v1807_v48, %v1902_v15  ;;  %v10205_v52 = vpop.f32.mrf.mxu0  ;;  %v1621_v60 = vld [vmem:[#allocation2 + $0xe1] sm:$0xff]  ;;  %10699 = vmatpush3.msra.mxu0 %v8684_v31 }
 0x136   : > { %2185 = vst [vmem:[#allocation3 + $0xb0] sm:$0xff] %v2090_v56  ;;  %1435 = vst [vmem:[#allocation2 + $0x118] sm:$0xff] %v1337_v45  ;;  %v1336_v55 = vmax.f32 %v984_v46, 0.0  ;;  %v11879_v25 = vadd.f32 %v10205_v52, %v11712_v6  ;;  %v1716_v18 = vmax.f32 %v1330_v61, %v1621_v60  ;;  %v2421_v15 = vld [vmem:[%s16534_s3 + $0x40] sm:$0xff]  ;;  %v2420_v46 = vld [vmem:[%s16534_s3 + $0x38] sm:$0xff] }
 0x137   : > { %v2437_v50 = vld [vmem:[#allocation4 + $0x50] sm:$0xff]  ;;  %v2092_v26 = vmax.f32 %v1712_v47, %v1997_v49  ;;  %v993_v41 = vpop.f32.mrf.mxu0  ;;  %v8681_v60 = vld [vmem:[%s16534_s3 + $0x2d8] sm:$0xff] }
 0x138   : > { %v3240_v51 = vld [vmem:[#allocation4 + $0x4f] sm:$0xff]  ;;  %10340 = vmatprep.mubr.f32.mxu1 %v2437_v50  ;;  %1434 = vst [vmem:[#allocation2 + $0x110] sm:$0xff] %v1336_v55  ;;  %v1339_v20 = vmax.f32 %v11879_v25, 0.0  ;;  %v11883_v24 = vadd.f32 %v11712_v6, %v993_v41  ;;  %v8682_v41 = vld [vmem:[%s16534_s3 + $0x2e0] sm:$0xff] }
 0x139   : > { %10577 = vmatprep.mubr.f32.mxu0 %v3240_v51  ;;  %2187 = vst [vmem:[#allocation3 + $0xc0] sm:$0xff] %v2092_v26  ;;  %v10208_v36 = vpop.f32.mrf.mxu0  ;;  %v1622_v63 = vld [vmem:[#allocation2 + $0xe9] sm:$0xff]  ;;  %v1623_v32 = vld [vmem:[#allocation2 + $0xf1] sm:$0xff] }
 0x13a   : > { %v2438_v0 = vld [vmem:[#allocation4 + $0x58] sm:$0xff]  ;;  %1437 = vst [vmem:[#allocation2 + $0x128] sm:$0xff] %v1339_v20  ;;  %v1338_v1 = vmax.f32 %v11883_v24, 0.0  ;;  %v1009_v3 = vadd.f32 %v10208_v36, %v11712_v6  ;;  %v1717_v22 = vmax.f32 %v1331_v35, %v1622_v63  ;;  %v2422_v35 = vld [vmem:[%s16534_s3 + $0x48] sm:$0xff]  ;;  %v1718_v19 = vmax.f32 %v1332_v21, %v1623_v32  ;;  %v2419_v50 = vld [vmem:[%s16534_s3 + $0x30] sm:$0xff] }
 0x13b   : > { %v3241_v40 = vld [vmem:[#allocation4 + $0x57] sm:$0xff]  ;;  %10341 = vmatmul.mubr.f32.gmra.mxu1 %v2438_v0  ;;  %v1003_v8 = vpop.f32.mrf.mxu0  ;;  %v1812_v9 = vld [vmem:[#allocation2 + $0x104] sm:$0xff]  ;;  %10388 = vmatprep.subr.mxu1 %v2422_v35 }
 0x13c   : > { %10578 = vmatmul.mubr.f32.gmra.mxu0 %v3241_v40  ;;  %v1811_v7 = vld [vmem:[#allocation2 + $0xfc] sm:$0xff]  ;;  %v1907_v13 = vld [vmem:[#allocation2 + $0x105] sm:$0xff]  ;;  %1436 = vst [vmem:[#allocation2 + $0x120] sm:$0xff] %v1338_v1  ;;  %v1341_v14 = vmax.f32 %v1009_v3, 0.0  ;;  %v11895_v17 = vadd.f32 %v11712_v6, %v1003_v8  ;;  %10389 = vmatpush3.msra.mxu1 %v2422_v35 }
 0x13d   : > { %v1906_v10 = vld [vmem:[#allocation2 + $0xfd] sm:$0xff]  ;;  %v2002_v34 = vmax.f32 %v1812_v9, %v1907_v13  ;;  %v10211_v23 = vpop.f32.mrf.mxu0  ;;  %10390 = vmatprep.subr.mxu1 %v2421_v15 }
 0x13e   : > { %v2001_v54 = vmax.f32 %v1811_v7, %v1906_v10  ;;  %v2316_v27 = vld [vmem:[#allocation3 + $0xa8] ss:$2 sm:$0xff]  ;;  %1439 = vst [vmem:[#allocation2 + $0x138] sm:$0xff] %v1341_v14  ;;  %v1340_v58 = vmax.f32 %v11895_v17, 0.0  ;;  %v1019_v57 = vadd.f32 %v10211_v23, %v11712_v6  ;;  %10391 = vmatpush3.msra.mxu1 %v2421_v15 }
 0x13f   : > { %v1624_v33 = vld [vmem:[#allocation2 + $0xf9] sm:$0xff]  ;;  %2319 = vst [vmem:[#allocation4 + $0x61] sm:$0xff] %v2316_v27  ;;  %v2097_v37 = vmax.f32 %v1717_v22, %v2002_v34  ;;  %v1813_v38 = vld [vmem:[#allocation2 + $0x10c] sm:$0xff]  ;;  %v1013_v39 = vpop.f32.mrf.mxu0  ;;  %10392 = vmatprep.subr.mxu1 %v2420_v46 }
 0x140   : > { %v2096_v61 = vmax.f32 %v1716_v18, %v2001_v54  ;;  %v1814_v42 = vld [vmem:[#allocation2 + $0x114] sm:$0xff]  ;;  %1438 = vst [vmem:[#allocation2 + $0x130] sm:$0xff] %v1340_v58  ;;  %v1343_v30 = vmax.f32 %v1019_v57, 0.0  ;;  %v1014_v16 = vadd.f32 %v11712_v6, %v1013_v39  ;;  %v1719_v44 = vmax.f32 %v1333_v4, %v1624_v33  ;;  %v2318_v12 = vld [vmem:[#allocation3 + $0xb8] ss:$2 sm:$0x3f]  ;;  %10393 = vmatpush3.msra.mxu1 %v2420_v46 }
 0x141   : > { %v1908_v43 = vld [vmem:[#allocation2 + $0x10d] sm:$0xff]  ;;  %v1909_v28 = vld [vmem:[#allocation2 + $0x115] sm:$0xff]  ;;  %2192 = vst [vmem:[#allocation3 + $0xe8] sm:$0xff] %v2097_v37  ;;  %v10214_v48 = vpop.f32.mrf.mxu0  ;;  %2320 = vst [vmem:[#allocation4 + $0x69] sm:$0x3f] %v2318_v12  ;;  %10394 = vmatprep.subr.mxu1 %v2419_v50 }
 0x142   : > { %2191 = vst [vmem:[#allocation3 + $0xe0] sm:$0xff] %v2096_v61  ;;  %v2003_v56 = vmax.f32 %v1813_v38, %v1908_v43  ;;  %v2004_v2 = vmax.f32 %v1814_v42, %v1909_v28  ;;  %1441 = vst [vmem:[#allocation2 + $0x148] sm:$0xff] %v1343_v30  ;;  %v1342_v5 = vmax.f32 %v1014_v16, 0.0  ;;  %v11926_v62 = vadd.f32 %v10214_v48, %v11712_v6  ;;  %v8683_v4 = vld [vmem:[%s16534_s3 + $0x2e8] sm:$0xff]  ;;  %v2417_v7 = vld [vmem:[%s16534_s3 + $0x20] sm:$0xff] }
 0x143   : > { %v1023_v49 = vpop.f32.mrf.mxu0  ;;  %10700 = vmatprep.subr.mxu0 %v8683_v4  ;;  %v1628_v0 = vld [vmem:[#allocation2 + $0x119] sm:$0xff]  ;;  %v1629_v63 = vld [vmem:[#allocation2 + $0x121] sm:$0xff]  ;;  %10395 = vmatpush3.msra.mxu1 %v2419_v50 }
 0x144   : > { %v2098_v21 = vmax.f32 %v1718_v19, %v2003_v56  ;;  %v2099_v47 = vmax.f32 %v1719_v44, %v2004_v2  ;;  %1440 = vst [vmem:[#allocation2 + $0x140] sm:$0xff] %v1342_v5  ;;  %v1345_v51 = vmax.f32 %v11926_v62, 0.0  ;;  %v11936_v52 = vadd.f32 %v11712_v6, %v1023_v49  ;;  %10701 = vmatpush3.msra.mxu0 %v8683_v4  ;;  %v11965_v13 = vld [vmem:[%s16533_s2] ss:$0 sm:$0xff]  ;;  %v2416_v35 = vld [vmem:[%s16534_s3 + $0x18] sm:$0xff]  ;;  %v8679_v61 = vld [vmem:[%s16534_s3 + $0x2c8] sm:$0xff] }
 0x145   : > { %v10217_v26 = vpop.f32.mrf.mxu0  ;;  %10702 = vmatprep.subr.mxu0 %v8682_v41  ;;  %v1723_v18 = vmax.f32 %v1337_v45, %v1628_v0  ;;  %10396 = vmatprep.subr.mxu1 %v2418_v59  ;;  %v1724_v37 = vmax.f32 %v1338_v1, %v1629_v63  ;;  %v8678_v1 = vld [vmem:[%s16534_s3 + $0x2c0] sm:$0xff]  ;;  %v2415_v56 = vld [vmem:[%s16534_s3 + $0x10] sm:$0xff]  ;;  %v8677_v46 = vld [vmem:[%s16534_s3 + $0x2b8] sm:$0xff] }
 0x146   : > { %2193 = vst [vmem:[#allocation3 + $0xf0] sm:$0xff] %v2098_v21  ;;  %2194 = vst [vmem:[#allocation3 + $0xf8] sm:$0xff] %v2099_v47  ;;  %v2439_v53 = vld [vmem:[#allocation4 + $0x60] sm:$0xff]  ;;  %v1344_v40 = vmax.f32 %v11936_v52, 0.0  ;;  %v11945_v36 = vadd.f32 %v10217_v26, %v11712_v6  ;;  %v8680_v6 = vld [vmem:[%s16534_s3 + $0x2d0] sm:$0xff]  ;;  %10703 = vmatpush3.msra.mxu0 %v8682_v41  ;;  %10397 = vmatpush3.msra.mxu1 %v2418_v59 }
 0x147   : > { %v3242_v55 = vld [vmem:[#allocation4 + $0x5f] sm:$0xff]  ;;  %1443 = vst [vmem:[#allocation2 + $0x158] sm:$0xff] %v1345_v51  ;;  %10343 = vmatprep.mubr.f32.mxu1 %v2439_v53  ;;  %v1033_v3 = vpop.f32.mrf.mxu0  ;;  %v1818_v8 = vld [vmem:[#allocation2 + $0x134] sm:$0xff]  ;;  %10704 = vmatprep.subr.mxu0 %v8681_v60  ;;  %v1630_v29 = vld [vmem:[#allocation2 + $0x129] sm:$0xff] }
 0x148   : > { %10580 = vmatprep.mubr.f32.mxu0 %v3242_v55  ;;  %v1913_v9 = vld [vmem:[#allocation2 + $0x135] sm:$0xff]  ;;  %1442 = vst [vmem:[#allocation2 + $0x150] sm:$0xff] %v1344_v40  ;;  %v1347_v10 = vmax.f32 %v11945_v36, 0.0  ;;  %v11968_v14 = vadd.f32 %v11965_v13, %v1033_v3  ;;  %v2440_v54 = vld [vmem:[#allocation4 + $0x68] sm:$0xff]  ;;  %10705 = vmatpush3.msra.mxu0 %v8681_v60  ;;  %v1725_v30 = vmax.f32 %v1339_v20, %v1630_v29  ;;  %v2413_v0 = vld [vmem:[%s16534_s3] sm:$0xff] }
 0x149   : > { %v2008_v22 = vmax.f32 %v1818_v8, %v1913_v9  ;;  %v3243_v34 = vld [vmem:[#allocation4 + $0x67] sm:$0xff]  ;;  %v10220_v23 = vpop.f32.mrf.mxu0  ;;  %v2322_v27 = vld [vmem:[#allocation3 + $0xe0] ss:$2 sm:$0xff]  ;;  %10344 = vmatmul.mubr.f32.gmra.mxu1 %v2440_v54  ;;  %10398 = vmatprep.subr.mxu1 %v2417_v7 }
 0x14a   : > { %1445 = vst [vmem:[#allocation2 + $0x168] sm:$0xff] %v1347_v10  ;;  %v1346_v31 = vmax.f32 %v11968_v14, 0.0  ;;  %10581 = vmatmul.mubr.f32.gmra.mxu0 %v3243_v34  ;;  %v1049_v32 = vadd.f32 %v11965_v13, %v10220_v23  ;;  %2325 = vst [vmem:[#allocation4 + $0x71] sm:$0xff] %v2322_v27  ;;  %v1631_v11 = vld [vmem:[#allocation2 + $0x131] sm:$0xff]  ;;  %10706 = vmatprep.subr.mxu0 %v8680_v6  ;;  %v2414_v5 = vld [vmem:[%s16534_s3 + $0x8] sm:$0xff] }
 0x14b   : > { %v2103_v45 = vmax.f32 %v1723_v18, %v2008_v22  ;;  %v1819_v33 = vld [vmem:[#allocation2 + $0x13c] sm:$0xff]  ;;  %v1043_v57 = vpop.f32.mrf.mxu0  ;;  %v1820_v38 = vld [vmem:[#allocation2 + $0x144] sm:$0xff]  ;;  %10399 = vmatpush3.msra.mxu1 %v2417_v7  ;;  %10707 = vmatpush3.msra.mxu0 %v8680_v6  ;;  %v1726_v4 = vmax.f32 %v1340_v58, %v1631_v11  ;;  %v8676_v41 = vld [vmem:[%s16534_s3 + $0x2b0] sm:$0xff] }
 0x14c   : > { %v1914_v39 = vld [vmem:[#allocation2 + $0x13d] sm:$0xff]  ;;  %v1915_v42 = vld [vmem:[#allocation2 + $0x145] sm:$0xff]  ;;  %1444 = vst [vmem:[#allocation2 + $0x160] sm:$0xff] %v1346_v31  ;;  %v1349_v43 = vmax.f32 %v1049_v32, 0.0  ;;  %v1044_v28 = vadd.f32 %v11965_v13, %v1043_v57  ;;  %10400 = vmatprep.subr.mxu1 %v2416_v35  ;;  %10708 = vmatprep.subr.mxu0 %v8679_v61 }
 0x14d   : > { %2198 = vst [vmem:[#allocation3 + $0x118] sm:$0xff] %v2103_v45  ;;  %v2009_v16 = vmax.f32 %v1819_v33, %v1914_v39  ;;  %v2010_v19 = vmax.f32 %v1820_v38, %v1915_v42  ;;  %v10223_v44 = vpop.f32.mrf.mxu0  ;;  %v2324_v24 = vld [vmem:[#allocation3 + $0xf0] ss:$2 sm:$0x3f]  ;;  %10401 = vmatpush3.msra.mxu1 %v2416_v35  ;;  %10709 = vmatpush3.msra.mxu0 %v8679_v61  ;;  %v8637_v23 = vld [vmem:[%s16534_s3 + $0x178] sm:$0xff] }
 0x14e   : > { %1447 = vst [vmem:[#allocation2 + $0x178] sm:$0xff] %v1349_v43  ;;  %v1348_v2 = vmax.f32 %v1044_v28, 0.0  ;;  %v11996_v25 = vadd.f32 %v11965_v13, %v10223_v44  ;;  %2326 = vst [vmem:[#allocation4 + $0x79] sm:$0x3f] %v2324_v24  ;;  %10710 = vmatprep.subr.mxu0 %v8678_v1  ;;  %10402 = vmatprep.subr.mxu1 %v2415_v56  ;;  %v8675_v9 = vld [vmem:[%s16534_s3 + $0x2a8] sm:$0xff]  ;;  %v8674_v32 = vld [vmem:[%s16534_s3 + $0x2a0] sm:$0xff] }
 0x14f   : > { %v2104_v20 = vmax.f32 %v1724_v37, %v2009_v16  ;;  %v2105_v48 = vmax.f32 %v1725_v30, %v2010_v19  ;;  %v1821_v12 = vld [vmem:[#allocation2 + $0x14c] sm:$0xff]  ;;  %v1053_v15 = vpop.f32.mrf.mxu0  ;;  %10711 = vmatpush3.msra.mxu0 %v8678_v1  ;;  %10403 = vmatpush3.msra.mxu1 %v2415_v56  ;;  %v8673_v28 = vld [vmem:[%s16534_s3 + $0x298] sm:$0xff] }
 0x150   : > { %v1916_v21 = vld [vmem:[#allocation2 + $0x14d] sm:$0xff]  ;;  %1446 = vst [vmem:[#allocation2 + $0x170] sm:$0xff] %v1348_v2  ;;  %v1351_v47 = vmax.f32 %v11996_v25, 0.0  ;;  %v1054_v49 = vadd.f32 %v11965_v13, %v1053_v15  ;;  %10712 = vmatprep.subr.mxu0 %v8677_v46  ;;  %10404 = vmatprep.subr.mxu1 %v2414_v5 }
 0x151   : > { %2199 = vst [vmem:[#allocation3 + $0x120] sm:$0xff] %v2104_v20  ;;  %2200 = vst [vmem:[#allocation3 + $0x128] sm:$0xff] %v2105_v48  ;;  %v2011_v50 = vmax.f32 %v1821_v12, %v1916_v21  ;;  %v2441_v53 = vld [vmem:[#allocation4 + $0x70] sm:$0xff]  ;;  %v10226_v26 = vpop.f32.mrf.mxu0  ;;  %10713 = vmatpush3.msra.mxu0 %v8677_v46  ;;  %10405 = vmatpush3.msra.mxu1 %v2414_v5 }
 0x152   : > { %v3244_v55 = vld [vmem:[#allocation4 + $0x6f] sm:$0xff]  ;;  %1449 = vst [vmem:[#allocation2 + $0x188] sm:$0xff] %v1351_v47  ;;  %v1350_v17 = vmax.f32 %v1054_v49, 0.0  ;;  %10346 = vmatprep.mubr.f32.mxu1 %v2441_v53  ;;  %v12011_v58 = vadd.f32 %v11965_v13, %v10226_v26  ;;  %10714 = vmatprep.subr.mxu0 %v8676_v41 }
 0x153   : > { %10583 = vmatprep.mubr.f32.mxu0 %v3244_v55  ;;  %v2106_v59 = vmax.f32 %v1726_v4, %v2011_v50  ;;  %v1063_v60 = vpop.f32.mrf.mxu0  ;;  %10406 = vmatprep.subr.mxu1 %v2413_v0  ;;  %v1635_v18 = vld [vmem:[#allocation2 + $0x151] sm:$0xff]  ;;  %v1636_v22 = vld [vmem:[#allocation2 + $0x159] sm:$0xff]  ;;  %v1637_v30 = vld [vmem:[#allocation2 + $0x161] sm:$0xff] }
 0x154   : > { %1448 = vst [vmem:[#allocation2 + $0x180] sm:$0xff] %v1350_v17  ;;  %v1353_v63 = vmax.f32 %v12011_v58, 0.0  ;;  %v12021_v3 = vadd.f32 %v11965_v13, %v1063_v60  ;;  %10715 = vmatpush3.msra.mxu0 %v8676_v41  ;;  %10407 = vmatpush3.msra.mxu1 %v2413_v0  ;;  %v1730_v61 = vmax.f32 %v1344_v40, %v1635_v18  ;;  %v8672_v24 = vld [vmem:[%s16534_s3 + $0x290] sm:$0xff]  ;;  %v8671_v49 = vld [vmem:[%s16534_s3 + $0x288] sm:$0xff] }
 0x155   : > { %2201 = vst [vmem:[#allocation3 + $0x130] sm:$0xff] %v2106_v59  ;;  %v2442_v7 = vld [vmem:[#allocation4 + $0x78] sm:$0xff]  ;;  %v10229_v8 = vpop.f32.mrf.mxu0  ;;  %10716 = vmatprep.subr.mxu0 %v8675_v9  ;;  %10456 = vmatprep.subr.mxu1 %v8637_v23  ;;  %v1731_v37 = vmax.f32 %v1345_v51, %v1636_v22  ;;  %v1732_v12 = vmax.f32 %v1346_v31, %v1637_v30  ;;  %v8670_v31 = vld [vmem:[%s16534_s3 + $0x280] sm:$0xff] }
 0x156   : > { %v3245_v6 = vld [vmem:[#allocation4 + $0x77] sm:$0xff]  ;;  %1451 = vst [vmem:[#allocation2 + $0x198] sm:$0xff] %v1353_v63  ;;  %v1352_v54 = vmax.f32 %v12021_v3, 0.0  ;;  %10347 = vmatmul.mubr.f32.gmra.mxu1 %v2442_v7  ;;  %v1079_v34 = vadd.f32 %v11965_v13, %v10229_v8  ;;  %10717 = vmatpush3.msra.mxu0 %v8675_v9 }
 0x157   : > { %10584 = vmatmul.mubr.f32.gmra.mxu0 %v3245_v6  ;;  %v1825_v27 = vld [vmem:[#allocation2 + $0x16c] sm:$0xff]  ;;  %v1073_v29 = vpop.f32.mrf.mxu0  ;;  %v1826_v11 = vld [vmem:[#allocation2 + $0x174] sm:$0xff]  ;;  %10718 = vmatprep.subr.mxu0 %v8674_v32 }
 0x158   : > { %v1920_v45 = vld [vmem:[#allocation2 + $0x16d] sm:$0xff]  ;;  %v1921_v33 = vld [vmem:[#allocation2 + $0x175] sm:$0xff]  ;;  %1450 = vst [vmem:[#allocation2 + $0x190] sm:$0xff] %v1352_v54  ;;  %v1355_v57 = vmax.f32 %v1079_v34, 0.0  ;;  %v12039_v35 = vadd.f32 %v11965_v13, %v1073_v29  ;;  %10719 = vmatpush3.msra.mxu0 %v8674_v32 }
 0x159   : > { %v2015_v38 = vmax.f32 %v1825_v27, %v1920_v45  ;;  %v2016_v39 = vmax.f32 %v1826_v11, %v1921_v33  ;;  %v10232_v42 = vpop.f32.mrf.mxu0  ;;  %v2328_v43 = vld [vmem:[#allocation3 + $0x118] ss:$2 sm:$0xff]  ;;  %10720 = vmatprep.subr.mxu0 %v8673_v28 }
 0x15a   : > { %v1638_v16 = vld [vmem:[#allocation2 + $0x169] sm:$0xff]  ;;  %1453 = vst [vmem:[#allocation2 + $0x1a8] sm:$0xff] %v1355_v57  ;;  %v1354_v19 = vmax.f32 %v12039_v35, 0.0  ;;  %v1089_v52 = vadd.f32 %v11965_v13, %v10232_v42  ;;  %2331 = vst [vmem:[#allocation4 + $0x81] sm:$0xff] %v2328_v43  ;;  %10721 = vmatpush3.msra.mxu0 %v8673_v28 }
 0x15b   : > { %v2110_v62 = vmax.f32 %v1730_v61, %v2015_v38  ;;  %v2111_v51 = vmax.f32 %v1731_v37, %v2016_v39  ;;  %v1827_v40 = vld [vmem:[#allocation2 + $0x17c] sm:$0xff]  ;;  %v1083_v44 = vpop.f32.mrf.mxu0  ;;  %v1828_v1 = vld [vmem:[#allocation2 + $0x184] sm:$0xff]  ;;  %v1733_v15 = vmax.f32 %v1347_v10, %v1638_v16  ;;  %10722 = vmatprep.subr.mxu0 %v8672_v24 }
 0x15c   : > { %v1922_v56 = vld [vmem:[#allocation2 + $0x17d] sm:$0xff]  ;;  %v1923_v2 = vld [vmem:[#allocation2 + $0x185] sm:$0xff]  ;;  %1452 = vst [vmem:[#allocation2 + $0x1a0] sm:$0xff] %v1354_v19  ;;  %v1357_v20 = vmax.f32 %v1089_v52, 0.0  ;;  %v1084_v48 = vadd.f32 %v11965_v13, %v1083_v44  ;;  %10723 = vmatpush3.msra.mxu0 %v8672_v24 }
 0x15d   : > { %2205 = vst [vmem:[#allocation3 + $0x150] sm:$0xff] %v2110_v62  ;;  %2206 = vst [vmem:[#allocation3 + $0x158] sm:$0xff] %v2111_v51  ;;  %v2017_v46 = vmax.f32 %v1827_v40, %v1922_v56  ;;  %v2018_v5 = vmax.f32 %v1828_v1, %v1923_v2  ;;  %v10235_v4 = vpop.f32.mrf.mxu0  ;;  %v2330_v21 = vld [vmem:[#allocation3 + $0x128] ss:$2 sm:$0x3f]  ;;  %10724 = vmatprep.subr.mxu0 %v8671_v49 }
 0x15e   : > { %1455 = vst [vmem:[#allocation2 + $0x1b8] sm:$0xff] %v1357_v20  ;;  %v1356_v50 = vmax.f32 %v1084_v48, 0.0  ;;  %v12064_v53 = vadd.f32 %v11965_v13, %v10235_v4  ;;  %2332 = vst [vmem:[#allocation4 + $0x89] sm:$0x3f] %v2330_v21  ;;  %10725 = vmatpush3.msra.mxu0 %v8671_v49 }
 0x15f   : > { %v2112_v36 = vmax.f32 %v1732_v12, %v2017_v46  ;;  %v2113_v10 = vmax.f32 %v1733_v15, %v2018_v5  ;;  %v1093_v14 = vpop.f32.mrf.mxu0  ;;  %v1642_v59 = vld [vmem:[#allocation2 + $0x189] sm:$0xff]  ;;  %10726 = vmatprep.subr.mxu0 %v8670_v31  ;;  %v1643_v45 = vld [vmem:[#allocation2 + $0x191] sm:$0xff] }
 0x160   : > { %1454 = vst [vmem:[#allocation2 + $0x1b0] sm:$0xff] %v1356_v50  ;;  %v1359_v55 = vmax.f32 %v12064_v53, 0.0  ;;  %v12071_v26 = vadd.f32 %v11965_v13, %v1093_v14  ;;  %10727 = vmatpush3.msra.mxu0 %v8670_v31  ;;  %v1737_v34 = vmax.f32 %v1351_v47, %v1642_v59  ;;  %v1738_v30 = vmax.f32 %v1352_v54, %v1643_v45 }
 0x161   : > { %2207 = vst [vmem:[#allocation3 + $0x160] sm:$0xff] %v2112_v36  ;;  %2208 = vst [vmem:[#allocation3 + $0x168] sm:$0xff] %v2113_v10  ;;  %v2443_v17 = vld [vmem:[#allocation4 + $0x80] sm:$0xff]  ;;  %v10238_v0 = vpop.f32.mrf.mxu0 }
 0x162   : > { %v3246_v41 = vld [vmem:[#allocation4 + $0x7f] sm:$0xff]  ;;  %1457 = vst [vmem:[#allocation2 + $0x1c8] sm:$0xff] %v1359_v55  ;;  %v1358_v60 = vmax.f32 %v12071_v26, 0.0  ;;  %10349 = vmatprep.mubr.f32.mxu1 %v2443_v17  ;;  %v12077_v7 = vadd.f32 %v11965_v13, %v10238_v0 }
 0x163   : > { %10586 = vmatprep.mubr.f32.mxu0 %v3246_v41  ;;  %v1103_v6 = vpop.f32.mrf.mxu0  ;;  %v1832_v8 = vld [vmem:[#allocation2 + $0x1a4] sm:$0xff]  ;;  %v1644_v33 = vld [vmem:[#allocation2 + $0x199] sm:$0xff] }
 0x164   : > { %v1927_v9 = vld [vmem:[#allocation2 + $0x1a5] sm:$0xff]  ;;  %1456 = vst [vmem:[#allocation2 + $0x1c0] sm:$0xff] %v1358_v60  ;;  %v1361_v18 = vmax.f32 %v12077_v7, 0.0  ;;  %v12083_v22 = vadd.f32 %v11965_v13, %v1103_v6  ;;  %v1739_v16 = vmax.f32 %v1353_v63, %v1644_v33 }
 0x165   : > { %v2022_v23 = vmax.f32 %v1832_v8, %v1927_v9  ;;  %v2444_v27 = vld [vmem:[#allocation4 + $0x88] sm:$0xff]  ;;  %v10241_v32 = vpop.f32.mrf.mxu0 }
 0x166   : > { %v3247_v29 = vld [vmem:[#allocation4 + $0x87] sm:$0xff]  ;;  %1459 = vst [vmem:[#allocation2 + $0x1d8] sm:$0xff] %v1361_v18  ;;  %v1360_v57 = vmax.f32 %v12083_v22, 0.0  ;;  %10350 = vmatmul.mubr.f32.gmra.mxu1 %v2444_v27  ;;  %v1119_v61 = vadd.f32 %v11965_v13, %v10241_v32  ;;  %v12142_v22 = vld [vmem:[%s16534_s3 + $0x3f8] sm:$0xff] }
 0x167   : > { %v2334_v11 = vld [vmem:[#allocation3 + $0x150] ss:$2 sm:$0xff]  ;;  %10587 = vmatmul.mubr.f32.gmra.mxu0 %v3247_v29  ;;  %v2117_v37 = vmax.f32 %v1737_v34, %v2022_v23  ;;  %v1113_v47 = vpop.f32.mrf.mxu0  ;;  %v1834_v38 = vld [vmem:[#allocation2 + $0x1b4] sm:$0xff]  ;;  %10856 = vmatprep.subr.mxu0 %v12142_v22 }
 0x168   : > { %2337 = vst [vmem:[#allocation4 + $0x91] sm:$0xff] %v2334_v11  ;;  %v1833_v25 = vld [vmem:[#allocation2 + $0x1ac] sm:$0xff]  ;;  %v1929_v42 = vld [vmem:[#allocation2 + $0x1b5] sm:$0xff]  ;;  %1458 = vst [vmem:[#allocation2 + $0x1d0] sm:$0xff] %v1360_v57  ;;  %v1363_v43 = vmax.f32 %v1119_v61, 0.0  ;;  %v1114_v28 = vadd.f32 %v11965_v13, %v1113_v47 }
 0x169   : > { %v1928_v39 = vld [vmem:[#allocation2 + $0x1ad] sm:$0xff]  ;;  %2212 = vst [vmem:[#allocation3 + $0x188] sm:$0xff] %v2117_v37  ;;  %v2024_v62 = vmax.f32 %v1834_v38, %v1929_v42  ;;  %v10244_v51 = vpop.f32.mrf.mxu0  ;;  %v1645_v44 = vld [vmem:[#allocation2 + $0x1a1] sm:$0xff] }
 0x16a   : > { %v2023_v52 = vmax.f32 %v1833_v25, %v1928_v39  ;;  %v2336_v40 = vld [vmem:[#allocation3 + $0x160] ss:$2 sm:$0x3f]  ;;  %1461 = vst [vmem:[#allocation2 + $0x1e8] sm:$0xff] %v1363_v43  ;;  %v1362_v24 = vmax.f32 %v1114_v28, 0.0  ;;  %v12099_v1 = vadd.f32 %v11965_v13, %v10244_v51  ;;  %v1740_v48 = vmax.f32 %v1354_v19, %v1645_v44 }
 0x16b   : > { %2338 = vst [vmem:[#allocation4 + $0x99] sm:$0x3f] %v2336_v40  ;;  %v2119_v2 = vmax.f32 %v1739_v16, %v2024_v62  ;;  %v1835_v20 = vld [vmem:[#allocation2 + $0x1bc] sm:$0xff]  ;;  %v1123_v3 = vpop.f32.mrf.mxu0 }
 0x16c   : > { %v2118_v56 = vmax.f32 %v1738_v30, %v2023_v52  ;;  %v1930_v54 = vld [vmem:[#allocation2 + $0x1bd] sm:$0xff]  ;;  %1460 = vst [vmem:[#allocation2 + $0x1e0] sm:$0xff] %v1362_v24  ;;  %v1365_v58 = vmax.f32 %v12099_v1, 0.0  ;;  %v1124_v63 = vadd.f32 %v11965_v13, %v1123_v3 }
 0x16d   : > { %2214 = vst [vmem:[#allocation3 + $0x198] sm:$0xff] %v2119_v2  ;;  %v2025_v12 = vmax.f32 %v1835_v20, %v1930_v54  ;;  %v10247_v5 = vpop.f32.mrf.mxu0  ;;  %v1649_v31 = vld [vmem:[#allocation2 + $0x1c1] sm:$0xff] }
 0x16e   : > { %2213 = vst [vmem:[#allocation3 + $0x190] sm:$0xff] %v2118_v56  ;;  %1463 = vst [vmem:[#allocation2 + $0x1f8] sm:$0xff] %v1365_v58  ;;  %v1364_v4 = vmax.f32 %v1124_v63, 0.0  ;;  %v12108_v21 = vadd.f32 %v11965_v13, %v10247_v5  ;;  %v1744_v29 = vmax.f32 %v1358_v60, %v1649_v31 }
 0x16f   : > { %v2445_v15 = vld [vmem:[#allocation4 + $0x90] sm:$0xff]  ;;  %v2120_v49 = vmax.f32 %v1740_v48, %v2025_v12  ;;  %v1133_v50 = vpop.f32.mrf.mxu0 }
 0x170   : > { %v3248_v46 = vld [vmem:[#allocation4 + $0x8f] sm:$0xff]  ;;  %10352 = vmatprep.mubr.f32.mxu1 %v2445_v15  ;;  %1462 = vst [vmem:[#allocation2 + $0x1f0] sm:$0xff] %v1364_v4  ;;  %v1367_v35 = vmax.f32 %v12108_v21, 0.0  ;;  %v12112_v19 = vadd.f32 %v11965_v13, %v1133_v50 }
 0x171   : > { %10589 = vmatprep.mubr.f32.mxu0 %v3248_v46  ;;  %2215 = vst [vmem:[#allocation3 + $0x1a0] sm:$0xff] %v2120_v49  ;;  %v10250_v14 = vpop.f32.mrf.mxu0  ;;  %v1650_v17 = vld [vmem:[#allocation2 + $0x1c9] sm:$0xff]  ;;  %v1651_v37 = vld [vmem:[#allocation2 + $0x1d1] sm:$0xff] }
 0x172   : > { %v2446_v36 = vld [vmem:[#allocation4 + $0x98] sm:$0xff]  ;;  %1465 = vst [vmem:[#allocation2 + $0x208] sm:$0xff] %v1367_v35  ;;  %v1366_v41 = vmax.f32 %v12112_v19, 0.0  ;;  %v1149_v0 = vadd.f32 %v11965_v13, %v10250_v14  ;;  %v1745_v32 = vmax.f32 %v1359_v55, %v1650_v17  ;;  %v1746_v16 = vmax.f32 %v1360_v57, %v1651_v37 }
 0x173   : > { %v3249_v10 = vld [vmem:[#allocation4 + $0x97] sm:$0xff]  ;;  %10353 = vmatmul.mubr.f32.gmra.mxu1 %v2446_v36  ;;  %v1143_v6 = vpop.f32.mrf.mxu0  ;;  %v1840_v8 = vld [vmem:[#allocation2 + $0x1e4] sm:$0xff] }
 0x174   : > { %10590 = vmatmul.mubr.f32.gmra.mxu0 %v3249_v10  ;;  %v1839_v59 = vld [vmem:[#allocation2 + $0x1dc] sm:$0xff]  ;;  %v1935_v34 = vld [vmem:[#allocation2 + $0x1e5] sm:$0xff]  ;;  %1464 = vst [vmem:[#allocation2 + $0x200] sm:$0xff] %v1366_v41  ;;  %v1369_v23 = vmax.f32 %v1149_v0, 0.0  ;;  %v12121_v27 = vadd.f32 %v11965_v13, %v1143_v6 }
 0x175   : > { %v1934_v9 = vld [vmem:[#allocation2 + $0x1dd] sm:$0xff]  ;;  %v2030_v45 = vmax.f32 %v1840_v8, %v1935_v34  ;;  %v10253_v33 = vpop.f32.mrf.mxu0 }
 0x176   : > { %v2029_v11 = vmax.f32 %v1839_v59, %v1934_v9  ;;  %v2340_v61 = vld [vmem:[#allocation3 + $0x188] ss:$2 sm:$0xff]  ;;  %1467 = vst [vmem:[#allocation2 + $0x218] sm:$0xff] %v1369_v23  ;;  %v1368_v47 = vmax.f32 %v12121_v27, 0.0  ;;  %v1159_v38 = vadd.f32 %v11965_v13, %v10253_v33 }
 0x177   : > { %v1652_v25 = vld [vmem:[#allocation2 + $0x1d9] sm:$0xff]  ;;  %2343 = vst [vmem:[#allocation4 + $0xa1] sm:$0xff] %v2340_v61  ;;  %v2125_v42 = vmax.f32 %v1745_v32, %v2030_v45  ;;  %v1841_v43 = vld [vmem:[#allocation2 + $0x1ec] sm:$0xff]  ;;  %v1153_v26 = vpop.f32.mrf.mxu0 }
 0x178   : > { %v2124_v39 = vmax.f32 %v1744_v29, %v2029_v11  ;;  %v1842_v60 = vld [vmem:[#allocation2 + $0x1f4] sm:$0xff]  ;;  %1466 = vst [vmem:[#allocation2 + $0x210] sm:$0xff] %v1368_v47  ;;  %v1371_v55 = vmax.f32 %v1159_v38, 0.0  ;;  %v1154_v30 = vadd.f32 %v11965_v13, %v1153_v26  ;;  %v1747_v52 = vmax.f32 %v1361_v18, %v1652_v25  ;;  %v2342_v44 = vld [vmem:[#allocation3 + $0x198] ss:$2 sm:$0x3f] }
 0x179   : > { %v1936_v28 = vld [vmem:[#allocation2 + $0x1ed] sm:$0xff]  ;;  %v1937_v53 = vld [vmem:[#allocation2 + $0x1f5] sm:$0xff]  ;;  %2220 = vst [vmem:[#allocation3 + $0x1c8] sm:$0xff] %v2125_v42  ;;  %v10256_v40 = vpop.f32.mrf.mxu0  ;;  %2344 = vst [vmem:[#allocation4 + $0xa9] sm:$0x3f] %v2342_v44 }
 0x17a   : > { %2219 = vst [vmem:[#allocation3 + $0x1c0] sm:$0xff] %v2124_v39  ;;  %v2031_v62 = vmax.f32 %v1841_v43, %v1936_v28  ;;  %v2032_v51 = vmax.f32 %v1842_v60, %v1937_v53  ;;  %1469 = vst [vmem:[#allocation2 + $0x228] sm:$0xff] %v1371_v55  ;;  %v1370_v24 = vmax.f32 %v1154_v30, 0.0  ;;  %v12137_v56 = vadd.f32 %v11965_v13, %v10256_v40 }
 0x17b   : > { %v1163_v18 = vpop.f32.mrf.mxu0  ;;  %v1656_v48 = vld [vmem:[#allocation2 + $0x1f9] sm:$0xff]  ;;  %v1657_v59 = vld [vmem:[#allocation2 + $0x201] sm:$0xff] }
 0x17c   : > { %v2126_v57 = vmax.f32 %v1746_v16, %v2031_v62  ;;  %v2127_v7 = vmax.f32 %v1747_v52, %v2032_v51  ;;  %1468 = vst [vmem:[#allocation2 + $0x220] sm:$0xff] %v1370_v24  ;;  %v1373_v2 = vmax.f32 %v12137_v56, 0.0  ;;  %v12147_v20 = vadd.f32 %v11965_v13, %v1163_v18 }
 0x17d   : > { %v10259_v63 = vpop.f32.mrf.mxu0  ;;  %v1751_v36 = vmax.f32 %v1365_v58, %v1656_v48  ;;  %v1752_v33 = vmax.f32 %v1366_v41, %v1657_v59 }
 0x17e   : > { %2221 = vst [vmem:[#allocation3 + $0x1d0] sm:$0xff] %v2126_v57  ;;  %2222 = vst [vmem:[#allocation3 + $0x1d8] sm:$0xff] %v2127_v7  ;;  %v2447_v3 = vld [vmem:[#allocation4 + $0xa0] sm:$0xff]  ;;  %v1372_v12 = vmax.f32 %v12147_v20, 0.0  ;;  %v12153_v15 = vadd.f32 %v11965_v13, %v10259_v63 }
 0x17f   : > { %v3250_v54 = vld [vmem:[#allocation4 + $0x9f] sm:$0xff]  ;;  %1471 = vst [vmem:[#allocation2 + $0x238] sm:$0xff] %v1373_v2  ;;  %10355 = vmatprep.mubr.f32.mxu1 %v2447_v3  ;;  %v1173_v46 = vpop.f32.mrf.mxu0  ;;  %v1846_v5 = vld [vmem:[#allocation2 + $0x214] sm:$0xff]  ;;  %v1658_v6 = vld [vmem:[#allocation2 + $0x209] sm:$0xff] }
 0x180   : > { %10592 = vmatprep.mubr.f32.mxu0 %v3250_v54  ;;  %v1941_v4 = vld [vmem:[#allocation2 + $0x215] sm:$0xff]  ;;  %1470 = vst [vmem:[#allocation2 + $0x230] sm:$0xff] %v1372_v12  ;;  %v1375_v49 = vmax.f32 %v12153_v15, 0.0  ;;  %v12159_v50 = vadd.f32 %v11965_v13, %v1173_v46  ;;  %v2448_v14 = vld [vmem:[#allocation4 + $0xa8] sm:$0xff]  ;;  %v1753_v61 = vmax.f32 %v1367_v35, %v1658_v6 }
 0x181   : > { %v2036_v10 = vmax.f32 %v1846_v5, %v1941_v4  ;;  %v3251_v31 = vld [vmem:[#allocation4 + $0xa7] sm:$0xff]  ;;  %v10262_v17 = vpop.f32.mrf.mxu0  ;;  %v2346_v0 = vld [vmem:[#allocation3 + $0x1c0] ss:$2 sm:$0xff]  ;;  %10356 = vmatmul.mubr.f32.gmra.mxu1 %v2448_v14 }
 0x182   : > { %1473 = vst [vmem:[#allocation2 + $0x248] sm:$0xff] %v1375_v49  ;;  %v1374_v8 = vmax.f32 %v12159_v50, 0.0  ;;  %10593 = vmatmul.mubr.f32.gmra.mxu0 %v3251_v31  ;;  %v1189_v9 = vadd.f32 %v11965_v13, %v10262_v17  ;;  %2349 = vst [vmem:[#allocation4 + $0xb1] sm:$0xff] %v2346_v0  ;;  %v1659_v42 = vld [vmem:[#allocation2 + $0x211] sm:$0xff]  ;;  %v12202_v31 = vld [vmem:[%s16533_s2] ss:$0 sm:$0xff] }
 0x183   : > { %v2131_v34 = vmax.f32 %v1751_v36, %v2036_v10  ;;  %v1847_v1 = vld [vmem:[#allocation2 + $0x21c] sm:$0xff]  ;;  %v1183_v58 = vpop.f32.mrf.mxu0  ;;  %v1848_v23 = vld [vmem:[#allocation2 + $0x224] sm:$0xff]  ;;  %v1754_v55 = vmax.f32 %v1368_v47, %v1659_v42 }
 0x184   : > { %v1942_v29 = vld [vmem:[#allocation2 + $0x21d] sm:$0xff]  ;;  %v1943_v32 = vld [vmem:[#allocation2 + $0x225] sm:$0xff]  ;;  %1472 = vst [vmem:[#allocation2 + $0x240] sm:$0xff] %v1374_v8  ;;  %v1377_v11 = vmax.f32 %v1189_v9, 0.0  ;;  %v1184_v45 = vadd.f32 %v11965_v13, %v1183_v58 }
 0x185   : > { %2226 = vst [vmem:[#allocation3 + $0x1f8] sm:$0xff] %v2131_v34  ;;  %v2037_v37 = vmax.f32 %v1847_v1, %v1942_v29  ;;  %v2038_v25 = vmax.f32 %v1848_v23, %v1943_v32  ;;  %v10265_v38 = vpop.f32.mrf.mxu0  ;;  %v2348_v39 = vld [vmem:[#allocation3 + $0x1d0] ss:$2 sm:$0x3f] }
 0x186   : > { %1475 = vst [vmem:[#allocation2 + $0x258] sm:$0xff] %v1377_v11  ;;  %v1376_v43 = vmax.f32 %v1184_v45, 0.0  ;;  %v12175_v26 = vadd.f32 %v11965_v13, %v10265_v38  ;;  %2350 = vst [vmem:[#allocation4 + $0xb9] sm:$0x3f] %v2348_v39 }
 0x187   : > { %v2132_v60 = vmax.f32 %v1752_v33, %v2037_v37  ;;  %v2133_v28 = vmax.f32 %v1753_v61, %v2038_v25  ;;  %v1849_v53 = vld [vmem:[#allocation2 + $0x22c] sm:$0xff]  ;;  %v1193_v19 = vpop.f32.mrf.mxu0 }
 0x188   : > { %v1944_v41 = vld [vmem:[#allocation2 + $0x22d] sm:$0xff]  ;;  %1474 = vst [vmem:[#allocation2 + $0x250] sm:$0xff] %v1376_v43  ;;  %v1379_v21 = vmax.f32 %v12175_v26, 0.0  ;;  %v1194_v35 = vadd.f32 %v11965_v13, %v1193_v19 }
 0x189   : > { %2227 = vst [vmem:[#allocation3 + $0x200] sm:$0xff] %v2132_v60  ;;  %2228 = vst [vmem:[#allocation3 + $0x208] sm:$0xff] %v2133_v28  ;;  %v2039_v30 = vmax.f32 %v1849_v53, %v1944_v41  ;;  %v2449_v16 = vld [vmem:[#allocation4 + $0xb0] sm:$0xff]  ;;  %v10268_v62 = vpop.f32.mrf.mxu0 }
 0x18a   : > { %v3252_v52 = vld [vmem:[#allocation4 + $0xaf] sm:$0xff]  ;;  %1477 = vst [vmem:[#allocation2 + $0x268] sm:$0xff] %v1379_v21  ;;  %v1378_v51 = vmax.f32 %v1194_v35, 0.0  ;;  %10358 = vmatprep.mubr.f32.mxu1 %v2449_v16  ;;  %v12184_v40 = vadd.f32 %v11965_v13, %v10268_v62 }
 0x18b   : > { %10595 = vmatprep.mubr.f32.mxu0 %v3252_v52  ;;  %v2134_v44 = vmax.f32 %v1754_v55, %v2039_v30  ;;  %v1203_v24 = vpop.f32.mrf.mxu0  ;;  %v1663_v3 = vld [vmem:[#allocation2 + $0x231] sm:$0xff]  ;;  %v1664_v54 = vld [vmem:[#allocation2 + $0x239] sm:$0xff]  ;;  %v1665_v1 = vld [vmem:[#allocation2 + $0x241] sm:$0xff] }
 0x18c   : > { %1476 = vst [vmem:[#allocation2 + $0x260] sm:$0xff] %v1378_v51  ;;  %v1381_v27 = vmax.f32 %v12184_v40, 0.0  ;;  %v12188_v47 = vadd.f32 %v11965_v13, %v1203_v24  ;;  %v1759_v0 = vmax.f32 %v1373_v2, %v1664_v54  ;;  %v1760_v37 = vmax.f32 %v1374_v8, %v1665_v1 }
 0x18d   : > { %2229 = vst [vmem:[#allocation3 + $0x210] sm:$0xff] %v2134_v44  ;;  %v2450_v57 = vld [vmem:[#allocation4 + $0xb8] sm:$0xff]  ;;  %v10271_v18 = vpop.f32.mrf.mxu0 }
 0x18e   : > { %v12190_v7 = vld [vmem:[#allocation4 + $0xb7] sm:$0xff]  ;;  %1479 = vst [vmem:[#allocation2 + $0x278] sm:$0xff] %v1381_v27  ;;  %v1380_v63 = vmax.f32 %v12188_v47, 0.0  ;;  %10359 = vmatmul.mubr.f32.gmra.mxu1 %v2450_v57  ;;  %v1219_v48 = vadd.f32 %v11965_v13, %v10271_v18  ;;  %v1758_v13 = vmax.f32 %v1372_v12, %v1663_v3 }
 0x18f   : > { %10596 = vmatmul.mubr.f32.gmra.mxu0 %v12190_v7  ;;  %v1853_v46 = vld [vmem:[#allocation2 + $0x24c] sm:$0xff]  ;;  %v1213_v5 = vpop.f32.mrf.mxu0  ;;  %v1854_v4 = vld [vmem:[#allocation2 + $0x254] sm:$0xff] }
 0x190   : > { %v1948_v36 = vld [vmem:[#allocation2 + $0x24d] sm:$0xff]  ;;  %v1949_v10 = vld [vmem:[#allocation2 + $0x255] sm:$0xff]  ;;  %1478 = vst [vmem:[#allocation2 + $0x270] sm:$0xff] %v1380_v63  ;;  %v1383_v14 = vmax.f32 %v1219_v48, 0.0  ;;  %v12205_v17 = vadd.f32 %v12202_v31, %v1213_v5 }
 0x191   : > { %v2043_v59 = vmax.f32 %v1853_v46, %v1948_v36  ;;  %v2044_v6 = vmax.f32 %v1854_v4, %v1949_v10  ;;  %v10274_v9 = vpop.f32.mrf.mxu0  ;;  %v12211_v34 = vld [vmem:[#allocation3 + $0x1f8] ss:$2 sm:$0xff] }
 0x192   : > { %v1666_v58 = vld [vmem:[#allocation2 + $0x249] sm:$0xff]  ;;  %1481 = vst [vmem:[#allocation2 + $0x288] sm:$0xff] %v1383_v14  ;;  %v1382_v23 = vmax.f32 %v12205_v17, 0.0  ;;  %v1229_v29 = vadd.f32 %v12202_v31, %v10274_v9  ;;  %2355 = vst [vmem:[#allocation4 + $0xc1] sm:$0xff] %v12211_v34 }
 0x193   : > { %v2138_v32 = vmax.f32 %v1758_v13, %v2043_v59  ;;  %v2139_v20 = vmax.f32 %v1759_v0, %v2044_v6  ;;  %v1855_v12 = vld [vmem:[#allocation2 + $0x25c] sm:$0xff]  ;;  %v1223_v11 = vpop.f32.mrf.mxu0  ;;  %v1856_v56 = vld [vmem:[#allocation2 + $0x264] sm:$0xff]  ;;  %v1761_v25 = vmax.f32 %v1375_v49, %v1666_v58 }
 0x194   : > { %v1950_v2 = vld [vmem:[#allocation2 + $0x25d] sm:$0xff]  ;;  %v1951_v45 = vld [vmem:[#allocation2 + $0x265] sm:$0xff]  ;;  %1480 = vst [vmem:[#allocation2 + $0x280] sm:$0xff] %v1382_v23  ;;  %v1385_v33 = vmax.f32 %v1229_v29, 0.0  ;;  %v1224_v61 = vadd.f32 %v12202_v31, %v1223_v11 }
 0x195   : > { %2233 = vst [vmem:[#allocation3 + $0x230] sm:$0xff] %v2138_v32  ;;  %2234 = vst [vmem:[#allocation3 + $0x238] sm:$0xff] %v2139_v20  ;;  %v2045_v38 = vmax.f32 %v1855_v12, %v1950_v2  ;;  %v2046_v39 = vmax.f32 %v1856_v56, %v1951_v45  ;;  %v10277_v42 = vpop.f32.mrf.mxu0  ;;  %v2354_v43 = vld [vmem:[#allocation3 + $0x208] ss:$2 sm:$0x3f] }
 0x196   : > { %1483 = vst [vmem:[#allocation2 + $0x298] sm:$0xff] %v1385_v33  ;;  %v1384_v60 = vmax.f32 %v1224_v61, 0.0  ;;  %v12224_v28 = vadd.f32 %v12202_v31, %v10277_v42  ;;  %2356 = vst [vmem:[#allocation4 + $0xc9] sm:$0x3f] %v2354_v43 }
 0x197   : > { %v2140_v53 = vmax.f32 %v1760_v37, %v2045_v38  ;;  %v2141_v19 = vmax.f32 %v1761_v25, %v2046_v39  ;;  %v1233_v41 = vpop.f32.mrf.mxu0  ;;  %v1670_v55 = vld [vmem:[#allocation2 + $0x269] sm:$0xff]  ;;  %v1671_v5 = vld [vmem:[#allocation2 + $0x271] sm:$0xff] }
 0x198   : > { %1482 = vst [vmem:[#allocation2 + $0x290] sm:$0xff] %v1384_v60  ;;  %v1387_v50 = vmax.f32 %v12224_v28, 0.0  ;;  %v12228_v15 = vadd.f32 %v12202_v31, %v1233_v41  ;;  %v1765_v57 = vmax.f32 %v1379_v21, %v1670_v55  ;;  %v1766_v1 = vmax.f32 %v1380_v63, %v1671_v5 }
 0x199   : > { %2235 = vst [vmem:[#allocation3 + $0x240] sm:$0xff] %v2140_v53  ;;  %2236 = vst [vmem:[#allocation3 + $0x248] sm:$0xff] %v2141_v19  ;;  %v2451_v49 = vld [vmem:[#allocation4 + $0xc0] sm:$0xff]  ;;  %v10280_v35 = vpop.f32.mrf.mxu0 }
 0x19a   : > { %v12230_v8 = vld [vmem:[#allocation4 + $0xbf] sm:$0xff]  ;;  %1485 = vst [vmem:[#allocation2 + $0x2a8] sm:$0xff] %v1387_v50  ;;  %v1386_v30 = vmax.f32 %v12228_v15, 0.0  ;;  %10361 = vmatprep.mubr.f32.mxu1 %v2451_v49  ;;  %v12237_v16 = vadd.f32 %v12202_v31, %v10280_v35 }
 0x19b   : > { %10598 = vmatprep.mubr.f32.mxu0 %v12230_v8  ;;  %v1243_v52 = vpop.f32.mrf.mxu0  ;;  %v1860_v62 = vld [vmem:[#allocation2 + $0x284] sm:$0xff]  ;;  %v1672_v4 = vld [vmem:[#allocation2 + $0x279] sm:$0xff] }
 0x19c   : > { %v1955_v51 = vld [vmem:[#allocation2 + $0x285] sm:$0xff]  ;;  %1484 = vst [vmem:[#allocation2 + $0x2a0] sm:$0xff] %v1386_v30  ;;  %v1389_v44 = vmax.f32 %v12237_v16, 0.0  ;;  %v12243_v24 = vadd.f32 %v12202_v31, %v1243_v52  ;;  %v1767_v58 = vmax.f32 %v1381_v27, %v1672_v4 }
 0x19d   : > { %v2050_v18 = vmax.f32 %v1860_v62, %v1955_v51  ;;  %v2452_v3 = vld [vmem:[#allocation4 + $0xc8] sm:$0xff]  ;;  %v10283_v48 = vpop.f32.mrf.mxu0 }
 0x19e   : > { %v12247_v54 = vld [vmem:[#allocation4 + $0xc7] sm:$0xff]  ;;  %1487 = vst [vmem:[#allocation2 + $0x2b8] sm:$0xff] %v1389_v44  ;;  %v1388_v36 = vmax.f32 %v12243_v24, 0.0  ;;  %10362 = vmatmul.mubr.f32.gmra.mxu1 %v2452_v3  ;;  %v1259_v26 = vadd.f32 %v12202_v31, %v10283_v48 }
 0x19f   : > { %v12249_v46 = vld [vmem:[#allocation3 + $0x230] ss:$2 sm:$0xff]  ;;  %10599 = vmatmul.mubr.f32.gmra.mxu0 %v12247_v54  ;;  %v2145_v21 = vmax.f32 %v1765_v57, %v2050_v18  ;;  %v1253_v14 = vpop.f32.mrf.mxu0  ;;  %v1862_v13 = vld [vmem:[#allocation2 + $0x294] sm:$0xff] }
 0x1a0   : > { %2361 = vst [vmem:[#allocation4 + $0xd1] sm:$0xff] %v12249_v46  ;;  %v1861_v10 = vld [vmem:[#allocation2 + $0x28c] sm:$0xff]  ;;  %v1957_v59 = vld [vmem:[#allocation2 + $0x295] sm:$0xff]  ;;  %1486 = vst [vmem:[#allocation2 + $0x2b0] sm:$0xff] %v1388_v36  ;;  %v1391_v6 = vmax.f32 %v1259_v26, 0.0  ;;  %v1254_v9 = vadd.f32 %v12202_v31, %v1253_v14 }
 0x1a1   : > { %v1956_v0 = vld [vmem:[#allocation2 + $0x28d] sm:$0xff]  ;;  %2240 = vst [vmem:[#allocation3 + $0x268] sm:$0xff] %v2145_v21  ;;  %v2052_v32 = vmax.f32 %v1862_v13, %v1957_v59  ;;  %v10286_v20 = vpop.f32.mrf.mxu0  ;;  %v1673_v11 = vld [vmem:[#allocation2 + $0x281] sm:$0xff] }
 0x1a2   : > { %v2051_v29 = vmax.f32 %v1861_v10, %v1956_v0  ;;  %v2360_v12 = vld [vmem:[#allocation3 + $0x240] ss:$2 sm:$0x3f]  ;;  %1489 = vst [vmem:[#allocation2 + $0x2c8] sm:$0xff] %v1391_v6  ;;  %v1390_v56 = vmax.f32 %v1254_v9, 0.0  ;;  %v12265_v2 = vadd.f32 %v12202_v31, %v10286_v20  ;;  %v1768_v37 = vmax.f32 %v1382_v23, %v1673_v11 }
 0x1a3   : > { %2362 = vst [vmem:[#allocation4 + $0xd9] sm:$0x3f] %v2360_v12  ;;  %v2147_v33 = vmax.f32 %v1767_v58, %v2052_v32  ;;  %v1863_v61 = vld [vmem:[#allocation2 + $0x29c] sm:$0xff]  ;;  %v1263_v47 = vpop.f32.mrf.mxu0 }
 0x1a4   : > { %v2146_v45 = vmax.f32 %v1766_v1, %v2051_v29  ;;  %v1958_v63 = vld [vmem:[#allocation2 + $0x29d] sm:$0xff]  ;;  %1488 = vst [vmem:[#allocation2 + $0x2c0] sm:$0xff] %v1390_v56  ;;  %v1393_v40 = vmax.f32 %v12265_v2, 0.0  ;;  %v1264_v27 = vadd.f32 %v12202_v31, %v1263_v47 }
 0x1a5   : > { %2242 = vst [vmem:[#allocation3 + $0x278] sm:$0xff] %v2147_v33  ;;  %v2053_v25 = vmax.f32 %v1863_v61, %v1958_v63  ;;  %v10289_v42 = vpop.f32.mrf.mxu0  ;;  %v1677_v55 = vld [vmem:[#allocation2 + $0x2a1] sm:$0xff] }
 0x1a6   : > { %2241 = vst [vmem:[#allocation3 + $0x270] sm:$0xff] %v2146_v45  ;;  %1491 = vst [vmem:[#allocation2 + $0x2d8] sm:$0xff] %v1393_v40  ;;  %v1392_v43 = vmax.f32 %v1264_v27, 0.0  ;;  %v12277_v60 = vadd.f32 %v12202_v31, %v10289_v42  ;;  %v1772_v21 = vmax.f32 %v1386_v30, %v1677_v55 }
 0x1a7   : > { %v2453_v38 = vld [vmem:[#allocation4 + $0xd0] sm:$0xff]  ;;  %v2148_v53 = vmax.f32 %v1768_v37, %v2053_v25  ;;  %v1273_v17 = vpop.f32.mrf.mxu0 }
 0x1a8   : > { %v12271_v39 = vld [vmem:[#allocation4 + $0xcf] sm:$0xff]  ;;  %10364 = vmatprep.mubr.f32.mxu1 %v2453_v38  ;;  %1490 = vst [vmem:[#allocation2 + $0x2d0] sm:$0xff] %v1392_v43  ;;  %v1395_v23 = vmax.f32 %v12277_v60, 0.0  ;;  %v12281_v19 = vadd.f32 %v12202_v31, %v1273_v17 }
 0x1a9   : > { %10601 = vmatprep.mubr.f32.mxu0 %v12271_v39  ;;  %2243 = vst [vmem:[#allocation3 + $0x280] sm:$0xff] %v2148_v53  ;;  %v10292_v35 = vpop.f32.mrf.mxu0  ;;  %v1678_v52 = vld [vmem:[#allocation2 + $0x2a9] sm:$0xff]  ;;  %v1679_v6 = vld [vmem:[#allocation2 + $0x2b1] sm:$0xff] }
 0x1aa   : > { %v2454_v41 = vld [vmem:[#allocation4 + $0xd8] sm:$0xff]  ;;  %1493 = vst [vmem:[#allocation2 + $0x2e8] sm:$0xff] %v1395_v23  ;;  %v1394_v62 = vmax.f32 %v12281_v19, 0.0  ;;  %v1289_v51 = vadd.f32 %v12202_v31, %v10292_v35  ;;  %v1773_v10 = vmax.f32 %v1387_v50, %v1678_v52  ;;  %v1774_v56 = vmax.f32 %v1388_v36, %v1679_v6 }
 0x1ab   : > { %v12283_v49 = vld [vmem:[#allocation4 + $0xd7] sm:$0xff]  ;;  %10365 = vmatmul.mubr.f32.gmra.mxu1 %v2454_v41  ;;  %v1283_v18 = vpop.f32.mrf.mxu0  ;;  %v1868_v3 = vld [vmem:[#allocation2 + $0x2c4] sm:$0xff] }
 0x1ac   : > { %10602 = vmatmul.mubr.f32.gmra.mxu0 %v12283_v49  ;;  %v1867_v57 = vld [vmem:[#allocation2 + $0x2bc] sm:$0xff]  ;;  %v1963_v5 = vld [vmem:[#allocation2 + $0x2c5] sm:$0xff]  ;;  %1492 = vst [vmem:[#allocation2 + $0x2e0] sm:$0xff] %v1394_v62  ;;  %v1397_v4 = vmax.f32 %v1289_v51, 0.0  ;;  %v1284_v26 = vadd.f32 %v12202_v31, %v1283_v18 }
 0x1ad   : > { %v1962_v48 = vld [vmem:[#allocation2 + $0x2bd] sm:$0xff]  ;;  %v2058_v13 = vmax.f32 %v1868_v3, %v1963_v5  ;;  %v10295_v0 = vpop.f32.mrf.mxu0 }
 0x1ae   : > { %v2057_v14 = vmax.f32 %v1867_v57, %v1962_v48  ;;  %v12297_v59 = vld [vmem:[#allocation3 + $0x268] ss:$2 sm:$0xff]  ;;  %1495 = vst [vmem:[#allocation2 + $0x2f8] sm:$0xff] %v1397_v4  ;;  %v1396_v1 = vmax.f32 %v1284_v26, 0.0  ;;  %v1299_v58 = vadd.f32 %v12202_v31, %v10295_v0 }
 0x1af   : > { %v1680_v9 = vld [vmem:[#allocation2 + $0x2b9] sm:$0xff]  ;;  %2367 = vst [vmem:[#allocation4 + $0xe1] sm:$0xff] %v12297_v59  ;;  %v2153_v32 = vmax.f32 %v1773_v10, %v2058_v13  ;;  %v1869_v15 = vld [vmem:[#allocation2 + $0x2cc] sm:$0xff]  ;;  %v1293_v30 = vpop.f32.mrf.mxu0 }
 0x1b0   : > { %v2152_v29 = vmax.f32 %v1772_v21, %v2057_v14  ;;  %v1870_v20 = vld [vmem:[#allocation2 + $0x2d4] sm:$0xff]  ;;  %1494 = vst [vmem:[#allocation2 + $0x2f0] sm:$0xff] %v1396_v1  ;;  %v1399_v12 = vmax.f32 %v1299_v58, 0.0  ;;  %v1294_v11 = vadd.f32 %v12202_v31, %v1293_v30  ;;  %v1775_v45 = vmax.f32 %v1389_v44, %v1680_v9  ;;  %v2366_v47 = vld [vmem:[#allocation3 + $0x278] ss:$2 sm:$0x3f] }
 0x1b1   : > { %v1964_v28 = vld [vmem:[#allocation2 + $0x2cd] sm:$0xff]  ;;  %v1965_v50 = vld [vmem:[#allocation2 + $0x2d5] sm:$0xff]  ;;  %2248 = vst [vmem:[#allocation3 + $0x2a8] sm:$0xff] %v2153_v32  ;;  %2368 = vst [vmem:[#allocation4 + $0xe9] sm:$0x3f] %v2366_v47 }
 0x1b2   : > { %2247 = vst [vmem:[#allocation3 + $0x2a0] sm:$0xff] %v2152_v29  ;;  %v2059_v33 = vmax.f32 %v1869_v15, %v1964_v28  ;;  %v2060_v61 = vmax.f32 %v1870_v20, %v1965_v50  ;;  %1497 = vst [vmem:[#allocation2 + $0x308] sm:$0xff] %v1399_v12  ;;  %v1398_v63 = vmax.f32 %v1294_v11, 0.0  ;;  %v2381_v58 = vld [vmem:[#allocation4 + $0xf] sm:$0xff]  ;;  %v2382_v28 = vld [vmem:[#allocation4 + $0x17] sm:$0xff] }
 0x1b3   : > { %v1684_v36 = vld [vmem:[#allocation2 + $0x2d9] sm:$0xff]  ;;  %v1685_v16 = vld [vmem:[#allocation2 + $0x2e1] sm:$0xff]  ;;  %v3264_v15 = vld [vmem:[#allocation4 + $0x10f] sm:$0xff] }
 0x1b4   : > { %v2154_v27 = vmax.f32 %v1774_v56, %v2059_v33  ;;  %v2155_v37 = vmax.f32 %v1775_v45, %v2060_v61  ;;  %1496 = vst [vmem:[#allocation2 + $0x300] sm:$0xff] %v1398_v63  ;;  %v1779_v41 = vmax.f32 %v1393_v40, %v1684_v36  ;;  %v1780_v2 = vmax.f32 %v1394_v62, %v1685_v16  ;;  %v3265_v50 = vld [vmem:[#allocation4 + $0x117] sm:$0xff]  ;;  %v2383_v12 = vld [vmem:[#allocation4 + $0x1f] sm:$0xff]  ;;  %v2384_v33 = vld [vmem:[#allocation4 + $0x27] sm:$0xff] }
 0x1b5   : > { %v8636_v11 = vld [vmem:[%s16534_s3 + $0x170] sm:$0xff]  ;;  %v12357_v56 = vld [vmem:[#allocation4 + $0x21] sm:$0xff]  ;;  %v11143_v45 = vld [vmem:[%s16534_s3 + $0x178] sm:$0xff] }
 0x1b6   : > { %2249 = vst [vmem:[#allocation3 + $0x2b0] sm:$0xff] %v2154_v27  ;;  %2250 = vst [vmem:[#allocation3 + $0x2b8] sm:$0xff] %v2155_v37  ;;  %v12306_v31 = vld [vmem:[#allocation4 + $0xe0] sm:$0xff]  ;;  %v12362_v61 = vld [vmem:[#allocation4 + $0x29] sm:$0xff] }
 0x1b7   : > { %v12308_v24 = vld [vmem:[#allocation4 + $0xdf] sm:$0xff]  ;;  %10367 = vmatprep.mubr.f32.mxu1 %v12306_v31  ;;  %v1592_v44 = vld [vmem:[#allocation2 + $0x2f0] sm:$0x7]  ;;  %v1874_v42 = vld [vmem:[#allocation2 + $0x2f4] sm:$0xff] }
 0x1b8   : > { %10604 = vmatprep.mubr.f32.mxu0 %v12308_v24  ;;  %v1687_v25 = vld [vmem:[#allocation2 + $0x2f1] sm:$0x7]  ;;  %v1686_v38 = vld [vmem:[#allocation2 + $0x2e9] sm:$0xff]  ;;  %v1969_v43 = vld [vmem:[#allocation2 + $0x2f5] sm:$0xff] }
 0x1b9   : > { %v1877_v53 = vld [vmem:[#allocation2 + $0x30c] sm:$0x7]  ;;  %v1782_v35 = vmax.f32 %v1592_v44, %v1687_v25  ;;  %v2064_v55 = vmax.f32 %v1874_v42, %v1969_v43  ;;  %v12318_v18 = vld [vmem:[#allocation3 + $0x2a0] ss:$2 sm:$0xff]  ;;  %v1781_v14 = vmax.f32 %v1395_v23, %v1686_v38  ;;  %v8634_v44 = vld [vmem:[%s16534_s3 + $0x160] sm:$0xff] }
 0x1ba   : > { %v1972_v17 = vld [vmem:[#allocation2 + $0x30d] sm:$0x7]  ;;  %2373 = vst [vmem:[#allocation4 + $0xf1] sm:$0xff] %v12318_v18  ;;  %v12369_v27 = vld [vmem:[#allocation4 + $0x31] sm:$0xff]  ;;  %v12376_v16 = vld [vmem:[#allocation4 + $0x39] sm:$0xff] }
 0x1bb   : > { %v2067_v52 = vmax.f32 %v1877_v53, %v1972_v17  ;;  %v12314_v51 = vld [vmem:[#allocation4 + $0xe8] sm:$0xff]  ;;  %v1875_v3 = vld [vmem:[#allocation2 + $0x2fc] sm:$0xff]  ;;  %v2159_v40 = vmax.f32 %v1779_v41, %v2064_v55  ;;  %v8716_v37 = vld [vmem:[%s16534_s3 + $0x3f0] sm:$0xff] }
 0x1bc   : > { %v12316_v57 = vld [vmem:[#allocation4 + $0xe7] sm:$0xff]  ;;  %v1970_v5 = vld [vmem:[#allocation2 + $0x2fd] sm:$0xff]  ;;  %10368 = vmatmul.mubr.f32.gmra.mxu1 %v12314_v51  ;;  %v2385_v63 = vld [vmem:[#allocation4 + $0x2f] sm:$0xff] }
 0x1bd   : > { %v1876_v48 = vld [vmem:[#allocation2 + $0x304] sm:$0xff]  ;;  %10605 = vmatmul.mubr.f32.gmra.mxu0 %v12316_v57  ;;  %v2162_v4 = vmax.f32 %v1782_v35, %v2067_v52  ;;  %v2065_v21 = vmax.f32 %v1875_v3, %v1970_v5  ;;  %2254 = vst [vmem:[#allocation3 + $0x2d8] sm:$0xff] %v2159_v40  ;;  %v2386_v36 = vld [vmem:[#allocation4 + $0x37] sm:$0xff]  ;;  %v2389_v17 = vld [vmem:[#allocation4 + $0x4f] sm:$0xff] }
 0x1be   : > { %v1971_v26 = vld [vmem:[#allocation2 + $0x305] sm:$0xff]  ;;  %v8633_v53 = vld [vmem:[%s16534_s3 + $0x158] sm:$0xff]  ;;  %v8632_v3 = vld [vmem:[%s16534_s3 + $0x150] sm:$0xff] }
 0x1bf   : > { %v2372_v10 = vld [vmem:[#allocation3 + $0x2b0] ss:$2 sm:$0x3f]  ;;  %v2066_v13 = vmax.f32 %v1876_v48, %v1971_v26  ;;  %2257 = vst [vmem:[#allocation3 + $0x2f0] sm:$0x7] %v2162_v4  ;;  %v2160_v0 = vmax.f32 %v1780_v2, %v2065_v21  ;;  %v12394_v41 = vld [vmem:[#allocation4 + $0x51] sm:$0xff] }
 0x1c0   : > { %2374 = vst [vmem:[#allocation4 + $0xf9] sm:$0x3f] %v2372_v10  ;;  %v8635_v47 = vld [vmem:[%s16534_s3 + $0x168] sm:$0xff]  ;;  %v2387_v25 = vld [vmem:[#allocation4 + $0x3f] sm:$0xff]  ;;  %v2390_v55 = vld [vmem:[#allocation4 + $0x57] sm:$0xff] }
 0x1c1   : > { %v2161_v6 = vmax.f32 %v1781_v14, %v2066_v13  ;;  %2255 = vst [vmem:[#allocation3 + $0x2e0] sm:$0xff] %v2160_v0  ;;  %v12327_v9 = vld [vmem:[#allocation4 + $0xf0] sm:$0xff]  ;;  %v12382_v38 = vld [vmem:[#allocation4 + $0x41] sm:$0xff]  ;;  %v12400_v52 = vld [vmem:[#allocation4 + $0x59] sm:$0xff] }
 0x1c2   : > { %v12329_v19 = vld [vmem:[#allocation4 + $0xef] sm:$0xff]  ;;  %10370 = vmatprep.mubr.f32.mxu1 %v12327_v9  ;;  %v8714_v35 = vld [vmem:[%s16534_s3 + $0x3e0] sm:$0xff]  ;;  %v8713_v2 = vld [vmem:[%s16534_s3 + $0x3d8] sm:$0xff] }
 0x1c3   : > { %2256 = vst [vmem:[#allocation3 + $0x2e8] sm:$0xff] %v2161_v6  ;;  %10607 = vmatprep.mubr.f32.mxu0 %v12329_v19  ;;  %v8715_v42 = vld [vmem:[%s16534_s3 + $0x3e8] sm:$0xff]  ;;  %v2391_v48 = vld [vmem:[#allocation4 + $0x5f] sm:$0xff]  ;;  %v12418_v10 = vld [vmem:[#allocation4 + $0x71] sm:$0xff] }
 0x1c4   : > { %v12388_v43 = vld [vmem:[#allocation4 + $0x49] sm:$0xff]  ;;  %v12406_v5 = vld [vmem:[#allocation4 + $0x61] sm:$0xff]  ;;  %v2394_v13 = vld [vmem:[#allocation4 + $0x77] sm:$0xff] }
 0x1c5   : > { %v2392_v40 = vld [vmem:[#allocation4 + $0x67] sm:$0xff]  ;;  %v2393_v21 = vld [vmem:[#allocation4 + $0x6f] sm:$0xff]  ;;  %v12424_v0 = vld [vmem:[#allocation4 + $0x79] sm:$0xff] }
 0x1c6   : > { %v12412_v4 = vld [vmem:[#allocation4 + $0x69] sm:$0xff]  ;;  %v8630_v6 = vld [vmem:[%s16534_s3 + $0x140] sm:$0xff] }
 0x1c7   : > { %v12333_v62 = vld [vmem:[#allocation4 + $0xf8] sm:$0xff]  ;;  %v8631_v26 = vld [vmem:[%s16534_s3 + $0x148] sm:$0xff]  ;;  %v8712_v14 = vld [vmem:[%s16534_s3 + $0x3d0] sm:$0xff] }
 0x1c8   : > { %v12335_v60 = vld [vmem:[#allocation4 + $0xf7] sm:$0xff]  ;;  %10371 = vmatmul.mubr.f32.gmra.mxu1 %v12333_v62  ;;  %v12339_v23 = vld [vmem:[#allocation3 + $0x2d8] ss:$2 sm:$0xff] }
 0x1c9   : > { %10608 = vmatmul.mubr.f32.gmra.mxu0 %v12335_v60  ;;  %2379 = vst [vmem:[#allocation4 + $0x101] sm:$0xff] %v12339_v23 }
 0x1ca   : > { %v2378_v1 = vld [vmem:[#allocation3 + $0x2e8] ss:$2 sm:$0x3f] }
 0x1cb   : > { %2380 = vst [vmem:[#allocation4 + $0x109] sm:$0x3f] %v2378_v1  ;;  %v2395_v1 = vld [vmem:[#allocation4 + $0x7f] sm:$0xff] }
 0x1d0   : > { %v12342_v29 = vld [vmem:[#allocation4 + $0x100] sm:$0xff] }
 0x1d1   : > { %v12344_v32 = vld [vmem:[#allocation4 + $0xff] sm:$0xff]  ;;  %10373 = vmatprep.mubr.f32.mxu1 %v12342_v29 }
 0x1d2   : > { %10610 = vmatprep.mubr.f32.mxu0 %v12344_v32  ;;  %v12348_v30 = vld [vmem:[#allocation4 + $0x108] sm:$0xff] }
 0x1d3   : > { %v12350_v20 = vld [vmem:[#allocation4 + $0x107] sm:$0xff]  ;;  %10374 = vmatmul.mubr.f32.gmra.mxu1 %v12348_v30 }
 0x1d4   : > { %10611 = vmatmul.mubr.f32.gmra.mxu0 %v12350_v20  ;;  %10408 = vmatprep.mubr.f32.mxu1 %v2381_v58  ;;  %v12430_v58 = vld [vmem:[#allocation4 + $0x81] sm:$0xff] }
 0x1d5   : > { %10613 = vmatprep.mubr.f32.mxu0 %v3264_v15  ;;  %v8711_v15 = vld [vmem:[%s16534_s3 + $0x3c8] sm:$0xff] }
 0x1d7   : > { %10409 = vmatmul.mubr.f32.vlgmr.msra.gmra.mxu1 %v2382_v28  ;;  %v2396_v28 = vld [vmem:[#allocation4 + $0x87] sm:$0xff] }
 0x1d8   : > { %10614 = vmatmul.mubr.f32.gmra.mxu0 %v3265_v50  ;;  %10457 = vmatpush3.msra.mxu1 %v11143_v45  ;;  %v12436_v50 = vld [vmem:[#allocation4 + $0x89] sm:$0xff]  ;;  %v12442_v45 = vld [vmem:[#allocation4 + $0x91] sm:$0xff] }
 0x1d9   : > { %10411 = vmatprep.mubr.f32.mxu1 %v2383_v12  ;;  %10458 = vmatprep.subr.mxu1 %v8636_v11  ;;  %v8629_v12 = vld [vmem:[%s16534_s3 + $0x138] sm:$0xff] }
 0x1da   : > { %10728 = vmatprep.mubr.f32.mxu0 %v12357_v56  ;;  %10459 = vmatpush3.msra.mxu1 %v8636_v11  ;;  %v2397_v11 = vld [vmem:[#allocation4 + $0x8f] sm:$0xff] }
 0x1db   : > { %10412 = vmatmul.mubr.f32.gmra.mxu1 %v2384_v33  ;;  %10460 = vmatprep.subr.mxu1 %v8635_v47  ;;  %v8710_v33 = vld [vmem:[%s16534_s3 + $0x3c0] sm:$0xff] }
 0x1dc   : > { %10729 = vmatmul.mubr.f32.vlgmr.msra.gmra.mxu0 %v12362_v61  ;;  %10414 = vmatprep.mubr.f32.mxu1 %v2385_v63  ;;  %v12448_v63 = vld [vmem:[#allocation4 + $0x99] sm:$0xff] }
 0x1dd   : > { %10731 = vmatprep.mubr.f32.mxu0 %v12369_v27  ;;  %10857 = vmatpush3.msra.mxu0 %v12142_v22  ;;  %v2388_v22 = vld [vmem:[#allocation4 + $0x47] sm:$0xff] }
 0x1de   : > { %10461 = vmatpush3.msra.mxu1 %v8635_v47  ;;  %10858 = vmatprep.subr.mxu0 %v8716_v37  ;;  %v2398_v47 = vld [vmem:[#allocation4 + $0x97] sm:$0xff] }
 0x1df   : > { %10415 = vmatmul.mubr.f32.gmra.mxu1 %v2386_v36  ;;  %10462 = vmatprep.subr.mxu1 %v8634_v44  ;;  %v2399_v36 = vld [vmem:[#allocation4 + $0x9f] sm:$0xff] }
 0x1e0   : > { %10732 = vmatmul.mubr.f32.gmra.mxu0 %v12376_v16  ;;  %10417 = vmatprep.mubr.f32.mxu1 %v2387_v25  ;;  %v8709_v25 = vld [vmem:[%s16534_s3 + $0x3b8] sm:$0xff] }
 0x1e1   : > { %10734 = vmatprep.mubr.f32.mxu0 %v12382_v38  ;;  %10859 = vmatpush3.msra.mxu0 %v8716_v37  ;;  %v8628_v37 = vld [vmem:[%s16534_s3 + $0x130] sm:$0xff] }
 0x1e2   : > { %10463 = vmatpush3.msra.mxu1 %v8634_v44  ;;  %10860 = vmatprep.subr.mxu0 %v8715_v42  ;;  %v12454_v44 = vld [vmem:[#allocation4 + $0xa1] sm:$0xff] }
 0x1e3   : > { %10418 = vmatmul.mubr.f32.gmra.mxu1 %v2388_v22  ;;  %10464 = vmatprep.subr.mxu1 %v8633_v53  ;;  %v12460_v22 = vld [vmem:[#allocation4 + $0xa9] sm:$0xff] }
 0x1e4   : > { %10735 = vmatmul.mubr.f32.gmra.mxu0 %v12388_v43  ;;  %10420 = vmatprep.mubr.f32.mxu1 %v2389_v17  ;;  %v2401_v17 = vld [vmem:[#allocation4 + $0xaf] sm:$0xff] }
 0x1e5   : > { %10737 = vmatprep.mubr.f32.mxu0 %v12394_v41  ;;  %10861 = vmatpush3.msra.mxu0 %v8715_v42  ;;  %v2400_v42 = vld [vmem:[#allocation4 + $0xa7] sm:$0xff] }
 0x1e6   : > { %10465 = vmatpush3.msra.mxu1 %v8633_v53  ;;  %10862 = vmatprep.subr.mxu0 %v8714_v35  ;;  %v8627_v53 = vld [vmem:[%s16534_s3 + $0x128] sm:$0xff] }
 0x1e7   : > { %10421 = vmatmul.mubr.f32.gmra.mxu1 %v2390_v55  ;;  %10466 = vmatprep.subr.mxu1 %v8632_v3  ;;  %v8708_v55 = vld [vmem:[%s16534_s3 + $0x3b0] sm:$0xff] }
 0x1e8   : > { %10738 = vmatmul.mubr.f32.gmra.mxu0 %v12400_v52  ;;  %10423 = vmatprep.mubr.f32.mxu1 %v2391_v48  ;;  %v8626_v48 = vld [vmem:[%s16534_s3 + $0x120] sm:$0xff] }
 0x1e9   : > { %10740 = vmatprep.mubr.f32.mxu0 %v12406_v5  ;;  %10863 = vmatpush3.msra.mxu0 %v8714_v35  ;;  %v12466_v35 = vld [vmem:[#allocation4 + $0xb1] sm:$0xff] }
 0x1ea   : > { %10467 = vmatpush3.msra.mxu1 %v8632_v3  ;;  %10864 = vmatprep.subr.mxu0 %v8713_v2  ;;  %v12472_v3 = vld [vmem:[#allocation4 + $0xb9] sm:$0xff] }
 0x1eb   : > { %10424 = vmatmul.mubr.f32.gmra.mxu1 %v2392_v40  ;;  %10468 = vmatprep.subr.mxu1 %v8631_v26  ;;  %v12484_v40 = vld [vmem:[#allocation4 + $0xc9] sm:$0xff] }
 0x1ec   : > { %10741 = vmatmul.mubr.f32.gmra.mxu0 %v12412_v4  ;;  %10426 = vmatprep.mubr.f32.mxu1 %v2393_v21  ;;  %v8622_v21 = vld [vmem:[%s16534_s3 + $0x100] sm:$0xff] }
 0x1ed   : > { %10743 = vmatprep.mubr.f32.mxu0 %v12418_v10  ;;  %10865 = vmatpush3.msra.mxu0 %v8713_v2  ;;  %v8707_v2 = vld [vmem:[%s16534_s3 + $0x3a8] sm:$0xff] }
 0x1ee   : > { %10469 = vmatpush3.msra.mxu1 %v8631_v26  ;;  %10866 = vmatprep.subr.mxu0 %v8712_v14  ;;  %v8625_v26 = vld [vmem:[%s16534_s3 + $0x118] sm:$0xff] }
 0x1ef   : > { %10427 = vmatmul.mubr.f32.gmra.mxu1 %v2394_v13  ;;  %10470 = vmatprep.subr.mxu1 %v8630_v6  ;;  %v12535_v13 = vld [vmem:[#allocation4 + $0x109] sm:$0xff] }
 0x1f0   : > { %10744 = vmatmul.mubr.f32.gmra.mxu0 %v12424_v0  ;;  %10429 = vmatprep.mubr.f32.mxu1 %v2395_v1  ;;  %v3877_v1 = vld [vmem:[#allocation4 + $0x119] sm:$0xff] }
 0x1f1   : > { %10746 = vmatprep.mubr.f32.mxu0 %v12430_v58  ;;  %10867 = vmatpush3.msra.mxu0 %v8712_v14  ;;  %v8669_v14 = vld [vmem:[%s16534_s3 + $0x278] sm:$0xff] }
 0x1f2   : > { %10471 = vmatpush3.msra.mxu1 %v8630_v6  ;;  %10868 = vmatprep.subr.mxu0 %v8711_v15  ;;  %v2929_v6 = vld [vmem:[#allocation4 + $0x19] sm:$0xff] }
 0x1f3   : > { %10430 = vmatmul.mubr.f32.gmra.mxu1 %v2396_v28  ;;  %10472 = vmatprep.subr.mxu1 %v8629_v12  ;;  %v12549_v28 = vld [vmem:[#allocation4 + $0x38] sm:$0xff] }
 0x1f4   : > { %10747 = vmatmul.mubr.f32.gmra.mxu0 %v12436_v50  ;;  %10432 = vmatprep.mubr.f32.mxu1 %v2397_v11  ;;  %v12556_v11 = vld [vmem:[#allocation4 + $0x40] sm:$0xff] }
 0x1f5   : > { %10749 = vmatprep.mubr.f32.mxu0 %v12442_v45  ;;  %10869 = vmatpush3.msra.mxu0 %v8711_v15  ;;  %v8668_v15 = vld [vmem:[%s16534_s3 + $0x270] sm:$0xff] }
 0x1f6   : > { %10473 = vmatpush3.msra.mxu1 %v8629_v12  ;;  %10870 = vmatprep.subr.mxu0 %v8710_v33  ;;  %v8667_v12 = vld [vmem:[%s16534_s3 + $0x268] sm:$0xff] }
 0x1f7   : > { %10433 = vmatmul.mubr.f32.gmra.mxu1 %v2398_v47  ;;  %10474 = vmatprep.subr.mxu1 %v8628_v37  ;;  %v8665_v47 = vld [vmem:[%s16534_s3 + $0x258] sm:$0xff] }
 0x1f8   : > { %10750 = vmatmul.mubr.f32.gmra.mxu0 %v12448_v63  ;;  %10435 = vmatprep.mubr.f32.mxu1 %v2399_v36  ;;  %v8663_v36 = vld [vmem:[%s16534_s3 + $0x248] sm:$0xff] }
 0x1f9   : > { %10752 = vmatprep.mubr.f32.mxu0 %v12454_v44  ;;  %10871 = vmatpush3.msra.mxu0 %v8710_v33  ;;  %v8666_v33 = vld [vmem:[%s16534_s3 + $0x260] sm:$0xff] }
 0x1fa   : > { %10475 = vmatpush3.msra.mxu1 %v8628_v37  ;;  %10872 = vmatprep.subr.mxu0 %v8709_v25  ;;  %v8664_v37 = vld [vmem:[%s16534_s3 + $0x250] sm:$0xff] }
 0x1fb   : > { %10436 = vmatmul.mubr.f32.gmra.mxu1 %v2400_v42  ;;  %10476 = vmatprep.subr.mxu1 %v8627_v53  ;;  %v8661_v42 = vld [vmem:[%s16534_s3 + $0x238] sm:$0xff] }
 0x1fc   : > { %10753 = vmatmul.mubr.f32.gmra.mxu0 %v12460_v22  ;;  %10438 = vmatprep.mubr.f32.mxu1 %v2401_v17  ;;  %v8660_v17 = vld [vmem:[%s16534_s3 + $0x230] sm:$0xff] }
 0x1fd   : > { %10755 = vmatprep.mubr.f32.mxu0 %v12466_v35  ;;  %10873 = vmatpush3.msra.mxu0 %v8709_v25  ;;  %v8662_v25 = vld [vmem:[%s16534_s3 + $0x240] sm:$0xff] }
 0x1fe   : > { %10477 = vmatpush3.msra.mxu1 %v8627_v53  ;;  %10874 = vmatprep.subr.mxu0 %v8708_v55  ;;  %v12628_v53 = vld [vmem:[#allocation4 + $0xa8] sm:$0xff] }
 0x1ff   : > { %10439 = vmatmul.mubr.f32.gmra.mxu1 %v12190_v7  ;;  %10478 = vmatprep.subr.mxu1 %v8626_v48  ;;  %v8706_v7 = vld [vmem:[%s16534_s3 + $0x3a0] sm:$0xff] }
 0x200   : > { %10756 = vmatmul.mubr.f32.gmra.mxu0 %v12472_v3  ;;  %10441 = vmatprep.mubr.f32.mxu1 %v12230_v8  ;;  %v8624_v8 = vld [vmem:[%s16534_s3 + $0x110] sm:$0xff] }
 0x201   : > { %10758 = vmatprep.mubr.f32.mxu0 %v12211_v34  ;;  %10875 = vmatpush3.msra.mxu0 %v8708_v55  ;;  %v12496_v34 = vld [vmem:[#allocation4 + $0xd9] sm:$0xff] }
 0x202   : > { %10479 = vmatpush3.msra.mxu1 %v8626_v48  ;;  %10876 = vmatprep.subr.mxu0 %v8707_v2  ;;  %v12641_v55 = vld [vmem:[#allocation4 + $0xb8] sm:$0xff]  ;;  %v8659_v48 = vld [vmem:[%s16534_s3 + $0x228] sm:$0xff] }
 0x203   : > { %10442 = vmatmul.mubr.f32.gmra.mxu1 %v12247_v54  ;;  %10480 = vmatprep.subr.mxu1 %v8625_v26  ;;  %v8705_v54 = vld [vmem:[%s16534_s3 + $0x398] sm:$0xff] }
 0x204   : > { %10759 = vmatmul.mubr.f32.gmra.mxu0 %v12484_v40  ;;  %10444 = vmatprep.mubr.f32.mxu1 %v12271_v39  ;;  %v8623_v39 = vld [vmem:[%s16534_s3 + $0x108] sm:$0xff] }
 0x205   : > { %10761 = vmatprep.mubr.f32.mxu0 %v12249_v46  ;;  %10877 = vmatpush3.msra.mxu0 %v8707_v2  ;;  %v12508_v46 = vld [vmem:[#allocation4 + $0xe9] sm:$0xff] }
 0x206   : > { %10481 = vmatpush3.msra.mxu1 %v8625_v26  ;;  %10878 = vmatprep.subr.mxu0 %v8706_v7  ;;  %v12654_v2 = vld [vmem:[#allocation4 + $0xc8] sm:$0xff]  ;;  %v8658_v26 = vld [vmem:[%s16534_s3 + $0x220] sm:$0xff] }
 0x207   : > { %10445 = vmatmul.mubr.f32.gmra.mxu1 %v12283_v49  ;;  %10482 = vmatprep.subr.mxu1 %v8624_v8  ;;  %v8704_v49 = vld [vmem:[%s16534_s3 + $0x390] sm:$0xff] }
 0x208   : > { %10762 = vmatmul.mubr.f32.gmra.mxu0 %v12496_v34  ;;  %10447 = vmatprep.mubr.f32.mxu1 %v12308_v24  ;;  %v12520_v24 = vld [vmem:[#allocation4 + $0xf9] sm:$0xff] }
 0x209   : > { %10764 = vmatprep.mubr.f32.mxu0 %v12297_v59  ;;  %10879 = vmatpush3.msra.mxu0 %v8706_v7  ;;  %v12663_v7 = vld [vmem:[#allocation4 + $0xd0] sm:$0xff] }
 0x20a   : > { %10483 = vmatpush3.msra.mxu1 %v8624_v8  ;;  %10880 = vmatprep.subr.mxu0 %v8705_v54  ;;  %v12669_v8 = vld [vmem:[#allocation4 + $0xd8] sm:$0xff] }
 0x20b   : > { %10448 = vmatmul.mubr.f32.gmra.mxu1 %v12316_v57  ;;  %10484 = vmatprep.subr.mxu1 %v8623_v39  ;;  %v8703_v57 = vld [vmem:[%s16534_s3 + $0x388] sm:$0xff] }
 0x20c   : > { %10765 = vmatmul.mubr.f32.gmra.mxu0 %v12508_v46  ;;  %10450 = vmatprep.mubr.f32.mxu1 %v12329_v19  ;;  %v2928_v19 = vld [vmem:[#allocation4 + $0x11] sm:$0xff] }
 0x20d   : > { %10767 = vmatprep.mubr.f32.mxu0 %v12318_v18  ;;  %10881 = vmatpush3.msra.mxu0 %v8705_v54  ;;  %v12676_v54 = vld [vmem:[#allocation4 + $0xd1] sm:$0xff] }
 0x20e   : > { %10485 = vmatpush3.msra.mxu1 %v8623_v39  ;;  %10882 = vmatprep.subr.mxu0 %v8704_v49 }
 0x20f   : > { %10451 = vmatmul.mubr.f32.gmra.mxu1 %v12335_v60  ;;  %10486 = vmatprep.subr.mxu1 %v8622_v21  ;;  %v3876_v60 = vld [vmem:[#allocation4 + $0x111] sm:$0xff] }
 0x210   : > { %10768 = vmatmul.mubr.f32.gmra.mxu0 %v12520_v24  ;;  %10453 = vmatprep.mubr.f32.mxu1 %v12344_v32  ;;  %v8702_v32 = vld [vmem:[%s16534_s3 + $0x380] sm:$0xff] }
 0x211   : > { %10770 = vmatprep.mubr.f32.mxu0 %v12339_v23  ;;  %10883 = vmatpush3.msra.mxu0 %v8704_v49  ;;  %v8656_v49 = vld [vmem:[%s16534_s3 + $0x210] sm:$0xff] }
 0x212   : > { %10487 = vmatpush3.msra.mxu1 %v8622_v21  ;;  %10884 = vmatprep.subr.mxu0 %v8703_v57 }
 0x213   : > { %10454 = vmatmul.mubr.f32.gmra.mxu1 %v12350_v20  ;;  %10616 = vmatprep.subr.mxu1 %v8669_v14  ;;  %v12545_v20 = vld [vmem:[#allocation4 + $0x30] sm:$0xff] }
 0x214   : > { %10771 = vmatmul.mubr.f32.gmra.mxu0 %v12535_v13  ;;  %10488 = vmatprep.mubr.f32.mxu1 %v2928_v19 }
 0x215   : > { %10773 = vmatprep.mubr.f32.mxu0 %v3876_v60  ;;  %10885 = vmatpush3.msra.mxu0 %v8703_v57  ;;  %v8697_v57 = vld [vmem:[%s16534_s3 + $0x358] sm:$0xff] }
 0x216   : > { %10886 = vmatprep.subr.mxu0 %v8702_v32 }
 0x217   : > { %10489 = vmatmul.mubr.f32.vlgmr.msra.gmra.mxu1 %v2929_v6  ;;  %10887 = vmatpush3.msra.mxu0 %v8702_v32  ;;  %v8694_v32 = vld [vmem:[%s16534_s3 + $0x340] sm:$0xff] }
 0x218   : > { %10774 = vmatmul.mubr.f32.gmra.mxu0 %v3877_v1  ;;  %10617 = vmatpush3.msra.mxu1 %v8669_v14  ;;  %v8696_v14 = vld [vmem:[%s16534_s3 + $0x350] sm:$0xff]  ;;  %v8693_v1 = vld [vmem:[%s16534_s3 + $0x338] sm:$0xff] }
 0x219   : > { %10888 = vmatprep.mubr.f32.mxu0 %v12545_v20  ;;  %10491 = vmatprep.mubr.f32.mxu1 %v12357_v56  ;;  %v12560_v56 = vld [vmem:[#allocation4 + $0x48] sm:$0xff] }
 0x21a   : > { %10618 = vmatprep.subr.mxu1 %v8668_v15 }
 0x21b   : > { %10619 = vmatpush3.msra.mxu1 %v8668_v15  ;;  %v8692_v15 = vld [vmem:[%s16534_s3 + $0x330] sm:$0xff] }
 0x21c   : > { %10492 = vmatmul.mubr.f32.gmra.mxu1 %v12362_v61  ;;  %10889 = vmatmul.mubr.f32.vlgmr.msra.gmra.mxu0 %v12549_v28  ;;  %v12567_v61 = vld [vmem:[#allocation4 + $0x50] sm:$0xff] }
 0x21d   : > { %10494 = vmatprep.mubr.f32.mxu1 %v12369_v27  ;;  %10891 = vmatprep.mubr.f32.mxu0 %v12556_v11  ;;  %v12571_v27 = vld [vmem:[#allocation4 + $0x58] sm:$0xff] }
 0x21e   : > { %10620 = vmatprep.subr.mxu1 %v8667_v12 }
 0x21f   : > { %10621 = vmatpush3.msra.mxu1 %v8667_v12 }
 0x220   : > { %10495 = vmatmul.mubr.f32.gmra.mxu1 %v12376_v16  ;;  %10892 = vmatmul.mubr.f32.gmra.mxu0 %v12560_v56  ;;  %v12578_v16 = vld [vmem:[#allocation4 + $0x60] sm:$0xff] }
 0x221   : > { %10497 = vmatprep.mubr.f32.mxu1 %v12382_v38  ;;  %10894 = vmatprep.mubr.f32.mxu0 %v12567_v61  ;;  %v12582_v38 = vld [vmem:[#allocation4 + $0x68] sm:$0xff] }
 0x222   : > { %10622 = vmatprep.subr.mxu1 %v8666_v33 }
 0x223   : > { %10623 = vmatpush3.msra.mxu1 %v8666_v33 }
 0x224   : > { %10498 = vmatmul.mubr.f32.gmra.mxu1 %v12388_v43  ;;  %10895 = vmatmul.mubr.f32.gmra.mxu0 %v12571_v27  ;;  %v12589_v43 = vld [vmem:[#allocation4 + $0x70] sm:$0xff] }
 0x225   : > { %10500 = vmatprep.mubr.f32.mxu1 %v12394_v41  ;;  %10897 = vmatprep.mubr.f32.mxu0 %v12578_v16  ;;  %v12593_v41 = vld [vmem:[#allocation4 + $0x78] sm:$0xff] }
 0x226   : > { %10624 = vmatprep.subr.mxu1 %v8665_v47 }
 0x227   : > { %10625 = vmatpush3.msra.mxu1 %v8665_v47  ;;  %v12793_v47 = vpop.f32.mrf.mxu0 }
 0x228   : > { %10501 = vmatmul.mubr.f32.gmra.mxu1 %v12400_v52  ;;  %10898 = vmatmul.mubr.f32.gmra.mxu0 %v12582_v38  ;;  %v12600_v52 = vld [vmem:[#allocation4 + $0x80] sm:$0xff] }
 0x229   : > { %10503 = vmatprep.mubr.f32.mxu1 %v12406_v5  ;;  %10900 = vmatprep.mubr.f32.mxu0 %v12589_v43  ;;  %v12604_v5 = vld [vmem:[#allocation4 + $0x88] sm:$0xff] }
 0x22a   : > { %10626 = vmatprep.subr.mxu1 %v8664_v37 }
 0x22b   : > { %10627 = vmatpush3.msra.mxu1 %v8664_v37 }
 0x22c   : > { %10504 = vmatmul.mubr.f32.gmra.mxu1 %v12412_v4  ;;  %10901 = vmatmul.mubr.f32.gmra.mxu0 %v12593_v41  ;;  %v12611_v4 = vld [vmem:[#allocation4 + $0x90] sm:$0xff] }
 0x22d   : > { %10506 = vmatprep.mubr.f32.mxu1 %v12418_v10  ;;  %10903 = vmatprep.mubr.f32.mxu0 %v12600_v52  ;;  %v12615_v10 = vld [vmem:[#allocation4 + $0x98] sm:$0xff] }
 0x22e   : > { %10628 = vmatprep.subr.mxu1 %v8663_v36 }
 0x22f   : > { %10629 = vmatpush3.msra.mxu1 %v8663_v36 }
 0x230   : > { %10507 = vmatmul.mubr.f32.gmra.mxu1 %v12424_v0  ;;  %10904 = vmatmul.mubr.f32.gmra.mxu0 %v12604_v5  ;;  %v12622_v0 = vld [vmem:[#allocation4 + $0xa0] sm:$0xff] }
 0x231   : > { %10509 = vmatprep.mubr.f32.mxu1 %v12430_v58  ;;  %10906 = vmatprep.mubr.f32.mxu0 %v12611_v4  ;;  %v12626_v58 = vpop.f32.mrf.mxu1 }
 0x232   : > { %10630 = vmatprep.subr.mxu1 %v8662_v25 }
 0x233   : > { %10631 = vmatpush3.msra.mxu1 %v8662_v25 }
 0x234   : > { %10510 = vmatmul.mubr.f32.gmra.mxu1 %v12436_v50  ;;  %10907 = vmatmul.mubr.f32.gmra.mxu0 %v12615_v10  ;;  %v12635_v50 = vld [vmem:[#allocation4 + $0xb0] sm:$0xff] }
 0x235   : > { %10512 = vmatprep.mubr.f32.mxu1 %v12442_v45  ;;  %10909 = vmatprep.mubr.f32.mxu0 %v12622_v0  ;;  %v12639_v45 = vpop.f32.mrf.mxu1 }
 0x236   : > { %10632 = vmatprep.subr.mxu1 %v8661_v42 }
 0x237   : > { %10633 = vmatpush3.msra.mxu1 %v8661_v42 }
 0x238   : > { %10513 = vmatmul.mubr.f32.gmra.mxu1 %v12448_v63  ;;  %10910 = vmatmul.mubr.f32.gmra.mxu0 %v12628_v53  ;;  %v12648_v63 = vld [vmem:[#allocation4 + $0xc0] sm:$0xff] }
 0x239   : > { %10515 = vmatprep.mubr.f32.mxu1 %v12454_v44  ;;  %10912 = vmatprep.mubr.f32.mxu0 %v12635_v50  ;;  %v12652_v44 = vpop.f32.mrf.mxu1 }
 0x23a   : > { %10634 = vmatprep.subr.mxu1 %v8660_v17 }
 0x23b   : > { %10635 = vmatpush3.msra.mxu1 %v8660_v17  ;;  %v3564_v17 = vld [vmem:[#allocation4 + $0xe0] sm:$0xff] }
 0x23c   : > { %10516 = vmatmul.mubr.f32.gmra.mxu1 %v12460_v22  ;;  %10913 = vmatmul.mubr.f32.gmra.mxu0 %v12641_v55  ;;  %v12661_v22 = vld [vmem:[#allocation4 + $0xc1] sm:$0xff] }
 0x23d   : > { %10518 = vmatprep.mubr.f32.mxu1 %v12466_v35  ;;  %10915 = vmatprep.mubr.f32.mxu0 %v12648_v63  ;;  %v12667_v35 = vpop.f32.mrf.mxu1 }
 0x23e   : > { %10636 = vmatprep.subr.mxu1 %v8659_v48 }
 0x23f   : > { %10637 = vmatpush3.msra.mxu1 %v8659_v48  ;;  %v12680_v39 = vpop.f32.mrf.mxu1  ;;  %v3565_v48 = vld [vmem:[#allocation4 + $0xe8] sm:$0xff] }
 0x240   : > { %10519 = vmatmul.mubr.f32.gmra.mxu1 %v12472_v3  ;;  %10916 = vmatmul.mubr.f32.gmra.mxu0 %v12654_v2  ;;  %v8657_v3 = vld [vmem:[%s16534_s3 + $0x218] sm:$0xff] }
 0x241   : > { %10521 = vmatprep.mubr.f32.mxu1 %v12661_v22  ;;  %10918 = vmatprep.mubr.f32.mxu0 %v12663_v7 }
 0x242   : > { %10638 = vmatprep.subr.mxu1 %v8658_v26 }
 0x243   : > { %10639 = vmatpush3.msra.mxu1 %v8658_v26  ;;  %v3566_v26 = vld [vmem:[#allocation4 + $0xf0] sm:$0xff] }
 0x244   : > { %10522 = vmatmul.mubr.f32.gmra.mxu1 %v12484_v40  ;;  %10919 = vmatmul.mubr.f32.gmra.mxu0 %v12669_v8  ;;  %v12689_v40 = vpop.f32.mrf.mxu1 }
 0x245   : > { %10524 = vmatprep.mubr.f32.mxu1 %v12676_v54  ;;  %10921 = vmatprep.mubr.f32.mxu0 %v12306_v31  ;;  %v8655_v31 = vld [vmem:[%s16534_s3 + $0x208] sm:$0xff] }
 0x246   : > { %10640 = vmatprep.subr.mxu1 %v8657_v3  ;;  %v12694_v21 = vpop.f32.mrf.mxu1 }
 0x247   : > { %10641 = vmatpush3.msra.mxu1 %v8657_v3  ;;  %v3567_v3 = vld [vmem:[#allocation4 + $0xf8] sm:$0xff] }
 0x248   : > { %10525 = vmatmul.mubr.f32.gmra.mxu1 %v12496_v34  ;;  %10922 = vmatmul.mubr.f32.gmra.mxu0 %v12314_v51  ;;  %v12703_v51 = vpop.f32.mrf.mxu1  ;;  %v8699_v34 = vld [vmem:[%s16534_s3 + $0x368] sm:$0xff] }
 0x249   : > { %10527 = vmatprep.mubr.f32.mxu1 %v12297_v59  ;;  %10924 = vmatprep.mubr.f32.mxu0 %v12327_v9  ;;  %v8654_v59 = vld [vmem:[%s16534_s3 + $0x200] sm:$0xff]  ;;  %v8701_v9 = vld [vmem:[%s16534_s3 + $0x378] sm:$0xff] }
 0x24a   : > { %10642 = vmatprep.subr.mxu1 %v8656_v49 }
 0x24b   : > { %10643 = vmatpush3.msra.mxu1 %v8656_v49 }
 0x24c   : > { %10528 = vmatmul.mubr.f32.gmra.mxu1 %v12508_v46  ;;  %10925 = vmatmul.mubr.f32.gmra.mxu0 %v12333_v62  ;;  %v12713_v62 = vld [vmem:[#allocation4] sm:$0xff] }
 0x24d   : > { %10530 = vmatprep.mubr.f32.mxu1 %v12318_v18  ;;  %10927 = vmatprep.mubr.f32.mxu0 %v12342_v29  ;;  %v12711_v18 = vpop.f32.mrf.mxu1  ;;  %v8698_v46 = vld [vmem:[%s16534_s3 + $0x360] sm:$0xff] }
 0x24e   : > { %10644 = vmatprep.subr.mxu1 %v8655_v31 }
 0x24f   : > { %10645 = vmatpush3.msra.mxu1 %v8655_v31  ;;  %v12720_v29 = vpop.f32.mrf.mxu1 }
 0x250   : > { %10531 = vmatmul.mubr.f32.gmra.mxu1 %v12520_v24  ;;  %10928 = vmatmul.mubr.f32.gmra.mxu0 %v12348_v30 }
 0x251   : > { %10533 = vmatprep.mubr.f32.mxu1 %v12339_v23  ;;  %10646 = vmatprep.subr.mxu1 %v8654_v59  ;;  %v8700_v23 = vld [vmem:[%s16534_s3 + $0x370] sm:$0xff]  ;;  %v12725_v30 = vpop.f32.mrf.mxu1 }
 0x252   : > { %10647 = vmatpush3.msra.mxu1 %v8654_v59  ;;  %10930 = vmatprep.mubr.f32.mxu0 %v12713_v62 }
 0x253   : > { %10776 = vmatprep.subr.mxu1 %v8701_v9  ;;  %v12736_v24 = vpop.f32.mrf.mxu1 }
 0x254   : > { %10534 = vmatmul.mubr.f32.gmra.mxu1 %v12535_v13  ;;  %10931 = vmatmul.mubr.f32.gmra.mxu0 %v12713_v62  ;;  %v8695_v13 = vld [vmem:[%s16534_s3 + $0x348] sm:$0xff] }
 0x255   : > { %10648 = vmatprep.mubr.f32.mxu1 %v12713_v62  ;;  %10933 = vmatprep.mubr.f32.mxu0 %v12713_v62  ;;  %v12743_v19 = vpop.f32.mrf.mxu1 }
 0x257   : > { %v12753_v60 = vpop.f32.mrf.mxu1 }
 0x258   : > { %10649 = vmatmul.mubr.f32.vlgmr.msra.gmra.mxu1 %v12713_v62  ;;  %10934 = vmatmul.mubr.f32.gmra.mxu0 %v12713_v62 }
 0x259   : > { %10777 = vmatpush3.msra.mxu1 %v8701_v9  ;;  %10651 = vmatprep.mubr.f32.mxu1 %v12545_v20  ;;  %v12758_v6 = vpop.f32.mrf.mxu1  ;;  %v3569_v9 = vld [vmem:[#allocation4 + $0x108] sm:$0xff] }
 0x25a   : > { %10778 = vmatprep.subr.mxu1 %v8700_v23 }
 0x25b   : > { %10779 = vmatpush3.msra.mxu1 %v8700_v23  ;;  %v12768_v20 = vpop.f32.mrf.mxu1 }
 0x25c   : > { %10652 = vmatmul.mubr.f32.gmra.mxu1 %v12549_v28  ;;  %10780 = vmatprep.subr.mxu1 %v8699_v34  ;;  %v8691_v28 = vld [vmem:[%s16534_s3 + $0x328] sm:$0xff] }
 0x25d   : > { %10654 = vmatprep.mubr.f32.mxu1 %v12556_v11  ;;  %10781 = vmatpush3.msra.mxu1 %v8699_v34  ;;  %v12775_v12 = vpop.f32.mrf.mxu1  ;;  %v8690_v11 = vld [vmem:[%s16534_s3 + $0x320] sm:$0xff] }
 0x25e   : > { %10782 = vmatprep.subr.mxu1 %v8698_v46 }
 0x25f   : > { %10783 = vmatpush3.msra.mxu1 %v8698_v46  ;;  %v12785_v33 = vpop.f32.mrf.mxu1 }
 0x260   : > { %10655 = vmatmul.mubr.f32.gmra.mxu1 %v12560_v56  ;;  %10784 = vmatprep.subr.mxu1 %v8697_v57  ;;  %v8689_v56 = vld [vmem:[%s16534_s3 + $0x318] sm:$0xff]  ;;  %16544 = vst [vmem:[#allocation14_spill] sm:$0xff] %v12785_v33  ;;  %v4171_v33 = vld [vmem:[#allocation4 + $0xc7] sm:$0xff] }
 0x261   : > { %10657 = vmatprep.mubr.f32.mxu1 %v12567_v61  ;;  %10785 = vmatpush3.msra.mxu1 %v8697_v57  ;;  %v8688_v61 = vld [vmem:[%s16534_s3 + $0x310] sm:$0xff] }
 0x262   : > { %10786 = vmatprep.subr.mxu1 %v8696_v14  ;;  %v4152_v57 = vld [vmem:[#allocation4 + $0x2f] sm:$0xff] }
 0x263   : > { %10787 = vmatpush3.msra.mxu1 %v8696_v14 }
 0x264   : > { %10658 = vmatmul.mubr.f32.gmra.mxu1 %v12571_v27  ;;  %10788 = vmatprep.subr.mxu1 %v8695_v13  ;;  %v12790_v27 = vpop.f32.mrf.mxu1 }
 0x265   : > { %10660 = vmatprep.mubr.f32.mxu1 %v12578_v16  ;;  %10789 = vmatpush3.msra.mxu1 %v8695_v13  ;;  %v8687_v16 = vld [vmem:[%s16534_s3 + $0x308] sm:$0xff] }
 0x266   : > { %10790 = vmatprep.subr.mxu1 %v8694_v32  ;;  %v12802_v37 = vpop.f32.mrf.mxu1 }
 0x267   : > { %10791 = vmatpush3.msra.mxu1 %v8694_v32  ;;  %16545 = vst [vmem:[#allocation15_spill] sm:$0xff] %v12802_v37  ;;  %v4169_v37 = vld [vmem:[#allocation4 + $0xb7] sm:$0xff] }
 0x268   : > { %10661 = vmatmul.mubr.f32.gmra.mxu1 %v12582_v38  ;;  %10792 = vmatprep.subr.mxu1 %v8693_v1  ;;  %v8686_v38 = vld [vmem:[%s16534_s3 + $0x300] sm:$0xff]  ;;  %v12811_v36 = vpop.f32.mrf.mxu1 }
 0x269   : > { %10663 = vmatprep.mubr.f32.mxu1 %v12589_v43  ;;  %10793 = vmatpush3.msra.mxu1 %v8693_v1  ;;  %v12805_v43 = vpop.f32.mrf.mxu0  ;;  %v4153_v1 = vld [vmem:[#allocation4 + $0x37] sm:$0xff] }
 0x26a   : > { %10794 = vmatprep.subr.mxu1 %v8692_v15  ;;  %16546 = vst [vmem:[#allocation16_spill] sm:$0xff] %v12805_v43 }
 0x26b   : > { %10795 = vmatpush3.msra.mxu1 %v8692_v15  ;;  %v8732_v15 = vld [vmem:[%s16534_s3 + $0x470] sm:$0xff] }
 0x26c   : > { %10664 = vmatmul.mubr.f32.gmra.mxu1 %v12593_v41  ;;  %10796 = vmatprep.subr.mxu1 %v8691_v28  ;;  %v8733_v41 = vld [vmem:[%s16534_s3 + $0x478] sm:$0xff] }
 0x26d   : > { %10666 = vmatprep.mubr.f32.mxu1 %v12600_v52  ;;  %10797 = vmatpush3.msra.mxu1 %v8691_v28  ;;  %v12814_v52 = vpop.f32.mrf.mxu0 }
 0x26e   : > { %10798 = vmatprep.subr.mxu1 %v8690_v11  ;;  %16547 = vst [vmem:[#allocation17_spill] sm:$0xff] %v12814_v52 }
 0x26f   : > { %10799 = vmatpush3.msra.mxu1 %v8690_v11  ;;  %v4154_v11 = vld [vmem:[#allocation4 + $0x3f] sm:$0xff] }
 0x270   : > { %10667 = vmatmul.mubr.f32.gmra.mxu1 %v12604_v5  ;;  %10800 = vmatprep.subr.mxu1 %v8689_v56  ;;  %v12817_v5 = vpop.f32.mrf.mxu1 }
 0x271   : > { %10669 = vmatprep.mubr.f32.mxu1 %v12611_v4  ;;  %10801 = vmatpush3.msra.mxu1 %v8689_v56  ;;  %16548 = vst [vmem:[#allocation18_spill] sm:$0xff] %v12817_v5  ;;  %v12822_v4 = vpop.f32.mrf.mxu0 }
 0x272   : > { %10802 = vmatprep.subr.mxu1 %v8688_v61  ;;  %v12819_v25 = vpop.f32.mrf.mxu1  ;;  %16549 = vst [vmem:[#allocation19_spill] sm:$0xff] %v12822_v4  ;;  %v8723_v4 = vld [vmem:[%s16534_s3 + $0x428] sm:$0xff] }
 0x273   : > { %10803 = vmatpush3.msra.mxu1 %v8688_v61 }
 0x274   : > { %10670 = vmatmul.mubr.f32.gmra.mxu1 %v12615_v10  ;;  %10804 = vmatprep.subr.mxu1 %v8687_v16  ;;  %v12825_v10 = vpop.f32.mrf.mxu0  ;;  %v12827_v42 = vpop.f32.mrf.mxu1 }
 0x275   : > { %10672 = vmatprep.mubr.f32.mxu1 %v12622_v0  ;;  %10805 = vmatpush3.msra.mxu1 %v8687_v16  ;;  %16550 = vst [vmem:[#allocation20_spill] sm:$0xff] %v12825_v10  ;;  %16551 = vst [vmem:[#allocation21_spill] sm:$0xff] %v12827_v42  ;;  %v4155_v16 = vld [vmem:[#allocation4 + $0x47] sm:$0xff] }
 0x276   : > { %10806 = vmatprep.subr.mxu1 %v8686_v38  ;;  %v12831_v0 = vpop.f32.mrf.mxu1 }
 0x277   : > { %10807 = vmatpush3.msra.mxu1 %v8686_v38  ;;  %v8730_v38 = vld [vmem:[%s16534_s3 + $0x460] sm:$0xff] }
 0x278   : > { %10673 = vmatmul.mubr.f32.gmra.mxu1 %v12628_v53  ;;  %10936 = vmatprep.subr.mxu1 %v8733_v41  ;;  %v12833_v53 = vpop.f32.mrf.mxu0 }
 0x279   : > { %10675 = vmatprep.mubr.f32.mxu1 %v12635_v50  ;;  %16552 = vst [vmem:[#allocation22_spill] sm:$0xff] %v12833_v53  ;;  %v8724_v53 = vld [vmem:[%s16534_s3 + $0x430] sm:$0xff] }
 0x27a   : > { %v12836_v50 = vpop.f32.mrf.mxu0 }
 0x27b   : > { %16553 = vst [vmem:[#allocation23_spill] sm:$0xff] %v12836_v50 }
 0x27c   : > { %10676 = vmatmul.mubr.f32.gmra.mxu1 %v12641_v55  ;;  %v12838_v55 = vpop.f32.mrf.mxu1 }
 0x27d   : > { %10678 = vmatprep.mubr.f32.mxu1 %v12648_v63  ;;  %16554 = vst [vmem:[#allocation24_spill] sm:$0xff] %v12838_v55  ;;  %v4164_v55 = vld [vmem:[#allocation4 + $0x8f] sm:$0xff] }
 0x27e   : > { %v12840_v63 = vpop.f32.mrf.mxu1 }
 0x280   : > { %10679 = vmatmul.mubr.f32.gmra.mxu1 %v12654_v2  ;;  %v12842_v2 = vpop.f32.mrf.mxu0  ;;  %v12846_v49 = vpop.f32.mrf.mxu1 }
 0x281   : > { %10681 = vmatprep.mubr.f32.mxu1 %v12663_v7  ;;  %16555 = vst [vmem:[#allocation25_spill] sm:$0xff] %v12842_v2  ;;  %16557 = vst [vmem:[#allocation27_spill] sm:$0xff] %v12846_v49  ;;  %v8722_v49 = vld [vmem:[%s16534_s3 + $0x420] sm:$0xff] }
 0x282   : > { %v12844_v7 = vpop.f32.mrf.mxu0 }
 0x283   : > { %16556 = vst [vmem:[#allocation26_spill] sm:$0xff] %v12844_v7 }
 0x284   : > { %10682 = vmatmul.mubr.f32.gmra.mxu1 %v12669_v8  ;;  %v3568_v8 = vld [vmem:[#allocation4 + $0x100] sm:$0xff]  ;;  %v12850_v59 = vpop.f32.mrf.mxu0 }
 0x285   : > { %10684 = vmatprep.mubr.f32.mxu1 %v3564_v17  ;;  %16558 = vst [vmem:[#allocation28_spill] sm:$0xff] %v12850_v59 }
 0x286   : > { %v12852_v23 = vpop.f32.mrf.mxu0 }
 0x287   : > { %16559 = vst [vmem:[#allocation29_spill] sm:$0xff] %v12852_v23 }
 0x288   : > { %10685 = vmatmul.mubr.f32.gmra.mxu1 %v3565_v48  ;;  %v12848_v31 = vpop.f32.mrf.mxu1  ;;  %v12860_v14 = vpop.f32.mrf.mxu0 }
 0x289   : > { %10687 = vmatprep.mubr.f32.mxu1 %v3566_v26  ;;  %16560 = vst [vmem:[#allocation30_spill] sm:$0xff] %v12860_v14  ;;  %v8729_v26 = vld [vmem:[%s16534_s3 + $0x458] sm:$0xff] }
 0x28a   : > { %v12855_v34 = vpop.f32.mrf.mxu1  ;;  %v12864_v32 = vpop.f32.mrf.mxu0  ;;  %v4177_v14 = vld [vmem:[#allocation4 + $0xf7] sm:$0xff] }
 0x28b   : > { %16561 = vst [vmem:[#allocation31_spill] sm:$0xff] %v12864_v32 }
 0x28c   : > { %10688 = vmatmul.mubr.f32.gmra.mxu1 %v3567_v3  ;;  %v12876_v61 = vpop.f32.mrf.mxu0 }
 0x28d   : > { %10690 = vmatprep.mubr.f32.mxu1 %v3568_v8  ;;  %16562 = vst [vmem:[#allocation32_spill] sm:$0xff] %v12876_v61  ;;  %v4157_v8 = vld [vmem:[#allocation4 + $0x57] sm:$0xff] }
 0x28e   : > { %v12883_v48 = vpop.f32.mrf.mxu0  ;;  %v4173_v61 = vld [vmem:[#allocation4 + $0xd7] sm:$0xff] }
 0x28f   : > { %16563 = vst [vmem:[#allocation33_spill] sm:$0xff] %v12883_v48 }
 0x290   : > { %10691 = vmatmul.mubr.f32.gmra.mxu1 %v3569_v9  ;;  %v8728_v9 = vld [vmem:[%s16534_s3 + $0x450] sm:$0xff] }
 0x291   : > { %10693 = vmatprep.mubr.f32.mxu1 %v12713_v62 }
 0x293   : > { %v12857_v46 = vpop.f32.mrf.mxu1 }
 0x294   : > { %10694 = vmatmul.mubr.f32.gmra.mxu1 %v12713_v62  ;;  %v8731_v62 = vld [vmem:[%s16534_s3 + $0x468] sm:$0xff] }
 0x295   : > { %10808 = vmatprep.mubr.f32.mxu1 %v4152_v57  ;;  %v12862_v13 = vpop.f32.mrf.mxu1 }
 0x297   : > { %v12869_v28 = vpop.f32.mrf.mxu1 }
 0x298   : > { %10809 = vmatmul.mubr.f32.vlgmr.msra.gmra.mxu1 %v4153_v1  ;;  %v4158_v1 = vld [vmem:[#allocation4 + $0x5f] sm:$0xff] }
 0x299   : > { %10937 = vmatpush3.msra.mxu1 %v8733_v41  ;;  %10811 = vmatprep.mubr.f32.mxu1 %v4154_v11  ;;  %v12874_v56 = vpop.f32.mrf.mxu1  ;;  %v4156_v41 = vld [vmem:[#allocation4 + $0x4f] sm:$0xff] }
 0x29a   : > { %10938 = vmatprep.subr.mxu1 %v8732_v15  ;;  %v8727_v11 = vld [vmem:[%s16534_s3 + $0x448] sm:$0xff] }
 0x29b   : > { %10939 = vmatpush3.msra.mxu1 %v8732_v15  ;;  %v12881_v17 = vpop.f32.mrf.mxu1  ;;  %v12895_v15 = vpop.f32.mrf.mxu0 }
 0x29c   : > { %10812 = vmatmul.mubr.f32.gmra.mxu1 %v4155_v16  ;;  %10940 = vmatprep.subr.mxu1 %v8731_v62  ;;  %16564 = vst [vmem:[#allocation34_spill] sm:$0xff] %v12895_v15 }
 0x29d   : > { %10814 = vmatprep.mubr.f32.mxu1 %v4156_v41  ;;  %10941 = vmatpush3.msra.mxu1 %v8731_v62  ;;  %v12888_v3 = vpop.f32.mrf.mxu1  ;;  %v12902_v16 = vpop.f32.mrf.mxu0  ;;  %v8726_v41 = vld [vmem:[%s16534_s3 + $0x440] sm:$0xff] }
 0x29e   : > { %10942 = vmatprep.subr.mxu1 %v8730_v38  ;;  %16565 = vst [vmem:[#allocation35_spill] sm:$0xff] %v12902_v16 }
 0x29f   : > { %10943 = vmatpush3.msra.mxu1 %v8730_v38  ;;  %v12893_v57 = vpop.f32.mrf.mxu1  ;;  %v4159_v38 = vld [vmem:[#allocation4 + $0x67] sm:$0xff]  ;;  %v12914_v2 = vpop.f32.mrf.mxu0 }
 0x2a0   : > { %10815 = vmatmul.mubr.f32.gmra.mxu1 %v4157_v8  ;;  %10944 = vmatprep.subr.mxu1 %v8729_v26  ;;  %16566 = vst [vmem:[#allocation36_spill] sm:$0xff] %v12914_v2  ;;  %v8718_v2 = vld [vmem:[%s16534_s3 + $0x400] sm:$0xff] }
 0x2a1   : > { %10817 = vmatprep.mubr.f32.mxu1 %v4158_v1  ;;  %10945 = vmatpush3.msra.mxu1 %v8729_v26  ;;  %v12900_v62 = vpop.f32.mrf.mxu1  ;;  %v4160_v1 = vld [vmem:[#allocation4 + $0x6f] sm:$0xff]  ;;  %v8725_v26 = vld [vmem:[%s16534_s3 + $0x438] sm:$0xff] }
 0x2a2   : > { %10946 = vmatprep.subr.mxu1 %v8728_v9 }
 0x2a3   : > { %10947 = vmatpush3.msra.mxu1 %v8728_v9  ;;  %v12907_v8 = vpop.f32.mrf.mxu1  ;;  %v4161_v9 = vld [vmem:[#allocation4 + $0x77] sm:$0xff] }
 0x2a4   : > { %10818 = vmatmul.mubr.f32.gmra.mxu1 %v4159_v38  ;;  %10948 = vmatprep.subr.mxu1 %v8727_v11 }
 0x2a5   : > { %10820 = vmatprep.mubr.f32.mxu1 %v4160_v1  ;;  %10949 = vmatpush3.msra.mxu1 %v8727_v11  ;;  %v12912_v59 = vpop.f32.mrf.mxu1  ;;  %v4162_v1 = vld [vmem:[#allocation4 + $0x7f] sm:$0xff]  ;;  %v12921_v11 = vpop.f32.mrf.mxu0 }
 0x2a6   : > { %10950 = vmatprep.subr.mxu1 %v8726_v41  ;;  %16567 = vst [vmem:[#allocation37_spill] sm:$0xff] %v12921_v11  ;;  %v4165_v11 = vld [vmem:[#allocation4 + $0x97] sm:$0xff] }
 0x2a7   : > { %10951 = vmatpush3.msra.mxu1 %v8726_v41  ;;  %v12919_v38 = vpop.f32.mrf.mxu1  ;;  %v4163_v41 = vld [vmem:[#allocation4 + $0x87] sm:$0xff] }
 0x2a8   : > { %10821 = vmatmul.mubr.f32.gmra.mxu1 %v4161_v9  ;;  %10952 = vmatprep.subr.mxu1 %v8725_v26 }
 0x2a9   : > { %10823 = vmatprep.mubr.f32.mxu1 %v4162_v1  ;;  %10953 = vmatpush3.msra.mxu1 %v8725_v26  ;;  %v12926_v43 = vpop.f32.mrf.mxu1  ;;  %v12933_v1 = vpop.f32.mrf.mxu0  ;;  %v8721_v26 = vld [vmem:[%s16534_s3 + $0x418] sm:$0xff] }
 0x2aa   : > { %10954 = vmatprep.subr.mxu1 %v8724_v53  ;;  %16568 = vst [vmem:[#allocation38_spill] sm:$0xff] %v12933_v1 }
 0x2ab   : > { %10955 = vmatpush3.msra.mxu1 %v8724_v53  ;;  %v12931_v9 = vpop.f32.mrf.mxu1  ;;  %v12940_v53 = vpop.f32.mrf.mxu0 }
 0x2ac   : > { %10824 = vmatmul.mubr.f32.gmra.mxu1 %v4163_v41  ;;  %10956 = vmatprep.subr.mxu1 %v8723_v4  ;;  %16569 = vst [vmem:[#allocation39_spill] sm:$0xff] %v12940_v53  ;;  %v8720_v41 = vld [vmem:[%s16534_s3 + $0x410] sm:$0xff] }
 0x2ad   : > { %10826 = vmatprep.mubr.f32.mxu1 %v4164_v55  ;;  %10957 = vmatpush3.msra.mxu1 %v8723_v4  ;;  %v12938_v42 = vpop.f32.mrf.mxu1  ;;  %v4166_v55 = vld [vmem:[#allocation4 + $0x9f] sm:$0xff]  ;;  %v8719_v4 = vld [vmem:[%s16534_s3 + $0x408] sm:$0xff]  ;;  %v12952_v53 = vpop.f32.mrf.mxu0 }
 0x2ae   : > { %10958 = vmatprep.subr.mxu1 %v8722_v49  ;;  %16570 = vst [vmem:[#allocation40_spill] sm:$0xff] %v12952_v53 }
 0x2af   : > { %10959 = vmatpush3.msra.mxu1 %v8722_v49  ;;  %v12945_v5 = vpop.f32.mrf.mxu1  ;;  %v4167_v49 = vld [vmem:[#allocation4 + $0xa7] sm:$0xff] }
 0x2b0   : > { %10827 = vmatmul.mubr.f32.gmra.mxu1 %v4165_v11  ;;  %10960 = vmatprep.subr.mxu1 %v8721_v26 }
 0x2b1   : > { %10829 = vmatprep.mubr.f32.mxu1 %v4166_v55  ;;  %10961 = vmatpush3.msra.mxu1 %v8721_v26  ;;  %v12950_v1 = vpop.f32.mrf.mxu1  ;;  %v4168_v55 = vld [vmem:[#allocation4 + $0xaf] sm:$0xff]  ;;  %v12959_v26 = vpop.f32.mrf.mxu0 }
 0x2b2   : > { %10962 = vmatprep.subr.mxu1 %v8720_v41  ;;  %16571 = vst [vmem:[#allocation41_spill] sm:$0xff] %v12959_v26 }
 0x2b3   : > { %10963 = vmatpush3.msra.mxu1 %v8720_v41  ;;  %v12957_v11 = vpop.f32.mrf.mxu1  ;;  %v4170_v41 = vld [vmem:[#allocation4 + $0xbf] sm:$0xff]  ;;  %v12965_v15 = vpop.f32.mrf.mxu0 }
 0x2b4   : > { %10830 = vmatmul.mubr.f32.gmra.mxu1 %v4167_v49  ;;  %10964 = vmatprep.subr.mxu1 %v8719_v4  ;;  %16572 = vst [vmem:[#allocation42_spill] sm:$0xff] %v12965_v15  ;;  %v4174_v15 = vld [vmem:[#allocation4 + $0xdf] sm:$0xff] }
 0x2b5   : > { %10832 = vmatprep.mubr.f32.mxu1 %v4168_v55  ;;  %10965 = vmatpush3.msra.mxu1 %v8719_v4  ;;  %v12961_v16 = vpop.f32.mrf.mxu1  ;;  %v12969_v49 = vpop.f32.mrf.mxu0  ;;  %v4172_v4 = vld [vmem:[#allocation4 + $0xcf] sm:$0xff] }
 0x2b6   : > { %10966 = vmatprep.subr.mxu1 %v8718_v2  ;;  %16574 = vst [vmem:[#allocation44_spill] sm:$0xff] %v12969_v49  ;;  %v4175_v49 = vld [vmem:[#allocation4 + $0xe7] sm:$0xff] }
 0x2b7   : > { %10967 = vmatpush3.msra.mxu1 %v8718_v2  ;;  %v12963_v53 = vpop.f32.mrf.mxu1  ;;  %v12975_v2 = vpop.f32.mrf.mxu0 }
 0x2b8   : > { %10833 = vmatmul.mubr.f32.gmra.mxu1 %v4169_v37  ;;  %16576 = vst [vmem:[#allocation46_spill] sm:$0xff] %v12975_v2 }
 0x2b9   : > { %10835 = vmatprep.mubr.f32.mxu1 %v4170_v41  ;;  %v12967_v48 = vpop.f32.mrf.mxu1  ;;  %v12979_v41 = vpop.f32.mrf.mxu0 }
 0x2ba   : > { %16573 = vst [vmem:[#allocation43_spill] sm:$0xff] %v12967_v48  ;;  %16577 = vst [vmem:[#allocation47_spill] sm:$0xff] %v12979_v41  ;;  %v4178_v41 = vld [vmem:[#allocation4 + $0xff] sm:$0xff] }
 0x2bb   : > { %v12971_v26 = vpop.f32.mrf.mxu1 }
 0x2bc   : > { %10836 = vmatmul.mubr.f32.gmra.mxu1 %v4171_v33  ;;  %v4176_v33 = vld [vmem:[#allocation4 + $0xef] sm:$0xff] }
 0x2bd   : > { %10838 = vmatprep.mubr.f32.mxu1 %v4172_v4  ;;  %v12973_v55 = vpop.f32.mrf.mxu1  ;;  %v12985_v4 = vpop.f32.mrf.mxu0 }
 0x2be   : > { %16575 = vst [vmem:[#allocation45_spill] sm:$0xff] %v12973_v55  ;;  %16579 = vst [vmem:[#allocation49_spill] sm:$0xff] %v12985_v4 }
 0x2bf   : > { %v12977_v37 = vpop.f32.mrf.mxu1  ;;  %v12989_v2 = vpop.f32.mrf.mxu0 }
 0x2c0   : > { %10839 = vmatmul.mubr.f32.gmra.mxu1 %v4173_v61  ;;  %16581 = vst [vmem:[#allocation51_spill] sm:$0xff] %v12989_v2  ;;  %v4182_v2 = vld [vmem:[#allocation4 + $0x11f] sm:$0xff] }
 0x2c1   : > { %10841 = vmatprep.mubr.f32.mxu1 %v4174_v15  ;;  %v12981_v48 = vpop.f32.mrf.mxu1  ;;  %v12995_v23 = vpop.f32.mrf.mxu0 }
 0x2c2   : > { %16578 = vst [vmem:[#allocation48_spill] sm:$0xff] %v12981_v48  ;;  %v4180_v48 = vld [vmem:[#allocation4 + $0x10f] sm:$0xff]  ;;  %16583 = vst [vmem:[#allocation53_spill] sm:$0xff] %v12995_v23 }
 0x2c3   : > { %v12983_v32 = vpop.f32.mrf.mxu1 }
 0x2c4   : > { %10842 = vmatmul.mubr.f32.gmra.mxu1 %v4175_v49  ;;  %v4179_v49 = vld [vmem:[#allocation4 + $0x107] sm:$0xff] }
 0x2c5   : > { %10844 = vmatprep.mubr.f32.mxu1 %v4176_v33  ;;  %v12987_v55 = vpop.f32.mrf.mxu1  ;;  %v4181_v33 = vld [vmem:[#allocation4 + $0x117] sm:$0xff] }
 0x2c6   : > { %16580 = vst [vmem:[#allocation50_spill] sm:$0xff] %v12987_v55  ;;  %v13001_v55 = vpop.f32.mrf.mxu0 }
 0x2c7   : > { %v12991_v61 = vpop.f32.mrf.mxu1  ;;  %16585 = vst [vmem:[#allocation55_spill] sm:$0xff] %v13001_v55  ;;  %v2775_v55 = vadd.f32 %v12869_v28, %v12626_v58 }
 0x2c8   : > { %10845 = vmatmul.mubr.f32.gmra.mxu1 %v4177_v14  ;;  %v4183_v14 = vld [vmem:[#allocation4 + $0x127] sm:$0xff] }
 0x2c9   : > { %10847 = vmatprep.mubr.f32.mxu1 %v4178_v41  ;;  %v12993_v15 = vpop.f32.mrf.mxu1 }
 0x2ca   : > { %16582 = vst [vmem:[#allocation52_spill] sm:$0xff] %v12993_v15  ;;  %v13005_v15 = vpop.f32.mrf.mxu0 }
 0x2cb   : > { %v12997_v7 = vpop.f32.mrf.mxu1  ;;  %16586 = vst [vmem:[#allocation56_spill] sm:$0xff] %v13005_v15  ;;  %v4765_v15 = vld [vmem:[#allocation4 + $0x39] sm:$0xff] }
 0x2cc   : > { %10848 = vmatmul.mubr.f32.gmra.mxu1 %v4179_v49 }
 0x2cd   : > { %10850 = vmatprep.mubr.f32.mxu1 %v4180_v48  ;;  %v12999_v4 = vpop.f32.mrf.mxu1  ;;  %v4764_v48 = vld [vmem:[#allocation4 + $0x31] sm:$0xff] }
 0x2ce   : > { %16584 = vst [vmem:[#allocation54_spill] sm:$0xff] %v12999_v4 }
 0x2cf   : > { %v13003_v50 = vpop.f32.mrf.mxu1 }
 0x2d0   : > { %10851 = vmatmul.mubr.f32.gmra.mxu1 %v4181_v33  ;;  %v13015_v33 = vpop.f32.mrf.mxu0 }
 0x2d1   : > { %10853 = vmatprep.mubr.f32.mxu1 %v4182_v2  ;;  %v2909_v41 = vpop.f32.mrf.mxu1  ;;  %16587 = vst [vmem:[#allocation57_spill] sm:$0xff] %v13015_v33 }
 0x2d2   : > { %v13008_v23 = vadd.f32 %v2909_v41, %v12855_v34  ;;  %v4766_v34 = vld [vmem:[#allocation4 + $0x41] sm:$0xff]  ;;  %v13026_v58 = vpop.f32.mrf.mxu0 }
 0x2d3   : > { %v10455_v10 = vpop.f32.mrf.mxu1 }
 0x2d4   : > { %10854 = vmatmul.mubr.f32.gmra.mxu1 %v4183_v14  ;;  %v13011_v49 = vadd.f32 %v10455_v10, %v12857_v46  ;;  %v2770_v14 = vadd.f32 %v12874_v56, %v12639_v45  ;;  %v2785_v46 = vadd.f32 %v12881_v17, %v12652_v44  ;;  %v13036_v56 = vpop.f32.mrf.mxu0  ;;  %v4769_v17 = vld [vmem:[#allocation4 + $0x59] sm:$0xff] }
 0x2d5   : > { %10968 = vmatprep.mubr.f32.mxu1 %v4764_v48  ;;  %v2919_v4 = vpop.f32.mrf.mxu1  ;;  %v4768_v48 = vld [vmem:[#allocation4 + $0x51] sm:$0xff] }
 0x2d6   : > { %v13018_v2 = vadd.f32 %v2919_v4, %v12862_v13  ;;  %v4767_v13 = vld [vmem:[#allocation4 + $0x49] sm:$0xff] }
 0x2d7   : > { %v10490_v52 = vpop.f32.mrf.mxu1 }
 0x2d8   : > { %10969 = vmatmul.mubr.f32.vlgmr.msra.gmra.mxu1 %v4765_v15  ;;  %v13022_v41 = vadd.f32 %v10490_v52, %v2775_v55  ;;  %v2780_v15 = vadd.f32 %v12888_v3, %v12667_v35  ;;  %v2795_v52 = vadd.f32 %v12893_v57, %v12680_v39  ;;  %v13044_v3 = vpop.f32.mrf.mxu0  ;;  %v2805_v39 = vadd.f32 %v12907_v8, %v12694_v21  ;;  %v4773_v21 = vld [vmem:[#allocation4 + $0x79] sm:$0xff] }
 0x2d9   : > { %10971 = vmatprep.mubr.f32.mxu1 %v4766_v34  ;;  %v3043_v10 = vpop.f32.mrf.mxu1  ;;  %v4770_v34 = vld [vmem:[#allocation4 + $0x61] sm:$0xff] }
 0x2da   : > { %v13028_v28 = vadd.f32 %v3043_v10, %v2770_v14  ;;  %v2790_v14 = vadd.f32 %v12900_v62, %v12689_v40  ;;  %v13054_v62 = vpop.f32.mrf.mxu0 }
 0x2dc   : > { %v10493_v4 = vpop.f32.mrf.mxu1  ;;  %10972 = vmatmul.mubr.f32.gmra.mxu1 %v4767_v13 }
 0x2dd   : > { %v13032_v33 = vadd.f32 %v10493_v4, %v2785_v46  ;;  %10974 = vmatprep.mubr.f32.mxu1 %v4768_v48  ;;  %v4771_v46 = vld [vmem:[#allocation4 + $0x69] sm:$0xff]  ;;  %v4772_v4 = vld [vmem:[#allocation4 + $0x71] sm:$0xff]  ;;  %v2800_v48 = vadd.f32 %v12912_v59, %v12703_v51  ;;  %v13064_v59 = vpop.f32.mrf.mxu0 }
 0x2de   : > { %v3053_v45 = vpop.f32.mrf.mxu1 }
 0x2df   : > { %v13038_v44 = vadd.f32 %v3053_v45, %v2780_v15  ;;  %v2815_v45 = vadd.f32 %v12919_v38, %v12711_v18  ;;  %v4775_v18 = vld [vmem:[#allocation4 + $0x89] sm:$0xff] }
 0x2e0   : > { %v10496_v55 = vpop.f32.mrf.mxu1  ;;  %10975 = vmatmul.mubr.f32.gmra.mxu1 %v4769_v17  ;;  %v4774_v17 = vld [vmem:[#allocation4 + $0x81] sm:$0xff] }
 0x2e1   : > { %v13042_v10 = vadd.f32 %v10496_v55, %v2795_v52  ;;  %10977 = vmatprep.mubr.f32.mxu1 %v4770_v34  ;;  %v2810_v55 = vadd.f32 %v12926_v43, %v12720_v29  ;;  %v13074_v43 = vpop.f32.mrf.mxu0 }
 0x2e2   : > { %v3063_v35 = vpop.f32.mrf.mxu1 }
 0x2e3   : > { %v13048_v57 = vadd.f32 %v3063_v35, %v2790_v14  ;;  %v2825_v14 = vadd.f32 %v12931_v9, %v12725_v30  ;;  %v4777_v30 = vld [vmem:[#allocation4 + $0x99] sm:$0xff] }
 0x2e4   : > { %v10499_v13 = vpop.f32.mrf.mxu1  ;;  %10978 = vmatmul.mubr.f32.gmra.mxu1 %v4771_v46  ;;  %v2820_v46 = vadd.f32 %v12938_v42, %v12736_v24  ;;  %v13084_v42 = vpop.f32.mrf.mxu0 }
 0x2e5   : > { %v13052_v15 = vadd.f32 %v10499_v13, %v2805_v39  ;;  %10980 = vmatprep.mubr.f32.mxu1 %v4772_v4  ;;  %v4776_v39 = vld [vmem:[#allocation4 + $0x91] sm:$0xff]  ;;  %v2835_v4 = vadd.f32 %v12945_v5, %v12743_v19  ;;  %v4779_v19 = vld [vmem:[#allocation4 + $0xa9] sm:$0xff] }
 0x2e6   : > { %v3073_v40 = vpop.f32.mrf.mxu1 }
 0x2e7   : > { %v13058_v52 = vadd.f32 %v3073_v40, %v2800_v48  ;;  %v4778_v40 = vld [vmem:[#allocation4 + $0xa1] sm:$0xff] }
 0x2e8   : > { %v10502_v8 = vpop.f32.mrf.mxu1  ;;  %10981 = vmatmul.mubr.f32.gmra.mxu1 %v4773_v21 }
 0x2e9   : > { %v13062_v34 = vadd.f32 %v10502_v8, %v2815_v45  ;;  %10983 = vmatprep.mubr.f32.mxu1 %v4774_v17  ;;  %v2830_v45 = vadd.f32 %v12950_v1, %v12753_v60  ;;  %v2845_v8 = vadd.f32 %v12957_v11, %v12758_v6  ;;  %v13094_v1 = vpop.f32.mrf.mxu0  ;;  %v4781_v6 = vld [vmem:[#allocation4 + $0xb9] sm:$0xff] }
 0x2ea   : > { %v3083_v51 = vpop.f32.mrf.mxu1 }
 0x2eb   : > { %v13068_v35 = vadd.f32 %v3083_v51, %v2810_v55  ;;  %v4780_v55 = vld [vmem:[#allocation4 + $0xb1] sm:$0xff]  ;;  %v2840_v51 = vadd.f32 %v12961_v16, %v12768_v20  ;;  %v13105_v20 = vpop.f32.mrf.mxu0  ;;  %v2865_v16 = vadd.f32 %v12971_v26, %v12790_v27 }
 0x2ec   : > { %v10505_v38 = vpop.f32.mrf.mxu1  ;;  %10984 = vmatmul.mubr.f32.gmra.mxu1 %v4775_v18  ;;  %v2855_v18 = vadd.f32 %v12963_v53, %v12775_v12 }
 0x2ed   : > { %v13072_v13 = vadd.f32 %v10505_v38, %v2825_v14  ;;  %10986 = vmatprep.mubr.f32.mxu1 %v4776_v39 }
 0x2ee   : > { %v3093_v29 = vpop.f32.mrf.mxu1 }
 0x2ef   : > { %v13078_v48 = vadd.f32 %v3093_v29, %v2820_v46  ;;  %v4783_v29 = vld [vmem:[#allocation4 + $0xc9] sm:$0xff] }
 0x2f0   : > { %v10508_v9 = vpop.f32.mrf.mxu1  ;;  %10987 = vmatmul.mubr.f32.gmra.mxu1 %v4777_v30  ;;  %v13114_v30 = vpop.f32.mrf.mxu0 }
 0x2f1   : > { %v13082_v21 = vadd.f32 %v10508_v9, %v2835_v4  ;;  %10989 = vmatprep.mubr.f32.mxu1 %v4778_v40  ;;  %v4785_v9 = vld [vmem:[#allocation4 + $0xd9] sm:$0xff] }
 0x2f2   : > { %v3103_v24 = vpop.f32.mrf.mxu1  ;;  %v13122_v26 = vpop.f32.mrf.mxu0 }
 0x2f3   : > { %v13088_v17 = vadd.f32 %v3103_v24, %v2830_v45  ;;  %v4786_v45 = vld [vmem:[#allocation4 + $0xe1] sm:$0xff] }
 0x2f4   : > { %v10511_v5 = vpop.f32.mrf.mxu1  ;;  %10990 = vmatmul.mubr.f32.gmra.mxu1 %v4779_v19 }
 0x2f5   : > { %v13092_v14 = vadd.f32 %v10511_v5, %v2845_v8  ;;  %10992 = vmatprep.mubr.f32.mxu1 %v4780_v55  ;;  %v4787_v8 = vld [vmem:[#allocation4 + $0xe9] sm:$0xff]  ;;  %v4788_v5 = vld [vmem:[#allocation4 + $0xf1] sm:$0xff] }
 0x2f6   : > { %v3113_v60 = vpop.f32.mrf.mxu1 }
 0x2f7   : > { %v13098_v38 = vadd.f32 %v3113_v60, %v2840_v51  ;;  %v2895_v51 = vadd.f32 %v12991_v61, %v12831_v0  ;;  %v4789_v60 = vld [vmem:[#allocation4 + $0xf9] sm:$0xff] }
 0x2f8   : > { %v10514_v11 = vpop.f32.mrf.mxu1  ;;  %10993 = vmatmul.mubr.f32.gmra.mxu1 %v4781_v6  ;;  %v4790_v6 = vld [vmem:[#allocation4 + $0x101] sm:$0xff]  ;;  %v4793_v0 = vld [vmem:[#allocation4 + $0x119] sm:$0xff] }
 0x2f9   : > { %v13100_v39 = vadd.f32 %v10514_v11, %v2855_v18  ;;  %10995 = vmatprep.mubr.f32.mxu1 %v12661_v22  ;;  %v2875_v22 = vadd.f32 %v12977_v37, %v12811_v36  ;;  %v13130_v37 = vpop.f32.mrf.mxu0 }
 0x2fa   : > { %v13103_v46 = vpop.f32.mrf.mxu1  ;;  %16588 = vst [vmem:[#allocation58_spill] sm:$0xff] %v13130_v37 }
 0x2fc   : > { %v10517_v4 = vpop.f32.mrf.mxu1  ;;  %10996 = vmatmul.mubr.f32.gmra.mxu1 %v4783_v29  ;;  %v2905_v29 = vadd.f32 %v12997_v7, %v12840_v63 }
 0x2fd   : > { %v13109_v12 = vadd.f32 %v10517_v4, %v2865_v16  ;;  %10998 = vmatprep.mubr.f32.mxu1 %v12676_v54  ;;  %v2885_v54 = vadd.f32 %v12983_v32, %v12819_v25  ;;  %v4792_v32 = vld [vmem:[#allocation4 + $0x111] sm:$0xff]  ;;  %v13138_v16 = vpop.f32.mrf.mxu0  ;;  %v4791_v4 = vld [vmem:[#allocation4 + $0x109] sm:$0xff] }
 0x2fe   : > { %v13112_v53 = vpop.f32.mrf.mxu1  ;;  %16589 = vst [vmem:[#allocation59_spill] sm:$0xff] %v13138_v16  ;;  %v16605_v16 = vld [vmem:[#allocation31_spill] sm:$0xff] }
 0x300   : > { %v10520_v40 = vpop.f32.mrf.mxu1  ;;  %10999 = vmatmul.mubr.f32.gmra.mxu1 %v4785_v9 }
 0x301   : > { %v13118_v24 = vadd.f32 %v10520_v40, %v2875_v22  ;;  %11001 = vmatprep.mubr.f32.mxu1 %v4786_v45  ;;  %v4794_v40 = vld [vmem:[#allocation4 + $0x121] sm:$0xff]  ;;  %v13146_v45 = vpop.f32.mrf.mxu0 }
 0x302   : > { %v13120_v27 = vpop.f32.mrf.mxu1  ;;  %16590 = vst [vmem:[#allocation60_spill] sm:$0xff] %v13146_v45 }
 0x304   : > { %v10523_v19 = vpop.f32.mrf.mxu1  ;;  %11002 = vmatmul.mubr.f32.gmra.mxu1 %v4787_v8  ;;  %v5575_v8 = vld [vmem:[%s16536_s5 + $0xf8] sm:$0xff] }
 0x305   : > { %v13126_v55 = vadd.f32 %v10523_v19, %v2885_v54  ;;  %11004 = vmatprep.mubr.f32.mxu1 %v4788_v5  ;;  %v2915_v54 = vadd.f32 %v13003_v50, %v12848_v31  ;;  %9271 = vmatprep.subr.mxu0 %v5575_v8  ;;  %v4795_v19 = vld [vmem:[#allocation4 + $0x129] sm:$0xff]  ;;  %v5559_v5 = vld [vmem:[%s16536_s5 + $0x78] sm:$0xff] }
 0x306   : > { %v13128_v36 = vpop.f32.mrf.mxu1  ;;  %9272 = vmatpush3.msra.mxu0 %v5559_v5  ;;  %v5574_v50 = vld [vmem:[%s16536_s5 + $0xf0] sm:$0xff] }
 0x307   : > { %9273 = vmatprep.subr.mxu0 %v5574_v50  ;;  %v16594_v8 = vld [vmem:[#allocation17_spill] sm:$0xff] }
 0x308   : > { %v10526_v18 = vpop.f32.mrf.mxu1  ;;  %11005 = vmatmul.mubr.f32.gmra.mxu1 %v4789_v60  ;;  %v13160_v60 = vpop.f32.mrf.mxu0 }
 0x309   : > { %v13134_v11 = vadd.f32 %v10526_v18, %v2895_v51  ;;  %11007 = vmatprep.mubr.f32.mxu1 %v4790_v6  ;;  %16591 = vst [vmem:[#allocation61_spill] sm:$0xff] %v13160_v60  ;;  %v5558_v6 = vld [vmem:[%s16536_s5 + $0x70] sm:$0xff] }
 0x30a   : > { %v13136_v25 = vpop.f32.mrf.mxu1  ;;  %9274 = vmatpush3.msra.mxu0 %v5558_v6  ;;  %v5557_v6 = vld [vmem:[%s16536_s5 + $0x68] sm:$0xff] }
 0x30c   : > { %v10529_v22 = vpop.f32.mrf.mxu1  ;;  %11008 = vmatmul.mubr.f32.gmra.mxu1 %v4791_v4  ;;  %v3509_v4 = vadd.f32 %v12793_v47, %v13022_v41  ;;  %v16596_v41 = vld [vmem:[#allocation20_spill] sm:$0xff] }
 0x30d   : > { %v13142_v9 = vadd.f32 %v10529_v22, %v2905_v29  ;;  %11010 = vmatprep.mubr.f32.mxu1 %v4792_v32  ;;  %v13173_v29 = vpop.f32.mrf.mxu0  ;;  %v5573_v22 = vld [vmem:[%s16536_s5 + $0xe8] sm:$0xff] }
 0x30e   : > { %v13144_v61 = vpop.f32.mrf.mxu1  ;;  %16592 = vst [vmem:[#allocation62_spill] sm:$0xff] %v13173_v29  ;;  %9275 = vmatprep.subr.mxu0 %v5573_v22 }
 0x30f   : > { %9276 = vmatpush3.msra.mxu0 %v5557_v6 }
 0x310   : > { %v10532_v63 = vpop.f32.mrf.mxu1  ;;  %11011 = vmatmul.mubr.f32.gmra.mxu1 %v4793_v0 }
 0x311   : > { %v13153_v7 = vadd.f32 %v10532_v63, %v2915_v54  ;;  %11013 = vmatprep.mubr.f32.mxu1 %v4794_v40  ;;  %v13184_v54 = vpop.f32.mrf.mxu0  ;;  %v3511_v63 = vadd.f32 %v16594_v8, %v13032_v33  ;;  %v16598_v8 = vld [vmem:[#allocation23_spill] sm:$0xff] }
 0x312   : > { %v13158_v51 = vpop.f32.mrf.mxu1  ;;  %16593 = vst [vmem:[#allocation63_spill] sm:$0xff] %v13184_v54 }
 0x313   : > { %v13192_v47 = vpop.f32.mrf.mxu0 }
 0x314   : > { %v10535_v31 = vpop.f32.mrf.mxu1  ;;  %11014 = vmatmul.mubr.f32.gmra.mxu1 %v4795_v19  ;;  %16595 = vst [vmem:[#allocation17_spill] sm:$0xff] %v13192_v47 }
 0x315   : > { %v13166_v18 = vadd.f32 %v10535_v31, %v13011_v49  ;;  %v3513_v31 = vadd.f32 %v16596_v41, %v13042_v10  ;;  %v13203_v33 = vpop.f32.mrf.mxu0  ;;  %v16600_v41 = vld [vmem:[#allocation26_spill] sm:$0xff] }
 0x316   : > { %v13171_v32 = vpop.f32.mrf.mxu1  ;;  %16597 = vst [vmem:[#allocation20_spill] sm:$0xff] %v13203_v33  ;;  %v3517_v29 = vadd.f32 %v16600_v41, %v13062_v34  ;;  %v16603_v41 = vld [vmem:[#allocation30_spill] sm:$0xff] }
 0x317   : > { %v13211_v10 = vpop.f32.mrf.mxu0 }
 0x318   : > { %v10650_v0 = vpop.f32.mrf.mxu1  ;;  %16599 = vst [vmem:[#allocation23_spill] sm:$0xff] %v13211_v10 }
 0x319   : > { %v13180_v49 = vadd.f32 %v10650_v0, %v3509_v4 }
 0x31a   : > { %v13182_v40 = vpop.f32.mrf.mxu1 }
 0x31c   : > { %v10653_v19 = vpop.f32.mrf.mxu1 }
 0x31d   : > { %v13188_v5 = vadd.f32 %v10653_v19, %v3511_v63  ;;  %v3515_v63 = vadd.f32 %v16598_v8, %v13052_v15  ;;  %v5556_v15 = vld [vmem:[%s16536_s5 + $0x60] sm:$0xff] }
 0x31e   : > { %v13190_v50 = vpop.f32.mrf.mxu1 }
 0x320   : > { %v10656_v4 = vpop.f32.mrf.mxu1 }
 0x321   : > { %v13199_v22 = vadd.f32 %v10656_v4, %v3513_v31  ;;  %v5572_v4 = vld [vmem:[%s16536_s5 + $0xe0] sm:$0xff] }
 0x322   : > { %v13201_v0 = vpop.f32.mrf.mxu1  ;;  %9277 = vmatprep.subr.mxu0 %v5572_v4  ;;  %v3521_v4 = vadd.f32 %v16605_v16, %v13082_v21  ;;  %v16611_v16 = vld [vmem:[#allocation33_spill] sm:$0xff] }
 0x323   : > { %9278 = vmatpush3.msra.mxu0 %v5556_v15 }
 0x324   : > { %v10659_v19 = vpop.f32.mrf.mxu1 }
 0x325   : > { %v13207_v47 = vadd.f32 %v10659_v19, %v3515_v63  ;;  %v13225_v63 = vpop.f32.mrf.mxu0  ;;  %v16602_v19 = vld [vmem:[#allocation29_spill] sm:$0xff] }
 0x326   : > { %v13209_v54 = vpop.f32.mrf.mxu1  ;;  %16601 = vst [vmem:[#allocation26_spill] sm:$0xff] %v13225_v63  ;;  %v3519_v10 = vadd.f32 %v16602_v19, %v13072_v13  ;;  %v16607_v13 = vld [vmem:[#allocation32_spill] sm:$0xff] }
 0x327   : > { %v13233_v60 = vpop.f32.mrf.mxu0  ;;  %v3520_v15 = vadd.f32 %v16607_v13, %v13088_v17  ;;  %v3523_v17 = vadd.f32 %v16611_v16, %v13092_v14  ;;  %v16613_v14 = vld [vmem:[#allocation15_spill] sm:$0xff] }
 0x328   : > { %v10662_v6 = vpop.f32.mrf.mxu1  ;;  %16604 = vst [vmem:[#allocation29_spill] sm:$0xff] %v13233_v60  ;;  %v16612_v60 = vld [vmem:[#allocation34_spill] sm:$0xff] }
 0x329   : > { %v13215_v31 = vadd.f32 %v10662_v6, %v3517_v29  ;;  %v3518_v6 = vadd.f32 %v16603_v41, %v13078_v48  ;;  %v5555_v48 = vld [vmem:[%s16536_s5 + $0x58] sm:$0xff]  ;;  %v13251_v21 = vpop.f32.mrf.mxu0 }
 0x32a   : > { %v13223_v8 = vpop.f32.mrf.mxu1  ;;  %16610 = vst [vmem:[#allocation31_spill] sm:$0xff] %v13251_v21 }
 0x32c   : > { %v10665_v34 = vpop.f32.mrf.mxu1 }
 0x32d   : > { %v13229_v29 = vadd.f32 %v10665_v34, %v3519_v10  ;;  %v5571_v10 = vld [vmem:[%s16536_s5 + $0xd8] sm:$0xff] }
 0x32e   : > { %v3705_v33 = vpop.f32.mrf.mxu1  ;;  %9279 = vmatprep.subr.mxu0 %v5571_v10  ;;  %v16609_v34 = vld [vmem:[#allocation43_spill] sm:$0xff]  ;;  %v5570_v10 = vld [vmem:[%s16536_s5 + $0xd0] sm:$0xff] }
 0x32f   : > { %v13235_v45 = vadd.f32 %v3705_v33, %v3518_v6  ;;  %v16608_v33 = vld [vmem:[#allocation14_spill] sm:$0xff]  ;;  %9280 = vmatpush3.msra.mxu0 %v5555_v48  ;;  %v16614_v48 = vld [vmem:[#allocation45_spill] sm:$0xff] }
 0x330   : > { %v10668_v37 = vpop.f32.mrf.mxu1  ;;  %v2850_v41 = vadd.f32 %v16609_v34, %v16608_v33  ;;  %9281 = vmatprep.subr.mxu0 %v5570_v10  ;;  %v2860_v33 = vadd.f32 %v16614_v48, %v16613_v14  ;;  %v13270_v34 = vpop.f32.mrf.mxu0  ;;  %v5569_v10 = vld [vmem:[%s16536_s5 + $0xc8] sm:$0xff] }
 0x331   : > { %v13239_v63 = vadd.f32 %v10668_v37, %v3521_v4  ;;  %16615 = vst [vmem:[#allocation32_spill] sm:$0xff] %v13270_v34  ;;  %v16623_v34 = vld [vmem:[#allocation38_spill] sm:$0xff] }
 0x332   : > { %v3715_v19 = vpop.f32.mrf.mxu1  ;;  %v3218_v4 = vadd.f32 %v13103_v46, %v2850_v41  ;;  %v16616_v41 = vld [vmem:[#allocation35_spill] sm:$0xff]  ;;  %v3220_v16 = vadd.f32 %v13112_v53, %v2860_v33  ;;  %v16619_v53 = vld [vmem:[#allocation18_spill] sm:$0xff]  ;;  %v13291_v48 = vpop.f32.mrf.mxu0  ;;  %v16622_v33 = vld [vmem:[#allocation37_spill] sm:$0xff] }
 0x333   : > { %16606 = vst [vmem:[#allocation30_spill] sm:$0xff] %v13239_v63  ;;  %v13253_v37 = vadd.f32 %v3715_v19, %v3520_v15  ;;  %v3522_v63 = vadd.f32 %v16612_v60, %v13098_v38  ;;  %v5554_v15 = vld [vmem:[%s16536_s5 + $0x50] sm:$0xff]  ;;  %v3525_v38 = vadd.f32 %v16616_v41, %v13100_v39  ;;  %v5607_v39 = vld [vmem:[%s16536_s5 + $0x1f8] sm:$0xff]  ;;  %16621 = vst [vmem:[#allocation43_spill] sm:$0xff] %v13291_v48 }
 0x334   : > { %v10671_v6 = vpop.f32.mrf.mxu1  ;;  %9282 = vmatpush3.msra.mxu0 %v5554_v15  ;;  %9306 = vmatprep.subr.mxu1 %v5607_v39  ;;  %v3527_v41 = vadd.f32 %v16622_v33, %v13109_v12  ;;  %v5552_v12 = vld [vmem:[%s16536_s5 + $0x40] sm:$0xff] }
 0x335   : > { %v13258_v13 = vadd.f32 %v10671_v6, %v3523_v17  ;;  %v16618_v6 = vld [vmem:[#allocation36_spill] sm:$0xff]  ;;  %9283 = vmatprep.subr.mxu0 %v5569_v10  ;;  %v5591_v10 = vld [vmem:[%s16536_s5 + $0x178] sm:$0xff] }
 0x336   : > { %v3725_v19 = vpop.f32.mrf.mxu1  ;;  %v3524_v21 = vadd.f32 %v16618_v6, %v3218_v4  ;;  %9307 = vmatpush3.msra.mxu1 %v5591_v10  ;;  %v16630_v10 = vld [vmem:[#allocation40_spill] sm:$0xff] }
 0x337   : > { %v13272_v46 = vadd.f32 %v3725_v19, %v3522_v63  ;;  %v5553_v63 = vld [vmem:[%s16536_s5 + $0x48] sm:$0xff] }
 0x338   : > { %v10674_v60 = vpop.f32.mrf.mxu1  ;;  %v16620_v19 = vld [vmem:[#allocation48_spill] sm:$0xff]  ;;  %9284 = vmatpush3.msra.mxu0 %v5553_v63 }
 0x339   : > { %v13277_v17 = vadd.f32 %v10674_v60, %v3525_v38  ;;  %v2870_v14 = vadd.f32 %v16620_v19, %v16619_v53  ;;  %v16628_v19 = vld [vmem:[#allocation39_spill] sm:$0xff] }
 0x33a   : > { %v3735_v15 = vpop.f32.mrf.mxu1 }
 0x33b   : > { %16617 = vst [vmem:[#allocation14_spill] sm:$0xff] %v13277_v17  ;;  %v13293_v4 = vadd.f32 %v3735_v15, %v3524_v21  ;;  %v3222_v60 = vadd.f32 %v13120_v27, %v2870_v14  ;;  %v3526_v17 = vadd.f32 %v16623_v34, %v3220_v16  ;;  %v5568_v21 = vld [vmem:[%s16536_s5 + $0xc0] sm:$0xff]  ;;  %v5606_v27 = vld [vmem:[%s16536_s5 + $0x1f0] sm:$0xff]  ;;  %v13315_v15 = vpop.f32.mrf.mxu0  ;;  %v3529_v14 = vadd.f32 %v16628_v19, %v13118_v24  ;;  %v5551_v24 = vld [vmem:[%s16536_s5 + $0x38] sm:$0xff] }
 0x33c   : > { %v10677_v38 = vpop.f32.mrf.mxu1  ;;  %9285 = vmatprep.subr.mxu0 %v5568_v21  ;;  %v16624_v34 = vld [vmem:[#allocation21_spill] sm:$0xff]  ;;  %v16625_v16 = vld [vmem:[#allocation50_spill] sm:$0xff]  ;;  %16626 = vst [vmem:[#allocation33_spill] sm:$0xff] %v13315_v15  ;;  %9308 = vmatprep.subr.mxu1 %v5606_v27 }
 0x33d   : > { %v13298_v6 = vadd.f32 %v10677_v38, %v3527_v41  ;;  %v2880_v39 = vadd.f32 %v16625_v16, %v16624_v34  ;;  %9286 = vmatpush3.msra.mxu0 %v5552_v12  ;;  %v3528_v21 = vadd.f32 %v16630_v10, %v3222_v60  ;;  %v5590_v34 = vld [vmem:[%s16536_s5 + $0x170] sm:$0xff]  ;;  %v16631_v60 = vld [vmem:[#allocation24_spill] sm:$0xff]  ;;  %v13339_v16 = vpop.f32.mrf.mxu0 }
 0x33e   : > { %v3745_v63 = vpop.f32.mrf.mxu1  ;;  %9309 = vmatpush3.msra.mxu1 %v5590_v34  ;;  %16633 = vst [vmem:[#allocation45_spill] sm:$0xff] %v13339_v16  ;;  %v16635_v19 = vld [vmem:[#allocation41_spill] sm:$0xff] }
 0x33f   : > { %v13317_v53 = vadd.f32 %v3745_v63, %v3526_v17  ;;  %v3224_v41 = vadd.f32 %v13128_v36, %v2880_v39  ;;  %v5567_v17 = vld [vmem:[%s16536_s5 + $0xb8] sm:$0xff]  ;;  %v5605_v36 = vld [vmem:[%s16536_s5 + $0x1e8] sm:$0xff] }
 0x340   : > { %v10680_v33 = vpop.f32.mrf.mxu1  ;;  %9287 = vmatprep.subr.mxu0 %v5567_v17  ;;  %v16632_v63 = vld [vmem:[#allocation52_spill] sm:$0xff]  ;;  %9310 = vmatprep.subr.mxu1 %v5605_v36  ;;  %v16637_v17 = vld [vmem:[#allocation42_spill] sm:$0xff]  ;;  %v13360_v36 = vpop.f32.mrf.mxu0 }
 0x341   : > { %16627 = vst [vmem:[#allocation34_spill] sm:$0xff] %v13317_v53  ;;  %v13322_v38 = vadd.f32 %v10680_v33, %v3529_v14  ;;  %v2890_v27 = vadd.f32 %v16632_v63, %v16631_v60  ;;  %v3531_v14 = vadd.f32 %v16635_v19, %v13126_v55  ;;  %9288 = vmatpush3.msra.mxu0 %v5551_v24  ;;  %v5589_v60 = vld [vmem:[%s16536_s5 + $0x168] sm:$0xff]  ;;  %v5550_v55 = vld [vmem:[%s16536_s5 + $0x30] sm:$0xff]  ;;  %v16638_v24 = vld [vmem:[#allocation27_spill] sm:$0xff] }
 0x342   : > { %v3755_v12 = vpop.f32.mrf.mxu1  ;;  %v3530_v15 = vadd.f32 %v16637_v17, %v3224_v41  ;;  %16640 = vst [vmem:[#allocation18_spill] sm:$0xff] %v13360_v36  ;;  %v16642_v41 = vld [vmem:[#allocation44_spill] sm:$0xff]  ;;  %9311 = vmatpush3.msra.mxu1 %v5589_v60 }
 0x343   : > { %16629 = vst [vmem:[#allocation15_spill] sm:$0xff] %v13322_v38  ;;  %v13341_v39 = vadd.f32 %v3755_v12, %v3528_v21  ;;  %v3226_v10 = vadd.f32 %v13136_v25, %v2890_v27  ;;  %v5566_v21 = vld [vmem:[%s16536_s5 + $0xb0] sm:$0xff]  ;;  %v3533_v27 = vadd.f32 %v16642_v41, %v13134_v11  ;;  %v5604_v19 = vld [vmem:[%s16536_s5 + $0x1e0] sm:$0xff]  ;;  %v5565_v11 = vld [vmem:[%s16536_s5 + $0xa8] sm:$0xff] }
 0x344   : > { %v10683_v33 = vpop.f32.mrf.mxu1  ;;  %v16639_v12 = vld [vmem:[#allocation54_spill] sm:$0xff]  ;;  %9289 = vmatprep.subr.mxu0 %v5566_v21  ;;  %9312 = vmatprep.subr.mxu1 %v5604_v19  ;;  %v16647_v41 = vld [vmem:[#allocation47_spill] sm:$0xff] }
 0x345   : > { %16634 = vst [vmem:[#allocation35_spill] sm:$0xff] %v13341_v39  ;;  %v13346_v34 = vadd.f32 %v10683_v33, %v3531_v14  ;;  %v2900_v25 = vadd.f32 %v16639_v12, %v16638_v24  ;;  %9290 = vmatpush3.msra.mxu0 %v5550_v55  ;;  %v16644_v24 = vld [vmem:[#allocation46_spill] sm:$0xff]  ;;  %v13391_v55 = vpop.f32.mrf.mxu0 }
 0x346   : > { %v3765_v48 = vpop.f32.mrf.mxu1  ;;  %v3532_v12 = vadd.f32 %v16644_v24, %v3226_v10  ;;  %9291 = vmatprep.subr.mxu0 %v5565_v11  ;;  %v5587_v10 = vld [vmem:[%s16536_s5 + $0x158] sm:$0xff]  ;;  %v5602_v21 = vld [vmem:[%s16536_s5 + $0x1d0] sm:$0xff]  ;;  %16645 = vst [vmem:[#allocation38_spill] sm:$0xff] %v13391_v55 }
 0x347   : > { %16636 = vst [vmem:[#allocation36_spill] sm:$0xff] %v13346_v34  ;;  %v13362_v63 = vadd.f32 %v3765_v48, %v3530_v15  ;;  %v3228_v33 = vadd.f32 %v13144_v61, %v2900_v25  ;;  %v5588_v48 = vld [vmem:[%s16536_s5 + $0x160] sm:$0xff]  ;;  %v5603_v15 = vld [vmem:[%s16536_s5 + $0x1d8] sm:$0xff]  ;;  %v5549_v61 = vld [vmem:[%s16536_s5 + $0x28] sm:$0xff] }
 0x348   : > { %v10686_v14 = vpop.f32.mrf.mxu1  ;;  %9313 = vmatpush3.msra.mxu1 %v5588_v48  ;;  %9292 = vmatpush3.msra.mxu0 %v5549_v61  ;;  %v16649_v48 = vld [vmem:[#allocation49_spill] sm:$0xff]  ;;  %v13420_v61 = vpop.f32.mrf.mxu0 }
 0x349   : > { %16641 = vst [vmem:[#allocation48_spill] sm:$0xff] %v13362_v63  ;;  %v13370_v17 = vadd.f32 %v10686_v14, %v3533_v27  ;;  %v3535_v27 = vadd.f32 %v16647_v41, %v13142_v9  ;;  %9314 = vmatprep.subr.mxu1 %v5603_v15  ;;  %v3230_v14 = vadd.f32 %v13158_v51, %v13008_v23  ;;  %v5564_v9 = vld [vmem:[%s16536_s5 + $0xa0] sm:$0xff]  ;;  %v5601_v15 = vld [vmem:[%s16536_s5 + $0x1c8] sm:$0xff]  ;;  %16650 = vst [vmem:[#allocation39_spill] sm:$0xff] %v13420_v61 }
 0x34a   : > { %v3775_v60 = vpop.f32.mrf.mxu1  ;;  %9315 = vmatpush3.msra.mxu1 %v5587_v10  ;;  %v3534_v11 = vadd.f32 %v16649_v48, %v3228_v33  ;;  %9293 = vmatprep.subr.mxu0 %v5564_v9  ;;  %v5548_v23 = vld [vmem:[%s16536_s5 + $0x20] sm:$0xff]  ;;  %v5585_v51 = vld [vmem:[%s16536_s5 + $0x148] sm:$0xff] }
 0x34b   : > { %16643 = vst [vmem:[#allocation37_spill] sm:$0xff] %v13370_v17  ;;  %v13393_v25 = vadd.f32 %v3775_v60, %v3532_v12  ;;  %9316 = vmatprep.subr.mxu1 %v5602_v21  ;;  %v5586_v12 = vld [vmem:[%s16536_s5 + $0x150] sm:$0xff]  ;;  %v5600_v33 = vld [vmem:[%s16536_s5 + $0x1c0] sm:$0xff]  ;;  %9294 = vmatpush3.msra.mxu0 %v5548_v23  ;;  %v5547_v23 = vld [vmem:[%s16536_s5 + $0x18] sm:$0xff] }
 0x34c   : > { %v10689_v19 = vpop.f32.mrf.mxu1  ;;  %9317 = vmatpush3.msra.mxu1 %v5586_v12  ;;  %v16652_v21 = vld [vmem:[#allocation51_spill] sm:$0xff]  ;;  %v16654_v12 = vld [vmem:[#allocation53_spill] sm:$0xff] }
 0x34d   : > { %16646 = vst [vmem:[#allocation21_spill] sm:$0xff] %v13393_v25  ;;  %v13399_v24 = vadd.f32 %v10689_v19, %v3535_v27  ;;  %v3537_v41 = vadd.f32 %v16652_v21, %v13153_v7  ;;  %9318 = vmatprep.subr.mxu1 %v5601_v15  ;;  %v3232_v19 = vadd.f32 %v13171_v32, %v13018_v2  ;;  %v5563_v7 = vld [vmem:[%s16536_s5 + $0x98] sm:$0xff] }
 0x34e   : > { %v3785_v60 = vpop.f32.mrf.mxu1  ;;  %9319 = vmatpush3.msra.mxu1 %v5585_v51  ;;  %v3536_v9 = vadd.f32 %v16654_v12, %v3230_v14  ;;  %v5599_v15 = vld [vmem:[%s16536_s5 + $0x1b8] sm:$0xff]  ;;  %9295 = vmatprep.subr.mxu0 %v5563_v7  ;;  %v5562_v12 = vld [vmem:[%s16536_s5 + $0x90] sm:$0xff]  ;;  %v5581_v7 = vld [vmem:[%s16536_s5 + $0x128] sm:$0xff] }
 0x34f   : > { %16648 = vst [vmem:[#allocation50_spill] sm:$0xff] %v13399_v24  ;;  %v13422_v10 = vadd.f32 %v3785_v60, %v3534_v11  ;;  %9320 = vmatprep.subr.mxu1 %v5600_v33  ;;  %v5584_v11 = vld [vmem:[%s16536_s5 + $0x140] sm:$0xff]  ;;  %v13440_v60 = vpop.f32.mrf.mxu0  ;;  %v5583_v51 = vld [vmem:[%s16536_s5 + $0x138] sm:$0xff]  ;;  %v5598_v33 = vld [vmem:[%s16536_s5 + $0x1b0] sm:$0xff]  ;;  %9296 = vmatpush3.msra.mxu0 %v5547_v23 }
 0x350   : > { %v10692_v27 = vpop.f32.mrf.mxu1  ;;  %16655 = vst [vmem:[#allocation52_spill] sm:$0xff] %v13440_v60  ;;  %v16657_v32 = vld [vmem:[#allocation55_spill] sm:$0xff]  ;;  %9321 = vmatpush3.msra.mxu1 %v5584_v11  ;;  %9297 = vmatprep.subr.mxu0 %v5562_v12 }
 0x351   : > { %16651 = vst [vmem:[#allocation40_spill] sm:$0xff] %v13422_v10  ;;  %v13428_v48 = vadd.f32 %v10692_v27, %v3537_v41  ;;  %v3539_v14 = vadd.f32 %v16657_v32, %v13166_v18  ;;  %9322 = vmatprep.subr.mxu1 %v5599_v15  ;;  %v16659_v18 = vld [vmem:[#allocation56_spill] sm:$0xff]  ;;  %v5582_v27 = vld [vmem:[%s16536_s5 + $0x130] sm:$0xff]  ;;  %v13473_v15 = vpop.f32.mrf.mxu0  ;;  %v5671_v60 = vld [vmem:[%s16536_s5 + $0x3f8] sm:$0xff] }
 0x352   : > { %v3795_v55 = vpop.f32.mrf.mxu1  ;;  %v3538_v41 = vadd.f32 %v16659_v18, %v3232_v19  ;;  %9323 = vmatpush3.msra.mxu1 %v5583_v51  ;;  %v5546_v19 = vld [vmem:[%s16536_s5 + $0x10] sm:$0xff]  ;;  %v5580_v51 = vld [vmem:[%s16536_s5 + $0x120] sm:$0xff] }
 0x353   : > { %16653 = vst [vmem:[#allocation24_spill] sm:$0xff] %v13428_v48  ;;  %v13442_v2 = vadd.f32 %v3795_v55, %v3536_v9  ;;  %v5597_v9 = vld [vmem:[%s16536_s5 + $0x1a8] sm:$0xff]  ;;  %9324 = vmatprep.subr.mxu1 %v5598_v33  ;;  %9298 = vmatpush3.msra.mxu0 %v5546_v19  ;;  %v13499_v12 = vpop.f32.mrf.mxu0 }
 0x354   : > { %v10695_v21 = vpop.f32.mrf.mxu1  ;;  %9325 = vmatpush3.msra.mxu1 %v5582_v27  ;;  %v5561_v33 = vld [vmem:[%s16536_s5 + $0x88] sm:$0xff]  ;;  %v5579_v27 = vld [vmem:[%s16536_s5 + $0x118] sm:$0xff] }
 0x355   : > { %16656 = vst [vmem:[#allocation41_spill] sm:$0xff] %v13442_v2  ;;  %v13455_v55 = vadd.f32 %v10695_v21, %v3539_v14  ;;  %v5596_v14 = vld [vmem:[%s16536_s5 + $0x1a0] sm:$0xff]  ;;  %9326 = vmatprep.subr.mxu1 %v5597_v9  ;;  %v5595_v21 = vld [vmem:[%s16536_s5 + $0x198] sm:$0xff]  ;;  %9299 = vmatprep.subr.mxu0 %v5561_v33  ;;  %v5594_v9 = vld [vmem:[%s16536_s5 + $0x190] sm:$0xff]  ;;  %v13517_v33 = vpop.f32.mrf.mxu0 }
 0x356   : > { %v3805_v11 = vpop.f32.mrf.mxu1  ;;  %9327 = vmatpush3.msra.mxu1 %v5581_v7  ;;  %v5578_v7 = vld [vmem:[%s16536_s5 + $0x110] sm:$0xff] }
 0x357   : > { %16658 = vst [vmem:[#allocation42_spill] sm:$0xff] %v13455_v55  ;;  %v13475_v32 = vadd.f32 %v3805_v11, %v3538_v41  ;;  %9328 = vmatprep.subr.mxu1 %v5596_v14  ;;  %v5545_v41 = vld [vmem:[%s16536_s5 + $0x8] sm:$0xff]  ;;  %v5560_v14 = vld [vmem:[%s16536_s5 + $0x80] sm:$0xff]  ;;  %v13541_v61 = vpop.f32.mrf.mxu0 }
 0x358   : > { %v13480_v23 = vpop.f32.mrf.mxu1  ;;  %9329 = vmatpush3.msra.mxu1 %v5580_v51  ;;  %9300 = vmatpush3.msra.mxu0 %v5545_v41  ;;  %v5593_v51 = vld [vmem:[%s16536_s5 + $0x188] sm:$0xff] }
 0x359   : > { %16660 = vst [vmem:[#allocation27_spill] sm:$0xff] %v13475_v32  ;;  %9330 = vmatprep.subr.mxu1 %v5595_v21  ;;  %9301 = vmatprep.subr.mxu0 %v5560_v14  ;;  %v5544_v21 = vld [vmem:[%s16536_s5] sm:$0xff]  ;;  %v5577_v41 = vld [vmem:[%s16536_s5 + $0x108] sm:$0xff]  ;;  %v5639_v14 = vld [vmem:[%s16536_s5 + $0x2f8] sm:$0xff] }
 0x35a   : > { %v13491_v18 = vpop.f32.mrf.mxu1  ;;  %9331 = vmatpush3.msra.mxu1 %v5579_v27  ;;  %v5592_v27 = vld [vmem:[%s16536_s5 + $0x180] sm:$0xff]  ;;  %9302 = vmatpush3.msra.mxu0 %v5544_v21 }
 0x35b   : > { %9332 = vmatprep.subr.mxu1 %v5594_v9  ;;  %9341 = vmatprep.subr.mxu0 %v5639_v14 }
 0x35c   : > { %v13504_v11 = vpop.f32.mrf.mxu1  ;;  %9333 = vmatpush3.msra.mxu1 %v5578_v7  ;;  %v5576_v7 = vld [vmem:[%s16536_s5 + $0x100] sm:$0xff] }
 0x35d   : > { %9334 = vmatprep.subr.mxu1 %v5593_v51 }
 0x35e   : > { %v13506_v19 = vpop.f32.mrf.mxu1  ;;  %9335 = vmatpush3.msra.mxu1 %v5577_v41  ;;  %v13547_v41 = vpop.f32.mrf.mxu0 }
 0x35f   : > { %9336 = vmatprep.subr.mxu1 %v5592_v27 }
 0x360   : > { %v13528_v9 = vpop.f32.mrf.mxu1  ;;  %9337 = vmatpush3.msra.mxu1 %v5576_v7  ;;  %v13553_v36 = vpop.f32.mrf.mxu0 }
 0x361   : > { %9376 = vmatprep.subr.mxu1 %v5671_v60 }
 0x362   : > { %v13539_v32 = vpop.f32.mrf.mxu1  ;;  %v13559_v14 = vpop.f32.mrf.mxu0 }
 0x364   : > { %v13543_v51 = vpop.f32.mrf.mxu1  ;;  %v13565_v60 = vpop.f32.mrf.mxu0 }
 0x366   : > { %v13545_v21 = vpop.f32.mrf.mxu1  ;;  %v13571_v25 = vpop.f32.mrf.mxu0 }
 0x367   : > { %16667 = vst [vmem:[#allocation53_spill] sm:$0xff] %v13571_v25 }
 0x368   : > { %v13549_v55 = vpop.f32.mrf.mxu1  ;;  %v13577_v34 = vpop.f32.mrf.mxu0 }
 0x369   : > { %16670 = vst [vmem:[#allocation64_spill] sm:$0xff] %v13577_v34 }
 0x36a   : > { %v13551_v2 = vpop.f32.mrf.mxu1 }
 0x36c   : > { %v13555_v48 = vpop.f32.mrf.mxu1 }
 0x36d   : > { %16661 = vst [vmem:[#allocation54_spill] sm:$0xff] %v13555_v48 }
 0x36e   : > { %v13557_v27 = vpop.f32.mrf.mxu1 }
 0x36f   : > { %16662 = vst [vmem:[#allocation44_spill] sm:$0xff] %v13557_v27 }
 0x370   : > { %v13561_v7 = vpop.f32.mrf.mxu1 }
 0x371   : > { %16663 = vst [vmem:[#allocation46_spill] sm:$0xff] %v13561_v7  ;;  %v13583_v7 = vpop.f32.mrf.mxu0 }
 0x372   : > { %v13563_v16 = vpop.f32.mrf.mxu1  ;;  %16673 = vst [vmem:[#allocation67_spill] sm:$0xff] %v13583_v7 }
 0x373   : > { %16664 = vst [vmem:[#allocation47_spill] sm:$0xff] %v13563_v16 }
 0x374   : > { %v13567_v10 = vpop.f32.mrf.mxu1 }
 0x375   : > { %16665 = vst [vmem:[#allocation49_spill] sm:$0xff] %v13567_v10  ;;  %v13589_v10 = vpop.f32.mrf.mxu0 }
 0x376   : > { %v13569_v24 = vpop.f32.mrf.mxu1  ;;  %16676 = vst [vmem:[#allocation70_spill] sm:$0xff] %v13589_v10 }
 0x377   : > { %16666 = vst [vmem:[#allocation51_spill] sm:$0xff] %v13569_v24 }
 0x378   : > { %v13573_v17 = vpop.f32.mrf.mxu1 }
 0x379   : > { %16668 = vst [vmem:[#allocation55_spill] sm:$0xff] %v13573_v17  ;;  %v13595_v17 = vpop.f32.mrf.mxu0 }
 0x37a   : > { %v13575_v63 = vpop.f32.mrf.mxu1  ;;  %16679 = vst [vmem:[#allocation73_spill] sm:$0xff] %v13595_v17 }
 0x37b   : > { %16669 = vst [vmem:[#allocation56_spill] sm:$0xff] %v13575_v63 }
 0x37c   : > { %v13579_v39 = vpop.f32.mrf.mxu1 }
 0x37d   : > { %16671 = vst [vmem:[#allocation65_spill] sm:$0xff] %v13579_v39  ;;  %v13601_v39 = vpop.f32.mrf.mxu0 }
 0x37e   : > { %v13581_v27 = vpop.f32.mrf.mxu1  ;;  %16682 = vst [vmem:[#allocation76_spill] sm:$0xff] %v13601_v39 }
 0x37f   : > { %16672 = vst [vmem:[#allocation66_spill] sm:$0xff] %v13581_v27  ;;  %v13609_v10 = vpop.f32.mrf.mxu0 }
 0x380   : > { %v13585_v16 = vpop.f32.mrf.mxu1 }
 0x381   : > { %16674 = vst [vmem:[#allocation68_spill] sm:$0xff] %v13585_v16  ;;  %v16684_v16 = vld [vmem:[#allocation16_spill] sm:$0xff]  ;;  %v13621_v53 = vpop.f32.mrf.mxu0 }
 0x382   : > { %v13587_v48 = vpop.f32.mrf.mxu1  ;;  %v3508_v7 = vadd.f32 %v16684_v16, %v13028_v28 }
 0x383   : > { %16675 = vst [vmem:[#allocation69_spill] sm:$0xff] %v13587_v48 }
 0x384   : > { %v13591_v24 = vpop.f32.mrf.mxu1 }
 0x385   : > { %16677 = vst [vmem:[#allocation71_spill] sm:$0xff] %v13591_v24  ;;  %v3814_v24 = vadd.f32 %v13182_v40, %v3508_v7  ;;  %v16688_v40 = vld [vmem:[#allocation22_spill] sm:$0xff] }
 0x386   : > { %v13593_v25 = vpop.f32.mrf.mxu1  ;;  %v3512_v7 = vadd.f32 %v16688_v40, %v13048_v57  ;;  %v16689_v57 = vld [vmem:[#allocation25_spill] sm:$0xff] }
 0x387   : > { %16678 = vst [vmem:[#allocation72_spill] sm:$0xff] %v13593_v25  ;;  %v16686_v25 = vld [vmem:[#allocation19_spill] sm:$0xff]  ;;  %v4120_v16 = vadd.f32 %v13026_v58, %v3814_v24  ;;  %v3514_v24 = vadd.f32 %v16689_v57, %v13058_v52 }
 0x388   : > { %v13597_v63 = vpop.f32.mrf.mxu1  ;;  %v3510_v17 = vadd.f32 %v16686_v25, %v13038_v44  ;;  %v13636_v25 = vpop.f32.mrf.mxu0 }
 0x389   : > { %16680 = vst [vmem:[#allocation74_spill] sm:$0xff] %v13597_v63  ;;  %v4426_v44 = vadd.f32 %v13491_v18, %v4120_v16 }
 0x38a   : > { %v13599_v34 = vpop.f32.mrf.mxu1  ;;  %v3816_v39 = vadd.f32 %v13190_v50, %v3510_v17  ;;  %v3818_v50 = vadd.f32 %v13201_v0, %v3512_v7 }
 0x38b   : > { %16681 = vst [vmem:[#allocation75_spill] sm:$0xff] %v13599_v34  ;;  %v16687_v34 = vld [vmem:[#allocation57_spill] sm:$0xff]  ;;  %v4732_v0 = vadd.f32 %v13499_v12, %v4426_v44 }
 0x38c   : > { %v13603_v27 = vpop.f32.mrf.mxu1  ;;  %v4121_v63 = vadd.f32 %v16687_v34, %v13180_v49  ;;  %v4123_v49 = vadd.f32 %v13036_v56, %v13188_v5  ;;  %v4122_v34 = vadd.f32 %v13044_v3, %v3816_v39  ;;  %v13646_v56 = vld [vmem:[%s16535_s4] ss:$0 sm:$0xff]  ;;  %v4125_v3 = vadd.f32 %v13054_v62, %v13199_v22 }
 0x38d   : > { %16683 = vst [vmem:[#allocation77_spill] sm:$0xff] %v13603_v27  ;;  %v3820_v39 = vadd.f32 %v13209_v54, %v3514_v24  ;;  %v4124_v52 = vadd.f32 %v13064_v59, %v3818_v50  ;;  %v4127_v54 = vadd.f32 %v13074_v43, %v13207_v47 }
 0x38e   : > { %v13607_v48 = vpop.f32.mrf.mxu1  ;;  %v4427_v28 = vadd.f32 %v13480_v23, %v4121_v63  ;;  %v4429_v58 = vadd.f32 %v13504_v11, %v4123_v49  ;;  %v4428_v23 = vadd.f32 %v13506_v19, %v4122_v34  ;;  %v4431_v16 = vadd.f32 %v13528_v9, %v4125_v3  ;;  %v16691_v3 = vld [vmem:[#allocation30_spill] sm:$0xff] }
 0x38f   : > { %16685 = vst [vmem:[#allocation16_spill] sm:$0xff] %v13607_v48  ;;  %v4430_v59 = vadd.f32 %v13539_v32, %v4124_v52  ;;  %v4433_v9 = vadd.f32 %v13543_v51, %v4127_v54  ;;  %v4126_v34 = vadd.f32 %v13084_v42, %v3820_v39  ;;  %v4131_v42 = vadd.f32 %v13114_v30, %v13229_v29 }
 0x390   : > { %v13614_v38 = vpop.f32.mrf.mxu1  ;;  %v4733_v63 = vadd.f32 %v13473_v15, %v4427_v28  ;;  %v16690_v15 = vld [vmem:[#allocation28_spill] sm:$0xff]  ;;  %v13655_v28 = vpop.f32.mrf.mxu0  ;;  %v4735_v62 = vadd.f32 %v13517_v33, %v4429_v58  ;;  %v4129_v58 = vadd.f32 %v13094_v1, %v13215_v31  ;;  %v16692_v1 = vld [vmem:[#allocation58_spill] sm:$0xff] }
 0x391   : > { %v3516_v11 = vadd.f32 %v16690_v15, %v13068_v35  ;;  %v4734_v35 = vadd.f32 %v13541_v61, %v4428_v23  ;;  %v4737_v61 = vadd.f32 %v13547_v41, %v4431_v16  ;;  %v4432_v32 = vadd.f32 %v13545_v21, %v4126_v34  ;;  %v16694_v15 = vld [vmem:[#allocation60_spill] sm:$0xff] }
 0x392   : > { %v13619_v27 = vpop.f32.mrf.mxu1  ;;  %v13668_v33 = vpop.f32.mrf.mxu0  ;;  %v4736_v41 = vadd.f32 %v13553_v36, %v4430_v59  ;;  %v4130_v21 = vadd.f32 %v13122_v26, %v13235_v45  ;;  %v4133_v31 = vadd.f32 %v16692_v1, %v16691_v3  ;;  %v4739_v29 = vadd.f32 %v13559_v14, %v4433_v9  ;;  %v16696_v14 = vld [vmem:[#allocation14_spill] sm:$0xff]  ;;  %v16710_v3 = vld [vmem:[#allocation29_spill] sm:$0xff] }
 0x393   : > { %v3822_v22 = vadd.f32 %v13223_v8, %v3516_v11  ;;  %v4435_v39 = vadd.f32 %v13549_v55, %v4129_v58  ;;  %v4135_v11 = vadd.f32 %v16694_v15, %v13258_v13  ;;  %v16698_v13 = vld [vmem:[#allocation63_spill] sm:$0xff]  ;;  %v16700_v59 = vld [vmem:[#allocation34_spill] sm:$0xff]  ;;  %v16706_v58 = vld [vmem:[#allocation44_spill] sm:$0xff] }
 0x394   : > { %v13627_v48 = vpop.f32.mrf.mxu1  ;;  %v16712_v15 = vld [vmem:[#allocation48_spill] sm:$0xff] }
 0x395   : > { %v4128_v51 = vadd.f32 %v13105_v20, %v3822_v22  ;;  %v16693_v20 = vld [vmem:[#allocation59_spill] sm:$0xff] }
 0x396   : > { %v13634_v17 = vpop.f32.mrf.mxu1 }
 0x398   : > { %v10970_v18 = vpop.f32.mrf.mxu1 }
 0x399   : > { %v5039_v5 = vadd.f32 %v10970_v18, %v4733_v63 }
 0x39a   : > { %v4879_v19 = vpop.f32.mrf.mxu1 }
 0x39b   : > { %v5078_v40 = vadd.f32 %v13646_v56, %v5039_v5  ;;  %v5038_v7 = vadd.f32 %v4879_v19, %v4732_v0  ;;  %v4132_v5 = vadd.f32 %v16693_v20, %v13253_v37  ;;  %v13692_v0 = vpop.f32.mrf.mxu0  ;;  %v16695_v37 = vld [vmem:[#allocation61_spill] sm:$0xff]  ;;  %v16697_v19 = vld [vmem:[#allocation62_spill] sm:$0xff] }
 0x39c   : > { %v10973_v12 = vpop.f32.mrf.mxu1  ;;  %v4134_v52 = vadd.f32 %v16695_v37, %v13272_v46  ;;  %v13707_v16 = vadd.f32 %v16697_v19, %v16696_v14  ;;  %v16699_v46 = vld [vmem:[#allocation17_spill] sm:$0xff]  ;;  %v16715_v19 = vld [vmem:[#allocation32_spill] sm:$0xff] }
 0x39d   : > { %v5110_v44 = vmax.f32 %v5078_v40, 0.0  ;;  %v5077_v49 = vadd.f32 %v13646_v56, %v5038_v7  ;;  %v5041_v50 = vadd.f32 %v10973_v12, %v4735_v62  ;;  %v4738_v40 = vadd.f32 %v13565_v60, %v4432_v32  ;;  %v16702_v60 = vld [vmem:[#allocation15_spill] sm:$0xff]  ;;  %v13729_v34 = vpop.f32.mrf.mxu0  ;;  %v16714_v14 = vld [vmem:[#allocation37_spill] sm:$0xff] }
 0x39e   : > { %v4889_v63 = vpop.f32.mrf.mxu1  ;;  %v4434_v7 = vadd.f32 %v13551_v2, %v4128_v51  ;;  %v13715_v12 = vadd.f32 %v16698_v13, %v13293_v4  ;;  %v16703_v2 = vld [vmem:[#allocation23_spill] sm:$0xff]  ;;  %v4436_v51 = vadd.f32 %v16706_v58, %v4130_v21  ;;  %v16718_v13 = vld [vmem:[#allocation50_spill] sm:$0xff] }
 0x39f   : > { %5142 = vst [vmem:[#allocation5 + $0x8] sm:$0xff] %v5110_v44  ;;  %v5109_v8 = vmax.f32 %v5077_v49, 0.0  ;;  %v13671_v43 = vadd.f32 %v13646_v56, %v5041_v50  ;;  %v5040_v47 = vadd.f32 %v4889_v63, %v4734_v35  ;;  %v13719_v35 = vadd.f32 %v16699_v46, %v13298_v6  ;;  %v16701_v44 = vld [vmem:[#allocation20_spill] sm:$0xff]  ;;  %v16713_v21 = vld [vmem:[#allocation31_spill] sm:$0xff]  ;;  %v16719_v46 = vld [vmem:[#allocation33_spill] sm:$0xff] }
 0x3a0   : > { %v10976_v57 = vpop.f32.mrf.mxu1  ;;  %v13723_v49 = vadd.f32 %v16701_v44, %v16700_v59  ;;  %v13727_v50 = vadd.f32 %v16703_v2, %v16702_v60  ;;  %v13754_v37 = vadd.f32 %v16713_v21, %v16712_v15  ;;  %v13766_v59 = vadd.f32 %v16719_v46, %v16718_v13  ;;  %v13768_v60 = vpop.f32.mrf.mxu0  ;;  %v16727_v46 = vld [vmem:[#allocation73_spill] sm:$0xff] }
 0x3a1   : > { %5141 = vst [vmem:[#allocation5] sm:$0xff] %v5109_v8  ;;  %v5112_v24 = vmax.f32 %v13671_v43, 0.0  ;;  %v13682_v23 = vadd.f32 %v13646_v56, %v5040_v47  ;;  %v5043_v18 = vadd.f32 %v10976_v57, %v4737_v61  ;;  %v16704_v8 = vld [vmem:[#allocation53_spill] sm:$0xff]  ;;  %v16705_v61 = vld [vmem:[#allocation54_spill] sm:$0xff]  ;;  %v16707_v57 = vld [vmem:[#allocation35_spill] sm:$0xff] }
 0x3a2   : > { %v4899_v30 = vpop.f32.mrf.mxu1  ;;  %v4741_v47 = vadd.f32 %v16704_v8, %v4435_v39  ;;  %v4437_v32 = vadd.f32 %v16705_v61, %v4131_v42  ;;  %v16722_v61 = vld [vmem:[#allocation45_spill] sm:$0xff] }
 0x3a3   : > { %5144 = vst [vmem:[#allocation5 + $0x18] sm:$0xff] %v5112_v24  ;;  %v5111_v36 = vmax.f32 %v13682_v23, 0.0  ;;  %v13699_v26 = vadd.f32 %v13646_v56, %v5043_v18  ;;  %v5042_v45 = vadd.f32 %v4899_v30, %v4736_v41  ;;  %v16708_v23 = vld [vmem:[#allocation26_spill] sm:$0xff]  ;;  %v16709_v41 = vld [vmem:[#allocation36_spill] sm:$0xff] }
 0x3a4   : > { %v10979_v55 = vpop.f32.mrf.mxu1  ;;  %v13741_v18 = vadd.f32 %v16708_v23, %v16707_v57  ;;  %v13745_v1 = vadd.f32 %v16710_v3, %v16709_v41  ;;  %v16723_v23 = vld [vmem:[#allocation67_spill] sm:$0xff] }
 0x3a5   : > { %5143 = vst [vmem:[#allocation5 + $0x10] sm:$0xff] %v5111_v36  ;;  %v5114_v62 = vmax.f32 %v13699_v26, 0.0  ;;  %v5081_v22 = vadd.f32 %v13646_v56, %v5042_v45  ;;  %v5045_v54 = vadd.f32 %v10979_v55, %v4739_v29  ;;  %v16711_v45 = vld [vmem:[#allocation64_spill] sm:$0xff]  ;;  %v13758_v55 = vadd.f32 %v16715_v19, %v16714_v14  ;;  %v16726_v14 = vld [vmem:[#allocation49_spill] sm:$0xff] }
 0x3a6   : > { %v4909_v9 = vpop.f32.mrf.mxu1  ;;  %v4740_v42 = vadd.f32 %v16711_v45, %v4434_v7  ;;  %v16720_v7 = vld [vmem:[#allocation46_spill] sm:$0xff]  ;;  %v4743_v41 = vadd.f32 %v16723_v23, %v4437_v32  ;;  %v4441_v19 = vadd.f32 %v16726_v14, %v4135_v11  ;;  %v13791_v32 = vpop.f32.mrf.mxu0 }
 0x3a7   : > { %5146 = vst [vmem:[#allocation5 + $0x28] sm:$0xff] %v5114_v62  ;;  %v5113_v4 = vmax.f32 %v5081_v22, 0.0  ;;  %v13734_v63 = vadd.f32 %v13646_v56, %v5045_v54  ;;  %v5044_v6 = vadd.f32 %v4909_v9, %v4738_v40  ;;  %v16716_v40 = vld [vmem:[#allocation21_spill] sm:$0xff]  ;;  %v16717_v22 = vld [vmem:[#allocation43_spill] sm:$0xff]  ;;  %v4439_v2 = vadd.f32 %v16720_v7, %v4133_v31 }
 0x3a8   : > { %v10982_v20 = vpop.f32.mrf.mxu1  ;;  %v13762_v54 = vadd.f32 %v16717_v22, %v16716_v40  ;;  %v5388_v31 = vlaneseq  ;;  %v16728_v7 = vld [vmem:[#allocation51_spill] sm:$0xff] }
 0x3a9   : > { %5145 = vst [vmem:[#allocation5 + $0x20] sm:$0xff] %v5113_v4  ;;  %v5116_v30 = vmax.f32 %v13734_v63, 0.0  ;;  %v13749_v29 = vadd.f32 %v13646_v56, %v5044_v6  ;;  %v5047_v39 = vadd.f32 %v10982_v20, %v4741_v47  ;;  %v16721_v47 = vld [vmem:[#allocation40_spill] sm:$0xff]  ;;  %v16724_v20 = vld [vmem:[#allocation70_spill] sm:$0xff] }
 0x3aa   : > { %v4919_v44 = vpop.f32.mrf.mxu1  ;;  %v13779_v58 = vadd.f32 %v16722_v61, %v16721_v47  ;;  %v4742_v45 = vadd.f32 %v16724_v20, %v4436_v51  ;;  %v13789_v13 = vshrl.u32 %v5388_v31, 7  ;;  %v16729_v47 = vld [vmem:[#allocation24_spill] sm:$0xff]  ;;  %vm13813_vm1 = vcmp.lt.s32.totalorder %v5388_v31, 128 }
 0x3ab   : > { %5148 = vst [vmem:[#allocation5 + $0x38] sm:$0xff] %v5116_v30  ;;  %v5115_v9 = vmax.f32 %v13749_v29, 0.0  ;;  %v13775_v6 = vadd.f32 %v13646_v56, %v5047_v39  ;;  %v5046_v8 = vadd.f32 %v4919_v44, %v4740_v42  ;;  %v16725_v39 = vld [vmem:[#allocation47_spill] sm:$0xff]  ;;  %v4745_v44 = vadd.f32 %v16727_v46, %v4439_v2 }
 0x3ac   : > { %v5205_v57 = vld [vmem:[#allocation5 + $0x11] sm:$0xff]  ;;  %v10985_v3 = vpop.f32.mrf.mxu1  ;;  %v4438_v42 = vadd.f32 %v16725_v39, %v4132_v5  ;;  %v13818_v43 = vsub.s32 1, %v13789_v13 }
 0x3ad   : > { %v5235_v15 = vmax.f32 %v5111_v36, %v5205_v57  ;;  %5147 = vst [vmem:[#allocation5 + $0x30] sm:$0xff] %v5115_v9  ;;  %v5118_v21 = vmax.f32 %v13775_v6, 0.0  ;;  %v13785_v29 = vadd.f32 %v13646_v56, %v5046_v8  ;;  %v5049_v40 = vadd.f32 %v10985_v3, %v4743_v41  ;;  %v16730_v5 = vld [vmem:[#allocation18_spill] sm:$0xff]  ;;  %v16741_v6 = vld [vmem:[#allocation72_spill] sm:$0xff] }
 0x3ae   : > { %v4929_v22 = vpop.f32.mrf.mxu1  ;;  %v4440_v8 = vadd.f32 %v16728_v7, %v4134_v52  ;;  %v13800_v61 = vadd.f32 %v16730_v5, %v16729_v47 }
 0x3af   : > { %5150 = vst [vmem:[#allocation5 + $0x48] sm:$0xff] %v5118_v21  ;;  %v5117_v36 = vmax.f32 %v13785_v29, 0.0  ;;  %v5048_v51 = vadd.f32 %v4929_v22, %v4742_v45  ;;  %v13803_v23 = vadd.f32 %v13646_v56, %v5049_v40  ;;  %v16731_v29 = vld [vmem:[#allocation76_spill] sm:$0xff]  ;;  %v4747_v22 = vadd.f32 %v13609_v10, %v4441_v19 }
 0x3b0   : > { %v5206_v11 = vld [vmem:[#allocation5 + $0x19] sm:$0xff]  ;;  %v5207_v57 = vld [vmem:[#allocation5 + $0x21] sm:$0xff]  ;;  %v10988_v41 = vpop.f32.mrf.mxu1  ;;  %v4744_v39 = vadd.f32 %v16731_v29, %v4438_v42  ;;  %v13842_v29 = vsub.s32 3, %v13789_v13 }
 0x3b1   : > { %v5236_v3 = vmax.f32 %v5112_v24, %v5206_v11  ;;  %v5237_v20 = vmax.f32 %v5113_v4, %v5207_v57  ;;  %5149 = vst [vmem:[#allocation5 + $0x40] sm:$0xff] %v5117_v36  ;;  %v13808_v45 = vadd.f32 %v13646_v56, %v5048_v51  ;;  %v5051_v2 = vadd.f32 %v10988_v41, %v4745_v44  ;;  %v13820_v24 = vpop.f32.mrf.mxu0  ;;  %v16734_v42 = vld [vmem:[#allocation55_spill] sm:$0xff]  ;;  %v16735_v10 = vld [vmem:[#allocation56_spill] sm:$0xff] }
 0x3b2   : > { %v5120_v52 = vmax.f32 %v13803_v23, 0.0  ;;  %v4939_v14 = vpop.f32.mrf.mxu1  ;;  %v4443_v44 = vadd.f32 %v16734_v42, %v13707_v16  ;;  %v4442_v31 = vadd.f32 %v16735_v10, %v13715_v12  ;;  %v16736_v12 = vld [vmem:[#allocation65_spill] sm:$0xff]  ;;  %v5672_v40 = vld [vmem:[%s16536_s5 + $0x400] sm:$0xff] }
 0x3b3   : > { %v5328_v4 = vmax.f32 %v5235_v15, %v5237_v20  ;;  %v5119_v51 = vmax.f32 %v13808_v45, 0.0  ;;  %v13824_v46 = vadd.f32 %v13646_v56, %v5051_v2  ;;  %v5050_v47 = vadd.f32 %v4939_v14, %v4744_v39  ;;  %v13847_v26 = vpop.f32.mrf.mxu0 }
 0x3b4   : > { %v5208_v19 = vld [vmem:[#allocation5 + $0x29] sm:$0xff]  ;;  %v5209_v7 = vld [vmem:[#allocation5 + $0x31] sm:$0xff]  ;;  %5152 = vst [vmem:[#allocation5 + $0x58] sm:$0xff] %v5120_v52  ;;  %v10991_v5 = vpop.f32.mrf.mxu1  ;;  %v4746_v15 = vadd.f32 %v13621_v53, %v4440_v8  ;;  %v4445_v20 = vadd.f32 %v16736_v12, %v13719_v35  ;;  %v13845_v53 = vsub.s32 0, %v13789_v13  ;;  %v4749_v42 = vadd.f32 %v13636_v25, %v4443_v44 }
 0x3b5   : > { %5358 = vst [vmem:[#allocation6 + $0x10] sm:$0xff] %v5328_v4  ;;  %v5238_v11 = vmax.f32 %v5114_v62, %v5208_v19  ;;  %v5239_v57 = vmax.f32 %v5115_v9, %v5209_v7  ;;  %5151 = vst [vmem:[#allocation5 + $0x50] sm:$0xff] %v5119_v51  ;;  %v5122_v16 = vmax.f32 %v13824_v46, 0.0  ;;  %v5053_v41 = vadd.f32 %v10991_v5, %v4747_v22  ;;  %v16737_v8 = vld [vmem:[#allocation66_spill] sm:$0xff]  ;;  %v13873_v63 = vpop.f32.mrf.mxu0 }
 0x3b6   : > { %v13839_v45 = vadd.f32 %v13646_v56, %v5050_v47  ;;  %v4949_v2 = vpop.f32.mrf.mxu1  ;;  %v4444_v39 = vadd.f32 %v16737_v8, %v13723_v49  ;;  %v4748_v19 = vadd.f32 %v13655_v28, %v4442_v31  ;;  %v16738_v49 = vld [vmem:[#allocation68_spill] sm:$0xff]  ;;  %v4751_v28 = vadd.f32 %v13668_v33, %v4445_v20 }
 0x3b7   : > { %v5329_v62 = vmax.f32 %v5236_v3, %v5238_v11  ;;  %5154 = vst [vmem:[#allocation5 + $0x68] sm:$0xff] %v5122_v16  ;;  %v13852_v9 = vadd.f32 %v13646_v56, %v5053_v41  ;;  %v5052_v35 = vadd.f32 %v4949_v2, %v4746_v15  ;;  %v4447_v15 = vadd.f32 %v16738_v49, %v13727_v50  ;;  %v16739_v50 = vld [vmem:[#allocation69_spill] sm:$0xff] }
 0x3b8   : > { %v5210_v14 = vld [vmem:[#allocation5 + $0x39] sm:$0xff]  ;;  %v5211_v22 = vld [vmem:[#allocation5 + $0x41] sm:$0xff]  ;;  %v5121_v4 = vmax.f32 %v13839_v45, 0.0  ;;  %v10994_v10 = vpop.f32.mrf.mxu1  ;;  %v13871_v31 = vsub.s32 2, %v13789_v13  ;;  %v4446_v41 = vadd.f32 %v16739_v50, %v13741_v18  ;;  %v4750_v20 = vadd.f32 %v13692_v0, %v4444_v39 }
 0x3b9   : > { %5359 = vst [vmem:[#allocation6 + $0x18] sm:$0xff] %v5329_v62  ;;  %v5240_v3 = vmax.f32 %v5116_v30, %v5210_v14  ;;  %v5241_v7 = vmax.f32 %v5117_v36, %v5211_v22  ;;  %v5124_v47 = vmax.f32 %v13852_v9, 0.0  ;;  %v13863_v5 = vadd.f32 %v13646_v56, %v5052_v35  ;;  %v16745_v50 = vld [vmem:[#allocation42_spill] sm:$0xff] }
 0x3ba   : > { %5153 = vst [vmem:[#allocation5 + $0x60] sm:$0xff] %v5121_v4  ;;  %v5055_v25 = vadd.f32 %v10994_v10, %v4749_v42  ;;  %v4959_v44 = vpop.f32.mrf.mxu1  ;;  %v16740_v42 = vld [vmem:[#allocation71_spill] sm:$0xff]  ;;  %v4455_v46 = vadd.f32 %v13614_v38, %v13800_v61 }
 0x3bb   : > { %v5332_v30 = vmax.f32 %v5239_v57, %v5241_v7  ;;  %5156 = vst [vmem:[#allocation5 + $0x78] sm:$0xff] %v5124_v47  ;;  %v5123_v36 = vmax.f32 %v13863_v5, 0.0  ;;  %v5054_v11 = vadd.f32 %v4959_v44, %v4748_v19  ;;  %v13885_v57 = vsub.s32 5, %v13789_v13 }
 0x3bc   : > { %v5212_v12 = vld [vmem:[#allocation5 + $0x49] sm:$0xff]  ;;  %v5213_v2 = vld [vmem:[#allocation5 + $0x51] sm:$0xff]  ;;  %v13881_v62 = vadd.f32 %v13646_v56, %v5055_v25  ;;  %v10997_v33 = vpop.f32.mrf.mxu1  ;;  %v4449_v10 = vadd.f32 %v16740_v42, %v13745_v1  ;;  %v4753_v7 = vadd.f32 %v13729_v34, %v4447_v15  ;;  %v13908_v25 = vpop.f32.mrf.mxu0 }
 0x3bd   : > { %v5387_v35 = vld [vmem:[#allocation6 + $0x11] ss:$256 sm:$0x1]  ;;  %5362 = vst [vmem:[#allocation6 + $0x30] sm:$0xff] %v5332_v30  ;;  %v5242_v8 = vmax.f32 %v5118_v21, %v5212_v12  ;;  %v13889_v14 = vmax.f32 %v5119_v51, %v5213_v2  ;;  %5155 = vst [vmem:[#allocation5 + $0x70] sm:$0xff] %v5123_v36  ;;  %v13894_v18 = vadd.f32 %v13646_v56, %v5054_v11  ;;  %v16742_v34 = vld [vmem:[#allocation74_spill] sm:$0xff] }
 0x3be   : > { %v5057_v22 = vadd.f32 %v10997_v33, %v4751_v28  ;;  %5392 = vst.msk [vmem:[#allocation7] sm:$0x1] %vm13813_vm1, %v5387_v35  ;;  %v5394_v0 = vld [vmem:[#allocation6 + $0x13] ss:$256 sm:$0x1]  ;;  %v4448_v21 = vadd.f32 %v16741_v6, %v13754_v37  ;;  %v5126_v51 = vmax.f32 %v13881_v62, 0.0  ;;  %v4969_v19 = vpop.f32.mrf.mxu1  ;;  %v4451_v37 = vadd.f32 %v16742_v34, %v13758_v55 }
 0x3bf   : > { %v5397_v39 = vld [vmem:[#allocation6 + $0x15] ss:$256 sm:$0x1]  ;;  %5395 = vst.msk [vmem:[#allocation7 + $0x1] sm:$0x1] %vm13813_vm1, %v5394_v0  ;;  %v5333_v44 = vmax.f32 %v5240_v3, %v5242_v8  ;;  %v5125_v1 = vmax.f32 %v13894_v18, 0.0  ;;  %v5056_v3 = vadd.f32 %v4969_v19, %v4750_v20  ;;  %v4752_v34 = vadd.f32 %v13768_v60, %v4446_v41  ;;  %v4703_v60 = vpop.f32.mrf.mxu0 }
 0x3c0   : > { %5398 = vst.msk [vmem:[#allocation7 + $0x2] sm:$0x1] %vm13813_vm1, %v5397_v39  ;;  %v5400_v49 = vld [vmem:[#allocation6 + $0x17] ss:$256 sm:$0x1]  ;;  %v13912_v28 = vadd.f32 %v13646_v56, %v5057_v22  ;;  %v16743_v15 = vld [vmem:[#allocation41_spill] sm:$0xff]  ;;  %v11000_v33 = vpop.f32.mrf.mxu1  ;;  %v4754_v45 = vadd.f32 %v13820_v24, %v4448_v21 }
 0x3c1   : > { %5401 = vst.msk [vmem:[#allocation7 + $0x3] sm:$0x1] %vm13813_vm1, %v5400_v49  ;;  %v16744_v30 = vld [vmem:[#allocation38_spill] sm:$0xff]  ;;  %v16746_v12 = vld [vmem:[#allocation39_spill] sm:$0xff]  ;;  %5158 = vst [vmem:[#allocation5 + $0x88] sm:$0xff] %v5126_v51  ;;  %v5059_v49 = vadd.f32 %v11000_v33, %v4753_v7  ;;  %v4755_v7 = vadd.f32 %v13791_v32, %v4449_v10  ;;  %v4757_v33 = vadd.f32 %v13847_v26, %v4451_v37 }
 0x3c2   : > { %v4148_v11 = vadd.f32 %v16744_v30, %v16743_v15  ;;  %v13922_v2 = vadd.f32 %v16746_v12, %v16745_v50  ;;  %v5403_v35 = vld [vmem:[#allocation6 + $0x19] ss:$256 sm:$0x1]  ;;  %v5406_v8 = vld [vmem:[#allocation6 + $0x1b] ss:$256 sm:$0x1]  ;;  %v13943_v15 = vadd.f32 %v13646_v56, %v5056_v3  ;;  %v4979_v30 = vpop.f32.mrf.mxu1 }
 0x3c3   : > { %v16747_v22 = vld [vmem:[#allocation27_spill] sm:$0xff]  ;;  %v16748_v0 = vld [vmem:[#allocation52_spill] sm:$0xff]  ;;  %5363 = vst [vmem:[#allocation6 + $0x38] sm:$0xff] %v5333_v44  ;;  %5157 = vst [vmem:[#allocation5 + $0x80] sm:$0xff] %v5125_v1  ;;  %v5128_v6 = vmax.f32 %v13912_v28, 0.0  ;;  %v13953_v23 = vadd.f32 %v13646_v56, %v5059_v49 }
 0x3c4   : > { %v13928_v39 = vadd.f32 %v16748_v0, %v16747_v22  ;;  %v5214_v55 = vld [vmem:[#allocation5 + $0x59] sm:$0xff]  ;;  %v5215_v42 = vld [vmem:[#allocation5 + $0x61] sm:$0xff]  ;;  %5404 = vst.msk [vmem:[#allocation7 + $0x4] sm:$0x1] %vm13813_vm1, %v5403_v35  ;;  %5407 = vst.msk [vmem:[#allocation7 + $0x5] sm:$0x1] %vm13813_vm1, %v5406_v8  ;;  %v11003_v3 = vpop.f32.mrf.mxu1  ;;  %v4454_v38 = vadd.f32 %v13619_v27, %v4148_v11 }
 0x3c5   : > { %v5409_v20 = vld [vmem:[#allocation6 + $0x1d] ss:$256 sm:$0x1]  ;;  %v5244_v19 = vmax.f32 %v5120_v52, %v5214_v55  ;;  %v5245_v44 = vmax.f32 %v5121_v4, %v5215_v42  ;;  %5160 = vst [vmem:[#allocation5 + $0x98] sm:$0xff] %v5128_v6  ;;  %v5058_v52 = vadd.f32 %v4979_v30, %v4752_v34  ;;  %v5216_v12 = vld [vmem:[#allocation5 + $0x69] sm:$0xff]  ;;  %v5217_v32 = vld [vmem:[#allocation5 + $0x71] sm:$0xff] }
 0x3c6   : > { %5410 = vst.msk [vmem:[#allocation7 + $0x6] sm:$0x1] %vm13813_vm1, %v5409_v20  ;;  %v16749_v41 = vld [vmem:[#allocation75_spill] sm:$0xff]  ;;  %v5127_v10 = vmax.f32 %v13943_v15, 0.0  ;;  %v5246_v8 = vmax.f32 %v5122_v16, %v5216_v12  ;;  %v5247_v22 = vmax.f32 %v5123_v36, %v5217_v32  ;;  %v5130_v0 = vmax.f32 %v13953_v23, 0.0  ;;  %v16750_v21 = vld [vmem:[#allocation77_spill] sm:$0xff]  ;;  %v4989_v5 = vpop.f32.mrf.mxu1 }
 0x3c7   : > { %v4450_v50 = vadd.f32 %v16749_v41, %v13762_v54  ;;  %v5336_v4 = vmax.f32 %v13889_v14, %v5245_v44  ;;  %v5412_v35 = vld [vmem:[#allocation6 + $0x31] ss:$256 sm:$0x1]  ;;  %v10932_v54 = vpop.f32.mrf.mxu0  ;;  %v13965_v24 = vadd.f32 %v13646_v56, %v5058_v52  ;;  %v5415_v14 = vld [vmem:[#allocation6 + $0x33] ss:$256 sm:$0x1]  ;;  %v4453_v26 = vadd.f32 %v16750_v21, %v13766_v59 }
 0x3c8   : > { %5413 = vst.msk [vmem:[#allocation7 + $0x7] sm:$0x1] %vm13813_vm1, %v5412_v35  ;;  %v16751_v37 = vld [vmem:[#allocation16_spill] sm:$0xff]  ;;  %5159 = vst [vmem:[#allocation5 + $0x90] sm:$0xff] %v5127_v10  ;;  %v5061_v16 = vadd.f32 %v11003_v3, %v4755_v7  ;;  %v5337_v49 = vmax.f32 %v5244_v19, %v5246_v8  ;;  %v11006_v19 = vpop.f32.mrf.mxu1  ;;  %v13992_v30 = vsub.s32 7, %v13789_v13 }
 0x3c9   : > { %v4452_v55 = vadd.f32 %v16751_v37, %v13779_v58  ;;  %5366 = vst [vmem:[#allocation6 + $0x50] sm:$0xff] %v5336_v4  ;;  %5416 = vst.msk [vmem:[#allocation7 + $0x8] sm:$0x1] %vm13813_vm1, %v5415_v14  ;;  %v5418_v36 = vld [vmem:[#allocation6 + $0x35] ss:$256 sm:$0x1]  ;;  %v5060_v58 = vadd.f32 %v4989_v5, %v4754_v45  ;;  %v4756_v44 = vadd.f32 %v13873_v63, %v4450_v50  ;;  %v4713_v41 = vpop.f32.mrf.mxu0 }
 0x3ca   : > { %v5421_v42 = vld [vmem:[#allocation6 + $0x37] ss:$256 sm:$0x1]  ;;  %5162 = vst [vmem:[#allocation5 + $0xa8] sm:$0xff] %v5130_v0  ;;  %v5129_v59 = vmax.f32 %v13965_v24, 0.0  ;;  %v5218_v61 = vld [vmem:[#allocation5 + $0x79] sm:$0xff]  ;;  %v13988_v20 = vadd.f32 %v13646_v56, %v5061_v16  ;;  %v5063_v63 = vadd.f32 %v11006_v19, %v4757_v33  ;;  %v14007_v4 = vadd.f32 %v10932_v54, %v4455_v46 }
 0x3cb   : > { %5419 = vst.msk [vmem:[#allocation7 + $0x9] sm:$0x1] %vm13813_vm1, %v5418_v36  ;;  %5422 = vst.msk [vmem:[#allocation7 + $0xa] sm:$0x1] %vm13813_vm1, %v5421_v42  ;;  %v5219_v34 = vld [vmem:[#allocation5 + $0x81] sm:$0xff]  ;;  %v13996_v52 = vmax.f32 %v5124_v47, %v5218_v61  ;;  %v14003_v11 = vadd.f32 %v13646_v56, %v5060_v58  ;;  %v4999_v47 = vpop.f32.mrf.mxu1  ;;  %v4759_v18 = vadd.f32 %v13908_v25, %v4453_v26  ;;  %v14036_v14 = vpop.f32.mrf.mxu0  ;;  %v5655_v37 = vld [vmem:[%s16536_s5 + $0x378] sm:$0xff] }
 0x3cc   : > { %v5424_v7 = vld [vmem:[#allocation6 + $0x39] ss:$256 sm:$0x1]  ;;  %5367 = vst [vmem:[#allocation6 + $0x58] sm:$0xff] %v5337_v49  ;;  %v5249_v27 = vmax.f32 %v5125_v1, %v5219_v34  ;;  %5161 = vst [vmem:[#allocation5 + $0xa0] sm:$0xff] %v5129_v59  ;;  %v5132_v9 = vmax.f32 %v13988_v20, 0.0  ;;  %v4758_v1 = vadd.f32 %v4703_v60, %v4452_v55  ;;  %v14017_v3 = vadd.f32 %v13646_v56, %v5063_v63 }
 0x3cd   : > { %5425 = vst.msk [vmem:[#allocation7 + $0xb] sm:$0x1] %vm13813_vm1, %v5424_v7  ;;  %v5427_v50 = vld [vmem:[#allocation6 + $0x3b] ss:$256 sm:$0x1]  ;;  %v5131_v32 = vmax.f32 %v14003_v11, 0.0  ;;  %v14021_v33 = vadd.f32 %v13627_v48, %v13922_v2  ;;  %v14023_v35 = vadd.f32 %v4713_v41, %v4454_v38  ;;  %v14027_v25 = vadd.f32 %v13634_v17, %v13928_v39  ;;  %v11009_v54 = vpop.f32.mrf.mxu1 }
 0x3ce   : > { %v5430_v45 = vld [vmem:[#allocation6 + $0x3d] ss:$256 sm:$0x1]  ;;  %5428 = vst.msk [vmem:[#allocation7 + $0xc] sm:$0x1] %vm13813_vm1, %v5427_v50  ;;  %v5340_v12 = vmax.f32 %v5247_v22, %v5249_v27  ;;  %5164 = vst [vmem:[#allocation5 + $0xb8] sm:$0xff] %v5132_v9  ;;  %v5062_v60 = vadd.f32 %v4999_v47, %v4756_v44  ;;  %v5065_v39 = vadd.f32 %v11009_v54, %v4759_v18  ;;  %v4723_v47 = vpop.f32.mrf.mxu0 }
 0x3cf   : > { %5431 = vst.msk [vmem:[#allocation7 + $0xd] sm:$0x1] %vm13813_vm1, %v5430_v45  ;;  %v14031_v8 = vld [vmem:[#allocation7] sm:$0xff]  ;;  %v5623_v22 = vld [vmem:[%s16536_s5 + $0x278] sm:$0xff]  ;;  %v5220_v48 = vld [vmem:[#allocation5 + $0x89] sm:$0xff]  ;;  %v5134_v17 = vmax.f32 %v14017_v3, 0.0  ;;  %v5009_v42 = vpop.f32.mrf.mxu1 }
 0x3d0   : > { %5370 = vst [vmem:[#allocation6 + $0x70] sm:$0xff] %v5340_v12  ;;  %v5221_v2 = vld [vmem:[#allocation5 + $0x91] sm:$0xff]  ;;  %5163 = vst [vmem:[#allocation5 + $0xb0] sm:$0xff] %v5131_v32  ;;  %v6343_v21 = vrot.slane %v14031_v8, %v13818_v43  ;;  %v6351_v26 = vrot.slane %v14031_v8, %v13842_v29  ;;  %v5250_v16 = vmax.f32 %v5126_v51, %v5220_v48  ;;  %v5669_v28 = vld [vmem:[%s16536_s5 + $0x3e8] sm:$0xff] }
 0x3d1   : > { %v5638_v55 = vld [vmem:[%s16536_s5 + $0x2f0] sm:$0xff]  ;;  %v14055_v5 = vmax.f32 %v5127_v10, %v5221_v2  ;;  %v14058_v36 = vadd.f32 %v13646_v56, %v5062_v60  ;;  %v6339_v49 = vrot.slane %v14031_v8, %v13845_v53  ;;  %5166 = vst [vmem:[#allocation5 + $0xc8] sm:$0xff] %v5134_v17  ;;  %v14067_v62 = vadd.f32 %v13646_v56, %v5065_v39  ;;  %v11012_v27 = vpop.f32.mrf.mxu1  ;;  %v5637_v60 = vld [vmem:[%s16536_s5 + $0x2e8] sm:$0xff]  ;;  %v5631_v3 = vld [vmem:[%s16536_s5 + $0x2b8] sm:$0xff] }
 0x3d2   : > { %v5433_v46 = vld [vmem:[#allocation6 + $0x51] ss:$256 sm:$0x1]  ;;  %v5436_v58 = vld [vmem:[#allocation6 + $0x53] ss:$256 sm:$0x1]  ;;  %v5064_v51 = vadd.f32 %v5009_v42, %v4758_v1  ;;  %6645 = vmatprep.mubr.f32.mxu0 %v6343_v21  ;;  %6715 = vmatprep.mubr.f32.mxu1 %v6351_v26  ;;  %v6347_v15 = vrot.slane %v14031_v8, %v13871_v31  ;;  %v5341_v19 = vmax.f32 %v13996_v52, %v5250_v16 }
 0x3d3   : > { %5434 = vst.msk [vmem:[#allocation7 + $0xe] sm:$0x1] %vm13813_vm1, %v5433_v46  ;;  %v5439_v38 = vld [vmem:[#allocation6 + $0x55] ss:$256 sm:$0x1]  ;;  %v5222_v44 = vld [vmem:[#allocation5 + $0x99] sm:$0xff]  ;;  %6646 = vmatmul.mubr.f32.vlgmr.msra.gmra.mxu0 %v6339_v49  ;;  %v6359_v63 = vrot.slane %v14031_v8, %v13885_v57  ;;  %v5067_v24 = vadd.f32 %v11012_v27, %v14007_v4  ;;  %v5019_v54 = vpop.f32.mrf.mxu1  ;;  %v4763_v46 = vadd.f32 %v14036_v14, %v14021_v33 }
 0x3d4   : > { %v5670_v10 = vld [vmem:[%s16536_s5 + $0x3f0] sm:$0xff]  ;;  %5437 = vst.msk [vmem:[#allocation7 + $0xf] sm:$0x1] %vm13813_vm1, %v5436_v58  ;;  %5440 = vst.msk [vmem:[#allocation7 + $0x10] sm:$0x1] %vm13813_vm1, %v5439_v38  ;;  %v5223_v7 = vld [vmem:[#allocation5 + $0xa1] sm:$0xff]  ;;  %v14092_v52 = vmax.f32 %v5128_v6, %v5222_v44  ;;  %v14098_v12 = vadd.f32 %v13646_v56, %v5064_v51  ;;  %6716 = vmatmul.mubr.f32.vlgmr.msra.gmra.mxu1 %v6347_v15  ;;  %9342 = vmatpush3.msra.mxu0 %v5623_v22 }
 0x3d5   : > { %v5622_v61 = vld [vmem:[%s16536_s5 + $0x270] sm:$0xff]  ;;  %v5133_v41 = vmax.f32 %v14058_v36, 0.0  ;;  %v5445_v45 = vld [vmem:[#allocation6 + $0x59] ss:$256 sm:$0x1]  ;;  %v5253_v18 = vmax.f32 %v5129_v59, %v5223_v7  ;;  %v5136_v1 = vmax.f32 %v14067_v62, 0.0  ;;  %9377 = vmatpush3.msra.mxu1 %v5655_v37  ;;  %9343 = vmatprep.subr.mxu0 %v5638_v55  ;;  %v6367_v59 = vrot.slane %v14031_v8, %v13992_v30  ;;  %v11015_v49 = vpop.f32.mrf.mxu1 }
 0x3d6   : > { %v5442_v34 = vld [vmem:[#allocation6 + $0x57] ss:$256 sm:$0x1]  ;;  %5446 = vst.msk [vmem:[#allocation7 + $0x12] sm:$0x1] %vm13813_vm1, %v5445_v45  ;;  %5371 = vst [vmem:[#allocation6 + $0x78] sm:$0xff] %v5341_v19  ;;  %6785 = vmatprep.mubr.f32.mxu0 %v6359_v63  ;;  %9378 = vmatprep.subr.mxu1 %v5670_v10  ;;  %v5066_v21 = vadd.f32 %v5019_v54, %v14023_v35  ;;  %v4762_v35 = vadd.f32 %v4723_v47, %v14027_v25 }
 0x3d7   : > { %v5654_v50 = vld [vmem:[%s16536_s5 + $0x370] sm:$0xff]  ;;  %5443 = vst.msk [vmem:[#allocation7 + $0x11] sm:$0x1] %vm13813_vm1, %v5442_v34  ;;  %v5448_v6 = vld [vmem:[#allocation6 + $0x5b] ss:$256 sm:$0x1]  ;;  %v5344_v4 = vmax.f32 %v14055_v5, %v5253_v18  ;;  %v14141_v42 = vadd.f32 %v13646_v56, %v5067_v24  ;;  %6855 = vmatprep.mubr.f32.mxu1 %v6367_v59  ;;  %9344 = vmatpush3.msra.mxu0 %v5622_v61  ;;  %v5029_v11 = vpop.f32.mrf.mxu1 }
 0x3d8   : > { %5165 = vst [vmem:[#allocation5 + $0xc0] sm:$0xff] %v5133_v41  ;;  %v5621_v22 = vld [vmem:[%s16536_s5 + $0x268] sm:$0xff]  ;;  %5449 = vst.msk [vmem:[#allocation7 + $0x13] sm:$0x1] %vm13813_vm1, %v5448_v6  ;;  %v5135_v39 = vmax.f32 %v14098_v12, 0.0  ;;  %v5636_v26 = vld [vmem:[%s16536_s5 + $0x2e0] sm:$0xff]  ;;  %v14152_v33 = vadd.f32 %v13646_v56, %v5066_v21  ;;  %9379 = vmatpush3.msra.mxu1 %v5654_v50  ;;  %9345 = vmatprep.subr.mxu0 %v5637_v60  ;;  %v5068_v34 = vadd.f32 %v5029_v11, %v4762_v35 }
 0x3d9   : > { %v5653_v48 = vld [vmem:[%s16536_s5 + $0x368] sm:$0xff]  ;;  %v5451_v2 = vld [vmem:[#allocation6 + $0x5d] ss:$256 sm:$0x1]  ;;  %5168 = vst [vmem:[#allocation5 + $0xd8] sm:$0xff] %v5136_v1  ;;  %v5668_v37 = vld [vmem:[%s16536_s5 + $0x3e0] sm:$0xff]  ;;  %9380 = vmatprep.subr.mxu1 %v5669_v28  ;;  %9346 = vmatpush3.msra.mxu0 %v5621_v22 }
 0x3da   : > { %v5620_v55 = vld [vmem:[%s16536_s5 + $0x260] sm:$0xff]  ;;  %5452 = vst.msk [vmem:[#allocation7 + $0x14] sm:$0x1] %vm13813_vm1, %v5451_v2  ;;  %v5224_v16 = vld [vmem:[#allocation5 + $0xa9] sm:$0xff]  ;;  %v5225_v5 = vld [vmem:[#allocation5 + $0xb1] sm:$0xff]  ;;  %v5138_v23 = vmax.f32 %v14141_v42, 0.0  ;;  %9381 = vmatpush3.msra.mxu1 %v5653_v48  ;;  %9347 = vmatprep.subr.mxu0 %v5636_v26 }
 0x3db   : > { %v5454_v58 = vld [vmem:[#allocation6 + $0x71] ss:$256 sm:$0x1]  ;;  %5374 = vst [vmem:[#allocation6 + $0x90] sm:$0xff] %v5344_v4  ;;  %v5254_v38 = vmax.f32 %v5130_v0, %v5224_v16  ;;  %v14147_v51 = vmax.f32 %v5131_v32, %v5225_v5  ;;  %5167 = vst [vmem:[#allocation5 + $0xd0] sm:$0xff] %v5135_v39  ;;  %v5069_v0 = vadd.f32 %v11015_v49, %v4763_v46  ;;  %v5652_v32 = vld [vmem:[%s16536_s5 + $0x360] sm:$0xff]  ;;  %9382 = vmatprep.subr.mxu1 %v5668_v37 }
 0x3dc   : > { %5455 = vst.msk [vmem:[#allocation7 + $0x15] sm:$0x1] %vm13813_vm1, %v5454_v58  ;;  %v5457_v25 = vld [vmem:[#allocation6 + $0x73] ss:$256 sm:$0x1]  ;;  %v5635_v15 = vld [vmem:[%s16536_s5 + $0x2d8] sm:$0xff]  ;;  %9348 = vmatpush3.msra.mxu0 %v5620_v55  ;;  %9383 = vmatpush3.msra.mxu1 %v5652_v32 }
 0x3dd   : > { %v5460_v14 = vld [vmem:[#allocation6 + $0x75] ss:$256 sm:$0x1]  ;;  %5458 = vst.msk [vmem:[#allocation7 + $0x16] sm:$0x1] %vm13813_vm1, %v5457_v25  ;;  %v5345_v10 = vmax.f32 %v14092_v52, %v5254_v38  ;;  %v5137_v61 = vmax.f32 %v14152_v33, 0.0  ;;  %v5108_v7 = vadd.f32 %v13646_v56, %v5069_v0  ;;  %v5107_v52 = vadd.f32 %v13646_v56, %v5068_v34  ;;  %9349 = vmatprep.subr.mxu0 %v5635_v15 }
 0x3de   : > { %5461 = vst.msk [vmem:[#allocation7 + $0x17] sm:$0x1] %vm13813_vm1, %v5460_v14  ;;  %v5667_v19 = vld [vmem:[%s16536_s5 + $0x3d8] sm:$0xff]  ;;  %5170 = vst [vmem:[#allocation5 + $0xe8] sm:$0xff] %v5138_v23  ;;  %v5634_v63 = vld [vmem:[%s16536_s5 + $0x2d0] sm:$0xff] }
 0x3df   : > { %v5619_v44 = vld [vmem:[%s16536_s5 + $0x258] sm:$0xff]  ;;  %v5666_v50 = vld [vmem:[%s16536_s5 + $0x3d0] sm:$0xff]  ;;  %5375 = vst [vmem:[#allocation6 + $0x98] sm:$0xff] %v5345_v10  ;;  %v5227_v47 = vld [vmem:[#allocation5 + $0xc1] sm:$0xff]  ;;  %v5140_v6 = vmax.f32 %v5108_v7, 0.0  ;;  %9384 = vmatprep.subr.mxu1 %v5667_v19  ;;  %v5139_v59 = vmax.f32 %v5107_v52, 0.0 }
 0x3e0   : > { %v5651_v27 = vld [vmem:[%s16536_s5 + $0x358] sm:$0xff]  ;;  %5169 = vst [vmem:[#allocation5 + $0xe0] sm:$0xff] %v5137_v61  ;;  %v5618_v18 = vld [vmem:[%s16536_s5 + $0x250] sm:$0xff]  ;;  %v5257_v28 = vmax.f32 %v5133_v41, %v5227_v47  ;;  %9350 = vmatpush3.msra.mxu0 %v5619_v44  ;;  %v5633_v56 = vld [vmem:[%s16536_s5 + $0x2c8] sm:$0xff] }
 0x3e1   : > { %v5226_v45 = vld [vmem:[#allocation5 + $0xb9] sm:$0xff]  ;;  %v5650_v24 = vld [vmem:[%s16536_s5 + $0x350] sm:$0xff]  ;;  %9385 = vmatpush3.msra.mxu1 %v5651_v27  ;;  %9351 = vmatprep.subr.mxu0 %v5634_v63  ;;  %v5665_v20 = vld [vmem:[%s16536_s5 + $0x3c8] sm:$0xff]  ;;  %5172 = vst [vmem:[#allocation5 + $0xf8] sm:$0xff] %v5140_v6  ;;  %v14326_v6 = vsub.s32 6, %v13789_v13 }
 0x3e2   : > { %v5256_v60 = vmax.f32 %v5132_v9, %v5226_v45  ;;  %v5617_v9 = vld [vmem:[%s16536_s5 + $0x248] sm:$0xff]  ;;  %v5348_v41 = vmax.f32 %v14147_v51, %v5257_v28  ;;  %v5229_v22 = vld [vmem:[#allocation5 + $0xd1] sm:$0xff]  ;;  %9386 = vmatprep.subr.mxu1 %v5666_v50  ;;  %9352 = vmatpush3.msra.mxu0 %v5618_v18  ;;  %v5632_v48 = vld [vmem:[%s16536_s5 + $0x2c0] sm:$0xff]  ;;  %5171 = vst [vmem:[#allocation5 + $0xf0] sm:$0xff] %v5139_v59  ;;  %v14317_v18 = vsub.s32 4, %v13789_v13 }
 0x3e3   : > { %v5649_v36 = vld [vmem:[%s16536_s5 + $0x348] sm:$0xff]  ;;  %v5259_v4 = vmax.f32 %v5135_v39, %v5229_v22  ;;  %9387 = vmatpush3.msra.mxu1 %v5650_v24  ;;  %9353 = vmatprep.subr.mxu0 %v5633_v56  ;;  %v5664_v21 = vld [vmem:[%s16536_s5 + $0x3c0] sm:$0xff]  ;;  %v5615_v12 = vld [vmem:[%s16536_s5 + $0x238] sm:$0xff] }
 0x3e4   : > { %v5228_v54 = vld [vmem:[#allocation5 + $0xc9] sm:$0xff]  ;;  %v5616_v26 = vld [vmem:[%s16536_s5 + $0x240] sm:$0xff]  ;;  %5378 = vst [vmem:[#allocation6 + $0xb0] sm:$0xff] %v5348_v41  ;;  %9388 = vmatprep.subr.mxu1 %v5665_v20  ;;  %9354 = vmatpush3.msra.mxu0 %v5617_v9  ;;  %v5647_v55 = vld [vmem:[%s16536_s5 + $0x338] sm:$0xff]  ;;  %v6355_v13 = vrot.slane %v14031_v8, %v14317_v18 }
 0x3e5   : > { %v5258_v2 = vmax.f32 %v5134_v17, %v5228_v54  ;;  %v5648_v37 = vld [vmem:[%s16536_s5 + $0x340] sm:$0xff]  ;;  %v5663_v17 = vld [vmem:[%s16536_s5 + $0x3b8] sm:$0xff]  ;;  %9389 = vmatpush3.msra.mxu1 %v5649_v36  ;;  %9355 = vmatprep.subr.mxu0 %v5632_v48  ;;  %v5630_v46 = vld [vmem:[%s16536_s5 + $0x2b0] sm:$0xff]  ;;  %v6363_v36 = vrot.slane %v14031_v8, %v14326_v6 }
 0x3e6   : > { %v5662_v35 = vld [vmem:[%s16536_s5 + $0x3b0] sm:$0xff]  ;;  %9390 = vmatprep.subr.mxu1 %v5664_v21  ;;  %9356 = vmatpush3.msra.mxu0 %v5616_v26  ;;  %v5629_v25 = vld [vmem:[%s16536_s5 + $0x2a8] sm:$0xff]  ;;  %v5628_v11 = vld [vmem:[%s16536_s5 + $0x2a0] sm:$0xff] }
 0x3e7   : > { %v5349_v39 = vmax.f32 %v5256_v60, %v5258_v2  ;;  %v5230_v16 = vld [vmem:[#allocation5 + $0xd9] sm:$0xff]  ;;  %v5231_v5 = vld [vmem:[#allocation5 + $0xe1] sm:$0xff]  ;;  %v5614_v49 = vld [vmem:[%s16536_s5 + $0x230] sm:$0xff]  ;;  %9391 = vmatpush3.msra.mxu1 %v5648_v37  ;;  %9357 = vmatprep.subr.mxu0 %v5631_v3 }
 0x3e8   : > { %v5260_v58 = vmax.f32 %v5136_v1, %v5230_v16  ;;  %v5261_v38 = vmax.f32 %v5137_v61, %v5231_v5  ;;  %v5646_v51 = vld [vmem:[%s16536_s5 + $0x330] sm:$0xff]  ;;  %9392 = vmatprep.subr.mxu1 %v5663_v17  ;;  %9358 = vmatpush3.msra.mxu0 %v5615_v12  ;;  %v5661_v62 = vld [vmem:[%s16536_s5 + $0x3a8] sm:$0xff]  ;;  %v5660_v15 = vld [vmem:[%s16536_s5 + $0x3a0] sm:$0xff] }
 0x3e9   : > { %5379 = vst [vmem:[#allocation6 + $0xb8] sm:$0xff] %v5349_v39  ;;  %v5613_v1 = vld [vmem:[%s16536_s5 + $0x228] sm:$0xff]  ;;  %9393 = vmatpush3.msra.mxu1 %v5647_v55  ;;  %9359 = vmatprep.subr.mxu0 %v5630_v46  ;;  %v5612_v10 = vld [vmem:[%s16536_s5 + $0x220] sm:$0xff]  ;;  %v5627_v42 = vld [vmem:[%s16536_s5 + $0x298] sm:$0xff] }
 0x3ea   : > { %v5352_v33 = vmax.f32 %v5259_v4, %v5261_v38  ;;  %v5645_v14 = vld [vmem:[%s16536_s5 + $0x328] sm:$0xff]  ;;  %9394 = vmatprep.subr.mxu1 %v5662_v35  ;;  %9360 = vmatpush3.msra.mxu0 %v5614_v49  ;;  %v5644_v61 = vld [vmem:[%s16536_s5 + $0x320] sm:$0xff]  ;;  %v5659_v34 = vld [vmem:[%s16536_s5 + $0x398] sm:$0xff] }
 0x3eb   : > { %v5293_v0 = vld [vmem:[#allocation5 + $0xe9] sm:$0xff]  ;;  %9395 = vmatpush3.msra.mxu1 %v5646_v51  ;;  %9361 = vmatprep.subr.mxu0 %v5629_v25  ;;  %v5611_v19 = vld [vmem:[%s16536_s5 + $0x218] sm:$0xff]  ;;  %v5624_v28 = vld [vmem:[%s16536_s5 + $0x280] sm:$0xff] }
 0x3ec   : > { %5382 = vst [vmem:[#allocation6 + $0xd0] sm:$0xff] %v5352_v33  ;;  %v5323_v32 = vmax.f32 %v5138_v23, %v5293_v0  ;;  %9396 = vmatprep.subr.mxu1 %v5661_v62  ;;  %9362 = vmatpush3.msra.mxu0 %v5613_v1  ;;  %v5643_v44 = vld [vmem:[%s16536_s5 + $0x318] sm:$0xff]  ;;  %v5626_v7 = vld [vmem:[%s16536_s5 + $0x290] sm:$0xff]  ;;  %v5625_v45 = vld [vmem:[%s16536_s5 + $0x288] sm:$0xff] }
 0x3ed   : > { %9397 = vmatpush3.msra.mxu1 %v5645_v14  ;;  %9363 = vmatprep.subr.mxu0 %v5628_v11  ;;  %v5658_v27 = vld [vmem:[%s16536_s5 + $0x390] sm:$0xff]  ;;  %v5657_v47 = vld [vmem:[%s16536_s5 + $0x388] sm:$0xff]  ;;  %v5656_v24 = vld [vmem:[%s16536_s5 + $0x380] sm:$0xff] }
 0x3ee   : > { %v5353_v23 = vmax.f32 %v5260_v58, %v5323_v32  ;;  %9398 = vmatprep.subr.mxu1 %v5660_v15  ;;  %9364 = vmatpush3.msra.mxu0 %v5612_v10  ;;  %v5610_v63 = vld [vmem:[%s16536_s5 + $0x210] sm:$0xff]  ;;  %v5609_v52 = vld [vmem:[%s16536_s5 + $0x208] sm:$0xff]  ;;  %v5608_v56 = vld [vmem:[%s16536_s5 + $0x200] sm:$0xff] }
 0x3ef   : > { %9399 = vmatpush3.msra.mxu1 %v5644_v61  ;;  %9365 = vmatprep.subr.mxu0 %v5627_v42  ;;  %v5642_v50 = vld [vmem:[%s16536_s5 + $0x310] sm:$0xff]  ;;  %v5641_v60 = vld [vmem:[%s16536_s5 + $0x308] sm:$0xff]  ;;  %v5640_v59 = vld [vmem:[%s16536_s5 + $0x300] sm:$0xff] }
 0x3f0   : > { %5383 = vst [vmem:[#allocation6 + $0xd8] sm:$0xff] %v5353_v23  ;;  %9400 = vmatprep.subr.mxu1 %v5659_v34  ;;  %9366 = vmatpush3.msra.mxu0 %v5611_v19  ;;  %v5703_v20 = vld [vmem:[%s16536_s5 + $0x4f8] sm:$0xff]  ;;  %v14342_v9 = vld [vmem:[#allocation7 + $0x8] sm:$0xff]  ;;  %v5702_v8 = vld [vmem:[%s16536_s5 + $0x4f0] sm:$0xff] }
 0x3f1   : > { %9401 = vmatpush3.msra.mxu1 %v5643_v44  ;;  %9367 = vmatprep.subr.mxu0 %v5626_v7  ;;  %v5735_v41 = vld [vmem:[%s16536_s5 + $0x5f8] sm:$0xff]  ;;  %v6375_v48 = vrot.slane %v14342_v9, %v13818_v43  ;;  %v5734_v2 = vld [vmem:[%s16536_s5 + $0x5f0] sm:$0xff]  ;;  %v6383_v21 = vrot.slane %v14342_v9, %v13842_v29  ;;  %v5701_v37 = vld [vmem:[%s16536_s5 + $0x4e8] sm:$0xff] }
 0x3f2   : > { %9402 = vmatprep.subr.mxu1 %v5658_v27  ;;  %9368 = vmatpush3.msra.mxu0 %v5610_v63  ;;  %v5687_v54 = vld [vmem:[%s16536_s5 + $0x478] sm:$0xff]  ;;  %v5686_v4 = vld [vmem:[%s16536_s5 + $0x470] sm:$0xff]  ;;  %v5733_v17 = vld [vmem:[%s16536_s5 + $0x5e8] sm:$0xff] }
 0x3f3   : > { %9403 = vmatpush3.msra.mxu1 %v5642_v50  ;;  %9369 = vmatprep.subr.mxu0 %v5625_v45  ;;  %v5719_v22 = vld [vmem:[%s16536_s5 + $0x578] sm:$0xff]  ;;  %v5718_v26 = vld [vmem:[%s16536_s5 + $0x570] sm:$0xff]  ;;  %v5685_v12 = vld [vmem:[%s16536_s5 + $0x468] sm:$0xff] }
 0x3f4   : > { %9404 = vmatprep.subr.mxu1 %v5657_v47  ;;  %9370 = vmatpush3.msra.mxu0 %v5609_v52  ;;  %v5463_v3 = vld [vmem:[#allocation6 + $0x77] ss:$256 sm:$0x1]  ;;  %v5466_v39 = vld [vmem:[#allocation6 + $0x79] ss:$256 sm:$0x1] }
 0x3f5   : > { %9405 = vmatpush3.msra.mxu1 %v5641_v60  ;;  %9371 = vmatprep.subr.mxu0 %v5624_v28  ;;  %5464 = vst.msk [vmem:[#allocation7 + $0x18] sm:$0x1] %vm13813_vm1, %v5463_v3  ;;  %v5717_v55 = vld [vmem:[%s16536_s5 + $0x568] sm:$0xff]  ;;  %v5700_v46 = vld [vmem:[%s16536_s5 + $0x4e0] sm:$0xff]  ;;  %5467 = vst.msk [vmem:[#allocation7 + $0x19] sm:$0x1] %vm13813_vm1, %v5466_v39 }
 0x3f6   : > { %9406 = vmatprep.subr.mxu1 %v5656_v24  ;;  %9372 = vmatpush3.msra.mxu0 %v5608_v56  ;;  %v5469_v35 = vld [vmem:[#allocation6 + $0x7b] ss:$256 sm:$0x1]  ;;  %v5732_v16 = vld [vmem:[%s16536_s5 + $0x5e0] sm:$0xff]  ;;  %v5698_v11 = vld [vmem:[%s16536_s5 + $0x4d0] sm:$0xff] }
 0x3f7   : > { %9407 = vmatpush3.msra.mxu1 %v5640_v59  ;;  %6786 = vmatmul.mubr.f32.vlgmr.msra.gmra.mxu0 %v6355_v13  ;;  %v5684_v5 = vld [vmem:[%s16536_s5 + $0x460] sm:$0xff]  ;;  %5470 = vst.msk [vmem:[#allocation7 + $0x1a] sm:$0x1] %vm13813_vm1, %v5469_v35  ;;  %v5472_v49 = vld [vmem:[#allocation6 + $0x7d] ss:$256 sm:$0x1] }
 0x3f8   : > { %6856 = vmatmul.mubr.f32.vlgmr.msra.gmra.mxu1 %v6363_v36  ;;  %9411 = vmatprep.subr.mxu0 %v5703_v20  ;;  %v5716_v58 = vld [vmem:[%s16536_s5 + $0x560] sm:$0xff]  ;;  %v5699_v38 = vld [vmem:[%s16536_s5 + $0x4d8] sm:$0xff]  ;;  %5473 = vst.msk [vmem:[#allocation7 + $0x1b] sm:$0x1] %vm13813_vm1, %v5472_v49  ;;  %v5730_v15 = vld [vmem:[%s16536_s5 + $0x5d0] sm:$0xff] }
 0x3f9   : > { %9446 = vmatprep.subr.mxu1 %v5735_v41  ;;  %9412 = vmatpush3.msra.mxu0 %v5687_v54  ;;  %v5475_v51 = vld [vmem:[#allocation6 + $0x91] ss:$256 sm:$0x1]  ;;  %v5731_v25 = vld [vmem:[%s16536_s5 + $0x5d8] sm:$0xff]  ;;  %v5697_v23 = vld [vmem:[%s16536_s5 + $0x4c8] sm:$0xff] }
 0x3fa   : > { %6925 = vmatprep.mubr.f32.mxu0 %v6375_v48  ;;  %9447 = vmatpush3.msra.mxu1 %v5719_v22  ;;  %v5683_v62 = vld [vmem:[%s16536_s5 + $0x458] sm:$0xff]  ;;  %5476 = vst.msk [vmem:[#allocation7 + $0x1c] sm:$0x1] %vm13813_vm1, %v5475_v51  ;;  %v5478_v1 = vld [vmem:[#allocation6 + $0x93] ss:$256 sm:$0x1] }
 0x3fb   : > { %6995 = vmatprep.mubr.f32.mxu1 %v6383_v21  ;;  %9413 = vmatprep.subr.mxu0 %v5702_v8  ;;  %5479 = vst.msk [vmem:[#allocation7 + $0x1d] sm:$0x1] %vm13813_vm1, %v5478_v1  ;;  %v5481_v33 = vld [vmem:[#allocation6 + $0x95] ss:$256 sm:$0x1]  ;;  %v5715_v0 = vld [vmem:[%s16536_s5 + $0x558] sm:$0xff] }
 0x3fc   : > { %9448 = vmatprep.subr.mxu1 %v5734_v2  ;;  %9414 = vmatpush3.msra.mxu0 %v5686_v4  ;;  %v5484_v14 = vld [vmem:[#allocation6 + $0x97] ss:$256 sm:$0x1]  ;;  %5482 = vst.msk [vmem:[#allocation7 + $0x1e] sm:$0x1] %vm13813_vm1, %v5481_v33  ;;  %v5729_v19 = vld [vmem:[%s16536_s5 + $0x5c8] sm:$0xff] }
 0x3fd   : > { %9449 = vmatpush3.msra.mxu1 %v5718_v26  ;;  %9415 = vmatprep.subr.mxu0 %v5701_v37  ;;  %5485 = vst.msk [vmem:[#allocation7 + $0x1f] sm:$0x1] %vm13813_vm1, %v5484_v14  ;;  %v5487_v32 = vld [vmem:[#allocation6 + $0x99] ss:$256 sm:$0x1]  ;;  %v5682_v10 = vld [vmem:[%s16536_s5 + $0x450] sm:$0xff] }
 0x3fe   : > { %9450 = vmatprep.subr.mxu1 %v5733_v17  ;;  %9416 = vmatpush3.msra.mxu0 %v5685_v12  ;;  %5488 = vst.msk [vmem:[#allocation7 + $0x20] sm:$0x1] %vm13813_vm1, %v5487_v32  ;;  %v5490_v61 = vld [vmem:[#allocation6 + $0x9b] ss:$256 sm:$0x1]  ;;  %v5714_v42 = vld [vmem:[%s16536_s5 + $0x550] sm:$0xff] }
 0x3ff   : > { %9451 = vmatpush3.msra.mxu1 %v5717_v55  ;;  %9417 = vmatprep.subr.mxu0 %v5700_v46  ;;  %5491 = vst.msk [vmem:[#allocation7 + $0x21] sm:$0x1] %vm13813_vm1, %v5490_v61  ;;  %v5493_v34 = vld [vmem:[#allocation6 + $0x9d] ss:$256 sm:$0x1]  ;;  %v5681_v44 = vld [vmem:[%s16536_s5 + $0x448] sm:$0xff] }
 0x400   : > { %9452 = vmatprep.subr.mxu1 %v5732_v16  ;;  %9418 = vmatpush3.msra.mxu0 %v5684_v5  ;;  %5494 = vst.msk [vmem:[#allocation7 + $0x22] sm:$0x1] %vm13813_vm1, %v5493_v34  ;;  %v5496_v7 = vld [vmem:[#allocation6 + $0xb1] ss:$256 sm:$0x1]  ;;  %v5713_v27 = vld [vmem:[%s16536_s5 + $0x548] sm:$0xff] }
 0x401   : > { %9453 = vmatpush3.msra.mxu1 %v5716_v58  ;;  %9419 = vmatprep.subr.mxu0 %v5699_v38  ;;  %v5696_v63 = vld [vmem:[%s16536_s5 + $0x4c0] sm:$0xff]  ;;  %5497 = vst.msk [vmem:[#allocation7 + $0x23] sm:$0x1] %vm13813_vm1, %v5496_v7  ;;  %v5499_v50 = vld [vmem:[#allocation6 + $0xb3] ss:$256 sm:$0x1] }
 0x402   : > { %9454 = vmatprep.subr.mxu1 %v5731_v25  ;;  %9420 = vmatpush3.msra.mxu0 %v5683_v62  ;;  %v5728_v45 = vld [vmem:[%s16536_s5 + $0x5c0] sm:$0xff]  ;;  %5500 = vst.msk [vmem:[#allocation7 + $0x24] sm:$0x1] %vm13813_vm1, %v5499_v50  ;;  %v5502_v52 = vld [vmem:[#allocation6 + $0xb5] ss:$256 sm:$0x1] }
 0x403   : > { %9455 = vmatpush3.msra.mxu1 %v5715_v0  ;;  %9421 = vmatprep.subr.mxu0 %v5698_v11  ;;  %v5680_v47 = vld [vmem:[%s16536_s5 + $0x440] sm:$0xff]  ;;  %v5695_v28 = vld [vmem:[%s16536_s5 + $0x4b8] sm:$0xff]  ;;  %5503 = vst.msk [vmem:[#allocation7 + $0x25] sm:$0x1] %vm13813_vm1, %v5502_v52  ;;  %v5694_v20 = vld [vmem:[%s16536_s5 + $0x4b0] sm:$0xff] }
 0x404   : > { %9456 = vmatprep.subr.mxu1 %v5730_v15  ;;  %9422 = vmatpush3.msra.mxu0 %v5682_v10  ;;  %v5712_v60 = vld [vmem:[%s16536_s5 + $0x540] sm:$0xff]  ;;  %v5505_v24 = vld [vmem:[#allocation6 + $0xb7] ss:$256 sm:$0x1]  ;;  %v5727_v56 = vld [vmem:[%s16536_s5 + $0x5b8] sm:$0xff] }
 0x405   : > { %9457 = vmatpush3.msra.mxu1 %v5714_v42  ;;  %9423 = vmatprep.subr.mxu0 %v5697_v23  ;;  %v5679_v59 = vld [vmem:[%s16536_s5 + $0x438] sm:$0xff]  ;;  %5506 = vst.msk [vmem:[#allocation7 + $0x26] sm:$0x1] %vm13813_vm1, %v5505_v24  ;;  %v5726_v41 = vld [vmem:[%s16536_s5 + $0x5b0] sm:$0xff]  ;;  %v5693_v8 = vld [vmem:[%s16536_s5 + $0x4a8] sm:$0xff]  ;;  %v6371_v23 = vrot.slane %v14342_v9, %v13845_v53 }
 0x406   : > { %9458 = vmatprep.subr.mxu1 %v5729_v19  ;;  %9424 = vmatpush3.msra.mxu0 %v5681_v44  ;;  %v5711_v13 = vld [vmem:[%s16536_s5 + $0x538] sm:$0xff]  ;;  %v5678_v54 = vld [vmem:[%s16536_s5 + $0x430] sm:$0xff]  ;;  %v5725_v4 = vld [vmem:[%s16536_s5 + $0x5a8] sm:$0xff]  ;;  %v6379_v19 = vrot.slane %v14342_v9, %v13871_v31 }
 0x407   : > { %9459 = vmatpush3.msra.mxu1 %v5713_v27  ;;  %9425 = vmatprep.subr.mxu0 %v5696_v63  ;;  %v5508_v36 = vld [vmem:[#allocation6 + $0xb9] ss:$256 sm:$0x1]  ;;  %v5511_v22 = vld [vmem:[#allocation6 + $0xbb] ss:$256 sm:$0x1]  ;;  %v6391_v63 = vrot.slane %v14342_v9, %v13885_v57 }
 0x408   : > { %9460 = vmatprep.subr.mxu1 %v5728_v45  ;;  %9426 = vmatpush3.msra.mxu0 %v5680_v47  ;;  %5509 = vst.msk [vmem:[#allocation7 + $0x27] sm:$0x1] %vm13813_vm1, %v5508_v36  ;;  %v5710_v48 = vld [vmem:[%s16536_s5 + $0x530] sm:$0xff]  ;;  %5512 = vst.msk [vmem:[#allocation7 + $0x28] sm:$0x1] %vm13813_vm1, %v5511_v22  ;;  %v5677_v21 = vld [vmem:[%s16536_s5 + $0x428] sm:$0xff]  ;;  %v6399_v45 = vrot.slane %v14342_v9, %v13992_v30 }
 0x409   : > { %9461 = vmatpush3.msra.mxu1 %v5712_v60  ;;  %9427 = vmatprep.subr.mxu0 %v5695_v28  ;;  %v5514_v2 = vld [vmem:[#allocation6 + $0xbd] ss:$256 sm:$0x1]  ;;  %v5517_v26 = vld [vmem:[#allocation6 + $0xd1] ss:$256 sm:$0x1] }
 0x40a   : > { %9462 = vmatprep.subr.mxu1 %v5727_v56  ;;  %9428 = vmatpush3.msra.mxu0 %v5679_v59  ;;  %5515 = vst.msk [vmem:[#allocation7 + $0x29] sm:$0x1] %vm13813_vm1, %v5514_v2  ;;  %v5709_v37 = vld [vmem:[%s16536_s5 + $0x528] sm:$0xff]  ;;  %v5692_v3 = vld [vmem:[%s16536_s5 + $0x4a0] sm:$0xff]  ;;  %5518 = vst.msk [vmem:[#allocation7 + $0x2a] sm:$0x1] %vm13813_vm1, %v5517_v26 }
 0x40b   : > { %9463 = vmatpush3.msra.mxu1 %v5711_v13  ;;  %9429 = vmatprep.subr.mxu0 %v5694_v20  ;;  %v5520_v17 = vld [vmem:[#allocation6 + $0xd3] ss:$256 sm:$0x1]  ;;  %v5724_v12 = vld [vmem:[%s16536_s5 + $0x5a0] sm:$0xff]  ;;  %v5691_v35 = vld [vmem:[%s16536_s5 + $0x498] sm:$0xff] }
 0x40c   : > { %9464 = vmatprep.subr.mxu1 %v5726_v41  ;;  %9430 = vmatpush3.msra.mxu0 %v5678_v54  ;;  %v5676_v39 = vld [vmem:[%s16536_s5 + $0x420] sm:$0xff]  ;;  %5521 = vst.msk [vmem:[#allocation7 + $0x2b] sm:$0x1] %vm13813_vm1, %v5520_v17  ;;  %v5523_v55 = vld [vmem:[#allocation6 + $0xd5] ss:$256 sm:$0x1] }
 0x40d   : > { %9465 = vmatpush3.msra.mxu1 %v5710_v48  ;;  %9431 = vmatprep.subr.mxu0 %v5693_v8  ;;  %v5708_v46 = vld [vmem:[%s16536_s5 + $0x520] sm:$0xff]  ;;  %5524 = vst.msk [vmem:[#allocation7 + $0x2c] sm:$0x1] %vm13813_vm1, %v5523_v55  ;;  %v5526_v16 = vld [vmem:[#allocation6 + $0xd7] ss:$256 sm:$0x1] }
 0x40e   : > { %9466 = vmatprep.subr.mxu1 %v5725_v4  ;;  %9432 = vmatpush3.msra.mxu0 %v5677_v21  ;;  %v5723_v5 = vld [vmem:[%s16536_s5 + $0x598] sm:$0xff]  ;;  %5527 = vst.msk [vmem:[#allocation7 + $0x2d] sm:$0x1] %vm13813_vm1, %v5526_v16  ;;  %v5690_v51 = vld [vmem:[%s16536_s5 + $0x490] sm:$0xff]  ;;  %v5689_v14 = vld [vmem:[%s16536_s5 + $0x488] sm:$0xff] }
 0x40f   : > { %9467 = vmatpush3.msra.mxu1 %v5709_v37  ;;  %9433 = vmatprep.subr.mxu0 %v5692_v3  ;;  %v5675_v49 = vld [vmem:[%s16536_s5 + $0x418] sm:$0xff]  ;;  %v5722_v25 = vld [vmem:[%s16536_s5 + $0x590] sm:$0xff]  ;;  %v5721_v11 = vld [vmem:[%s16536_s5 + $0x588] sm:$0xff] }
 0x410   : > { %v5529_v58 = vld [vmem:[#allocation6 + $0xd9] ss:$256 sm:$0x1]  ;;  %9468 = vmatprep.subr.mxu1 %v5724_v12  ;;  %9434 = vmatpush3.msra.mxu0 %v5676_v39  ;;  %v5674_v62 = vld [vmem:[%s16536_s5 + $0x410] sm:$0xff]  ;;  %v5673_v32 = vld [vmem:[%s16536_s5 + $0x408] sm:$0xff] }
 0x411   : > { %v5707_v38 = vld [vmem:[%s16536_s5 + $0x518] sm:$0xff]  ;;  %5530 = vst.msk [vmem:[#allocation7 + $0x2e] sm:$0x1] %vm13813_vm1, %v5529_v58  ;;  %9469 = vmatpush3.msra.mxu1 %v5708_v46  ;;  %9435 = vmatprep.subr.mxu0 %v5691_v35  ;;  %v5706_v33 = vld [vmem:[%s16536_s5 + $0x510] sm:$0xff]  ;;  %v5705_v15 = vld [vmem:[%s16536_s5 + $0x508] sm:$0xff] }
 0x412   : > { %v5532_v1 = vld [vmem:[#allocation6 + $0xdb] ss:$256 sm:$0x1]  ;;  %9470 = vmatprep.subr.mxu1 %v5723_v5  ;;  %9436 = vmatpush3.msra.mxu0 %v5675_v49  ;;  %v5535_v0 = vld [vmem:[#allocation6 + $0xdd] ss:$256 sm:$0x1] }
 0x413   : > { %5533 = vst.msk [vmem:[#allocation7 + $0x2f] sm:$0x1] %vm13813_vm1, %v5532_v1  ;;  %9471 = vmatpush3.msra.mxu1 %v5707_v38  ;;  %9437 = vmatprep.subr.mxu0 %v5690_v51  ;;  %5536 = vst.msk [vmem:[#allocation7 + $0x30] sm:$0x1] %vm13813_vm1, %v5535_v0  ;;  %v5688_v10 = vld [vmem:[%s16536_s5 + $0x480] sm:$0xff]  ;;  %v5767_v34 = vld [vmem:[%s16536_s5 + $0x6f8] sm:$0xff] }
 0x414   : > { %9472 = vmatprep.subr.mxu1 %v5722_v25  ;;  %9438 = vmatpush3.msra.mxu0 %v5674_v62  ;;  %v5720_v61 = vld [vmem:[%s16536_s5 + $0x580] sm:$0xff]  ;;  %v5799_v44 = vld [vmem:[%s16536_s5 + $0x7f8] sm:$0xff]  ;;  %v5766_v50 = vld [vmem:[%s16536_s5 + $0x6f0] sm:$0xff] }
 0x415   : > { %9473 = vmatpush3.msra.mxu1 %v5706_v33  ;;  %9439 = vmatprep.subr.mxu0 %v5689_v14  ;;  %v5704_v42 = vld [vmem:[%s16536_s5 + $0x500] sm:$0xff]  ;;  %v5751_v7 = vld [vmem:[%s16536_s5 + $0x678] sm:$0xff]  ;;  %v5798_v47 = vld [vmem:[%s16536_s5 + $0x7f0] sm:$0xff] }
 0x416   : > { %9474 = vmatprep.subr.mxu1 %v5721_v11  ;;  %9440 = vmatpush3.msra.mxu0 %v5673_v32  ;;  %v5783_v27 = vld [vmem:[%s16536_s5 + $0x778] sm:$0xff]  ;;  %v5750_v52 = vld [vmem:[%s16536_s5 + $0x670] sm:$0xff]  ;;  %v5765_v28 = vld [vmem:[%s16536_s5 + $0x6e8] sm:$0xff] }
 0x417   : > { %9475 = vmatpush3.msra.mxu1 %v5705_v15  ;;  %9441 = vmatprep.subr.mxu0 %v5688_v10  ;;  %v5782_v60 = vld [vmem:[%s16536_s5 + $0x770] sm:$0xff]  ;;  %v5797_v24 = vld [vmem:[%s16536_s5 + $0x7e8] sm:$0xff]  ;;  %v5764_v13 = vld [vmem:[%s16536_s5 + $0x6e0] sm:$0xff] }
 0x418   : > { %9476 = vmatprep.subr.mxu1 %v5720_v61  ;;  %9442 = vmatpush3.msra.mxu0 %v5672_v40  ;;  %v5749_v56 = vld [vmem:[%s16536_s5 + $0x668] sm:$0xff]  ;;  %v5796_v20 = vld [vmem:[%s16536_s5 + $0x7e0] sm:$0xff]  ;;  %v5763_v54 = vld [vmem:[%s16536_s5 + $0x6d8] sm:$0xff] }
 0x419   : > { %9477 = vmatpush3.msra.mxu1 %v5704_v42  ;;  %6926 = vmatmul.mubr.f32.vlgmr.msra.gmra.mxu0 %v6371_v23  ;;  %v5781_v59 = vld [vmem:[%s16536_s5 + $0x768] sm:$0xff]  ;;  %v5748_v36 = vld [vmem:[%s16536_s5 + $0x660] sm:$0xff]  ;;  %v5795_v22 = vld [vmem:[%s16536_s5 + $0x7d8] sm:$0xff] }
 0x41a   : > { %6996 = vmatmul.mubr.f32.vlgmr.msra.gmra.mxu1 %v6379_v19  ;;  %9481 = vmatprep.subr.mxu0 %v5767_v34  ;;  %v5780_v41 = vld [vmem:[%s16536_s5 + $0x760] sm:$0xff]  ;;  %v5747_v48 = vld [vmem:[%s16536_s5 + $0x658] sm:$0xff]  ;;  %v5762_v2 = vld [vmem:[%s16536_s5 + $0x6d0] sm:$0xff] }
 0x41b   : > { %9516 = vmatprep.subr.mxu1 %v5799_v44  ;;  %9482 = vmatpush3.msra.mxu0 %v5751_v7  ;;  %v5779_v8 = vld [vmem:[%s16536_s5 + $0x758] sm:$0xff]  ;;  %v5794_v4 = vld [vmem:[%s16536_s5 + $0x7d0] sm:$0xff]  ;;  %v5761_v37 = vld [vmem:[%s16536_s5 + $0x6c8] sm:$0xff] }
 0x41c   : > { %7065 = vmatprep.mubr.f32.mxu0 %v6391_v63  ;;  %9517 = vmatpush3.msra.mxu1 %v5783_v27  ;;  %v5746_v21 = vld [vmem:[%s16536_s5 + $0x650] sm:$0xff]  ;;  %v5793_v3 = vld [vmem:[%s16536_s5 + $0x7c8] sm:$0xff]  ;;  %v5760_v39 = vld [vmem:[%s16536_s5 + $0x6c0] sm:$0xff] }
 0x41d   : > { %7135 = vmatprep.mubr.f32.mxu1 %v6399_v45  ;;  %9483 = vmatprep.subr.mxu0 %v5766_v50  ;;  %v5778_v26 = vld [vmem:[%s16536_s5 + $0x750] sm:$0xff]  ;;  %v5745_v17 = vld [vmem:[%s16536_s5 + $0x648] sm:$0xff]  ;;  %v5792_v55 = vld [vmem:[%s16536_s5 + $0x7c0] sm:$0xff] }
 0x41e   : > { %9518 = vmatprep.subr.mxu1 %v5798_v47  ;;  %9484 = vmatpush3.msra.mxu0 %v5750_v52  ;;  %v5777_v12 = vld [vmem:[%s16536_s5 + $0x748] sm:$0xff]  ;;  %v5744_v46 = vld [vmem:[%s16536_s5 + $0x640] sm:$0xff]  ;;  %v5759_v16 = vld [vmem:[%s16536_s5 + $0x6b8] sm:$0xff] }
 0x41f   : > { %9519 = vmatpush3.msra.mxu1 %v5782_v60  ;;  %9485 = vmatprep.subr.mxu0 %v5765_v28  ;;  %v5776_v35 = vld [vmem:[%s16536_s5 + $0x740] sm:$0xff]  ;;  %v5791_v5 = vld [vmem:[%s16536_s5 + $0x7b8] sm:$0xff]  ;;  %v5758_v38 = vld [vmem:[%s16536_s5 + $0x6b0] sm:$0xff] }
 0x420   : > { %9520 = vmatprep.subr.mxu1 %v5797_v24  ;;  %9486 = vmatpush3.msra.mxu0 %v5749_v56  ;;  %v5743_v49 = vld [vmem:[%s16536_s5 + $0x638] sm:$0xff]  ;;  %v5790_v51 = vld [vmem:[%s16536_s5 + $0x7b0] sm:$0xff]  ;;  %v5757_v1 = vld [vmem:[%s16536_s5 + $0x6a8] sm:$0xff]  ;;  %v6387_v24 = vrot.slane %v14342_v9, %v14317_v18 }
 0x421   : > { %9521 = vmatpush3.msra.mxu1 %v5781_v59  ;;  %9487 = vmatprep.subr.mxu0 %v5764_v13  ;;  %v5775_v58 = vld [vmem:[%s16536_s5 + $0x738] sm:$0xff]  ;;  %v5742_v25 = vld [vmem:[%s16536_s5 + $0x630] sm:$0xff]  ;;  %v5789_v33 = vld [vmem:[%s16536_s5 + $0x7a8] sm:$0xff]  ;;  %v6395_v13 = vrot.slane %v14342_v9, %v14326_v6 }
 0x422   : > { %9522 = vmatprep.subr.mxu1 %v5796_v20  ;;  %9488 = vmatpush3.msra.mxu0 %v5748_v36  ;;  %v5774_v62 = vld [vmem:[%s16536_s5 + $0x730] sm:$0xff]  ;;  %v5741_v14 = vld [vmem:[%s16536_s5 + $0x628] sm:$0xff]  ;;  %v5756_v11 = vld [vmem:[%s16536_s5 + $0x6a0] sm:$0xff] }
 0x423   : > { %9523 = vmatpush3.msra.mxu1 %v5780_v41  ;;  %9489 = vmatprep.subr.mxu0 %v5763_v54  ;;  %v5773_v0 = vld [vmem:[%s16536_s5 + $0x728] sm:$0xff]  ;;  %v5788_v32 = vld [vmem:[%s16536_s5 + $0x7a0] sm:$0xff]  ;;  %v5755_v61 = vld [vmem:[%s16536_s5 + $0x698] sm:$0xff] }
 0x424   : > { %9524 = vmatprep.subr.mxu1 %v5795_v22  ;;  %9490 = vmatpush3.msra.mxu0 %v5747_v48  ;;  %v5740_v15 = vld [vmem:[%s16536_s5 + $0x620] sm:$0xff]  ;;  %v5787_v40 = vld [vmem:[%s16536_s5 + $0x798] sm:$0xff]  ;;  %v5754_v34 = vld [vmem:[%s16536_s5 + $0x690] sm:$0xff] }
 0x425   : > { %9525 = vmatpush3.msra.mxu1 %v5779_v8  ;;  %9491 = vmatprep.subr.mxu0 %v5762_v2  ;;  %v5772_v10 = vld [vmem:[%s16536_s5 + $0x720] sm:$0xff]  ;;  %v5739_v42 = vld [vmem:[%s16536_s5 + $0x618] sm:$0xff]  ;;  %v5786_v19 = vld [vmem:[%s16536_s5 + $0x790] sm:$0xff] }
 0x426   : > { %9526 = vmatprep.subr.mxu1 %v5794_v4  ;;  %9492 = vmatpush3.msra.mxu0 %v5746_v21  ;;  %v5771_v23 = vld [vmem:[%s16536_s5 + $0x718] sm:$0xff]  ;;  %v5738_v44 = vld [vmem:[%s16536_s5 + $0x610] sm:$0xff]  ;;  %v5753_v27 = vld [vmem:[%s16536_s5 + $0x688] sm:$0xff] }
 0x427   : > { %9527 = vmatpush3.msra.mxu1 %v5778_v26  ;;  %9493 = vmatprep.subr.mxu0 %v5761_v37  ;;  %v5770_v7 = vld [vmem:[%s16536_s5 + $0x710] sm:$0xff]  ;;  %v5785_v63 = vld [vmem:[%s16536_s5 + $0x788] sm:$0xff]  ;;  %v5752_v47 = vld [vmem:[%s16536_s5 + $0x680] sm:$0xff] }
 0x428   : > { %9528 = vmatprep.subr.mxu1 %v5793_v3  ;;  %9494 = vmatpush3.msra.mxu0 %v5745_v17  ;;  %v5737_v50 = vld [vmem:[%s16536_s5 + $0x608] sm:$0xff]  ;;  %v5784_v52 = vld [vmem:[%s16536_s5 + $0x780] sm:$0xff]  ;;  %v5831_v56 = vld [vmem:[%s16536_s5 + $0x8f8] sm:$0xff] }
 0x429   : > { %9529 = vmatpush3.msra.mxu1 %v5777_v12  ;;  %9495 = vmatprep.subr.mxu0 %v5760_v39  ;;  %v5769_v45 = vld [vmem:[%s16536_s5 + $0x708] sm:$0xff]  ;;  %v5736_v60 = vld [vmem:[%s16536_s5 + $0x600] sm:$0xff]  ;;  %v14794_v59 = vld [vmem:[#allocation7 + $0x10] sm:$0xff] }
 0x42a   : > { %9530 = vmatprep.subr.mxu1 %v5792_v55  ;;  %9496 = vmatpush3.msra.mxu0 %v5744_v46  ;;  %v5768_v28 = vld [vmem:[%s16536_s5 + $0x700] sm:$0xff]  ;;  %v5863_v20 = vld [vmem:[%s16536_s5 + $0x9f8] sm:$0xff]  ;;  %v6407_v54 = vrot.slane %v14794_v59, %v13818_v43  ;;  %v5830_v9 = vld [vmem:[%s16536_s5 + $0x8f0] sm:$0xff]  ;;  %v6415_v22 = vrot.slane %v14794_v59, %v13842_v29 }
 0x42b   : > { %9531 = vmatpush3.msra.mxu1 %v5776_v35  ;;  %9497 = vmatprep.subr.mxu0 %v5759_v16  ;;  %v5815_v36 = vld [vmem:[%s16536_s5 + $0x878] sm:$0xff]  ;;  %v5862_v48 = vld [vmem:[%s16536_s5 + $0x9f0] sm:$0xff]  ;;  %v5829_v4 = vld [vmem:[%s16536_s5 + $0x8e8] sm:$0xff] }
 0x42c   : > { %9532 = vmatprep.subr.mxu1 %v5791_v5  ;;  %9498 = vmatpush3.msra.mxu0 %v5743_v49  ;;  %v5847_v41 = vld [vmem:[%s16536_s5 + $0x978] sm:$0xff]  ;;  %v5814_v8 = vld [vmem:[%s16536_s5 + $0x870] sm:$0xff]  ;;  %v5861_v21 = vld [vmem:[%s16536_s5 + $0x9e8] sm:$0xff] }
 0x42d   : > { %9533 = vmatpush3.msra.mxu1 %v5775_v58  ;;  %9499 = vmatprep.subr.mxu0 %v5758_v38  ;;  %v5846_v2 = vld [vmem:[%s16536_s5 + $0x970] sm:$0xff]  ;;  %v5813_v26 = vld [vmem:[%s16536_s5 + $0x868] sm:$0xff]  ;;  %v5828_v3 = vld [vmem:[%s16536_s5 + $0x8e0] sm:$0xff] }
 0x42e   : > { %9534 = vmatprep.subr.mxu1 %v5790_v51  ;;  %9500 = vmatpush3.msra.mxu0 %v5742_v25  ;;  %v5845_v37 = vld [vmem:[%s16536_s5 + $0x968] sm:$0xff]  ;;  %v5860_v17 = vld [vmem:[%s16536_s5 + $0x9e0] sm:$0xff]  ;;  %v5827_v55 = vld [vmem:[%s16536_s5 + $0x8d8] sm:$0xff] }
 0x42f   : > { %9535 = vmatpush3.msra.mxu1 %v5774_v62  ;;  %9501 = vmatprep.subr.mxu0 %v5757_v1  ;;  %v5812_v12 = vld [vmem:[%s16536_s5 + $0x860] sm:$0xff]  ;;  %v5859_v46 = vld [vmem:[%s16536_s5 + $0x9d8] sm:$0xff]  ;;  %v5826_v5 = vld [vmem:[%s16536_s5 + $0x8d0] sm:$0xff] }
 0x430   : > { %9536 = vmatprep.subr.mxu1 %v5789_v33  ;;  %9502 = vmatpush3.msra.mxu0 %v5741_v14  ;;  %v5844_v39 = vld [vmem:[%s16536_s5 + $0x960] sm:$0xff]  ;;  %v5811_v35 = vld [vmem:[%s16536_s5 + $0x858] sm:$0xff]  ;;  %v5858_v49 = vld [vmem:[%s16536_s5 + $0x9d0] sm:$0xff] }
 0x431   : > { %9537 = vmatpush3.msra.mxu1 %v5773_v0  ;;  %9503 = vmatprep.subr.mxu0 %v5756_v11  ;;  %v5843_v16 = vld [vmem:[%s16536_s5 + $0x958] sm:$0xff]  ;;  %v5810_v58 = vld [vmem:[%s16536_s5 + $0x850] sm:$0xff]  ;;  %v5825_v51 = vld [vmem:[%s16536_s5 + $0x8c8] sm:$0xff] }
 0x432   : > { %9538 = vmatprep.subr.mxu1 %v5788_v32  ;;  %9504 = vmatpush3.msra.mxu0 %v5740_v15  ;;  %v5842_v38 = vld [vmem:[%s16536_s5 + $0x950] sm:$0xff]  ;;  %v5857_v25 = vld [vmem:[%s16536_s5 + $0x9c8] sm:$0xff]  ;;  %v5824_v33 = vld [vmem:[%s16536_s5 + $0x8c0] sm:$0xff] }
 0x433   : > { %9539 = vmatpush3.msra.mxu1 %v5772_v10  ;;  %9505 = vmatprep.subr.mxu0 %v5755_v61  ;;  %v5809_v62 = vld [vmem:[%s16536_s5 + $0x848] sm:$0xff]  ;;  %v5856_v14 = vld [vmem:[%s16536_s5 + $0x9c0] sm:$0xff]  ;;  %v5823_v32 = vld [vmem:[%s16536_s5 + $0x8b8] sm:$0xff] }
 0x434   : > { %9540 = vmatprep.subr.mxu1 %v5787_v40  ;;  %9506 = vmatpush3.msra.mxu0 %v5739_v42  ;;  %v5841_v1 = vld [vmem:[%s16536_s5 + $0x948] sm:$0xff]  ;;  %v5808_v0 = vld [vmem:[%s16536_s5 + $0x840] sm:$0xff]  ;;  %v5855_v15 = vld [vmem:[%s16536_s5 + $0x9b8] sm:$0xff] }
 0x435   : > { %9541 = vmatpush3.msra.mxu1 %v5771_v23  ;;  %9507 = vmatprep.subr.mxu0 %v5754_v34  ;;  %v5840_v11 = vld [vmem:[%s16536_s5 + $0x940] sm:$0xff]  ;;  %v5807_v10 = vld [vmem:[%s16536_s5 + $0x838] sm:$0xff]  ;;  %v5822_v40 = vld [vmem:[%s16536_s5 + $0x8b0] sm:$0xff] }
 0x436   : > { %9542 = vmatprep.subr.mxu1 %v5786_v19  ;;  %9508 = vmatpush3.msra.mxu0 %v5738_v44  ;;  %v5839_v61 = vld [vmem:[%s16536_s5 + $0x938] sm:$0xff]  ;;  %v5854_v42 = vld [vmem:[%s16536_s5 + $0x9b0] sm:$0xff]  ;;  %v5821_v19 = vld [vmem:[%s16536_s5 + $0x8a8] sm:$0xff] }
 0x437   : > { %9543 = vmatpush3.msra.mxu1 %v5770_v7  ;;  %9509 = vmatprep.subr.mxu0 %v5753_v27  ;;  %v5806_v23 = vld [vmem:[%s16536_s5 + $0x830] sm:$0xff]  ;;  %v5853_v44 = vld [vmem:[%s16536_s5 + $0x9a8] sm:$0xff] }
 0x438   : > { %9544 = vmatprep.subr.mxu1 %v5785_v63  ;;  %9510 = vmatpush3.msra.mxu0 %v5737_v50  ;;  %v5838_v34 = vld [vmem:[%s16536_s5 + $0x930] sm:$0xff]  ;;  %v5805_v7 = vld [vmem:[%s16536_s5 + $0x828] sm:$0xff]  ;;  %v5820_v63 = vld [vmem:[%s16536_s5 + $0x8a0] sm:$0xff] }
 0x439   : > { %9545 = vmatpush3.msra.mxu1 %v5769_v45  ;;  %9511 = vmatprep.subr.mxu0 %v5752_v47  ;;  %v5837_v27 = vld [vmem:[%s16536_s5 + $0x928] sm:$0xff]  ;;  %v5852_v50 = vld [vmem:[%s16536_s5 + $0x9a0] sm:$0xff] }
 0x43a   : > { %9546 = vmatprep.subr.mxu1 %v5784_v52  ;;  %9512 = vmatpush3.msra.mxu0 %v5736_v60  ;;  %v5804_v45 = vld [vmem:[%s16536_s5 + $0x820] sm:$0xff]  ;;  %v5819_v52 = vld [vmem:[%s16536_s5 + $0x898] sm:$0xff] }
 0x43b   : > { %9547 = vmatpush3.msra.mxu1 %v5768_v28  ;;  %7066 = vmatmul.mubr.f32.vlgmr.msra.gmra.mxu0 %v6387_v24  ;;  %v5836_v47 = vld [vmem:[%s16536_s5 + $0x920] sm:$0xff]  ;;  %v5851_v60 = vld [vmem:[%s16536_s5 + $0x998] sm:$0xff] }
 0x43c   : > { %7136 = vmatmul.mubr.f32.vlgmr.msra.gmra.mxu1 %v6395_v13  ;;  %9551 = vmatprep.subr.mxu0 %v5831_v56  ;;  %v5803_v28 = vld [vmem:[%s16536_s5 + $0x818] sm:$0xff]  ;;  %v5818_v56 = vld [vmem:[%s16536_s5 + $0x890] sm:$0xff] }
 0x43d   : > { %9586 = vmatprep.subr.mxu1 %v5863_v20  ;;  %9552 = vmatpush3.msra.mxu0 %v5815_v36  ;;  %v5835_v24 = vld [vmem:[%s16536_s5 + $0x918] sm:$0xff]  ;;  %v5850_v13 = vld [vmem:[%s16536_s5 + $0x990] sm:$0xff] }
 0x43e   : > { %7205 = vmatprep.mubr.f32.mxu0 %v6407_v54  ;;  %9587 = vmatpush3.msra.mxu1 %v5847_v41  ;;  %v5802_v20 = vld [vmem:[%s16536_s5 + $0x810] sm:$0xff]  ;;  %v5817_v41 = vld [vmem:[%s16536_s5 + $0x888] sm:$0xff] }
 0x43f   : > { %7275 = vmatprep.mubr.f32.mxu1 %v6415_v22  ;;  %9553 = vmatprep.subr.mxu0 %v5830_v9  ;;  %v5834_v36 = vld [vmem:[%s16536_s5 + $0x910] sm:$0xff]  ;;  %v5849_v54 = vld [vmem:[%s16536_s5 + $0x988] sm:$0xff] }
 0x440   : > { %9588 = vmatprep.subr.mxu1 %v5862_v48  ;;  %9554 = vmatpush3.msra.mxu0 %v5814_v8  ;;  %v5801_v9 = vld [vmem:[%s16536_s5 + $0x808] sm:$0xff]  ;;  %v5816_v48 = vld [vmem:[%s16536_s5 + $0x880] sm:$0xff] }
 0x441   : > { %9589 = vmatpush3.msra.mxu1 %v5846_v2  ;;  %9555 = vmatprep.subr.mxu0 %v5829_v4  ;;  %v5833_v22 = vld [vmem:[%s16536_s5 + $0x908] sm:$0xff]  ;;  %v5848_v8 = vld [vmem:[%s16536_s5 + $0x980] sm:$0xff] }
 0x442   : > { %9590 = vmatprep.subr.mxu1 %v5861_v21  ;;  %9556 = vmatpush3.msra.mxu0 %v5813_v26  ;;  %v5800_v2 = vld [vmem:[%s16536_s5 + $0x800] sm:$0xff]  ;;  %v6403_v21 = vrot.slane %v14794_v59, %v13845_v53  ;;  %v5895_v26 = vld [vmem:[%s16536_s5 + $0xaf8] sm:$0xff] }
 0x443   : > { %9591 = vmatpush3.msra.mxu1 %v5845_v37  ;;  %9557 = vmatprep.subr.mxu0 %v5828_v3  ;;  %v5832_v4 = vld [vmem:[%s16536_s5 + $0x900] sm:$0xff]  ;;  %v6411_v37 = vrot.slane %v14794_v59, %v13871_v31  ;;  %v5927_v3 = vld [vmem:[%s16536_s5 + $0xbf8] sm:$0xff] }
 0x444   : > { %9592 = vmatprep.subr.mxu1 %v5860_v17  ;;  %9558 = vmatpush3.msra.mxu0 %v5812_v12  ;;  %v5879_v17 = vld [vmem:[%s16536_s5 + $0xa78] sm:$0xff] }
 0x445   : > { %9593 = vmatpush3.msra.mxu1 %v5844_v39  ;;  %9559 = vmatprep.subr.mxu0 %v5827_v55  ;;  %v5911_v12 = vld [vmem:[%s16536_s5 + $0xb78] sm:$0xff]  ;;  %v6423_v39 = vrot.slane %v14794_v59, %v13885_v57  ;;  %v5894_v55 = vld [vmem:[%s16536_s5 + $0xaf0] sm:$0xff] }
 0x446   : > { %9594 = vmatprep.subr.mxu1 %v5859_v46  ;;  %9560 = vmatpush3.msra.mxu0 %v5811_v35  ;;  %v6431_v46 = vrot.slane %v14794_v59, %v13992_v30  ;;  %v5926_v35 = vld [vmem:[%s16536_s5 + $0xbf0] sm:$0xff] }
 0x447   : > { %9595 = vmatpush3.msra.mxu1 %v5843_v16  ;;  %9561 = vmatprep.subr.mxu0 %v5826_v5  ;;  %v5878_v16 = vld [vmem:[%s16536_s5 + $0xa70] sm:$0xff] }
 0x448   : > { %9596 = vmatprep.subr.mxu1 %v5858_v49  ;;  %9562 = vmatpush3.msra.mxu0 %v5810_v58  ;;  %v5910_v5 = vld [vmem:[%s16536_s5 + $0xb70] sm:$0xff]  ;;  %v5893_v49 = vld [vmem:[%s16536_s5 + $0xae8] sm:$0xff] }
 0x449   : > { %9597 = vmatpush3.msra.mxu1 %v5842_v38  ;;  %9563 = vmatprep.subr.mxu0 %v5825_v51  ;;  %v5925_v58 = vld [vmem:[%s16536_s5 + $0xbe8] sm:$0xff] }
 0x44a   : > { %9598 = vmatprep.subr.mxu1 %v5857_v25  ;;  %9564 = vmatpush3.msra.mxu0 %v5809_v62  ;;  %v5877_v38 = vld [vmem:[%s16536_s5 + $0xa68] sm:$0xff]  ;;  %v5892_v25 = vld [vmem:[%s16536_s5 + $0xae0] sm:$0xff] }
 0x44b   : > { %9599 = vmatpush3.msra.mxu1 %v5841_v1  ;;  %9565 = vmatprep.subr.mxu0 %v5824_v33  ;;  %v5909_v51 = vld [vmem:[%s16536_s5 + $0xb68] sm:$0xff]  ;;  %v5924_v62 = vld [vmem:[%s16536_s5 + $0xbe0] sm:$0xff] }
 0x44c   : > { %9600 = vmatprep.subr.mxu1 %v5856_v14  ;;  %9566 = vmatpush3.msra.mxu0 %v5808_v0  ;;  %v5876_v1 = vld [vmem:[%s16536_s5 + $0xa60] sm:$0xff]  ;;  %v5891_v14 = vld [vmem:[%s16536_s5 + $0xad8] sm:$0xff] }
 0x44d   : > { %9601 = vmatpush3.msra.mxu1 %v5840_v11  ;;  %9567 = vmatprep.subr.mxu0 %v5823_v32  ;;  %v5908_v33 = vld [vmem:[%s16536_s5 + $0xb60] sm:$0xff]  ;;  %v5923_v0 = vld [vmem:[%s16536_s5 + $0xbd8] sm:$0xff] }
 0x44e   : > { %9602 = vmatprep.subr.mxu1 %v5855_v15  ;;  %9568 = vmatpush3.msra.mxu0 %v5807_v10  ;;  %v5875_v11 = vld [vmem:[%s16536_s5 + $0xa58] sm:$0xff]  ;;  %v5890_v15 = vld [vmem:[%s16536_s5 + $0xad0] sm:$0xff] }
 0x44f   : > { %9603 = vmatpush3.msra.mxu1 %v5839_v61  ;;  %9569 = vmatprep.subr.mxu0 %v5822_v40  ;;  %v5907_v32 = vld [vmem:[%s16536_s5 + $0xb58] sm:$0xff]  ;;  %v5922_v10 = vld [vmem:[%s16536_s5 + $0xbd0] sm:$0xff] }
 0x450   : > { %9604 = vmatprep.subr.mxu1 %v5854_v42  ;;  %9570 = vmatpush3.msra.mxu0 %v5806_v23  ;;  %v5874_v61 = vld [vmem:[%s16536_s5 + $0xa50] sm:$0xff]  ;;  %v5889_v42 = vld [vmem:[%s16536_s5 + $0xac8] sm:$0xff] }
 0x451   : > { %9605 = vmatpush3.msra.mxu1 %v5838_v34  ;;  %9571 = vmatprep.subr.mxu0 %v5821_v19  ;;  %v5906_v40 = vld [vmem:[%s16536_s5 + $0xb50] sm:$0xff]  ;;  %v5921_v23 = vld [vmem:[%s16536_s5 + $0xbc8] sm:$0xff] }
 0x452   : > { %9606 = vmatprep.subr.mxu1 %v5853_v44  ;;  %9572 = vmatpush3.msra.mxu0 %v5805_v7  ;;  %v5873_v34 = vld [vmem:[%s16536_s5 + $0xa48] sm:$0xff]  ;;  %v5888_v44 = vld [vmem:[%s16536_s5 + $0xac0] sm:$0xff] }
 0x453   : > { %9607 = vmatpush3.msra.mxu1 %v5837_v27  ;;  %9573 = vmatprep.subr.mxu0 %v5820_v63  ;;  %v5905_v19 = vld [vmem:[%s16536_s5 + $0xb48] sm:$0xff]  ;;  %v5920_v7 = vld [vmem:[%s16536_s5 + $0xbc0] sm:$0xff] }
 0x454   : > { %9608 = vmatprep.subr.mxu1 %v5852_v50  ;;  %9574 = vmatpush3.msra.mxu0 %v5804_v45  ;;  %v5872_v27 = vld [vmem:[%s16536_s5 + $0xa40] sm:$0xff]  ;;  %v5887_v50 = vld [vmem:[%s16536_s5 + $0xab8] sm:$0xff] }
 0x455   : > { %9609 = vmatpush3.msra.mxu1 %v5836_v47  ;;  %9575 = vmatprep.subr.mxu0 %v5819_v52  ;;  %v5904_v63 = vld [vmem:[%s16536_s5 + $0xb40] sm:$0xff]  ;;  %v5919_v45 = vld [vmem:[%s16536_s5 + $0xbb8] sm:$0xff] }
 0x456   : > { %9610 = vmatprep.subr.mxu1 %v5851_v60  ;;  %9576 = vmatpush3.msra.mxu0 %v5803_v28  ;;  %v5871_v47 = vld [vmem:[%s16536_s5 + $0xa38] sm:$0xff]  ;;  %v5886_v60 = vld [vmem:[%s16536_s5 + $0xab0] sm:$0xff] }
 0x457   : > { %9611 = vmatpush3.msra.mxu1 %v5835_v24  ;;  %9577 = vmatprep.subr.mxu0 %v5818_v56  ;;  %v5903_v52 = vld [vmem:[%s16536_s5 + $0xb38] sm:$0xff]  ;;  %v5918_v28 = vld [vmem:[%s16536_s5 + $0xbb0] sm:$0xff] }
 0x458   : > { %9612 = vmatprep.subr.mxu1 %v5850_v13  ;;  %9578 = vmatpush3.msra.mxu0 %v5802_v20  ;;  %v5870_v24 = vld [vmem:[%s16536_s5 + $0xa30] sm:$0xff]  ;;  %v5885_v13 = vld [vmem:[%s16536_s5 + $0xaa8] sm:$0xff] }
 0x459   : > { %9613 = vmatpush3.msra.mxu1 %v5834_v36  ;;  %9579 = vmatprep.subr.mxu0 %v5817_v41  ;;  %v5902_v56 = vld [vmem:[%s16536_s5 + $0xb30] sm:$0xff]  ;;  %v5917_v20 = vld [vmem:[%s16536_s5 + $0xba8] sm:$0xff] }
 0x45a   : > { %9614 = vmatprep.subr.mxu1 %v5849_v54  ;;  %9580 = vmatpush3.msra.mxu0 %v5801_v9  ;;  %v5869_v36 = vld [vmem:[%s16536_s5 + $0xa28] sm:$0xff]  ;;  %v5884_v54 = vld [vmem:[%s16536_s5 + $0xaa0] sm:$0xff] }
 0x45b   : > { %9615 = vmatpush3.msra.mxu1 %v5833_v22  ;;  %9581 = vmatprep.subr.mxu0 %v5816_v48  ;;  %v5901_v41 = vld [vmem:[%s16536_s5 + $0xb28] sm:$0xff]  ;;  %v5916_v9 = vld [vmem:[%s16536_s5 + $0xba0] sm:$0xff] }
 0x45c   : > { %9616 = vmatprep.subr.mxu1 %v5848_v8  ;;  %9582 = vmatpush3.msra.mxu0 %v5800_v2  ;;  %v5868_v22 = vld [vmem:[%s16536_s5 + $0xa20] sm:$0xff]  ;;  %v5883_v8 = vld [vmem:[%s16536_s5 + $0xa98] sm:$0xff] }
 0x45d   : > { %9617 = vmatpush3.msra.mxu1 %v5832_v4  ;;  %7206 = vmatmul.mubr.f32.vlgmr.msra.gmra.mxu0 %v6403_v21  ;;  %v5900_v48 = vld [vmem:[%s16536_s5 + $0xb20] sm:$0xff]  ;;  %v5915_v2 = vld [vmem:[%s16536_s5 + $0xb98] sm:$0xff] }
 0x45e   : > { %7276 = vmatmul.mubr.f32.vlgmr.msra.gmra.mxu1 %v6411_v37  ;;  %9621 = vmatprep.subr.mxu0 %v5895_v26  ;;  %v5867_v4 = vld [vmem:[%s16536_s5 + $0xa18] sm:$0xff]  ;;  %v5882_v26 = vld [vmem:[%s16536_s5 + $0xa90] sm:$0xff] }
 0x45f   : > { %9656 = vmatprep.subr.mxu1 %v5927_v3  ;;  %9622 = vmatpush3.msra.mxu0 %v5879_v17  ;;  %v5899_v21 = vld [vmem:[%s16536_s5 + $0xb18] sm:$0xff]  ;;  %v5914_v37 = vld [vmem:[%s16536_s5 + $0xb90] sm:$0xff] }
 0x460   : > { %7345 = vmatprep.mubr.f32.mxu0 %v6423_v39  ;;  %9657 = vmatpush3.msra.mxu1 %v5911_v12  ;;  %v5866_v3 = vld [vmem:[%s16536_s5 + $0xa10] sm:$0xff]  ;;  %v5881_v12 = vld [vmem:[%s16536_s5 + $0xa88] sm:$0xff] }
 0x461   : > { %7415 = vmatprep.mubr.f32.mxu1 %v6431_v46  ;;  %9623 = vmatprep.subr.mxu0 %v5894_v55  ;;  %v5898_v17 = vld [vmem:[%s16536_s5 + $0xb10] sm:$0xff]  ;;  %v5913_v39 = vld [vmem:[%s16536_s5 + $0xb88] sm:$0xff] }
 0x462   : > { %9658 = vmatprep.subr.mxu1 %v5926_v35  ;;  %9624 = vmatpush3.msra.mxu0 %v5878_v16  ;;  %v5865_v55 = vld [vmem:[%s16536_s5 + $0xa08] sm:$0xff]  ;;  %v5880_v35 = vld [vmem:[%s16536_s5 + $0xa80] sm:$0xff] }
 0x463   : > { %9659 = vmatpush3.msra.mxu1 %v5910_v5  ;;  %9625 = vmatprep.subr.mxu0 %v5893_v49  ;;  %v5897_v46 = vld [vmem:[%s16536_s5 + $0xb08] sm:$0xff]  ;;  %v5912_v16 = vld [vmem:[%s16536_s5 + $0xb80] sm:$0xff] }
 0x464   : > { %9660 = vmatprep.subr.mxu1 %v5925_v58  ;;  %9626 = vmatpush3.msra.mxu0 %v5877_v38  ;;  %v5864_v5 = vld [vmem:[%s16536_s5 + $0xa00] sm:$0xff]  ;;  %v6419_v58 = vrot.slane %v14794_v59, %v14317_v18  ;;  %v5959_v38 = vld [vmem:[%s16536_s5 + $0xcf8] sm:$0xff] }
 0x465   : > { %9661 = vmatpush3.msra.mxu1 %v5909_v51  ;;  %9627 = vmatprep.subr.mxu0 %v5892_v25  ;;  %v5896_v49 = vld [vmem:[%s16536_s5 + $0xb00] sm:$0xff]  ;;  %v15196_v51 = vld [vmem:[#allocation7 + $0x18] sm:$0xff]  ;;  %v6427_v25 = vrot.slane %v14794_v59, %v14326_v6  ;;  %v5958_v59 = vld [vmem:[%s16536_s5 + $0xcf0] sm:$0xff] }
 0x466   : > { %9662 = vmatprep.subr.mxu1 %v5924_v62  ;;  %9628 = vmatpush3.msra.mxu0 %v5876_v1  ;;  %v5991_v62 = vld [vmem:[%s16536_s5 + $0xdf8] sm:$0xff] }
 0x467   : > { %9663 = vmatpush3.msra.mxu1 %v5908_v33  ;;  %9629 = vmatprep.subr.mxu0 %v5891_v14  ;;  %v5943_v1 = vld [vmem:[%s16536_s5 + $0xc78] sm:$0xff]  ;;  %v6439_v14 = vrot.slane %v15196_v51, %v13818_v43 }
 0x468   : > { %9664 = vmatprep.subr.mxu1 %v5923_v0  ;;  %9630 = vmatpush3.msra.mxu0 %v5875_v11  ;;  %v5975_v33 = vld [vmem:[%s16536_s5 + $0xd78] sm:$0xff]  ;;  %v6447_v0 = vrot.slane %v15196_v51, %v13842_v29  ;;  %v5990_v11 = vld [vmem:[%s16536_s5 + $0xdf0] sm:$0xff] }
 0x469   : > { %9665 = vmatpush3.msra.mxu1 %v5907_v32  ;;  %9631 = vmatprep.subr.mxu0 %v5890_v15  ;;  %v5942_v32 = vld [vmem:[%s16536_s5 + $0xc70] sm:$0xff] }
 0x46a   : > { %9666 = vmatprep.subr.mxu1 %v5922_v10  ;;  %9632 = vmatpush3.msra.mxu0 %v5874_v61  ;;  %v5974_v15 = vld [vmem:[%s16536_s5 + $0xd70] sm:$0xff]  ;;  %v5957_v10 = vld [vmem:[%s16536_s5 + $0xce8] sm:$0xff] }
 0x46b   : > { %9667 = vmatpush3.msra.mxu1 %v5906_v40  ;;  %9633 = vmatprep.subr.mxu0 %v5889_v42  ;;  %v5989_v61 = vld [vmem:[%s16536_s5 + $0xde8] sm:$0xff] }
 0x46c   : > { %9668 = vmatprep.subr.mxu1 %v5921_v23  ;;  %9634 = vmatpush3.msra.mxu0 %v5873_v34  ;;  %v5941_v40 = vld [vmem:[%s16536_s5 + $0xc68] sm:$0xff]  ;;  %v5956_v23 = vld [vmem:[%s16536_s5 + $0xce0] sm:$0xff] }
 0x46d   : > { %9669 = vmatpush3.msra.mxu1 %v5905_v19  ;;  %9635 = vmatprep.subr.mxu0 %v5888_v44  ;;  %v5973_v42 = vld [vmem:[%s16536_s5 + $0xd68] sm:$0xff]  ;;  %v5988_v34 = vld [vmem:[%s16536_s5 + $0xde0] sm:$0xff] }
 0x46e   : > { %9670 = vmatprep.subr.mxu1 %v5920_v7  ;;  %9636 = vmatpush3.msra.mxu0 %v5872_v27  ;;  %v5940_v19 = vld [vmem:[%s16536_s5 + $0xc60] sm:$0xff]  ;;  %v5955_v7 = vld [vmem:[%s16536_s5 + $0xcd8] sm:$0xff] }
 0x46f   : > { %9671 = vmatpush3.msra.mxu1 %v5904_v63  ;;  %9637 = vmatprep.subr.mxu0 %v5887_v50  ;;  %v5972_v44 = vld [vmem:[%s16536_s5 + $0xd60] sm:$0xff]  ;;  %v5987_v27 = vld [vmem:[%s16536_s5 + $0xdd8] sm:$0xff] }
 0x470   : > { %9672 = vmatprep.subr.mxu1 %v5919_v45  ;;  %9638 = vmatpush3.msra.mxu0 %v5871_v47  ;;  %v5939_v63 = vld [vmem:[%s16536_s5 + $0xc58] sm:$0xff]  ;;  %v5954_v45 = vld [vmem:[%s16536_s5 + $0xcd0] sm:$0xff] }
 0x471   : > { %9673 = vmatpush3.msra.mxu1 %v5903_v52  ;;  %9639 = vmatprep.subr.mxu0 %v5886_v60  ;;  %v5971_v50 = vld [vmem:[%s16536_s5 + $0xd58] sm:$0xff]  ;;  %v5986_v47 = vld [vmem:[%s16536_s5 + $0xdd0] sm:$0xff] }
 0x472   : > { %9674 = vmatprep.subr.mxu1 %v5918_v28  ;;  %9640 = vmatpush3.msra.mxu0 %v5870_v24  ;;  %v5938_v52 = vld [vmem:[%s16536_s5 + $0xc50] sm:$0xff]  ;;  %v5953_v28 = vld [vmem:[%s16536_s5 + $0xcc8] sm:$0xff] }
 0x473   : > { %9675 = vmatpush3.msra.mxu1 %v5902_v56  ;;  %9641 = vmatprep.subr.mxu0 %v5885_v13  ;;  %v5970_v60 = vld [vmem:[%s16536_s5 + $0xd50] sm:$0xff]  ;;  %v5985_v24 = vld [vmem:[%s16536_s5 + $0xdc8] sm:$0xff] }
 0x474   : > { %9676 = vmatprep.subr.mxu1 %v5917_v20  ;;  %9642 = vmatpush3.msra.mxu0 %v5869_v36  ;;  %v5937_v56 = vld [vmem:[%s16536_s5 + $0xc48] sm:$0xff]  ;;  %v5952_v20 = vld [vmem:[%s16536_s5 + $0xcc0] sm:$0xff] }
 0x475   : > { %9677 = vmatpush3.msra.mxu1 %v5901_v41  ;;  %9643 = vmatprep.subr.mxu0 %v5884_v54  ;;  %v5969_v13 = vld [vmem:[%s16536_s5 + $0xd48] sm:$0xff]  ;;  %v5984_v36 = vld [vmem:[%s16536_s5 + $0xdc0] sm:$0xff] }
 0x476   : > { %9678 = vmatprep.subr.mxu1 %v5916_v9  ;;  %9644 = vmatpush3.msra.mxu0 %v5868_v22  ;;  %v5936_v41 = vld [vmem:[%s16536_s5 + $0xc40] sm:$0xff]  ;;  %v5951_v9 = vld [vmem:[%s16536_s5 + $0xcb8] sm:$0xff] }
 0x477   : > { %9679 = vmatpush3.msra.mxu1 %v5900_v48  ;;  %9645 = vmatprep.subr.mxu0 %v5883_v8  ;;  %v5968_v54 = vld [vmem:[%s16536_s5 + $0xd40] sm:$0xff]  ;;  %v5983_v22 = vld [vmem:[%s16536_s5 + $0xdb8] sm:$0xff] }
 0x478   : > { %9680 = vmatprep.subr.mxu1 %v5915_v2  ;;  %9646 = vmatpush3.msra.mxu0 %v5867_v4  ;;  %v5935_v48 = vld [vmem:[%s16536_s5 + $0xc38] sm:$0xff]  ;;  %v5950_v2 = vld [vmem:[%s16536_s5 + $0xcb0] sm:$0xff] }
 0x479   : > { %9681 = vmatpush3.msra.mxu1 %v5899_v21  ;;  %9647 = vmatprep.subr.mxu0 %v5882_v26  ;;  %v5967_v8 = vld [vmem:[%s16536_s5 + $0xd38] sm:$0xff]  ;;  %v5982_v4 = vld [vmem:[%s16536_s5 + $0xdb0] sm:$0xff] }
 0x47a   : > { %9682 = vmatprep.subr.mxu1 %v5914_v37  ;;  %9648 = vmatpush3.msra.mxu0 %v5866_v3  ;;  %v5934_v21 = vld [vmem:[%s16536_s5 + $0xc30] sm:$0xff]  ;;  %v5949_v37 = vld [vmem:[%s16536_s5 + $0xca8] sm:$0xff] }
 0x47b   : > { %9683 = vmatpush3.msra.mxu1 %v5898_v17  ;;  %9649 = vmatprep.subr.mxu0 %v5881_v12  ;;  %v5966_v26 = vld [vmem:[%s16536_s5 + $0xd30] sm:$0xff]  ;;  %v5981_v3 = vld [vmem:[%s16536_s5 + $0xda8] sm:$0xff] }
 0x47c   : > { %9684 = vmatprep.subr.mxu1 %v5913_v39  ;;  %9650 = vmatpush3.msra.mxu0 %v5865_v55  ;;  %v5933_v17 = vld [vmem:[%s16536_s5 + $0xc28] sm:$0xff]  ;;  %v5948_v39 = vld [vmem:[%s16536_s5 + $0xca0] sm:$0xff] }
 0x47d   : > { %9685 = vmatpush3.msra.mxu1 %v5897_v46  ;;  %9651 = vmatprep.subr.mxu0 %v5880_v35  ;;  %v5965_v12 = vld [vmem:[%s16536_s5 + $0xd28] sm:$0xff]  ;;  %v5980_v55 = vld [vmem:[%s16536_s5 + $0xda0] sm:$0xff] }
 0x47e   : > { %9686 = vmatprep.subr.mxu1 %v5912_v16  ;;  %9652 = vmatpush3.msra.mxu0 %v5864_v5  ;;  %v5932_v46 = vld [vmem:[%s16536_s5 + $0xc20] sm:$0xff]  ;;  %v5947_v16 = vld [vmem:[%s16536_s5 + $0xc98] sm:$0xff] }
 0x47f   : > { %9687 = vmatpush3.msra.mxu1 %v5896_v49  ;;  %7346 = vmatmul.mubr.f32.vlgmr.msra.gmra.mxu0 %v6419_v58  ;;  %v5964_v35 = vld [vmem:[%s16536_s5 + $0xd20] sm:$0xff]  ;;  %v5979_v5 = vld [vmem:[%s16536_s5 + $0xd98] sm:$0xff] }
 0x480   : > { %7416 = vmatmul.mubr.f32.vlgmr.msra.gmra.mxu1 %v6427_v25  ;;  %9691 = vmatprep.subr.mxu0 %v5959_v38  ;;  %v5931_v49 = vld [vmem:[%s16536_s5 + $0xc18] sm:$0xff]  ;;  %v5946_v38 = vld [vmem:[%s16536_s5 + $0xc90] sm:$0xff] }
 0x481   : > { %9726 = vmatprep.subr.mxu1 %v5991_v62  ;;  %9692 = vmatpush3.msra.mxu0 %v5943_v1  ;;  %v5963_v58 = vld [vmem:[%s16536_s5 + $0xd18] sm:$0xff]  ;;  %v5978_v25 = vld [vmem:[%s16536_s5 + $0xd90] sm:$0xff] }
 0x482   : > { %7485 = vmatprep.mubr.f32.mxu0 %v6439_v14  ;;  %9727 = vmatpush3.msra.mxu1 %v5975_v33  ;;  %v5930_v62 = vld [vmem:[%s16536_s5 + $0xc10] sm:$0xff]  ;;  %v5945_v33 = vld [vmem:[%s16536_s5 + $0xc88] sm:$0xff] }
 0x483   : > { %7555 = vmatprep.mubr.f32.mxu1 %v6447_v0  ;;  %9693 = vmatprep.subr.mxu0 %v5958_v59  ;;  %v5962_v1 = vld [vmem:[%s16536_s5 + $0xd10] sm:$0xff]  ;;  %v5977_v14 = vld [vmem:[%s16536_s5 + $0xd88] sm:$0xff] }
 0x484   : > { %9728 = vmatprep.subr.mxu1 %v5990_v11  ;;  %9694 = vmatpush3.msra.mxu0 %v5942_v32  ;;  %v5929_v59 = vld [vmem:[%s16536_s5 + $0xc08] sm:$0xff]  ;;  %v5944_v11 = vld [vmem:[%s16536_s5 + $0xc80] sm:$0xff] }
 0x485   : > { %9729 = vmatpush3.msra.mxu1 %v5974_v15  ;;  %9695 = vmatprep.subr.mxu0 %v5957_v10  ;;  %v5961_v0 = vld [vmem:[%s16536_s5 + $0xd08] sm:$0xff]  ;;  %v5976_v32 = vld [vmem:[%s16536_s5 + $0xd80] sm:$0xff] }
 0x486   : > { %9730 = vmatprep.subr.mxu1 %v5989_v61  ;;  %9696 = vmatpush3.msra.mxu0 %v5941_v40  ;;  %v5928_v15 = vld [vmem:[%s16536_s5 + $0xc00] sm:$0xff]  ;;  %v6435_v61 = vrot.slane %v15196_v51, %v13845_v53  ;;  %v6023_v40 = vld [vmem:[%s16536_s5 + $0xef8] sm:$0xff] }
 0x487   : > { %9731 = vmatpush3.msra.mxu1 %v5973_v42  ;;  %9697 = vmatprep.subr.mxu0 %v5956_v23  ;;  %v5960_v10 = vld [vmem:[%s16536_s5 + $0xd00] sm:$0xff]  ;;  %v6443_v42 = vrot.slane %v15196_v51, %v13871_v31  ;;  %v6055_v23 = vld [vmem:[%s16536_s5 + $0xff8] sm:$0xff] }
 0x488   : > { %9732 = vmatprep.subr.mxu1 %v5988_v34  ;;  %9698 = vmatpush3.msra.mxu0 %v5940_v19  ;;  %v6007_v34 = vld [vmem:[%s16536_s5 + $0xe78] sm:$0xff] }
 0x489   : > { %9733 = vmatpush3.msra.mxu1 %v5972_v44  ;;  %9699 = vmatprep.subr.mxu0 %v5955_v7  ;;  %v6039_v19 = vld [vmem:[%s16536_s5 + $0xf78] sm:$0xff]  ;;  %v6455_v44 = vrot.slane %v15196_v51, %v13885_v57  ;;  %v6022_v7 = vld [vmem:[%s16536_s5 + $0xef0] sm:$0xff] }
 0x48a   : > { %9734 = vmatprep.subr.mxu1 %v5987_v27  ;;  %9700 = vmatpush3.msra.mxu0 %v5939_v63  ;;  %v6463_v27 = vrot.slane %v15196_v51, %v13992_v30  ;;  %v6054_v63 = vld [vmem:[%s16536_s5 + $0xff0] sm:$0xff] }
 0x48b   : > { %9735 = vmatpush3.msra.mxu1 %v5971_v50  ;;  %9701 = vmatprep.subr.mxu0 %v5954_v45  ;;  %v6006_v50 = vld [vmem:[%s16536_s5 + $0xe70] sm:$0xff] }
 0x48c   : > { %9736 = vmatprep.subr.mxu1 %v5986_v47  ;;  %9702 = vmatpush3.msra.mxu0 %v5938_v52  ;;  %v6038_v45 = vld [vmem:[%s16536_s5 + $0xf70] sm:$0xff]  ;;  %v6021_v47 = vld [vmem:[%s16536_s5 + $0xee8] sm:$0xff] }
 0x48d   : > { %9737 = vmatpush3.msra.mxu1 %v5970_v60  ;;  %9703 = vmatprep.subr.mxu0 %v5953_v28  ;;  %v6053_v52 = vld [vmem:[%s16536_s5 + $0xfe8] sm:$0xff] }
 0x48e   : > { %9738 = vmatprep.subr.mxu1 %v5985_v24  ;;  %9704 = vmatpush3.msra.mxu0 %v5937_v56  ;;  %v6005_v60 = vld [vmem:[%s16536_s5 + $0xe68] sm:$0xff]  ;;  %v6020_v24 = vld [vmem:[%s16536_s5 + $0xee0] sm:$0xff] }
 0x48f   : > { %9739 = vmatpush3.msra.mxu1 %v5969_v13  ;;  %9705 = vmatprep.subr.mxu0 %v5952_v20  ;;  %v6037_v28 = vld [vmem:[%s16536_s5 + $0xf68] sm:$0xff]  ;;  %v6052_v56 = vld [vmem:[%s16536_s5 + $0xfe0] sm:$0xff] }
 0x490   : > { %9740 = vmatprep.subr.mxu1 %v5984_v36  ;;  %9706 = vmatpush3.msra.mxu0 %v5936_v41  ;;  %v6004_v13 = vld [vmem:[%s16536_s5 + $0xe60] sm:$0xff]  ;;  %v6019_v36 = vld [vmem:[%s16536_s5 + $0xed8] sm:$0xff] }
 0x491   : > { %9741 = vmatpush3.msra.mxu1 %v5968_v54  ;;  %9707 = vmatprep.subr.mxu0 %v5951_v9  ;;  %v6036_v20 = vld [vmem:[%s16536_s5 + $0xf60] sm:$0xff]  ;;  %v6051_v41 = vld [vmem:[%s16536_s5 + $0xfd8] sm:$0xff] }
 0x492   : > { %9742 = vmatprep.subr.mxu1 %v5983_v22  ;;  %9708 = vmatpush3.msra.mxu0 %v5935_v48  ;;  %v6003_v54 = vld [vmem:[%s16536_s5 + $0xe58] sm:$0xff]  ;;  %v6018_v22 = vld [vmem:[%s16536_s5 + $0xed0] sm:$0xff] }
 0x493   : > { %9743 = vmatpush3.msra.mxu1 %v5967_v8  ;;  %9709 = vmatprep.subr.mxu0 %v5950_v2  ;;  %v6035_v9 = vld [vmem:[%s16536_s5 + $0xf58] sm:$0xff]  ;;  %v6050_v48 = vld [vmem:[%s16536_s5 + $0xfd0] sm:$0xff] }
 0x494   : > { %9744 = vmatprep.subr.mxu1 %v5982_v4  ;;  %9710 = vmatpush3.msra.mxu0 %v5934_v21  ;;  %v6002_v8 = vld [vmem:[%s16536_s5 + $0xe50] sm:$0xff]  ;;  %v6017_v4 = vld [vmem:[%s16536_s5 + $0xec8] sm:$0xff] }
 0x495   : > { %9745 = vmatpush3.msra.mxu1 %v5966_v26  ;;  %9711 = vmatprep.subr.mxu0 %v5949_v37  ;;  %v6034_v2 = vld [vmem:[%s16536_s5 + $0xf50] sm:$0xff]  ;;  %v6049_v21 = vld [vmem:[%s16536_s5 + $0xfc8] sm:$0xff] }
 0x496   : > { %9746 = vmatprep.subr.mxu1 %v5981_v3  ;;  %9712 = vmatpush3.msra.mxu0 %v5933_v17  ;;  %v6001_v26 = vld [vmem:[%s16536_s5 + $0xe48] sm:$0xff]  ;;  %v6016_v3 = vld [vmem:[%s16536_s5 + $0xec0] sm:$0xff] }
 0x497   : > { %9747 = vmatpush3.msra.mxu1 %v5965_v12  ;;  %9713 = vmatprep.subr.mxu0 %v5948_v39  ;;  %v6033_v37 = vld [vmem:[%s16536_s5 + $0xf48] sm:$0xff]  ;;  %v6048_v17 = vld [vmem:[%s16536_s5 + $0xfc0] sm:$0xff] }
 0x498   : > { %9748 = vmatprep.subr.mxu1 %v5980_v55  ;;  %9714 = vmatpush3.msra.mxu0 %v5932_v46  ;;  %v6000_v12 = vld [vmem:[%s16536_s5 + $0xe40] sm:$0xff]  ;;  %v6015_v55 = vld [vmem:[%s16536_s5 + $0xeb8] sm:$0xff] }
 0x499   : > { %9749 = vmatpush3.msra.mxu1 %v5964_v35  ;;  %9715 = vmatprep.subr.mxu0 %v5947_v16  ;;  %v6032_v39 = vld [vmem:[%s16536_s5 + $0xf40] sm:$0xff]  ;;  %v6047_v46 = vld [vmem:[%s16536_s5 + $0xfb8] sm:$0xff] }
 0x49a   : > { %9750 = vmatprep.subr.mxu1 %v5979_v5  ;;  %9716 = vmatpush3.msra.mxu0 %v5931_v49  ;;  %v5999_v35 = vld [vmem:[%s16536_s5 + $0xe38] sm:$0xff]  ;;  %v6014_v5 = vld [vmem:[%s16536_s5 + $0xeb0] sm:$0xff] }
 0x49b   : > { %9751 = vmatpush3.msra.mxu1 %v5963_v58  ;;  %9717 = vmatprep.subr.mxu0 %v5946_v38  ;;  %v6031_v16 = vld [vmem:[%s16536_s5 + $0xf38] sm:$0xff]  ;;  %v6046_v49 = vld [vmem:[%s16536_s5 + $0xfb0] sm:$0xff] }
 0x49c   : > { %9752 = vmatprep.subr.mxu1 %v5978_v25  ;;  %9718 = vmatpush3.msra.mxu0 %v5930_v62  ;;  %v5998_v58 = vld [vmem:[%s16536_s5 + $0xe30] sm:$0xff]  ;;  %v6013_v25 = vld [vmem:[%s16536_s5 + $0xea8] sm:$0xff] }
 0x49d   : > { %9753 = vmatpush3.msra.mxu1 %v5962_v1  ;;  %9719 = vmatprep.subr.mxu0 %v5945_v33  ;;  %v6030_v38 = vld [vmem:[%s16536_s5 + $0xf30] sm:$0xff]  ;;  %v6045_v62 = vld [vmem:[%s16536_s5 + $0xfa8] sm:$0xff] }
 0x49e   : > { %9754 = vmatprep.subr.mxu1 %v5977_v14  ;;  %9720 = vmatpush3.msra.mxu0 %v5929_v59  ;;  %v5997_v1 = vld [vmem:[%s16536_s5 + $0xe28] sm:$0xff]  ;;  %v6012_v14 = vld [vmem:[%s16536_s5 + $0xea0] sm:$0xff] }
 0x49f   : > { %9755 = vmatpush3.msra.mxu1 %v5961_v0  ;;  %9721 = vmatprep.subr.mxu0 %v5944_v11  ;;  %v6029_v33 = vld [vmem:[%s16536_s5 + $0xf28] sm:$0xff]  ;;  %v6044_v59 = vld [vmem:[%s16536_s5 + $0xfa0] sm:$0xff] }
 0x4a0   : > { %9756 = vmatprep.subr.mxu1 %v5976_v32  ;;  %9722 = vmatpush3.msra.mxu0 %v5928_v15  ;;  %v5996_v0 = vld [vmem:[%s16536_s5 + $0xe20] sm:$0xff]  ;;  %v6011_v32 = vld [vmem:[%s16536_s5 + $0xe98] sm:$0xff] }
 0x4a1   : > { %9757 = vmatpush3.msra.mxu1 %v5960_v10  ;;  %7486 = vmatmul.mubr.f32.vlgmr.msra.gmra.mxu0 %v6435_v61  ;;  %v6028_v11 = vld [vmem:[%s16536_s5 + $0xf20] sm:$0xff]  ;;  %v6043_v15 = vld [vmem:[%s16536_s5 + $0xf98] sm:$0xff] }
 0x4a2   : > { %7556 = vmatmul.mubr.f32.vlgmr.msra.gmra.mxu1 %v6443_v42  ;;  %9761 = vmatprep.subr.mxu0 %v6023_v40  ;;  %v5995_v10 = vld [vmem:[%s16536_s5 + $0xe18] sm:$0xff]  ;;  %v6010_v40 = vld [vmem:[%s16536_s5 + $0xe90] sm:$0xff] }
 0x4a3   : > { %9796 = vmatprep.subr.mxu1 %v6055_v23  ;;  %9762 = vmatpush3.msra.mxu0 %v6007_v34  ;;  %v6027_v61 = vld [vmem:[%s16536_s5 + $0xf18] sm:$0xff]  ;;  %v6042_v42 = vld [vmem:[%s16536_s5 + $0xf90] sm:$0xff] }
 0x4a4   : > { %7625 = vmatprep.mubr.f32.mxu0 %v6455_v44  ;;  %9797 = vmatpush3.msra.mxu1 %v6039_v19  ;;  %v5994_v23 = vld [vmem:[%s16536_s5 + $0xe10] sm:$0xff]  ;;  %v6009_v19 = vld [vmem:[%s16536_s5 + $0xe88] sm:$0xff] }
 0x4a5   : > { %7695 = vmatprep.mubr.f32.mxu1 %v6463_v27  ;;  %9763 = vmatprep.subr.mxu0 %v6022_v7  ;;  %v6026_v34 = vld [vmem:[%s16536_s5 + $0xf10] sm:$0xff]  ;;  %v6041_v44 = vld [vmem:[%s16536_s5 + $0xf88] sm:$0xff] }
 0x4a6   : > { %9798 = vmatprep.subr.mxu1 %v6054_v63  ;;  %9764 = vmatpush3.msra.mxu0 %v6006_v50  ;;  %v5993_v7 = vld [vmem:[%s16536_s5 + $0xe08] sm:$0xff]  ;;  %v6008_v63 = vld [vmem:[%s16536_s5 + $0xe80] sm:$0xff] }
 0x4a7   : > { %9799 = vmatpush3.msra.mxu1 %v6038_v45  ;;  %9765 = vmatprep.subr.mxu0 %v6021_v47  ;;  %v6025_v27 = vld [vmem:[%s16536_s5 + $0xf08] sm:$0xff]  ;;  %v6040_v50 = vld [vmem:[%s16536_s5 + $0xf80] sm:$0xff] }
 0x4a8   : > { %9800 = vmatprep.subr.mxu1 %v6053_v52  ;;  %9766 = vmatpush3.msra.mxu0 %v6005_v60  ;;  %v5992_v45 = vld [vmem:[%s16536_s5 + $0xe00] sm:$0xff]  ;;  %v6451_v52 = vrot.slane %v15196_v51, %v14317_v18  ;;  %v6087_v60 = vld [vmem:[%s16536_s5 + $0x10f8] sm:$0xff] }
 0x4a9   : > { %9801 = vmatpush3.msra.mxu1 %v6037_v28  ;;  %9767 = vmatprep.subr.mxu0 %v6020_v24  ;;  %v6024_v47 = vld [vmem:[%s16536_s5 + $0xf00] sm:$0xff]  ;;  %v6459_v24 = vrot.slane %v15196_v51, %v14326_v6  ;;  %v6086_v51 = vld [vmem:[%s16536_s5 + $0x10f0] sm:$0xff] }
 0x4aa   : > { %9802 = vmatprep.subr.mxu1 %v6052_v56  ;;  %9768 = vmatpush3.msra.mxu0 %v6004_v13  ;;  %v15598_v28 = vld [vmem:[#allocation7 + $0x20] sm:$0xff]  ;;  %v6119_v56 = vld [vmem:[%s16536_s5 + $0x11f8] sm:$0xff] }
 0x4ab   : > { %9803 = vmatpush3.msra.mxu1 %v6036_v20  ;;  %9769 = vmatprep.subr.mxu0 %v6019_v36  ;;  %v6071_v13 = vld [vmem:[%s16536_s5 + $0x1078] sm:$0xff]  ;;  %v6471_v36 = vrot.slane %v15598_v28, %v13818_v43 }
 0x4ac   : > { %9804 = vmatprep.subr.mxu1 %v6051_v41  ;;  %9770 = vmatpush3.msra.mxu0 %v6003_v54  ;;  %v6103_v20 = vld [vmem:[%s16536_s5 + $0x1178] sm:$0xff]  ;;  %v6479_v41 = vrot.slane %v15598_v28, %v13842_v29  ;;  %v6118_v54 = vld [vmem:[%s16536_s5 + $0x11f0] sm:$0xff] }
 0x4ad   : > { %9805 = vmatpush3.msra.mxu1 %v6035_v9  ;;  %9771 = vmatprep.subr.mxu0 %v6018_v22  ;;  %v6070_v9 = vld [vmem:[%s16536_s5 + $0x1070] sm:$0xff] }
 0x4ae   : > { %9806 = vmatprep.subr.mxu1 %v6050_v48  ;;  %9772 = vmatpush3.msra.mxu0 %v6002_v8  ;;  %v6102_v22 = vld [vmem:[%s16536_s5 + $0x1170] sm:$0xff]  ;;  %v6085_v48 = vld [vmem:[%s16536_s5 + $0x10e8] sm:$0xff] }
 0x4af   : > { %9807 = vmatpush3.msra.mxu1 %v6034_v2  ;;  %9773 = vmatprep.subr.mxu0 %v6017_v4  ;;  %v6117_v8 = vld [vmem:[%s16536_s5 + $0x11e8] sm:$0xff] }
 0x4b0   : > { %9808 = vmatprep.subr.mxu1 %v6049_v21  ;;  %9774 = vmatpush3.msra.mxu0 %v6001_v26  ;;  %v6069_v2 = vld [vmem:[%s16536_s5 + $0x1068] sm:$0xff]  ;;  %v6084_v21 = vld [vmem:[%s16536_s5 + $0x10e0] sm:$0xff] }
 0x4b1   : > { %9809 = vmatpush3.msra.mxu1 %v6033_v37  ;;  %9775 = vmatprep.subr.mxu0 %v6016_v3  ;;  %v6101_v4 = vld [vmem:[%s16536_s5 + $0x1168] sm:$0xff]  ;;  %v6116_v26 = vld [vmem:[%s16536_s5 + $0x11e0] sm:$0xff] }
 0x4b2   : > { %9810 = vmatprep.subr.mxu1 %v6048_v17  ;;  %9776 = vmatpush3.msra.mxu0 %v6000_v12  ;;  %v6068_v37 = vld [vmem:[%s16536_s5 + $0x1060] sm:$0xff]  ;;  %v6083_v17 = vld [vmem:[%s16536_s5 + $0x10d8] sm:$0xff] }
 0x4b3   : > { %9811 = vmatpush3.msra.mxu1 %v6032_v39  ;;  %9777 = vmatprep.subr.mxu0 %v6015_v55  ;;  %v6100_v3 = vld [vmem:[%s16536_s5 + $0x1160] sm:$0xff]  ;;  %v6115_v12 = vld [vmem:[%s16536_s5 + $0x11d8] sm:$0xff] }
 0x4b4   : > { %9812 = vmatprep.subr.mxu1 %v6047_v46  ;;  %9778 = vmatpush3.msra.mxu0 %v5999_v35  ;;  %v6067_v39 = vld [vmem:[%s16536_s5 + $0x1058] sm:$0xff]  ;;  %v6082_v46 = vld [vmem:[%s16536_s5 + $0x10d0] sm:$0xff] }
 0x4b5   : > { %9813 = vmatpush3.msra.mxu1 %v6031_v16  ;;  %9779 = vmatprep.subr.mxu0 %v6014_v5  ;;  %v6099_v55 = vld [vmem:[%s16536_s5 + $0x1158] sm:$0xff]  ;;  %v6114_v35 = vld [vmem:[%s16536_s5 + $0x11d0] sm:$0xff] }
 0x4b6   : > { %9814 = vmatprep.subr.mxu1 %v6046_v49  ;;  %9780 = vmatpush3.msra.mxu0 %v5998_v58  ;;  %v6066_v16 = vld [vmem:[%s16536_s5 + $0x1050] sm:$0xff]  ;;  %v6081_v49 = vld [vmem:[%s16536_s5 + $0x10c8] sm:$0xff] }
 0x4b7   : > { %9815 = vmatpush3.msra.mxu1 %v6030_v38  ;;  %9781 = vmatprep.subr.mxu0 %v6013_v25  ;;  %v6098_v5 = vld [vmem:[%s16536_s5 + $0x1150] sm:$0xff]  ;;  %v6113_v58 = vld [vmem:[%s16536_s5 + $0x11c8] sm:$0xff] }
 0x4b8   : > { %9816 = vmatprep.subr.mxu1 %v6045_v62  ;;  %9782 = vmatpush3.msra.mxu0 %v5997_v1  ;;  %v6065_v38 = vld [vmem:[%s16536_s5 + $0x1048] sm:$0xff]  ;;  %v6080_v62 = vld [vmem:[%s16536_s5 + $0x10c0] sm:$0xff] }
 0x4b9   : > { %9817 = vmatpush3.msra.mxu1 %v6029_v33  ;;  %9783 = vmatprep.subr.mxu0 %v6012_v14  ;;  %v6097_v25 = vld [vmem:[%s16536_s5 + $0x1148] sm:$0xff]  ;;  %v6112_v1 = vld [vmem:[%s16536_s5 + $0x11c0] sm:$0xff] }
 0x4ba   : > { %9818 = vmatprep.subr.mxu1 %v6044_v59  ;;  %9784 = vmatpush3.msra.mxu0 %v5996_v0  ;;  %v6064_v33 = vld [vmem:[%s16536_s5 + $0x1040] sm:$0xff]  ;;  %v6079_v59 = vld [vmem:[%s16536_s5 + $0x10b8] sm:$0xff] }
 0x4bb   : > { %9819 = vmatpush3.msra.mxu1 %v6028_v11  ;;  %9785 = vmatprep.subr.mxu0 %v6011_v32  ;;  %v6096_v14 = vld [vmem:[%s16536_s5 + $0x1140] sm:$0xff]  ;;  %v6111_v0 = vld [vmem:[%s16536_s5 + $0x11b8] sm:$0xff] }
 0x4bc   : > { %9820 = vmatprep.subr.mxu1 %v6043_v15  ;;  %9786 = vmatpush3.msra.mxu0 %v5995_v10  ;;  %v6063_v11 = vld [vmem:[%s16536_s5 + $0x1038] sm:$0xff]  ;;  %v6078_v15 = vld [vmem:[%s16536_s5 + $0x10b0] sm:$0xff] }
 0x4bd   : > { %9821 = vmatpush3.msra.mxu1 %v6027_v61  ;;  %9787 = vmatprep.subr.mxu0 %v6010_v40  ;;  %v6095_v32 = vld [vmem:[%s16536_s5 + $0x1138] sm:$0xff]  ;;  %v6110_v10 = vld [vmem:[%s16536_s5 + $0x11b0] sm:$0xff] }
 0x4be   : > { %9822 = vmatprep.subr.mxu1 %v6042_v42  ;;  %9788 = vmatpush3.msra.mxu0 %v5994_v23  ;;  %v6062_v61 = vld [vmem:[%s16536_s5 + $0x1030] sm:$0xff]  ;;  %v6077_v42 = vld [vmem:[%s16536_s5 + $0x10a8] sm:$0xff] }
 0x4bf   : > { %9823 = vmatpush3.msra.mxu1 %v6026_v34  ;;  %9789 = vmatprep.subr.mxu0 %v6009_v19  ;;  %v6094_v40 = vld [vmem:[%s16536_s5 + $0x1130] sm:$0xff]  ;;  %v6109_v23 = vld [vmem:[%s16536_s5 + $0x11a8] sm:$0xff] }
 0x4c0   : > { %9824 = vmatprep.subr.mxu1 %v6041_v44  ;;  %9790 = vmatpush3.msra.mxu0 %v5993_v7  ;;  %v6061_v34 = vld [vmem:[%s16536_s5 + $0x1028] sm:$0xff]  ;;  %v6076_v44 = vld [vmem:[%s16536_s5 + $0x10a0] sm:$0xff] }
 0x4c1   : > { %9825 = vmatpush3.msra.mxu1 %v6025_v27  ;;  %9791 = vmatprep.subr.mxu0 %v6008_v63  ;;  %v6093_v19 = vld [vmem:[%s16536_s5 + $0x1128] sm:$0xff]  ;;  %v6108_v7 = vld [vmem:[%s16536_s5 + $0x11a0] sm:$0xff] }
 0x4c2   : > { %9826 = vmatprep.subr.mxu1 %v6040_v50  ;;  %9792 = vmatpush3.msra.mxu0 %v5992_v45  ;;  %v6060_v27 = vld [vmem:[%s16536_s5 + $0x1020] sm:$0xff]  ;;  %v6075_v50 = vld [vmem:[%s16536_s5 + $0x1098] sm:$0xff] }
 0x4c3   : > { %9827 = vmatpush3.msra.mxu1 %v6024_v47  ;;  %7626 = vmatmul.mubr.f32.vlgmr.msra.gmra.mxu0 %v6451_v52  ;;  %v6092_v63 = vld [vmem:[%s16536_s5 + $0x1120] sm:$0xff]  ;;  %v6107_v45 = vld [vmem:[%s16536_s5 + $0x1198] sm:$0xff] }
 0x4c4   : > { %7696 = vmatmul.mubr.f32.vlgmr.msra.gmra.mxu1 %v6459_v24  ;;  %9831 = vmatprep.subr.mxu0 %v6087_v60  ;;  %v6059_v47 = vld [vmem:[%s16536_s5 + $0x1018] sm:$0xff]  ;;  %v6074_v60 = vld [vmem:[%s16536_s5 + $0x1090] sm:$0xff] }
 0x4c5   : > { %9866 = vmatprep.subr.mxu1 %v6119_v56  ;;  %9832 = vmatpush3.msra.mxu0 %v6071_v13  ;;  %v6091_v52 = vld [vmem:[%s16536_s5 + $0x1118] sm:$0xff]  ;;  %v6106_v24 = vld [vmem:[%s16536_s5 + $0x1190] sm:$0xff] }
 0x4c6   : > { %7765 = vmatprep.mubr.f32.mxu0 %v6471_v36  ;;  %9867 = vmatpush3.msra.mxu1 %v6103_v20  ;;  %v6058_v56 = vld [vmem:[%s16536_s5 + $0x1010] sm:$0xff]  ;;  %v6073_v20 = vld [vmem:[%s16536_s5 + $0x1088] sm:$0xff] }
 0x4c7   : > { %7835 = vmatprep.mubr.f32.mxu1 %v6479_v41  ;;  %9833 = vmatprep.subr.mxu0 %v6086_v51  ;;  %v6090_v13 = vld [vmem:[%s16536_s5 + $0x1110] sm:$0xff]  ;;  %v6105_v36 = vld [vmem:[%s16536_s5 + $0x1188] sm:$0xff] }
 0x4c8   : > { %9868 = vmatprep.subr.mxu1 %v6118_v54  ;;  %9834 = vmatpush3.msra.mxu0 %v6070_v9  ;;  %v6057_v51 = vld [vmem:[%s16536_s5 + $0x1008] sm:$0xff]  ;;  %v6072_v54 = vld [vmem:[%s16536_s5 + $0x1080] sm:$0xff] }
 0x4c9   : > { %9869 = vmatpush3.msra.mxu1 %v6102_v22  ;;  %9835 = vmatprep.subr.mxu0 %v6085_v48  ;;  %v6089_v41 = vld [vmem:[%s16536_s5 + $0x1108] sm:$0xff]  ;;  %v6104_v9 = vld [vmem:[%s16536_s5 + $0x1180] sm:$0xff] }
 0x4ca   : > { %9870 = vmatprep.subr.mxu1 %v6117_v8  ;;  %9836 = vmatpush3.msra.mxu0 %v6069_v2  ;;  %v6056_v22 = vld [vmem:[%s16536_s5 + $0x1000] sm:$0xff]  ;;  %v6467_v8 = vrot.slane %v15598_v28, %v13845_v53  ;;  %v6151_v2 = vld [vmem:[%s16536_s5 + $0x12f8] sm:$0xff] }
 0x4cb   : > { %9871 = vmatpush3.msra.mxu1 %v6101_v4  ;;  %9837 = vmatprep.subr.mxu0 %v6084_v21  ;;  %v6088_v48 = vld [vmem:[%s16536_s5 + $0x1100] sm:$0xff]  ;;  %v6475_v4 = vrot.slane %v15598_v28, %v13871_v31  ;;  %v6183_v21 = vld [vmem:[%s16536_s5 + $0x13f8] sm:$0xff] }
 0x4cc   : > { %9872 = vmatprep.subr.mxu1 %v6116_v26  ;;  %9838 = vmatpush3.msra.mxu0 %v6068_v37  ;;  %v6135_v26 = vld [vmem:[%s16536_s5 + $0x1278] sm:$0xff] }
 0x4cd   : > { %9873 = vmatpush3.msra.mxu1 %v6100_v3  ;;  %9839 = vmatprep.subr.mxu0 %v6083_v17  ;;  %v6167_v37 = vld [vmem:[%s16536_s5 + $0x1378] sm:$0xff]  ;;  %v6487_v3 = vrot.slane %v15598_v28, %v13885_v57  ;;  %v6150_v17 = vld [vmem:[%s16536_s5 + $0x12f0] sm:$0xff] }
 0x4ce   : > { %9874 = vmatprep.subr.mxu1 %v6115_v12  ;;  %9840 = vmatpush3.msra.mxu0 %v6067_v39  ;;  %v6495_v12 = vrot.slane %v15598_v28, %v13992_v30  ;;  %v6182_v39 = vld [vmem:[%s16536_s5 + $0x13f0] sm:$0xff] }
 0x4cf   : > { %9875 = vmatpush3.msra.mxu1 %v6099_v55  ;;  %9841 = vmatprep.subr.mxu0 %v6082_v46  ;;  %v6134_v55 = vld [vmem:[%s16536_s5 + $0x1270] sm:$0xff] }
 0x4d0   : > { %9876 = vmatprep.subr.mxu1 %v6114_v35  ;;  %9842 = vmatpush3.msra.mxu0 %v6066_v16  ;;  %v6166_v46 = vld [vmem:[%s16536_s5 + $0x1370] sm:$0xff]  ;;  %v6149_v35 = vld [vmem:[%s16536_s5 + $0x12e8] sm:$0xff] }
 0x4d1   : > { %9877 = vmatpush3.msra.mxu1 %v6098_v5  ;;  %9843 = vmatprep.subr.mxu0 %v6081_v49  ;;  %v6181_v16 = vld [vmem:[%s16536_s5 + $0x13e8] sm:$0xff] }
 0x4d2   : > { %9878 = vmatprep.subr.mxu1 %v6113_v58  ;;  %9844 = vmatpush3.msra.mxu0 %v6065_v38  ;;  %v6133_v5 = vld [vmem:[%s16536_s5 + $0x1268] sm:$0xff]  ;;  %v6148_v58 = vld [vmem:[%s16536_s5 + $0x12e0] sm:$0xff] }
 0x4d3   : > { %9879 = vmatpush3.msra.mxu1 %v6097_v25  ;;  %9845 = vmatprep.subr.mxu0 %v6080_v62  ;;  %v6165_v49 = vld [vmem:[%s16536_s5 + $0x1368] sm:$0xff]  ;;  %v6180_v38 = vld [vmem:[%s16536_s5 + $0x13e0] sm:$0xff] }
 0x4d4   : > { %9880 = vmatprep.subr.mxu1 %v6112_v1  ;;  %9846 = vmatpush3.msra.mxu0 %v6064_v33  ;;  %v6132_v25 = vld [vmem:[%s16536_s5 + $0x1260] sm:$0xff]  ;;  %v6147_v1 = vld [vmem:[%s16536_s5 + $0x12d8] sm:$0xff] }
 0x4d5   : > { %9881 = vmatpush3.msra.mxu1 %v6096_v14  ;;  %9847 = vmatprep.subr.mxu0 %v6079_v59  ;;  %v6164_v62 = vld [vmem:[%s16536_s5 + $0x1360] sm:$0xff]  ;;  %v6179_v33 = vld [vmem:[%s16536_s5 + $0x13d8] sm:$0xff] }
 0x4d6   : > { %9882 = vmatprep.subr.mxu1 %v6111_v0  ;;  %9848 = vmatpush3.msra.mxu0 %v6063_v11  ;;  %v6131_v14 = vld [vmem:[%s16536_s5 + $0x1258] sm:$0xff]  ;;  %v6146_v0 = vld [vmem:[%s16536_s5 + $0x12d0] sm:$0xff] }
 0x4d7   : > { %9883 = vmatpush3.msra.mxu1 %v6095_v32  ;;  %9849 = vmatprep.subr.mxu0 %v6078_v15  ;;  %v6163_v59 = vld [vmem:[%s16536_s5 + $0x1358] sm:$0xff]  ;;  %v6178_v11 = vld [vmem:[%s16536_s5 + $0x13d0] sm:$0xff] }
 0x4d8   : > { %9884 = vmatprep.subr.mxu1 %v6110_v10  ;;  %9850 = vmatpush3.msra.mxu0 %v6062_v61  ;;  %v6130_v32 = vld [vmem:[%s16536_s5 + $0x1250] sm:$0xff]  ;;  %v6145_v10 = vld [vmem:[%s16536_s5 + $0x12c8] sm:$0xff] }
 0x4d9   : > { %9885 = vmatpush3.msra.mxu1 %v6094_v40  ;;  %9851 = vmatprep.subr.mxu0 %v6077_v42  ;;  %v6162_v15 = vld [vmem:[%s16536_s5 + $0x1350] sm:$0xff]  ;;  %v6177_v61 = vld [vmem:[%s16536_s5 + $0x13c8] sm:$0xff] }
 0x4da   : > { %9886 = vmatprep.subr.mxu1 %v6109_v23  ;;  %9852 = vmatpush3.msra.mxu0 %v6061_v34  ;;  %v6129_v40 = vld [vmem:[%s16536_s5 + $0x1248] sm:$0xff]  ;;  %v6144_v23 = vld [vmem:[%s16536_s5 + $0x12c0] sm:$0xff] }
 0x4db   : > { %9887 = vmatpush3.msra.mxu1 %v6093_v19  ;;  %9853 = vmatprep.subr.mxu0 %v6076_v44  ;;  %v6161_v42 = vld [vmem:[%s16536_s5 + $0x1348] sm:$0xff]  ;;  %v6176_v34 = vld [vmem:[%s16536_s5 + $0x13c0] sm:$0xff] }
 0x4dc   : > { %9888 = vmatprep.subr.mxu1 %v6108_v7  ;;  %9854 = vmatpush3.msra.mxu0 %v6060_v27  ;;  %v6128_v19 = vld [vmem:[%s16536_s5 + $0x1240] sm:$0xff]  ;;  %v6143_v7 = vld [vmem:[%s16536_s5 + $0x12b8] sm:$0xff] }
 0x4dd   : > { %9889 = vmatpush3.msra.mxu1 %v6092_v63  ;;  %9855 = vmatprep.subr.mxu0 %v6075_v50  ;;  %v6160_v44 = vld [vmem:[%s16536_s5 + $0x1340] sm:$0xff]  ;;  %v6175_v27 = vld [vmem:[%s16536_s5 + $0x13b8] sm:$0xff] }
 0x4de   : > { %9890 = vmatprep.subr.mxu1 %v6107_v45  ;;  %9856 = vmatpush3.msra.mxu0 %v6059_v47  ;;  %v6127_v63 = vld [vmem:[%s16536_s5 + $0x1238] sm:$0xff]  ;;  %v6142_v45 = vld [vmem:[%s16536_s5 + $0x12b0] sm:$0xff] }
 0x4df   : > { %9891 = vmatpush3.msra.mxu1 %v6091_v52  ;;  %9857 = vmatprep.subr.mxu0 %v6074_v60  ;;  %v6159_v50 = vld [vmem:[%s16536_s5 + $0x1338] sm:$0xff]  ;;  %v6174_v47 = vld [vmem:[%s16536_s5 + $0x13b0] sm:$0xff] }
 0x4e0   : > { %9892 = vmatprep.subr.mxu1 %v6106_v24  ;;  %9858 = vmatpush3.msra.mxu0 %v6058_v56  ;;  %v6126_v52 = vld [vmem:[%s16536_s5 + $0x1230] sm:$0xff]  ;;  %v6141_v24 = vld [vmem:[%s16536_s5 + $0x12a8] sm:$0xff] }
 0x4e1   : > { %9893 = vmatpush3.msra.mxu1 %v6090_v13  ;;  %9859 = vmatprep.subr.mxu0 %v6073_v20  ;;  %v6158_v60 = vld [vmem:[%s16536_s5 + $0x1330] sm:$0xff]  ;;  %v6173_v56 = vld [vmem:[%s16536_s5 + $0x13a8] sm:$0xff] }
 0x4e2   : > { %9894 = vmatprep.subr.mxu1 %v6105_v36  ;;  %9860 = vmatpush3.msra.mxu0 %v6057_v51  ;;  %v6125_v13 = vld [vmem:[%s16536_s5 + $0x1228] sm:$0xff]  ;;  %v6140_v36 = vld [vmem:[%s16536_s5 + $0x12a0] sm:$0xff] }
 0x4e3   : > { %9895 = vmatpush3.msra.mxu1 %v6089_v41  ;;  %9861 = vmatprep.subr.mxu0 %v6072_v54  ;;  %v6157_v20 = vld [vmem:[%s16536_s5 + $0x1328] sm:$0xff]  ;;  %v6172_v51 = vld [vmem:[%s16536_s5 + $0x13a0] sm:$0xff] }
 0x4e4   : > { %9896 = vmatprep.subr.mxu1 %v6104_v9  ;;  %9862 = vmatpush3.msra.mxu0 %v6056_v22  ;;  %v6124_v41 = vld [vmem:[%s16536_s5 + $0x1220] sm:$0xff]  ;;  %v6139_v9 = vld [vmem:[%s16536_s5 + $0x1298] sm:$0xff] }
 0x4e5   : > { %9897 = vmatpush3.msra.mxu1 %v6088_v48  ;;  %7766 = vmatmul.mubr.f32.vlgmr.msra.gmra.mxu0 %v6467_v8  ;;  %v6156_v54 = vld [vmem:[%s16536_s5 + $0x1320] sm:$0xff]  ;;  %v6171_v22 = vld [vmem:[%s16536_s5 + $0x1398] sm:$0xff] }
 0x4e6   : > { %7836 = vmatmul.mubr.f32.vlgmr.msra.gmra.mxu1 %v6475_v4  ;;  %9901 = vmatprep.subr.mxu0 %v6151_v2  ;;  %v6123_v48 = vld [vmem:[%s16536_s5 + $0x1218] sm:$0xff]  ;;  %v6138_v2 = vld [vmem:[%s16536_s5 + $0x1290] sm:$0xff] }
 0x4e7   : > { %9936 = vmatprep.subr.mxu1 %v6183_v21  ;;  %9902 = vmatpush3.msra.mxu0 %v6135_v26  ;;  %v6155_v8 = vld [vmem:[%s16536_s5 + $0x1318] sm:$0xff]  ;;  %v6170_v4 = vld [vmem:[%s16536_s5 + $0x1390] sm:$0xff] }
 0x4e8   : > { %7905 = vmatprep.mubr.f32.mxu0 %v6487_v3  ;;  %9937 = vmatpush3.msra.mxu1 %v6167_v37  ;;  %v6122_v21 = vld [vmem:[%s16536_s5 + $0x1210] sm:$0xff]  ;;  %v6137_v37 = vld [vmem:[%s16536_s5 + $0x1288] sm:$0xff] }
 0x4e9   : > { %7975 = vmatprep.mubr.f32.mxu1 %v6495_v12  ;;  %9903 = vmatprep.subr.mxu0 %v6150_v17  ;;  %v6154_v26 = vld [vmem:[%s16536_s5 + $0x1310] sm:$0xff]  ;;  %v6169_v3 = vld [vmem:[%s16536_s5 + $0x1388] sm:$0xff] }
 0x4ea   : > { %9938 = vmatprep.subr.mxu1 %v6182_v39  ;;  %9904 = vmatpush3.msra.mxu0 %v6134_v55  ;;  %v6121_v17 = vld [vmem:[%s16536_s5 + $0x1208] sm:$0xff]  ;;  %v6136_v39 = vld [vmem:[%s16536_s5 + $0x1280] sm:$0xff] }
 0x4eb   : > { %9939 = vmatpush3.msra.mxu1 %v6166_v46  ;;  %9905 = vmatprep.subr.mxu0 %v6149_v35  ;;  %v6153_v12 = vld [vmem:[%s16536_s5 + $0x1308] sm:$0xff]  ;;  %v6168_v55 = vld [vmem:[%s16536_s5 + $0x1380] sm:$0xff] }
 0x4ec   : > { %9940 = vmatprep.subr.mxu1 %v6181_v16  ;;  %9906 = vmatpush3.msra.mxu0 %v6133_v5  ;;  %v6120_v46 = vld [vmem:[%s16536_s5 + $0x1200] sm:$0xff]  ;;  %v6483_v16 = vrot.slane %v15598_v28, %v14317_v18  ;;  %v6215_v5 = vld [vmem:[%s16536_s5 + $0x14f8] sm:$0xff] }
 0x4ed   : > { %9941 = vmatpush3.msra.mxu1 %v6165_v49  ;;  %9907 = vmatprep.subr.mxu0 %v6148_v58  ;;  %v6152_v35 = vld [vmem:[%s16536_s5 + $0x1300] sm:$0xff]  ;;  %v16000_v49 = vld [vmem:[#allocation7 + $0x28] sm:$0xff]  ;;  %v6491_v58 = vrot.slane %v15598_v28, %v14326_v6  ;;  %v6214_v28 = vld [vmem:[%s16536_s5 + $0x14f0] sm:$0xff] }
 0x4ee   : > { %9942 = vmatprep.subr.mxu1 %v6180_v38  ;;  %9908 = vmatpush3.msra.mxu0 %v6132_v25  ;;  %v6247_v38 = vld [vmem:[%s16536_s5 + $0x15f8] sm:$0xff] }
 0x4ef   : > { %9943 = vmatpush3.msra.mxu1 %v6164_v62  ;;  %9909 = vmatprep.subr.mxu0 %v6147_v1  ;;  %v6199_v25 = vld [vmem:[%s16536_s5 + $0x1478] sm:$0xff]  ;;  %v6503_v1 = vrot.slane %v16000_v49, %v13818_v43  ;;  %v6230_v43 = vld [vmem:[%s16536_s5 + $0x1570] sm:$0xff] }
 0x4f0   : > { %9944 = vmatprep.subr.mxu1 %v6179_v33  ;;  %9910 = vmatpush3.msra.mxu0 %v6131_v14  ;;  %v6231_v62 = vld [vmem:[%s16536_s5 + $0x1578] sm:$0xff]  ;;  %v6511_v33 = vrot.slane %v16000_v49, %v13842_v29  ;;  %v6246_v14 = vld [vmem:[%s16536_s5 + $0x15f0] sm:$0xff]  ;;  %v6245_v29 = vld [vmem:[%s16536_s5 + $0x15e8] sm:$0xff] }
 0x4f1   : > { %9945 = vmatpush3.msra.mxu1 %v6163_v59  ;;  %9911 = vmatprep.subr.mxu0 %v6146_v0  ;;  %v6198_v59 = vld [vmem:[%s16536_s5 + $0x1470] sm:$0xff]  ;;  %v6213_v0 = vld [vmem:[%s16536_s5 + $0x14e8] sm:$0xff] }
 0x4f2   : > { %9946 = vmatprep.subr.mxu1 %v6178_v11  ;;  %9912 = vmatpush3.msra.mxu0 %v6130_v32  ;;  %v6197_v11 = vld [vmem:[%s16536_s5 + $0x1468] sm:$0xff] }
 0x4f3   : > { %9947 = vmatpush3.msra.mxu1 %v6162_v15  ;;  %9913 = vmatprep.subr.mxu0 %v6145_v10  ;;  %v6229_v32 = vld [vmem:[%s16536_s5 + $0x1568] sm:$0xff]  ;;  %v6212_v15 = vld [vmem:[%s16536_s5 + $0x14e0] sm:$0xff] }
 0x4f4   : > { %9948 = vmatprep.subr.mxu1 %v6177_v61  ;;  %9914 = vmatpush3.msra.mxu0 %v6129_v40  ;;  %v6244_v10 = vld [vmem:[%s16536_s5 + $0x15e0] sm:$0xff] }
 0x4f5   : > { %9949 = vmatpush3.msra.mxu1 %v6161_v42  ;;  %9915 = vmatprep.subr.mxu0 %v6144_v23  ;;  %v6196_v61 = vld [vmem:[%s16536_s5 + $0x1460] sm:$0xff]  ;;  %v6211_v42 = vld [vmem:[%s16536_s5 + $0x14d8] sm:$0xff] }
 0x4f6   : > { %9950 = vmatprep.subr.mxu1 %v6176_v34  ;;  %9916 = vmatpush3.msra.mxu0 %v6128_v19  ;;  %v6228_v40 = vld [vmem:[%s16536_s5 + $0x1560] sm:$0xff]  ;;  %v6243_v23 = vld [vmem:[%s16536_s5 + $0x15d8] sm:$0xff] }
 0x4f7   : > { %9951 = vmatpush3.msra.mxu1 %v6160_v44  ;;  %9917 = vmatprep.subr.mxu0 %v6143_v7  ;;  %v6195_v34 = vld [vmem:[%s16536_s5 + $0x1458] sm:$0xff]  ;;  %v6210_v44 = vld [vmem:[%s16536_s5 + $0x14d0] sm:$0xff] }
 0x4f8   : > { %9952 = vmatprep.subr.mxu1 %v6175_v27  ;;  %9918 = vmatpush3.msra.mxu0 %v6127_v63  ;;  %v6227_v19 = vld [vmem:[%s16536_s5 + $0x1558] sm:$0xff]  ;;  %v6242_v7 = vld [vmem:[%s16536_s5 + $0x15d0] sm:$0xff] }
 0x4f9   : > { %9953 = vmatpush3.msra.mxu1 %v6159_v50  ;;  %9919 = vmatprep.subr.mxu0 %v6142_v45  ;;  %v6194_v27 = vld [vmem:[%s16536_s5 + $0x1450] sm:$0xff]  ;;  %v6209_v50 = vld [vmem:[%s16536_s5 + $0x14c8] sm:$0xff] }
 0x4fa   : > { %9954 = vmatprep.subr.mxu1 %v6174_v47  ;;  %9920 = vmatpush3.msra.mxu0 %v6126_v52  ;;  %v6226_v63 = vld [vmem:[%s16536_s5 + $0x1550] sm:$0xff]  ;;  %v6241_v45 = vld [vmem:[%s16536_s5 + $0x15c8] sm:$0xff] }
 0x4fb   : > { %9955 = vmatpush3.msra.mxu1 %v6158_v60  ;;  %9921 = vmatprep.subr.mxu0 %v6141_v24  ;;  %v6193_v47 = vld [vmem:[%s16536_s5 + $0x1448] sm:$0xff]  ;;  %v6208_v60 = vld [vmem:[%s16536_s5 + $0x14c0] sm:$0xff] }
 0x4fc   : > { %9956 = vmatprep.subr.mxu1 %v6173_v56  ;;  %9922 = vmatpush3.msra.mxu0 %v6125_v13  ;;  %v6225_v52 = vld [vmem:[%s16536_s5 + $0x1548] sm:$0xff]  ;;  %v6240_v24 = vld [vmem:[%s16536_s5 + $0x15c0] sm:$0xff] }
 0x4fd   : > { %9957 = vmatpush3.msra.mxu1 %v6157_v20  ;;  %9923 = vmatprep.subr.mxu0 %v6140_v36  ;;  %v6192_v56 = vld [vmem:[%s16536_s5 + $0x1440] sm:$0xff]  ;;  %v6207_v20 = vld [vmem:[%s16536_s5 + $0x14b8] sm:$0xff] }
 0x4fe   : > { %9958 = vmatprep.subr.mxu1 %v6172_v51  ;;  %9924 = vmatpush3.msra.mxu0 %v6124_v41  ;;  %v6224_v13 = vld [vmem:[%s16536_s5 + $0x1540] sm:$0xff]  ;;  %v6239_v36 = vld [vmem:[%s16536_s5 + $0x15b8] sm:$0xff] }
 0x4ff   : > { %9959 = vmatpush3.msra.mxu1 %v6156_v54  ;;  %9925 = vmatprep.subr.mxu0 %v6139_v9  ;;  %v6191_v51 = vld [vmem:[%s16536_s5 + $0x1438] sm:$0xff]  ;;  %v6206_v54 = vld [vmem:[%s16536_s5 + $0x14b0] sm:$0xff] }
 0x500   : > { %9960 = vmatprep.subr.mxu1 %v6171_v22  ;;  %9926 = vmatpush3.msra.mxu0 %v6123_v48  ;;  %v6223_v41 = vld [vmem:[%s16536_s5 + $0x1538] sm:$0xff]  ;;  %v6238_v9 = vld [vmem:[%s16536_s5 + $0x15b0] sm:$0xff] }
 0x501   : > { %9961 = vmatpush3.msra.mxu1 %v6155_v8  ;;  %9927 = vmatprep.subr.mxu0 %v6138_v2  ;;  %v6190_v22 = vld [vmem:[%s16536_s5 + $0x1430] sm:$0xff]  ;;  %v6205_v8 = vld [vmem:[%s16536_s5 + $0x14a8] sm:$0xff] }
 0x502   : > { %9962 = vmatprep.subr.mxu1 %v6170_v4  ;;  %9928 = vmatpush3.msra.mxu0 %v6122_v21  ;;  %v6222_v48 = vld [vmem:[%s16536_s5 + $0x1530] sm:$0xff]  ;;  %v6237_v2 = vld [vmem:[%s16536_s5 + $0x15a8] sm:$0xff] }
 0x503   : > { %9963 = vmatpush3.msra.mxu1 %v6154_v26  ;;  %9929 = vmatprep.subr.mxu0 %v6137_v37  ;;  %v6189_v4 = vld [vmem:[%s16536_s5 + $0x1428] sm:$0xff]  ;;  %v6204_v26 = vld [vmem:[%s16536_s5 + $0x14a0] sm:$0xff] }
 0x504   : > { %9964 = vmatprep.subr.mxu1 %v6169_v3  ;;  %9930 = vmatpush3.msra.mxu0 %v6121_v17  ;;  %v6221_v21 = vld [vmem:[%s16536_s5 + $0x1528] sm:$0xff]  ;;  %v6236_v37 = vld [vmem:[%s16536_s5 + $0x15a0] sm:$0xff] }
 0x505   : > { %9965 = vmatpush3.msra.mxu1 %v6153_v12  ;;  %9931 = vmatprep.subr.mxu0 %v6136_v39  ;;  %v6188_v3 = vld [vmem:[%s16536_s5 + $0x1420] sm:$0xff]  ;;  %v6203_v12 = vld [vmem:[%s16536_s5 + $0x1498] sm:$0xff] }
 0x506   : > { %9966 = vmatprep.subr.mxu1 %v6168_v55  ;;  %9932 = vmatpush3.msra.mxu0 %v6120_v46  ;;  %v6220_v17 = vld [vmem:[%s16536_s5 + $0x1520] sm:$0xff]  ;;  %v6235_v39 = vld [vmem:[%s16536_s5 + $0x1598] sm:$0xff] }
 0x507   : > { %9967 = vmatpush3.msra.mxu1 %v6152_v35  ;;  %7906 = vmatmul.mubr.f32.vlgmr.msra.gmra.mxu0 %v6483_v16  ;;  %v6187_v55 = vld [vmem:[%s16536_s5 + $0x1418] sm:$0xff]  ;;  %v6202_v35 = vld [vmem:[%s16536_s5 + $0x1490] sm:$0xff] }
 0x508   : > { %7976 = vmatmul.mubr.f32.vlgmr.msra.gmra.mxu1 %v6491_v58  ;;  %9971 = vmatprep.subr.mxu0 %v6215_v5  ;;  %v6219_v46 = vld [vmem:[%s16536_s5 + $0x1518] sm:$0xff]  ;;  %v6234_v16 = vld [vmem:[%s16536_s5 + $0x1590] sm:$0xff] }
 0x509   : > { %10006 = vmatprep.subr.mxu1 %v6247_v38  ;;  %9972 = vmatpush3.msra.mxu0 %v6199_v25  ;;  %v6186_v5 = vld [vmem:[%s16536_s5 + $0x1410] sm:$0xff]  ;;  %v6201_v38 = vld [vmem:[%s16536_s5 + $0x1488] sm:$0xff] }
 0x50a   : > { %8045 = vmatprep.mubr.f32.mxu0 %v6503_v1  ;;  %10007 = vmatpush3.msra.mxu1 %v6231_v62  ;;  %v6218_v58 = vld [vmem:[%s16536_s5 + $0x1510] sm:$0xff]  ;;  %v6233_v25 = vld [vmem:[%s16536_s5 + $0x1588] sm:$0xff] }
 0x50b   : > { %8115 = vmatprep.mubr.f32.mxu1 %v6511_v33  ;;  %9973 = vmatprep.subr.mxu0 %v6214_v28  ;;  %v6185_v62 = vld [vmem:[%s16536_s5 + $0x1408] sm:$0xff]  ;;  %v6200_v28 = vld [vmem:[%s16536_s5 + $0x1480] sm:$0xff] }
 0x50c   : > { %10008 = vmatprep.subr.mxu1 %v6246_v14  ;;  %9974 = vmatpush3.msra.mxu0 %v6198_v59  ;;  %v6217_v1 = vld [vmem:[%s16536_s5 + $0x1508] sm:$0xff]  ;;  %v6232_v33 = vld [vmem:[%s16536_s5 + $0x1580] sm:$0xff] }
 0x50d   : > { %10009 = vmatpush3.msra.mxu1 %v6230_v43  ;;  %9975 = vmatprep.subr.mxu0 %v6213_v0  ;;  %v6184_v14 = vld [vmem:[%s16536_s5 + $0x1400] sm:$0xff]  ;;  %v6499_v43 = vrot.slane %v16000_v49, %v13845_v53  ;;  %v6279_v0 = vld [vmem:[%s16536_s5 + $0x16f8] sm:$0xff] }
 0x50e   : > { %10010 = vmatprep.subr.mxu1 %v6245_v29  ;;  %9976 = vmatpush3.msra.mxu0 %v6197_v11  ;;  %v6216_v59 = vld [vmem:[%s16536_s5 + $0x1500] sm:$0xff]  ;;  %v6507_v29 = vrot.slane %v16000_v49, %v13871_v31  ;;  %v6311_v11 = vld [vmem:[%s16536_s5 + $0x17f8] sm:$0xff]  ;;  %v6278_v31 = vld [vmem:[%s16536_s5 + $0x16f0] sm:$0xff] }
 0x50f   : > { %10011 = vmatpush3.msra.mxu1 %v6229_v32  ;;  %9977 = vmatprep.subr.mxu0 %v6212_v15  ;;  %v6263_v32 = vld [vmem:[%s16536_s5 + $0x1678] sm:$0xff]  ;;  %v6519_v15 = vrot.slane %v16000_v49, %v13885_v57  ;;  %v6294_v57 = vld [vmem:[%s16536_s5 + $0x1770] sm:$0xff] }
 0x510   : > { %10012 = vmatprep.subr.mxu1 %v6244_v10  ;;  %9978 = vmatpush3.msra.mxu0 %v6196_v61  ;;  %v6295_v53 = vld [vmem:[%s16536_s5 + $0x1778] sm:$0xff]  ;;  %v6527_v10 = vrot.slane %v16000_v49, %v13992_v30  ;;  %v6310_v61 = vld [vmem:[%s16536_s5 + $0x17f0] sm:$0xff]  ;;  %v6309_v30 = vld [vmem:[%s16536_s5 + $0x17e8] sm:$0xff] }
 0x511   : > { %10013 = vmatpush3.msra.mxu1 %v6228_v40  ;;  %9979 = vmatprep.subr.mxu0 %v6211_v42  ;;  %v6262_v40 = vld [vmem:[%s16536_s5 + $0x1670] sm:$0xff]  ;;  %v6277_v42 = vld [vmem:[%s16536_s5 + $0x16e8] sm:$0xff] }
 0x512   : > { %10014 = vmatprep.subr.mxu1 %v6243_v23  ;;  %9980 = vmatpush3.msra.mxu0 %v6195_v34  ;;  %v6261_v23 = vld [vmem:[%s16536_s5 + $0x1668] sm:$0xff] }
 0x513   : > { %10015 = vmatpush3.msra.mxu1 %v6227_v19  ;;  %9981 = vmatprep.subr.mxu0 %v6210_v44  ;;  %v6293_v34 = vld [vmem:[%s16536_s5 + $0x1768] sm:$0xff]  ;;  %v6276_v19 = vld [vmem:[%s16536_s5 + $0x16e0] sm:$0xff] }
 0x514   : > { %10016 = vmatprep.subr.mxu1 %v6242_v7  ;;  %9982 = vmatpush3.msra.mxu0 %v6194_v27  ;;  %v6308_v44 = vld [vmem:[%s16536_s5 + $0x17e0] sm:$0xff] }
 0x515   : > { %10017 = vmatpush3.msra.mxu1 %v6226_v63  ;;  %9983 = vmatprep.subr.mxu0 %v6209_v50  ;;  %v6260_v7 = vld [vmem:[%s16536_s5 + $0x1660] sm:$0xff]  ;;  %v6275_v63 = vld [vmem:[%s16536_s5 + $0x16d8] sm:$0xff] }
 0x516   : > { %10018 = vmatprep.subr.mxu1 %v6241_v45  ;;  %9984 = vmatpush3.msra.mxu0 %v6193_v47  ;;  %v6292_v27 = vld [vmem:[%s16536_s5 + $0x1760] sm:$0xff]  ;;  %v6307_v50 = vld [vmem:[%s16536_s5 + $0x17d8] sm:$0xff] }
 0x517   : > { %10019 = vmatpush3.msra.mxu1 %v6225_v52  ;;  %9985 = vmatprep.subr.mxu0 %v6208_v60  ;;  %v6259_v45 = vld [vmem:[%s16536_s5 + $0x1658] sm:$0xff]  ;;  %v6274_v52 = vld [vmem:[%s16536_s5 + $0x16d0] sm:$0xff] }
 0x518   : > { %10020 = vmatprep.subr.mxu1 %v6240_v24  ;;  %9986 = vmatpush3.msra.mxu0 %v6192_v56  ;;  %v6291_v47 = vld [vmem:[%s16536_s5 + $0x1758] sm:$0xff]  ;;  %v6306_v60 = vld [vmem:[%s16536_s5 + $0x17d0] sm:$0xff] }
 0x519   : > { %10021 = vmatpush3.msra.mxu1 %v6224_v13  ;;  %9987 = vmatprep.subr.mxu0 %v6207_v20  ;;  %v6258_v24 = vld [vmem:[%s16536_s5 + $0x1650] sm:$0xff]  ;;  %v6273_v13 = vld [vmem:[%s16536_s5 + $0x16c8] sm:$0xff] }
 0x51a   : > { %10022 = vmatprep.subr.mxu1 %v6239_v36  ;;  %9988 = vmatpush3.msra.mxu0 %v6191_v51  ;;  %v6290_v56 = vld [vmem:[%s16536_s5 + $0x1750] sm:$0xff]  ;;  %v6305_v20 = vld [vmem:[%s16536_s5 + $0x17c8] sm:$0xff] }
 0x51b   : > { %10023 = vmatpush3.msra.mxu1 %v6223_v41  ;;  %9989 = vmatprep.subr.mxu0 %v6206_v54  ;;  %v6257_v36 = vld [vmem:[%s16536_s5 + $0x1648] sm:$0xff]  ;;  %v6272_v41 = vld [vmem:[%s16536_s5 + $0x16c0] sm:$0xff] }
 0x51c   : > { %10024 = vmatprep.subr.mxu1 %v6238_v9  ;;  %9990 = vmatpush3.msra.mxu0 %v6190_v22  ;;  %v6289_v51 = vld [vmem:[%s16536_s5 + $0x1748] sm:$0xff]  ;;  %v6304_v54 = vld [vmem:[%s16536_s5 + $0x17c0] sm:$0xff] }
 0x51d   : > { %10025 = vmatpush3.msra.mxu1 %v6222_v48  ;;  %9991 = vmatprep.subr.mxu0 %v6205_v8  ;;  %v6256_v9 = vld [vmem:[%s16536_s5 + $0x1640] sm:$0xff]  ;;  %v6271_v48 = vld [vmem:[%s16536_s5 + $0x16b8] sm:$0xff] }
 0x51e   : > { %10026 = vmatprep.subr.mxu1 %v6237_v2  ;;  %9992 = vmatpush3.msra.mxu0 %v6189_v4  ;;  %v6288_v22 = vld [vmem:[%s16536_s5 + $0x1740] sm:$0xff]  ;;  %v6303_v8 = vld [vmem:[%s16536_s5 + $0x17b8] sm:$0xff] }
 0x51f   : > { %10027 = vmatpush3.msra.mxu1 %v6221_v21  ;;  %9993 = vmatprep.subr.mxu0 %v6204_v26  ;;  %v6255_v2 = vld [vmem:[%s16536_s5 + $0x1638] sm:$0xff]  ;;  %v6270_v21 = vld [vmem:[%s16536_s5 + $0x16b0] sm:$0xff] }
 0x520   : > { %10028 = vmatprep.subr.mxu1 %v6236_v37  ;;  %9994 = vmatpush3.msra.mxu0 %v6188_v3  ;;  %v6287_v4 = vld [vmem:[%s16536_s5 + $0x1738] sm:$0xff]  ;;  %v6302_v26 = vld [vmem:[%s16536_s5 + $0x17b0] sm:$0xff] }
 0x521   : > { %10029 = vmatpush3.msra.mxu1 %v6220_v17  ;;  %9995 = vmatprep.subr.mxu0 %v6203_v12  ;;  %v6254_v37 = vld [vmem:[%s16536_s5 + $0x1630] sm:$0xff]  ;;  %v6269_v17 = vld [vmem:[%s16536_s5 + $0x16a8] sm:$0xff] }
 0x522   : > { %10030 = vmatprep.subr.mxu1 %v6235_v39  ;;  %9996 = vmatpush3.msra.mxu0 %v6187_v55  ;;  %v6286_v3 = vld [vmem:[%s16536_s5 + $0x1730] sm:$0xff]  ;;  %v6301_v12 = vld [vmem:[%s16536_s5 + $0x17a8] sm:$0xff] }
 0x523   : > { %10031 = vmatpush3.msra.mxu1 %v6219_v46  ;;  %9997 = vmatprep.subr.mxu0 %v6202_v35  ;;  %v6253_v39 = vld [vmem:[%s16536_s5 + $0x1628] sm:$0xff]  ;;  %v6268_v46 = vld [vmem:[%s16536_s5 + $0x16a0] sm:$0xff] }
 0x524   : > { %10032 = vmatprep.subr.mxu1 %v6234_v16  ;;  %9998 = vmatpush3.msra.mxu0 %v6186_v5  ;;  %v6285_v55 = vld [vmem:[%s16536_s5 + $0x1728] sm:$0xff]  ;;  %v6300_v35 = vld [vmem:[%s16536_s5 + $0x17a0] sm:$0xff] }
 0x525   : > { %10033 = vmatpush3.msra.mxu1 %v6218_v58  ;;  %9999 = vmatprep.subr.mxu0 %v6201_v38  ;;  %v6252_v16 = vld [vmem:[%s16536_s5 + $0x1620] sm:$0xff]  ;;  %v6267_v58 = vld [vmem:[%s16536_s5 + $0x1698] sm:$0xff] }
 0x526   : > { %10034 = vmatprep.subr.mxu1 %v6233_v25  ;;  %10000 = vmatpush3.msra.mxu0 %v6185_v62  ;;  %v6284_v5 = vld [vmem:[%s16536_s5 + $0x1720] sm:$0xff]  ;;  %v6299_v38 = vld [vmem:[%s16536_s5 + $0x1798] sm:$0xff] }
 0x527   : > { %10035 = vmatpush3.msra.mxu1 %v6217_v1  ;;  %10001 = vmatprep.subr.mxu0 %v6200_v28  ;;  %v6251_v25 = vld [vmem:[%s16536_s5 + $0x1618] sm:$0xff]  ;;  %v6266_v1 = vld [vmem:[%s16536_s5 + $0x1690] sm:$0xff] }
 0x528   : > { %10036 = vmatprep.subr.mxu1 %v6232_v33  ;;  %10002 = vmatpush3.msra.mxu0 %v6184_v14  ;;  %v6283_v62 = vld [vmem:[%s16536_s5 + $0x1718] sm:$0xff]  ;;  %v6298_v28 = vld [vmem:[%s16536_s5 + $0x1790] sm:$0xff] }
 0x529   : > { %10037 = vmatpush3.msra.mxu1 %v6216_v59  ;;  %8046 = vmatmul.mubr.f32.vlgmr.msra.gmra.mxu0 %v6499_v43  ;;  %v6250_v33 = vld [vmem:[%s16536_s5 + $0x1610] sm:$0xff]  ;;  %v6265_v59 = vld [vmem:[%s16536_s5 + $0x1688] sm:$0xff] }
 0x52a   : > { %8116 = vmatmul.mubr.f32.vlgmr.msra.gmra.mxu1 %v6507_v29  ;;  %10041 = vmatprep.subr.mxu0 %v6279_v0  ;;  %v6282_v14 = vld [vmem:[%s16536_s5 + $0x1710] sm:$0xff]  ;;  %v6297_v43 = vld [vmem:[%s16536_s5 + $0x1788] sm:$0xff] }
 0x52b   : > { %10076 = vmatprep.subr.mxu1 %v6311_v11  ;;  %10042 = vmatpush3.msra.mxu0 %v6263_v32  ;;  %v6249_v0 = vld [vmem:[%s16536_s5 + $0x1608] sm:$0xff]  ;;  %v6264_v11 = vld [vmem:[%s16536_s5 + $0x1680] sm:$0xff] }
 0x52c   : > { %8185 = vmatprep.mubr.f32.mxu0 %v6519_v15  ;;  %10077 = vmatpush3.msra.mxu1 %v6295_v53  ;;  %v6281_v29 = vld [vmem:[%s16536_s5 + $0x1708] sm:$0xff]  ;;  %v6296_v32 = vld [vmem:[%s16536_s5 + $0x1780] sm:$0xff] }
 0x52d   : > { %8255 = vmatprep.mubr.f32.mxu1 %v6527_v10  ;;  %10043 = vmatprep.subr.mxu0 %v6278_v31  ;;  %v6248_v53 = vld [vmem:[%s16536_s5 + $0x1600] sm:$0xff]  ;;  %v6515_v31 = vrot.slane %v16000_v49, %v14317_v18  ;;  %v6523_v10 = vrot.slane %v16000_v49, %v14326_v6  ;;  %v6326_v18 = vld [vmem:[%s16536_s5 + $0x1870] sm:$0xff]  ;;  %v6325_v6 = vld [vmem:[%s16536_s5 + $0x1868] sm:$0xff] }
 0x52e   : > { %10078 = vmatprep.subr.mxu1 %v6310_v61  ;;  %10044 = vmatpush3.msra.mxu0 %v6262_v40  ;;  %v6280_v15 = vld [vmem:[%s16536_s5 + $0x1700] sm:$0xff]  ;;  %v6327_v61 = vld [vmem:[%s16536_s5 + $0x1878] sm:$0xff] }
 0x52f   : > { %10079 = vmatpush3.msra.mxu1 %v6294_v57  ;;  %10045 = vmatprep.subr.mxu0 %v6277_v42  ;;  %v16404_v40 = vld [vmem:[#allocation4] sm:$0xff]  ;;  %v6323_v57 = vld [vmem:[%s16536_s5 + $0x1858] sm:$0xff]  ;;  %v6322_v42 = vld [vmem:[%s16536_s5 + $0x1850] sm:$0xff] }
 0x530   : > { %10080 = vmatprep.subr.mxu1 %v6309_v30  ;;  %10046 = vmatpush3.msra.mxu0 %v6261_v23  ;;  %v6324_v49 = vld [vmem:[%s16536_s5 + $0x1860] sm:$0xff]  ;;  %v6321_v30 = vld [vmem:[%s16536_s5 + $0x1848] sm:$0xff] }
 0x531   : > { %10081 = vmatpush3.msra.mxu1 %v6293_v34  ;;  %10047 = vmatprep.subr.mxu0 %v6276_v19  ;;  %v6320_v23 = vld [vmem:[%s16536_s5 + $0x1840] sm:$0xff]  ;;  %v6319_v34 = vld [vmem:[%s16536_s5 + $0x1838] sm:$0xff]  ;;  %v6318_v19 = vld [vmem:[%s16536_s5 + $0x1830] sm:$0xff] }
 0x532   : > { %10082 = vmatprep.subr.mxu1 %v6308_v44  ;;  %10048 = vmatpush3.msra.mxu0 %v6260_v7  ;;  %v6317_v44 = vld [vmem:[%s16536_s5 + $0x1828] sm:$0xff]  ;;  %v6316_v7 = vld [vmem:[%s16536_s5 + $0x1820] sm:$0xff] }
 0x533   : > { %10083 = vmatpush3.msra.mxu1 %v6292_v27  ;;  %10049 = vmatprep.subr.mxu0 %v6275_v63  ;;  %v6315_v27 = vld [vmem:[%s16536_s5 + $0x1818] sm:$0xff]  ;;  %v6314_v63 = vld [vmem:[%s16536_s5 + $0x1810] sm:$0xff] }
 0x534   : > { %10084 = vmatprep.subr.mxu1 %v6307_v50  ;;  %10050 = vmatpush3.msra.mxu0 %v6259_v45  ;;  %v6313_v50 = vld [vmem:[%s16536_s5 + $0x1808] sm:$0xff]  ;;  %v6312_v45 = vld [vmem:[%s16536_s5 + $0x1800] sm:$0xff] }
 0x535   : > { %10085 = vmatpush3.msra.mxu1 %v6291_v47  ;;  %10051 = vmatprep.subr.mxu0 %v6274_v52  ;;  %v8735_v47 = vld [vmem:[#allocation7 + $0x30] ss:$0 sm:$0xff] }
 0x536   : > { %10086 = vmatprep.subr.mxu1 %v6306_v60  ;;  %10052 = vmatpush3.msra.mxu0 %v6258_v24  ;;  %v8347_v52 = vld [vmem:[#allocation8 + $0x78] sm:$0xff]  ;;  %v8346_v60 = vld [vmem:[#allocation8 + $0x70] sm:$0xff]  ;;  %v8345_v24 = vld [vmem:[#allocation8 + $0x68] sm:$0xff] }
 0x537   : > { %10087 = vmatpush3.msra.mxu1 %v6290_v56  ;;  %10053 = vmatprep.subr.mxu0 %v6273_v13  ;;  %v8344_v56 = vld [vmem:[#allocation8 + $0x60] sm:$0xff]  ;;  %v8343_v13 = vld [vmem:[#allocation8 + $0x58] sm:$0xff] }
 0x538   : > { %10088 = vmatprep.subr.mxu1 %v6305_v20  ;;  %10054 = vmatpush3.msra.mxu0 %v6257_v36  ;;  %v8342_v20 = vld [vmem:[#allocation8 + $0x50] sm:$0xff]  ;;  %v8341_v36 = vld [vmem:[#allocation8 + $0x48] sm:$0xff] }
 0x539   : > { %10089 = vmatpush3.msra.mxu1 %v6289_v51  ;;  %10055 = vmatprep.subr.mxu0 %v6272_v41  ;;  %v8340_v51 = vld [vmem:[#allocation8 + $0x40] sm:$0xff]  ;;  %v8339_v41 = vld [vmem:[#allocation8 + $0x38] sm:$0xff] }
 0x53a   : > { %10090 = vmatprep.subr.mxu1 %v6304_v54  ;;  %10056 = vmatpush3.msra.mxu0 %v6256_v9  ;;  %v8338_v54 = vld [vmem:[#allocation8 + $0x30] sm:$0xff]  ;;  %v8337_v9 = vld [vmem:[#allocation8 + $0x28] sm:$0xff] }
 0x53b   : > { %10091 = vmatpush3.msra.mxu1 %v6288_v22  ;;  %10057 = vmatprep.subr.mxu0 %v6271_v48  ;;  %v8336_v22 = vld [vmem:[#allocation8 + $0x20] sm:$0xff]  ;;  %v8335_v48 = vld [vmem:[#allocation8 + $0x18] sm:$0xff] }
 0x53c   : > { %10092 = vmatprep.subr.mxu1 %v6303_v8  ;;  %10058 = vmatpush3.msra.mxu0 %v6255_v2  ;;  %v8334_v8 = vld [vmem:[#allocation8 + $0x10] sm:$0xff]  ;;  %v8333_v2 = vld [vmem:[#allocation8 + $0x8] sm:$0xff] }
 0x53d   : > { %10093 = vmatpush3.msra.mxu1 %v6287_v4  ;;  %10059 = vmatprep.subr.mxu0 %v6270_v21  ;;  %v8332_v4 = vld [vmem:[#allocation8] sm:$0xff]  ;;  %v9303_v21 = vpop.f32.mrf.mxu0 }
 0x53e   : > { %10094 = vmatprep.subr.mxu1 %v6302_v26  ;;  %10060 = vmatpush3.msra.mxu0 %v6254_v37  ;;  %v9338_v37 = vpop.f32.mrf.mxu1 }
 0x53f   : > { %10095 = vmatpush3.msra.mxu1 %v6286_v3  ;;  %10061 = vmatprep.subr.mxu0 %v6269_v17  ;;  %v9304_v26 = vpop.f32.mrf.mxu0 }
 0x540   : > { %10096 = vmatprep.subr.mxu1 %v6301_v12  ;;  %10062 = vmatpush3.msra.mxu0 %v6253_v39  ;;  %v9305_v17 = vadd.f32 %v9304_v26, %v9303_v21  ;;  %v6328_v12 = vld [vmem:[%s16537_s6] sm:$0x1]  ;;  %v9339_v39 = vpop.f32.mrf.mxu1 }
 0x541   : > { %10097 = vmatpush3.msra.mxu1 %v6285_v55  ;;  %10063 = vmatprep.subr.mxu0 %v6268_v46  ;;  %v9373_v3 = vpop.f32.mrf.mxu0 }
 0x542   : > { %10098 = vmatprep.subr.mxu1 %v6300_v35  ;;  %10064 = vmatpush3.msra.mxu0 %v6252_v16  ;;  %v6648_v46 = vadd.f32 %v9305_v17, %v6328_v12  ;;  %v9408_v35 = vpop.f32.mrf.mxu1 }
 0x543   : > { %10099 = vmatpush3.msra.mxu1 %v6284_v5  ;;  %10065 = vmatprep.subr.mxu0 %v6267_v58  ;;  %v9374_v55 = vpop.f32.mrf.mxu0  ;;  %v9340_v5 = vadd.f32 %v9339_v39, %v9338_v37 }
 0x544   : > { %10100 = vmatprep.subr.mxu1 %v6299_v38  ;;  %10066 = vmatpush3.msra.mxu0 %v6251_v25  ;;  %v9375_v58 = vadd.f32 %v9374_v55, %v9373_v3  ;;  %v9409_v25 = vpop.f32.mrf.mxu1 }
 0x545   : > { %10101 = vmatpush3.msra.mxu1 %v6283_v62  ;;  %10067 = vmatprep.subr.mxu0 %v6266_v1  ;;  %v9443_v16 = vpop.f32.mrf.mxu0  ;;  %v6718_v38 = vadd.f32 %v9340_v5, %v6648_v46 }
 0x546   : > { %10102 = vmatprep.subr.mxu1 %v6298_v28  ;;  %10068 = vmatpush3.msra.mxu0 %v6250_v33  ;;  %v9478_v28 = vpop.f32.mrf.mxu1 }
 0x547   : > { %10103 = vmatpush3.msra.mxu1 %v6282_v14  ;;  %10069 = vmatprep.subr.mxu0 %v6265_v59  ;;  %v9444_v62 = vpop.f32.mrf.mxu0  ;;  %v6788_v1 = vadd.f32 %v9375_v58, %v6718_v38  ;;  %v9410_v14 = vadd.f32 %v9409_v25, %v9408_v35 }
 0x548   : > { %10104 = vmatprep.subr.mxu1 %v6297_v43  ;;  %10070 = vmatpush3.msra.mxu0 %v6249_v0  ;;  %v9445_v59 = vadd.f32 %v9444_v62, %v9443_v16  ;;  %v9479_v0 = vpop.f32.mrf.mxu1 }
 0x549   : > { %10105 = vmatpush3.msra.mxu1 %v6281_v29  ;;  %10071 = vmatprep.subr.mxu0 %v6264_v11  ;;  %v9513_v33 = vpop.f32.mrf.mxu0  ;;  %v6858_v43 = vadd.f32 %v9410_v14, %v6788_v1 }
 0x54a   : > { %10106 = vmatprep.subr.mxu1 %v6296_v32  ;;  %10072 = vmatpush3.msra.mxu0 %v6248_v53  ;;  %v9548_v32 = vpop.f32.mrf.mxu1 }
 0x54b   : > { %10107 = vmatpush3.msra.mxu1 %v6280_v15  ;;  %8186 = vmatmul.mubr.f32.vlgmr.msra.gmra.mxu0 %v6515_v31  ;;  %v9514_v29 = vpop.f32.mrf.mxu0  ;;  %v6928_v11 = vadd.f32 %v9445_v59, %v6858_v43  ;;  %v9480_v15 = vadd.f32 %v9479_v0, %v9478_v28 }
 0x54c   : > { %8256 = vmatmul.mubr.f32.vlgmr.msra.gmra.mxu1 %v6523_v10  ;;  %11016 = vmatprep.subr.mxu0 %v16404_v40  ;;  %v9515_v31 = vadd.f32 %v9514_v29, %v9513_v33 }
 0x54d   : > { %11017 = vmatpush3.msra.mxu0 %v6327_v61  ;;  %11048 = vmatprep.mubr.msk.f32.mxu0 %vm11242_vm2, %v16404_v40  ;;  %v9583_v53 = vpop.f32.mrf.mxu0  ;;  %v6998_v10 = vadd.f32 %v9480_v15, %v6928_v11  ;;  %v9549_v61 = vpop.f32.mrf.mxu1 }
 0x54e   : > { %11018 = vmatprep.subr.mxu0 %v16404_v40  ;;  %11051 = vmatprep.subr.mxu1 %v16404_v40 }
 0x54f   : > { %11019 = vmatpush3.msra.mxu0 %v6326_v18  ;;  %11083 = vmatprep.mubr.msk.f32.mxu1 %vm11242_vm2, %v16404_v40  ;;  %v7068_v18 = vadd.f32 %v9515_v31, %v6998_v10 }
 0x550   : > { %11020 = vmatprep.subr.mxu0 %v16404_v40  ;;  %11052 = vmatpush3.msra.mxu1 %v8347_v52 }
 0x551   : > { %11021 = vmatpush3.msra.mxu0 %v6325_v6  ;;  %11053 = vmatprep.subr.mxu1 %v16404_v40  ;;  %v9618_v6 = vpop.f32.mrf.mxu1 }
 0x552   : > { %11022 = vmatprep.subr.mxu0 %v16404_v40  ;;  %11054 = vmatpush3.msra.mxu1 %v8346_v60 }
 0x553   : > { %11023 = vmatpush3.msra.mxu0 %v6324_v49  ;;  %11055 = vmatprep.subr.mxu1 %v16404_v40 }
 0x554   : > { %11024 = vmatprep.subr.mxu0 %v16404_v40  ;;  %11056 = vmatpush3.msra.mxu1 %v8345_v24 }
 0x555   : > { %11025 = vmatpush3.msra.mxu0 %v6323_v57  ;;  %11057 = vmatprep.subr.mxu1 %v16404_v40  ;;  %v9550_v57 = vadd.f32 %v9549_v61, %v9548_v32 }
 0x556   : > { %11026 = vmatprep.subr.mxu0 %v16404_v40  ;;  %11058 = vmatpush3.msra.mxu1 %v8344_v56 }
 0x557   : > { %11027 = vmatpush3.msra.mxu0 %v6322_v42  ;;  %11059 = vmatprep.subr.mxu1 %v16404_v40 }
 0x558   : > { %11028 = vmatprep.subr.mxu0 %v16404_v40  ;;  %11060 = vmatpush3.msra.mxu1 %v8343_v13 }
 0x559   : > { %11029 = vmatpush3.msra.mxu0 %v6321_v30  ;;  %11061 = vmatprep.subr.mxu1 %v16404_v40  ;;  %v7138_v30 = vadd.f32 %v9550_v57, %v7068_v18 }
 0x55a   : > { %11030 = vmatprep.subr.mxu0 %v16404_v40  ;;  %11062 = vmatpush3.msra.mxu1 %v8342_v20 }
 0x55b   : > { %11031 = vmatpush3.msra.mxu0 %v6320_v23  ;;  %11063 = vmatprep.subr.mxu1 %v16404_v40  ;;  %v9619_v23 = vpop.f32.mrf.mxu1 }
 0x55c   : > { %11032 = vmatprep.subr.mxu0 %v16404_v40  ;;  %11064 = vmatpush3.msra.mxu1 %v8341_v36 }
 0x55d   : > { %11033 = vmatpush3.msra.mxu0 %v6319_v34  ;;  %11065 = vmatprep.subr.mxu1 %v16404_v40 }
 0x55e   : > { %11034 = vmatprep.subr.mxu0 %v16404_v40  ;;  %11066 = vmatpush3.msra.mxu1 %v8340_v51 }
 0x55f   : > { %11035 = vmatpush3.msra.mxu0 %v6318_v19  ;;  %11067 = vmatprep.subr.mxu1 %v16404_v40 }
 0x560   : > { %11036 = vmatprep.subr.mxu0 %v16404_v40  ;;  %11068 = vmatpush3.msra.mxu1 %v8339_v41 }
 0x561   : > { %11037 = vmatpush3.msra.mxu0 %v6317_v44  ;;  %11069 = vmatprep.subr.mxu1 %v16404_v40  ;;  %v9688_v44 = vpop.f32.mrf.mxu1 }
 0x562   : > { %11038 = vmatprep.subr.mxu0 %v16404_v40  ;;  %11070 = vmatpush3.msra.mxu1 %v8338_v54 }
 0x563   : > { %11039 = vmatpush3.msra.mxu0 %v6316_v7  ;;  %11071 = vmatprep.subr.mxu1 %v16404_v40 }
 0x564   : > { %11040 = vmatprep.subr.mxu0 %v16404_v40  ;;  %11072 = vmatpush3.msra.mxu1 %v8337_v9 }
 0x565   : > { %11041 = vmatpush3.msra.mxu0 %v6315_v27  ;;  %11073 = vmatprep.subr.mxu1 %v16404_v40  ;;  %v9620_v27 = vadd.f32 %v9619_v23, %v9618_v6 }
 0x566   : > { %11042 = vmatprep.subr.mxu0 %v16404_v40  ;;  %11074 = vmatpush3.msra.mxu1 %v8336_v22 }
 0x567   : > { %11043 = vmatpush3.msra.mxu0 %v6314_v63  ;;  %11075 = vmatprep.subr.mxu1 %v16404_v40 }
 0x568   : > { %11044 = vmatprep.subr.mxu0 %v16404_v40  ;;  %11076 = vmatpush3.msra.mxu1 %v8335_v48 }
 0x569   : > { %11045 = vmatpush3.msra.mxu0 %v6313_v50  ;;  %11077 = vmatprep.subr.mxu1 %v16404_v40 }
 0x56a   : > { %11046 = vmatprep.subr.mxu0 %v16404_v40  ;;  %11078 = vmatpush3.msra.mxu1 %v8334_v8 }
 0x56b   : > { %11047 = vmatpush3.msra.mxu0 %v6312_v45  ;;  %11079 = vmatprep.subr.mxu1 %v16404_v40  ;;  %v9689_v45 = vpop.f32.mrf.mxu1 }
 0x56c   : > { %11049 = vmatmul.mubr.f32.vlgmr.msra.gmra.mxu0 %v8735_v47  ;;  %11080 = vmatpush3.msra.mxu1 %v8333_v2  ;;  %v9690_v56 = vadd.f32 %v9689_v45, %v9688_v44 }
 0x56d   : > { %11081 = vmatprep.subr.mxu1 %v16404_v40  ;;  %v9584_v40 = vpop.f32.mrf.mxu0  ;;  %v9758_v60 = vpop.f32.mrf.mxu1 }
 0x56e   : > { %11082 = vmatpush3.msra.mxu1 %v8332_v4  ;;  %v9585_v42 = vadd.f32 %v9584_v40, %v9583_v53 }
 0x56f   : > { %v9653_v49 = vpop.f32.mrf.mxu0  ;;  %v9759_v36 = vpop.f32.mrf.mxu1 }
 0x570   : > { %v7208_v19 = vadd.f32 %v9585_v42, %v7138_v30  ;;  %v9760_v22 = vadd.f32 %v9759_v36, %v9758_v60  ;;  %v8348_v30 = vld [vmem:[%s16539_s8] sm:$0x1] }
 0x571   : > { %v9654_v34 = vpop.f32.mrf.mxu0 }
 0x572   : > { %v9655_v63 = vadd.f32 %v9654_v34, %v9653_v49  ;;  %v7278_v50 = vadd.f32 %v9620_v27, %v7208_v19 }
 0x573   : > { %v9723_v7 = vpop.f32.mrf.mxu0 }
 0x574   : > { %v7348_v52 = vadd.f32 %v9655_v63, %v7278_v50 }
 0x575   : > { %v9724_v47 = vpop.f32.mrf.mxu0 }
 0x576   : > { %v9725_v13 = vadd.f32 %v9724_v47, %v9723_v7  ;;  %v7418_v20 = vadd.f32 %v9690_v56, %v7348_v52 }
 0x578   : > { %v7488_v41 = vadd.f32 %v9725_v13, %v7418_v20 }
 0x57a   : > { %v7558_v8 = vadd.f32 %v9760_v22, %v7488_v41 }
 0x583   : > { %v9793_v24 = vpop.f32.mrf.mxu0 }
 0x584   : > { %v9828_v54 = vpop.f32.mrf.mxu1 }
 0x585   : > { %v9794_v51 = vpop.f32.mrf.mxu0 }
 0x586   : > { %v9795_v48 = vadd.f32 %v9794_v51, %v9793_v24  ;;  %v9829_v2 = vpop.f32.mrf.mxu1 }
 0x587   : > { %v9830_v3 = vadd.f32 %v9829_v2, %v9828_v54 }
 0x588   : > { %v7628_v21 = vadd.f32 %v9795_v48, %v7558_v8 }
 0x58a   : > { %v7698_v12 = vadd.f32 %v9830_v3, %v7628_v21 }
 0x5a5   : > { %v9863_v9 = vpop.f32.mrf.mxu0 }
 0x5a6   : > { %v9898_v26 = vpop.f32.mrf.mxu1 }
 0x5a7   : > { %v9864_v4 = vpop.f32.mrf.mxu0 }
 0x5a8   : > { %v9865_v17 = vadd.f32 %v9864_v4, %v9863_v9  ;;  %v9899_v39 = vpop.f32.mrf.mxu1 }
 0x5a9   : > { %v9900_v5 = vadd.f32 %v9899_v39, %v9898_v26 }
 0x5aa   : > { %v7768_v46 = vadd.f32 %v9865_v17, %v7698_v12 }
 0x5ac   : > { %v7838_v38 = vadd.f32 %v9900_v5, %v7768_v46 }
 0x5c7   : > { %v9933_v37 = vpop.f32.mrf.mxu0 }
 0x5c8   : > { %v9968_v35 = vpop.f32.mrf.mxu1 }
 0x5c9   : > { %v9934_v55 = vpop.f32.mrf.mxu0 }
 0x5ca   : > { %v9935_v58 = vadd.f32 %v9934_v55, %v9933_v37  ;;  %v9969_v25 = vpop.f32.mrf.mxu1 }
 0x5cb   : > { %v9970_v14 = vadd.f32 %v9969_v25, %v9968_v35 }
 0x5cc   : > { %v7908_v1 = vadd.f32 %v9935_v58, %v7838_v38 }
 0x5ce   : > { %v7978_v43 = vadd.f32 %v9970_v14, %v7908_v1 }
 0x5e9   : > { %v10003_v16 = vpop.f32.mrf.mxu0 }
 0x5ea   : > { %v10038_v28 = vpop.f32.mrf.mxu1 }
 0x5eb   : > { %v10004_v62 = vpop.f32.mrf.mxu0 }
 0x5ec   : > { %v10005_v59 = vadd.f32 %v10004_v62, %v10003_v16  ;;  %v10039_v0 = vpop.f32.mrf.mxu1 }
 0x5ed   : > { %v10040_v53 = vadd.f32 %v10039_v0, %v10038_v28 }
 0x5ee   : > { %v8048_v11 = vadd.f32 %v10005_v59, %v7978_v43 }
 0x5f0   : > { %v8118_v31 = vadd.f32 %v10040_v53, %v8048_v11 }
 0x60b   : > { %v10073_v33 = vpop.f32.mrf.mxu0 }
 0x60c   : > { %v10108_v32 = vpop.f32.mrf.mxu1 }
 0x60d   : > { %v10074_v29 = vpop.f32.mrf.mxu0 }
 0x60e   : > { %v10075_v15 = vadd.f32 %v10074_v29, %v10073_v33  ;;  %v10109_v10 = vpop.f32.mrf.mxu1 }
 0x60f   : > { %v10110_v40 = vadd.f32 %v10109_v10, %v10108_v32 }
 0x610   : > { %v8188_v61 = vadd.f32 %v10075_v15, %v8118_v31 }
 0x612   : > { %v8258_v18 = vadd.f32 %v10110_v40, %v8188_v61 }
 0x62c   : > { %v8327_v6 = vpop.f32.mrf.mxu0 }
 0x62d   : > { %v8328_v49 = vadd.f32 %v8327_v6, %v8258_v18 }
 0x62e   : > { %v11050_v57 = vpop.f32.mrf.mxu0 }
 0x62f   : > { %v8331_v42 = vmax.f32 %v8328_v49, 0.0 }
 0x631   : > { %11084 = vmatmul.mubr.f32.vlgmr.msra.gmra.mxu1 %v8331_v42 }
 0x6f1   : > { %v8415_v23 = vpop.f32.mrf.mxu1 }
 0x6f2   : > { %v8416_v34 = vadd.f32 %v8415_v23, %v8348_v30 }
 0x6f3   : > { %v11085_v19 = vpop.f32.mrf.mxu1 }
 0x6f4   : > { %8419 = vst [vmem:[%s339_s16] sm:$0x1] %v8416_v34 }
 0x6f5   : > { %11185 = shalt.err (!%p11182_p0)
}
 0x6f6   : > { %s11186_s29 = scalar_lea.hbm %s16496_s24, 16  ;;  %s11190_s16 = scalar_lea.hbm %s16540_s9, 32 }
 0x6f7   : > { %p11187_p1 = scmp.ne.s32.totalorder %s16496_s24, %s11186_s29  ;;  %p11191_p4 = scmp.lt.s32.totalorder %s16496_s24, %s16540_s9 }
 0x6f8   : > { %p11192_p7 = scmp.lt.s32.totalorder %s11190_s16, %s11186_s29 }
 0x6f9   : > { %p11188_p2 = pnand %p11187_p1, %p11332_p5 }
 0x6fa   : > { %p11193_p8 = por %p11192_p7, %p11191_p4 }
 0x6fb   : > { %p11189_p3 = pneg %p11188_p2 }
 0x6fd   : > { %p11194_p6 = pnand %p11193_p8, %p11189_p3 }
 0x6ff   : > { %11197 = shalt.err (!%p11194_p6)
}
 0x700   : > { %11091 = dma.vmem_to_hbm [thread:$0]  (%p11332_p5), %s8434_s17, 16, %s16496_s24, %s8421_s25  }
 0x701 PF: > { %p11103_p9 = scmp.ge.s32.totalorder %s11236_s12, 2  ;;  %s8445_s21 = sand.u32 1, %s11224_s30  }
 0x702   : > { %p16752_p10 = scmp.ne.s32.totalorder %s16542_s20, 0  ;;  %s8446_s26 = scalar_lea.sflag [#allocation10], %s8445_s21 }
 0x704   : > { %p11098_p11 = pnand %p11103_p9, %p16752_p10 }
 0x706   : > { %p11099_p12 = pneg %p11098_p11 }
 0x708   : > { %11219 = dma.done.wait (%p11099_p12), %s8446_s26, 16  }
 0x709   : > { %11221 = vsyncadd (%p11099_p12), %s8446_s26, 4294967280  ;;  %p20_p13 = scmp.ge.s32.totalorder %s11319_s15, 4   ;;  %s16753_s30 = smov %s11228_s10 }
 0x70a   : > { %s16754_s10 = smov %s11232_s11  ;;  %s16755_s11 = smov %s11330_s18 }
 0x70b   : > { %s16756_s12 = smov %s11319_s15  ;;  %22 = sbr.rel (!%p20_p13) target bundleno = 4 (0x4), region = 180 }
 0x710   :  { %8450 = vsyncpa [#allocation9], 1 }
 0x711   :  { %8452 = vsyncpa [#allocation9 + $0x1], 1 }
 0x712   :  { %8453 = vsyncpa [#allocation10], 1 }
 0x713   :  { %8455 = vsyncpa [#allocation10 + $0x1], 1 }

</bundles_post_ra>
